<compile_context>
chip_gen: v5e
topology: v5e:2x2
jax: 0.10.0
libtpu: 0.0.40
codegen_flags: <defaults>
</compile_context>

<pallas_src>
import functools

import jax
import jax.numpy as jnp
import numpy as np
from jax.experimental import pallas as pl
from jax.experimental.pallas import tpu as pltpu


# ----------------------------- helpers --------------------------------------

def _taps(radius):
    return [(dy, dx) for dy in range(-radius, radius + 1)
            for dx in range(-radius, radius + 1)]


def _valid_masks(H, W, taps):
    """(len(taps), H*W) 0/1 table: is the (dy,dx)-neighbour of pixel p inside?"""
    p = np.arange(H * W)
    rows, cols = p // W, p % W
    out = np.zeros((len(taps), H * W), np.float32)
    for k, (dy, dx) in enumerate(taps):
        out[k] = ((rows + dy >= 0) & (rows + dy < H) &
                  (cols + dx >= 0) & (cols + dx < W)).astype(np.float32)
    return out


def _fold_bn(w_oihw, gamma, beta, mean, var, eps=1e-5):
    """Fold eval-mode BatchNorm into a bias-free conv. w: (Cout, Cin, kh, kw)."""
    scale = gamma / jnp.sqrt(var + eps)
    return w_oihw * scale[:, None, None, None], beta - mean * scale


# ----------------------------- Pallas kernel --------------------------------

def _rescbam_kernel(x_ref, w1_ref, b1_ref, w2_ref, b2_ref,
                    wca1_ref, wca2_ref, m3_ref, wsa_avg_ref, wsa_max_ref,
                    o_ref, *, W, taps3, taps7):
    x = x_ref[0]                                          # (C, P), lane-dense
    P = x.shape[-1]

    def shift(v, s):
        # result[..., p] = v[..., (p + s) % P]; wrapped lanes are zeroed by the
        # per-tap validity masks downstream.
        r = (-s) % P
        return v if r == 0 else jnp.roll(v, r, axis=-1)

    def conv3x3(src, w_ref, b_ref):
        # src: (Cin, P); w_ref: (9, Cout, Cin); b_ref: (Cout, 1)
        acc = jnp.zeros((w_ref.shape[1], P), jnp.float32)
        for k, (dy, dx) in enumerate(taps3):
            tap = shift(src, dy * W + dx) * m3_ref[k:k + 1, :]
            acc = acc + jnp.dot(w_ref[k], tap,
                                preferred_element_type=jnp.float32)
        return acc + b_ref[...]

    # conv1 + bn1 + relu, then conv2 + bn2 (BN folded into weights/bias).
    y1 = jnp.maximum(conv3x3(x, w1_ref, b1_ref), 0.0)
    y2 = conv3x3(y1, w2_ref, b2_ref)

    # ---- channel attention: sigmoid(fc(avg_pool) + fc(max_pool)) ----
    avg_c = jnp.mean(y2, axis=1, keepdims=True)           # (C, 1)
    max_c = jnp.max(y2, axis=1, keepdims=True)            # (C, 1)

    def fc(v):                                            # (C, 1) -> (C, 1)
        h = jnp.maximum(
            jnp.dot(wca1_ref[...], v, preferred_element_type=jnp.float32), 0.0)
        return jnp.dot(wca2_ref[...], h, preferred_element_type=jnp.float32)

    ca = jax.nn.sigmoid(fc(avg_c) + fc(max_c))            # (C, 1)
    y3 = y2 * ca                                          # broadcast over lanes

    # ---- spatial attention: sigmoid(conv7x7([mean_c(y3); max_c(y3)])) ----
    avg_s = jnp.mean(y3, axis=0, keepdims=True)           # (1, P)
    max_s = jnp.max(y3, axis=0, keepdims=True)            # (1, P)
    logit = jnp.zeros((1, P), jnp.float32)
    for k, (dy, dx) in enumerate(taps7):
        s = dy * W + dx
        logit = (logit
                 + shift(avg_s, s) * wsa_avg_ref[k:k + 1, :]
                 + shift(max_s, s) * wsa_max_ref[k:k + 1, :])
    sa = jax.nn.sigmoid(logit)                            # (1, P)
    y4 = y3 * sa                                          # broadcast over sublanes

    # ---- residual add + relu (downsample is None in this configuration) ----
    o_ref[0] = jnp.maximum(y4 + x, 0.0).astype(o_ref.dtype)


# ------------------------------- wrapper -------------------------------------

def rescbam_forward(x, params):
    """x: (N, C, H, W) float32; returns (N, C, H, W) float32."""
    N, C, H, W = x.shape
    P = H * W
    assert P % 128 == 0, "flattened spatial size must be a multiple of 128"

    taps3, taps7 = _taps(1), _taps(3)
    m3 = jnp.asarray(_valid_masks(H, W, taps3))            # (9,  P)
    m7 = jnp.asarray(_valid_masks(H, W, taps7))            # (49, P)

    w1f, b1f = _fold_bn(params["conv1"], *params["bn1"])
    w2f, b2f = _fold_bn(params["conv2"], *params["bn2"])
    # (Cout, Cin, 3, 3) -> (9, Cout, Cin), tap index k = (dy+1)*3 + (dx+1)
    w1k = jnp.transpose(w1f, (2, 3, 0, 1)).reshape(9, C, C)
    w2k = jnp.transpose(w2f, (2, 3, 0, 1)).reshape(9, C, C)
    b1k = b1f.reshape(C, 1)
    b2k = b2f.reshape(C, 1)

    wca1 = params["ca_fc1"]                                # (Cr, C)
    wca2 = params["ca_fc2"]                                # (C, Cr)
    Cr = wca1.shape[0]

    # Fold the 7x7 spatial-attention scalar weights into the per-tap validity
    # masks: one (49, P) table per input map (mean / max) -> no scalar loads.
    wsa = params["sa_conv"]                                # (1, 2, 7, 7)
    wsa_avg = wsa[0, 0].reshape(49, 1) * m7                # (49, P)
    wsa_max = wsa[0, 1].reshape(49, 1) * m7                # (49, P)

    kernel = functools.partial(_rescbam_kernel, W=W, taps3=taps3, taps7=taps7)

    out_flat = pl.pallas_call(
        kernel,
        out_shape=jax.ShapeDtypeStruct((N, C, P), jnp.float32),
        grid=(N,),
        in_specs=[
            pl.BlockSpec((1, C, P), lambda n: (n, 0, 0)),   # x (one image)
            pl.BlockSpec((9, C, C), lambda n: (0, 0, 0)),   # conv1 (BN folded)
            pl.BlockSpec((C, 1), lambda n: (0, 0)),         # bias1
            pl.BlockSpec((9, C, C), lambda n: (0, 0, 0)),   # conv2 (BN folded)
            pl.BlockSpec((C, 1), lambda n: (0, 0)),         # bias2
            pl.BlockSpec((Cr, C), lambda n: (0, 0)),        # CA fc1
            pl.BlockSpec((C, Cr), lambda n: (0, 0)),        # CA fc2
            pl.BlockSpec((9, P), lambda n: (0, 0)),         # 3x3 validity masks
            pl.BlockSpec((49, P), lambda n: (0, 0)),        # SA weight*mask (mean)
            pl.BlockSpec((49, P), lambda n: (0, 0)),        # SA weight*mask (max)
        ],
        out_specs=pl.BlockSpec((1, C, P), lambda n: (n, 0, 0)),
        compiler_params=pltpu.CompilerParams(
            dimension_semantics=("parallel",)),
    )(x.reshape(N, C, P).astype(jnp.float32),
      w1k, b1k, w2k, b2k, wca1, wca2, m3, wsa_avg, wsa_max)

    return out_flat.reshape(N, C, H, W)


# --------------------------- pure-JAX reference ------------------------------

def reference(x, params):
    w1, b1 = _fold_bn(params["conv1"], *params["bn1"])
    w2, b2 = _fold_bn(params["conv2"], *params["bn2"])
    wca1, wca2 = params["ca_fc1"], params["ca_fc2"]
    wsa = params["sa_conv"]

    def conv(v, w, pad):
        return jax.lax.conv_general_dilated(
            v, w, window_strides=(1, 1), padding=[(pad, pad), (pad, pad)],
            dimension_numbers=("NCHW", "OIHW", "NCHW"),
            precision=jax.lax.Precision.HIGHEST)

    y1 = jax.nn.relu(conv(x, w1, 1) + b1[None, :, None, None])
    y2 = conv(y1, w2, 1) + b2[None, :, None, None]

    avg, mx = y2.mean(axis=(2, 3)), y2.max(axis=(2, 3))            # (N, C)
    fc = lambda v: jax.nn.relu(v @ wca1.T) @ wca2.T
    ca = jax.nn.sigmoid(fc(avg) + fc(mx))[:, :, None, None]
    y3 = y2 * ca

    sa_in = jnp.stack([y3.mean(axis=1), y3.max(axis=1)], axis=1)   # (N, 2, H, W)
    sa = jax.nn.sigmoid(conv(sa_in, wsa, 3))                       # (N, 1, H, W)
    y4 = y3 * sa
    return jax.nn.relu(y4 + x)


# ------------------------------ parameters -----------------------------------

def init_params(key, planes, ratio=16):
    assert planes % ratio == 0 and planes >= ratio
    cr = planes // ratio
    ks = jax.random.split(key, 7)

    def bn(k, c):
        k1, k2, k3, k4 = jax.random.split(k, 4)
        return (1.0 + 0.1 * jax.random.normal(k1, (c,), jnp.float32),     # gamma
                0.1 * jax.random.normal(k2, (c,), jnp.float32),           # beta
                0.1 * jax.random.normal(k3, (c,), jnp.float32),           # run mean
                0.5 + jnp.abs(jax.random.normal(k4, (c,), jnp.float32)))  # run var

    s3 = 1.0 / np.sqrt(9.0 * planes)
    return {
        "conv1": s3 * jax.random.normal(ks[0], (planes, planes, 3, 3), jnp.float32),
        "bn1": bn(ks[1], planes),
        "conv2": s3 * jax.random.normal(ks[2], (planes, planes, 3, 3), jnp.float32),
        "bn2": bn(ks[3], planes),
        "ca_fc1": (1.0 / np.sqrt(planes)) *
                  jax.random.normal(ks[4], (cr, planes), jnp.float32),
        "ca_fc2": (1.0 / np.sqrt(cr)) *
                  jax.random.normal(ks[5], (planes, cr), jnp.float32),
        "sa_conv": 0.1 * jax.random.normal(ks[6], (1, 2, 7, 7), jnp.float32),
    }


# --------------------------------- main ---------------------------------------

if __name__ == "__main__":
    key = jax.random.PRNGKey(0)
    k_p, k_x = jax.random.split(key)

    # ResCBAMBlock's forward is only shape-consistent for inplanes == planes,
    # stride=1, downsample=None; ChannelAttention(ratio=16) needs planes >= 16.
    N, C, H, W = 2, 32, 16, 16
    x = jax.random.normal(k_x, (N, C, H, W), jnp.float32)
    params = init_params(k_p, planes=C, ratio=16)

    out = jax.block_until_ready(rescbam_forward(x, params))
    ref = jax.block_until_ready(reference(x, params))

    assert out.shape == (N, C, H, W)
    np.testing.assert_allclose(np.asarray(out), np.asarray(ref),
                               rtol=1e-2, atol=1e-2)
    print("KERNEL_OK")
</pallas_src>

<mosaic_0001>
module attributes {stable_mosaic.version = 11 : i64} {
  func.func @_rescbam_kernel(%arg0: i32, %arg1: memref<1x32x256xf32, #tpu.memory_space<vmem>>, %arg2: memref<9x32x32xf32, #tpu.memory_space<vmem>>, %arg3: memref<32x1xf32, #tpu.memory_space<vmem>>, %arg4: memref<9x32x32xf32, #tpu.memory_space<vmem>>, %arg5: memref<32x1xf32, #tpu.memory_space<vmem>>, %arg6: memref<2x32xf32, #tpu.memory_space<vmem>>, %arg7: memref<32x2xf32, #tpu.memory_space<vmem>>, %arg8: memref<9x256xf32, #tpu.memory_space<vmem>>, %arg9: memref<49x256xf32, #tpu.memory_space<vmem>>, %arg10: memref<49x256xf32, #tpu.memory_space<vmem>>, %arg11: memref<1x32x256xf32, #tpu.memory_space<vmem>>) attributes {dimension_semantics = [#tpu.dimension_semantics<parallel>], iteration_bounds = array<i64: 2>, scalar_prefetch = 0 : i64, scratch_operands = 0 : i64, tpu.core_type = #tpu.core_type<tc>, window_params = [{transform_indices = @transform_0, window_bounds = array<i64: 1, 32, 256>}, {pipeline_mode = #tpu.pipeline_mode<synchronous>, transform_indices = @transform_1, window_bounds = array<i64: 9, 32, 32>}, {pipeline_mode = #tpu.pipeline_mode<synchronous>, transform_indices = @transform_2, window_bounds = array<i64: 32, 1>}, {pipeline_mode = #tpu.pipeline_mode<synchronous>, transform_indices = @transform_3, window_bounds = array<i64: 9, 32, 32>}, {pipeline_mode = #tpu.pipeline_mode<synchronous>, transform_indices = @transform_4, window_bounds = array<i64: 32, 1>}, {pipeline_mode = #tpu.pipeline_mode<synchronous>, transform_indices = @transform_5, window_bounds = array<i64: 2, 32>}, {pipeline_mode = #tpu.pipeline_mode<synchronous>, transform_indices = @transform_6, window_bounds = array<i64: 32, 2>}, {pipeline_mode = #tpu.pipeline_mode<synchronous>, transform_indices = @transform_7, window_bounds = array<i64: 9, 256>}, {pipeline_mode = #tpu.pipeline_mode<synchronous>, transform_indices = @transform_8, window_bounds = array<i64: 49, 256>}, {pipeline_mode = #tpu.pipeline_mode<synchronous>, transform_indices = @transform_9, window_bounds = array<i64: 49, 256>}, {transform_indices = @transform_10, window_bounds = array<i64: 1, 32, 256>}]} {
    %c0 = arith.constant 0 : index
    %c0_0 = arith.constant 0 : index
    %c0_1 = arith.constant 0 : index
    %0 = vector.load %arg1[%c0, %c0_0, %c0_1] : memref<1x32x256xf32, #tpu.memory_space<vmem>>, vector<1x32x256xf32>
    %1 = vector.shape_cast %0 : vector<1x32x256xf32> to vector<32x256xf32>
    %cst = arith.constant 0.000000e+00 : f32
    %2 = vector.broadcast %cst : f32 to vector<32x256xf32>
    %3 = vector.extract_strided_slice %1 {offsets = [0, 239], sizes = [32, 17], strides = [1, 1]} : vector<32x256xf32> to vector<32x17xf32>
    %4 = vector.extract_strided_slice %1 {offsets = [0, 0], sizes = [32, 239], strides = [1, 1]} : vector<32x256xf32> to vector<32x239xf32>
    %5 = tpu.concatenate %3, %4 in 1 : vector<32x17xf32>, vector<32x239xf32> -> vector<32x256xf32>
    %c0_2 = arith.constant 0 : index
    %c0_3 = arith.constant 0 : index
    %6 = vector.load %arg8[%c0_2, %c0_3] : memref<9x256xf32, #tpu.memory_space<vmem>>, vector<1x256xf32>
    %7 = vector.broadcast %6 : vector<1x256xf32> to vector<32x256xf32>
    %8 = arith.mulf %5, %7 : vector<32x256xf32>
    %c0_4 = arith.constant 0 : index
    %c0_5 = arith.constant 0 : index
    %c0_6 = arith.constant 0 : index
    %9 = vector.load %arg2[%c0_4, %c0_5, %c0_6] : memref<9x32x32xf32, #tpu.memory_space<vmem>>, vector<1x32x32xf32>
    %10 = vector.shape_cast %9 : vector<1x32x32xf32> to vector<32x32xf32>
    %cst_7 = arith.constant dense<0.000000e+00> : vector<32x256xf32>
    %11 = tpu.matmul %10, %8, %cst_7 {dimension_numbers = #tpu.dot_dimension_numbers<[1], [0], [0], [1], [0, 0, 1, 1], [], []>} : vector<32x32xf32>, vector<32x256xf32>, vector<32x256xf32> -> vector<32x256xf32>
    %12 = arith.addf %2, %11 : vector<32x256xf32>
    %13 = vector.extract_strided_slice %1 {offsets = [0, 240], sizes = [32, 16], strides = [1, 1]} : vector<32x256xf32> to vector<32x16xf32>
    %14 = vector.extract_strided_slice %1 {offsets = [0, 0], sizes = [32, 240], strides = [1, 1]} : vector<32x256xf32> to vector<32x240xf32>
    %15 = tpu.concatenate %13, %14 in 1 : vector<32x16xf32>, vector<32x240xf32> -> vector<32x256xf32>
    %c1 = arith.constant 1 : index
    %c0_8 = arith.constant 0 : index
    %16 = vector.load %arg8[%c1, %c0_8] : memref<9x256xf32, #tpu.memory_space<vmem>>, vector<1x256xf32>
    %17 = vector.broadcast %16 : vector<1x256xf32> to vector<32x256xf32>
    %18 = arith.mulf %15, %17 : vector<32x256xf32>
    %c1_9 = arith.constant 1 : index
    %c0_10 = arith.constant 0 : index
    %c0_11 = arith.constant 0 : index
    %19 = vector.load %arg2[%c1_9, %c0_10, %c0_11] : memref<9x32x32xf32, #tpu.memory_space<vmem>>, vector<1x32x32xf32>
    %20 = vector.shape_cast %19 : vector<1x32x32xf32> to vector<32x32xf32>
    %cst_12 = arith.constant dense<0.000000e+00> : vector<32x256xf32>
    %21 = tpu.matmul %20, %18, %cst_12 {dimension_numbers = #tpu.dot_dimension_numbers<[1], [0], [0], [1], [0, 0, 1, 1], [], []>} : vector<32x32xf32>, vector<32x256xf32>, vector<32x256xf32> -> vector<32x256xf32>
    %22 = arith.addf %12, %21 : vector<32x256xf32>
    %23 = vector.extract_strided_slice %1 {offsets = [0, 241], sizes = [32, 15], strides = [1, 1]} : vector<32x256xf32> to vector<32x15xf32>
    %24 = vector.extract_strided_slice %1 {offsets = [0, 0], sizes = [32, 241], strides = [1, 1]} : vector<32x256xf32> to vector<32x241xf32>
    %25 = tpu.concatenate %23, %24 in 1 : vector<32x15xf32>, vector<32x241xf32> -> vector<32x256xf32>
    %c2 = arith.constant 2 : index
    %c0_13 = arith.constant 0 : index
    %26 = vector.load %arg8[%c2, %c0_13] : memref<9x256xf32, #tpu.memory_space<vmem>>, vector<1x256xf32>
    %27 = vector.broadcast %26 : vector<1x256xf32> to vector<32x256xf32>
    %28 = arith.mulf %25, %27 : vector<32x256xf32>
    %c2_14 = arith.constant 2 : index
    %c0_15 = arith.constant 0 : index
    %c0_16 = arith.constant 0 : index
    %29 = vector.load %arg2[%c2_14, %c0_15, %c0_16] : memref<9x32x32xf32, #tpu.memory_space<vmem>>, vector<1x32x32xf32>
    %30 = vector.shape_cast %29 : vector<1x32x32xf32> to vector<32x32xf32>
    %cst_17 = arith.constant dense<0.000000e+00> : vector<32x256xf32>
    %31 = tpu.matmul %30, %28, %cst_17 {dimension_numbers = #tpu.dot_dimension_numbers<[1], [0], [0], [1], [0, 0, 1, 1], [], []>} : vector<32x32xf32>, vector<32x256xf32>, vector<32x256xf32> -> vector<32x256xf32>
    %32 = arith.addf %22, %31 : vector<32x256xf32>
    %33 = vector.extract_strided_slice %1 {offsets = [0, 255], sizes = [32, 1], strides = [1, 1]} : vector<32x256xf32> to vector<32x1xf32>
    %34 = vector.extract_strided_slice %1 {offsets = [0, 0], sizes = [32, 255], strides = [1, 1]} : vector<32x256xf32> to vector<32x255xf32>
    %35 = tpu.concatenate %33, %34 in 1 : vector<32x1xf32>, vector<32x255xf32> -> vector<32x256xf32>
    %c3 = arith.constant 3 : index
    %c0_18 = arith.constant 0 : index
    %36 = vector.load %arg8[%c3, %c0_18] : memref<9x256xf32, #tpu.memory_space<vmem>>, vector<1x256xf32>
    %37 = vector.broadcast %36 : vector<1x256xf32> to vector<32x256xf32>
    %38 = arith.mulf %35, %37 : vector<32x256xf32>
    %c3_19 = arith.constant 3 : index
    %c0_20 = arith.constant 0 : index
    %c0_21 = arith.constant 0 : index
    %39 = vector.load %arg2[%c3_19, %c0_20, %c0_21] : memref<9x32x32xf32, #tpu.memory_space<vmem>>, vector<1x32x32xf32>
    %40 = vector.shape_cast %39 : vector<1x32x32xf32> to vector<32x32xf32>
    %cst_22 = arith.constant dense<0.000000e+00> : vector<32x256xf32>
    %41 = tpu.matmul %40, %38, %cst_22 {dimension_numbers = #tpu.dot_dimension_numbers<[1], [0], [0], [1], [0, 0, 1, 1], [], []>} : vector<32x32xf32>, vector<32x256xf32>, vector<32x256xf32> -> vector<32x256xf32>
    %42 = arith.addf %32, %41 : vector<32x256xf32>
    %c4 = arith.constant 4 : index
    %c0_23 = arith.constant 0 : index
    %43 = vector.load %arg8[%c4, %c0_23] : memref<9x256xf32, #tpu.memory_space<vmem>>, vector<1x256xf32>
    %44 = vector.broadcast %43 : vector<1x256xf32> to vector<32x256xf32>
    %45 = arith.mulf %1, %44 : vector<32x256xf32>
    %c4_24 = arith.constant 4 : index
    %c0_25 = arith.constant 0 : index
    %c0_26 = arith.constant 0 : index
    %46 = vector.load %arg2[%c4_24, %c0_25, %c0_26] : memref<9x32x32xf32, #tpu.memory_space<vmem>>, vector<1x32x32xf32>
    %47 = vector.shape_cast %46 : vector<1x32x32xf32> to vector<32x32xf32>
    %cst_27 = arith.constant dense<0.000000e+00> : vector<32x256xf32>
    %48 = tpu.matmul %47, %45, %cst_27 {dimension_numbers = #tpu.dot_dimension_numbers<[1], [0], [0], [1], [0, 0, 1, 1], [], []>} : vector<32x32xf32>, vector<32x256xf32>, vector<32x256xf32> -> vector<32x256xf32>
    %49 = arith.addf %42, %48 : vector<32x256xf32>
    %50 = vector.extract_strided_slice %1 {offsets = [0, 1], sizes = [32, 255], strides = [1, 1]} : vector<32x256xf32> to vector<32x255xf32>
    %51 = vector.extract_strided_slice %1 {offsets = [0, 0], sizes = [32, 1], strides = [1, 1]} : vector<32x256xf32> to vector<32x1xf32>
    %52 = tpu.concatenate %50, %51 in 1 : vector<32x255xf32>, vector<32x1xf32> -> vector<32x256xf32>
    %c5 = arith.constant 5 : index
    %c0_28 = arith.constant 0 : index
    %53 = vector.load %arg8[%c5, %c0_28] : memref<9x256xf32, #tpu.memory_space<vmem>>, vector<1x256xf32>
    %54 = vector.broadcast %53 : vector<1x256xf32> to vector<32x256xf32>
    %55 = arith.mulf %52, %54 : vector<32x256xf32>
    %c5_29 = arith.constant 5 : index
    %c0_30 = arith.constant 0 : index
    %c0_31 = arith.constant 0 : index
    %56 = vector.load %arg2[%c5_29, %c0_30, %c0_31] : memref<9x32x32xf32, #tpu.memory_space<vmem>>, vector<1x32x32xf32>
    %57 = vector.shape_cast %56 : vector<1x32x32xf32> to vector<32x32xf32>
    %cst_32 = arith.constant dense<0.000000e+00> : vector<32x256xf32>
    %58 = tpu.matmul %57, %55, %cst_32 {dimension_numbers = #tpu.dot_dimension_numbers<[1], [0], [0], [1], [0, 0, 1, 1], [], []>} : vector<32x32xf32>, vector<32x256xf32>, vector<32x256xf32> -> vector<32x256xf32>
    %59 = arith.addf %49, %58 : vector<32x256xf32>
    %60 = vector.extract_strided_slice %1 {offsets = [0, 15], sizes = [32, 241], strides = [1, 1]} : vector<32x256xf32> to vector<32x241xf32>
    %61 = vector.extract_strided_slice %1 {offsets = [0, 0], sizes = [32, 15], strides = [1, 1]} : vector<32x256xf32> to vector<32x15xf32>
    %62 = tpu.concatenate %60, %61 in 1 : vector<32x241xf32>, vector<32x15xf32> -> vector<32x256xf32>
    %c6 = arith.constant 6 : index
    %c0_33 = arith.constant 0 : index
    %63 = vector.load %arg8[%c6, %c0_33] : memref<9x256xf32, #tpu.memory_space<vmem>>, vector<1x256xf32>
    %64 = vector.broadcast %63 : vector<1x256xf32> to vector<32x256xf32>
    %65 = arith.mulf %62, %64 : vector<32x256xf32>
    %c6_34 = arith.constant 6 : index
    %c0_35 = arith.constant 0 : index
    %c0_36 = arith.constant 0 : index
    %66 = vector.load %arg2[%c6_34, %c0_35, %c0_36] : memref<9x32x32xf32, #tpu.memory_space<vmem>>, vector<1x32x32xf32>
    %67 = vector.shape_cast %66 : vector<1x32x32xf32> to vector<32x32xf32>
    %cst_37 = arith.constant dense<0.000000e+00> : vector<32x256xf32>
    %68 = tpu.matmul %67, %65, %cst_37 {dimension_numbers = #tpu.dot_dimension_numbers<[1], [0], [0], [1], [0, 0, 1, 1], [], []>} : vector<32x32xf32>, vector<32x256xf32>, vector<32x256xf32> -> vector<32x256xf32>
    %69 = arith.addf %59, %68 : vector<32x256xf32>
    %70 = vector.extract_strided_slice %1 {offsets = [0, 16], sizes = [32, 240], strides = [1, 1]} : vector<32x256xf32> to vector<32x240xf32>
    %71 = vector.extract_strided_slice %1 {offsets = [0, 0], sizes = [32, 16], strides = [1, 1]} : vector<32x256xf32> to vector<32x16xf32>
    %72 = tpu.concatenate %70, %71 in 1 : vector<32x240xf32>, vector<32x16xf32> -> vector<32x256xf32>
    %c7 = arith.constant 7 : index
    %c0_38 = arith.constant 0 : index
    %73 = vector.load %arg8[%c7, %c0_38] : memref<9x256xf32, #tpu.memory_space<vmem>>, vector<1x256xf32>
    %74 = vector.broadcast %73 : vector<1x256xf32> to vector<32x256xf32>
    %75 = arith.mulf %72, %74 : vector<32x256xf32>
    %c7_39 = arith.constant 7 : index
    %c0_40 = arith.constant 0 : index
    %c0_41 = arith.constant 0 : index
    %76 = vector.load %arg2[%c7_39, %c0_40, %c0_41] : memref<9x32x32xf32, #tpu.memory_space<vmem>>, vector<1x32x32xf32>
    %77 = vector.shape_cast %76 : vector<1x32x32xf32> to vector<32x32xf32>
    %cst_42 = arith.constant dense<0.000000e+00> : vector<32x256xf32>
    %78 = tpu.matmul %77, %75, %cst_42 {dimension_numbers = #tpu.dot_dimension_numbers<[1], [0], [0], [1], [0, 0, 1, 1], [], []>} : vector<32x32xf32>, vector<32x256xf32>, vector<32x256xf32> -> vector<32x256xf32>
    %79 = arith.addf %69, %78 : vector<32x256xf32>
    %80 = vector.extract_strided_slice %1 {offsets = [0, 17], sizes = [32, 239], strides = [1, 1]} : vector<32x256xf32> to vector<32x239xf32>
    %81 = vector.extract_strided_slice %1 {offsets = [0, 0], sizes = [32, 17], strides = [1, 1]} : vector<32x256xf32> to vector<32x17xf32>
    %82 = tpu.concatenate %80, %81 in 1 : vector<32x239xf32>, vector<32x17xf32> -> vector<32x256xf32>
    %c8 = arith.constant 8 : index
    %c0_43 = arith.constant 0 : index
    %83 = vector.load %arg8[%c8, %c0_43] : memref<9x256xf32, #tpu.memory_space<vmem>>, vector<1x256xf32>
    %84 = vector.broadcast %83 : vector<1x256xf32> to vector<32x256xf32>
    %85 = arith.mulf %82, %84 : vector<32x256xf32>
    %c8_44 = arith.constant 8 : index
    %c0_45 = arith.constant 0 : index
    %c0_46 = arith.constant 0 : index
    %86 = vector.load %arg2[%c8_44, %c0_45, %c0_46] : memref<9x32x32xf32, #tpu.memory_space<vmem>>, vector<1x32x32xf32>
    %87 = vector.shape_cast %86 : vector<1x32x32xf32> to vector<32x32xf32>
    %cst_47 = arith.constant dense<0.000000e+00> : vector<32x256xf32>
    %88 = tpu.matmul %87, %85, %cst_47 {dimension_numbers = #tpu.dot_dimension_numbers<[1], [0], [0], [1], [0, 0, 1, 1], [], []>} : vector<32x32xf32>, vector<32x256xf32>, vector<32x256xf32> -> vector<32x256xf32>
    %89 = arith.addf %79, %88 : vector<32x256xf32>
    %c0_48 = arith.constant 0 : index
    %c0_49 = arith.constant 0 : index
    %90 = vector.load %arg3[%c0_48, %c0_49] : memref<32x1xf32, #tpu.memory_space<vmem>>, vector<32x1xf32>
    %91 = vector.broadcast %90 : vector<32x1xf32> to vector<32x256xf32>
    %92 = arith.addf %89, %91 : vector<32x256xf32>
    %cst_50 = arith.constant 0.000000e+00 : f32
    %93 = vector.broadcast %cst_50 : f32 to vector<32x256xf32>
    %94 = arith.maximumf %92, %93 : vector<32x256xf32>
    %cst_51 = arith.constant 0.000000e+00 : f32
    %95 = vector.broadcast %cst_51 : f32 to vector<32x256xf32>
    %96 = vector.extract_strided_slice %94 {offsets = [0, 239], sizes = [32, 17], strides = [1, 1]} : vector<32x256xf32> to vector<32x17xf32>
    %97 = vector.extract_strided_slice %94 {offsets = [0, 0], sizes = [32, 239], strides = [1, 1]} : vector<32x256xf32> to vector<32x239xf32>
    %98 = tpu.concatenate %96, %97 in 1 : vector<32x17xf32>, vector<32x239xf32> -> vector<32x256xf32>
    %c0_52 = arith.constant 0 : index
    %c0_53 = arith.constant 0 : index
    %99 = vector.load %arg8[%c0_52, %c0_53] : memref<9x256xf32, #tpu.memory_space<vmem>>, vector<1x256xf32>
    %100 = vector.broadcast %99 : vector<1x256xf32> to vector<32x256xf32>
    %101 = arith.mulf %98, %100 : vector<32x256xf32>
    %c0_54 = arith.constant 0 : index
    %c0_55 = arith.constant 0 : index
    %c0_56 = arith.constant 0 : index
    %102 = vector.load %arg4[%c0_54, %c0_55, %c0_56] : memref<9x32x32xf32, #tpu.memory_space<vmem>>, vector<1x32x32xf32>
    %103 = vector.shape_cast %102 : vector<1x32x32xf32> to vector<32x32xf32>
    %cst_57 = arith.constant dense<0.000000e+00> : vector<32x256xf32>
    %104 = tpu.matmul %103, %101, %cst_57 {dimension_numbers = #tpu.dot_dimension_numbers<[1], [0], [0], [1], [0, 0, 1, 1], [], []>} : vector<32x32xf32>, vector<32x256xf32>, vector<32x256xf32> -> vector<32x256xf32>
    %105 = arith.addf %95, %104 : vector<32x256xf32>
    %106 = vector.extract_strided_slice %94 {offsets = [0, 240], sizes = [32, 16], strides = [1, 1]} : vector<32x256xf32> to vector<32x16xf32>
    %107 = vector.extract_strided_slice %94 {offsets = [0, 0], sizes = [32, 240], strides = [1, 1]} : vector<32x256xf32> to vector<32x240xf32>
    %108 = tpu.concatenate %106, %107 in 1 : vector<32x16xf32>, vector<32x240xf32> -> vector<32x256xf32>
    %c1_58 = arith.constant 1 : index
    %c0_59 = arith.constant 0 : index
    %109 = vector.load %arg8[%c1_58, %c0_59] : memref<9x256xf32, #tpu.memory_space<vmem>>, vector<1x256xf32>
    %110 = vector.broadcast %109 : vector<1x256xf32> to vector<32x256xf32>
    %111 = arith.mulf %108, %110 : vector<32x256xf32>
    %c1_60 = arith.constant 1 : index
    %c0_61 = arith.constant 0 : index
    %c0_62 = arith.constant 0 : index
    %112 = vector.load %arg4[%c1_60, %c0_61, %c0_62] : memref<9x32x32xf32, #tpu.memory_space<vmem>>, vector<1x32x32xf32>
    %113 = vector.shape_cast %112 : vector<1x32x32xf32> to vector<32x32xf32>
    %cst_63 = arith.constant dense<0.000000e+00> : vector<32x256xf32>
    %114 = tpu.matmul %113, %111, %cst_63 {dimension_numbers = #tpu.dot_dimension_numbers<[1], [0], [0], [1], [0, 0, 1, 1], [], []>} : vector<32x32xf32>, vector<32x256xf32>, vector<32x256xf32> -> vector<32x256xf32>
    %115 = arith.addf %105, %114 : vector<32x256xf32>
    %116 = vector.extract_strided_slice %94 {offsets = [0, 241], sizes = [32, 15], strides = [1, 1]} : vector<32x256xf32> to vector<32x15xf32>
    %117 = vector.extract_strided_slice %94 {offsets = [0, 0], sizes = [32, 241], strides = [1, 1]} : vector<32x256xf32> to vector<32x241xf32>
    %118 = tpu.concatenate %116, %117 in 1 : vector<32x15xf32>, vector<32x241xf32> -> vector<32x256xf32>
    %c2_64 = arith.constant 2 : index
    %c0_65 = arith.constant 0 : index
    %119 = vector.load %arg8[%c2_64, %c0_65] : memref<9x256xf32, #tpu.memory_space<vmem>>, vector<1x256xf32>
    %120 = vector.broadcast %119 : vector<1x256xf32> to vector<32x256xf32>
    %121 = arith.mulf %118, %120 : vector<32x256xf32>
    %c2_66 = arith.constant 2 : index
    %c0_67 = arith.constant 0 : index
    %c0_68 = arith.constant 0 : index
    %122 = vector.load %arg4[%c2_66, %c0_67, %c0_68] : memref<9x32x32xf32, #tpu.memory_space<vmem>>, vector<1x32x32xf32>
    %123 = vector.shape_cast %122 : vector<1x32x32xf32> to vector<32x32xf32>
    %cst_69 = arith.constant dense<0.000000e+00> : vector<32x256xf32>
    %124 = tpu.matmul %123, %121, %cst_69 {dimension_numbers = #tpu.dot_dimension_numbers<[1], [0], [0], [1], [0, 0, 1, 1], [], []>} : vector<32x32xf32>, vector<32x256xf32>, vector<32x256xf32> -> vector<32x256xf32>
    %125 = arith.addf %115, %124 : vector<32x256xf32>
    %126 = vector.extract_strided_slice %94 {offsets = [0, 255], sizes = [32, 1], strides = [1, 1]} : vector<32x256xf32> to vector<32x1xf32>
    %127 = vector.extract_strided_slice %94 {offsets = [0, 0], sizes = [32, 255], strides = [1, 1]} : vector<32x256xf32> to vector<32x255xf32>
    %128 = tpu.concatenate %126, %127 in 1 : vector<32x1xf32>, vector<32x255xf32> -> vector<32x256xf32>
    %c3_70 = arith.constant 3 : index
    %c0_71 = arith.constant 0 : index
    %129 = vector.load %arg8[%c3_70, %c0_71] : memref<9x256xf32, #tpu.memory_space<vmem>>, vector<1x256xf32>
    %130 = vector.broadcast %129 : vector<1x256xf32> to vector<32x256xf32>
    %131 = arith.mulf %128, %130 : vector<32x256xf32>
    %c3_72 = arith.constant 3 : index
    %c0_73 = arith.constant 0 : index
    %c0_74 = arith.constant 0 : index
    %132 = vector.load %arg4[%c3_72, %c0_73, %c0_74] : memref<9x32x32xf32, #tpu.memory_space<vmem>>, vector<1x32x32xf32>
    %133 = vector.shape_cast %132 : vector<1x32x32xf32> to vector<32x32xf32>
    %cst_75 = arith.constant dense<0.000000e+00> : vector<32x256xf32>
    %134 = tpu.matmul %133, %131, %cst_75 {dimension_numbers = #tpu.dot_dimension_numbers<[1], [0], [0], [1], [0, 0, 1, 1], [], []>} : vector<32x32xf32>, vector<32x256xf32>, vector<32x256xf32> -> vector<32x256xf32>
    %135 = arith.addf %125, %134 : vector<32x256xf32>
    %c4_76 = arith.constant 4 : index
    %c0_77 = arith.constant 0 : index
    %136 = vector.load %arg8[%c4_76, %c0_77] : memref<9x256xf32, #tpu.memory_space<vmem>>, vector<1x256xf32>
    %137 = vector.broadcast %136 : vector<1x256xf32> to vector<32x256xf32>
    %138 = arith.mulf %94, %137 : vector<32x256xf32>
    %c4_78 = arith.constant 4 : index
    %c0_79 = arith.constant 0 : index
    %c0_80 = arith.constant 0 : index
    %139 = vector.load %arg4[%c4_78, %c0_79, %c0_80] : memref<9x32x32xf32, #tpu.memory_space<vmem>>, vector<1x32x32xf32>
    %140 = vector.shape_cast %139 : vector<1x32x32xf32> to vector<32x32xf32>
    %cst_81 = arith.constant dense<0.000000e+00> : vector<32x256xf32>
    %141 = tpu.matmul %140, %138, %cst_81 {dimension_numbers = #tpu.dot_dimension_numbers<[1], [0], [0], [1], [0, 0, 1, 1], [], []>} : vector<32x32xf32>, vector<32x256xf32>, vector<32x256xf32> -> vector<32x256xf32>
    %142 = arith.addf %135, %141 : vector<32x256xf32>
    %143 = vector.extract_strided_slice %94 {offsets = [0, 1], sizes = [32, 255], strides = [1, 1]} : vector<32x256xf32> to vector<32x255xf32>
    %144 = vector.extract_strided_slice %94 {offsets = [0, 0], sizes = [32, 1], strides = [1, 1]} : vector<32x256xf32> to vector<32x1xf32>
    %145 = tpu.concatenate %143, %144 in 1 : vector<32x255xf32>, vector<32x1xf32> -> vector<32x256xf32>
    %c5_82 = arith.constant 5 : index
    %c0_83 = arith.constant 0 : index
    %146 = vector.load %arg8[%c5_82, %c0_83] : memref<9x256xf32, #tpu.memory_space<vmem>>, vector<1x256xf32>
    %147 = vector.broadcast %146 : vector<1x256xf32> to vector<32x256xf32>
    %148 = arith.mulf %145, %147 : vector<32x256xf32>
    %c5_84 = arith.constant 5 : index
    %c0_85 = arith.constant 0 : index
    %c0_86 = arith.constant 0 : index
    %149 = vector.load %arg4[%c5_84, %c0_85, %c0_86] : memref<9x32x32xf32, #tpu.memory_space<vmem>>, vector<1x32x32xf32>
    %150 = vector.shape_cast %149 : vector<1x32x32xf32> to vector<32x32xf32>
    %cst_87 = arith.constant dense<0.000000e+00> : vector<32x256xf32>
    %151 = tpu.matmul %150, %148, %cst_87 {dimension_numbers = #tpu.dot_dimension_numbers<[1], [0], [0], [1], [0, 0, 1, 1], [], []>} : vector<32x32xf32>, vector<32x256xf32>, vector<32x256xf32> -> vector<32x256xf32>
    %152 = arith.addf %142, %151 : vector<32x256xf32>
    %153 = vector.extract_strided_slice %94 {offsets = [0, 15], sizes = [32, 241], strides = [1, 1]} : vector<32x256xf32> to vector<32x241xf32>
    %154 = vector.extract_strided_slice %94 {offsets = [0, 0], sizes = [32, 15], strides = [1, 1]} : vector<32x256xf32> to vector<32x15xf32>
    %155 = tpu.concatenate %153, %154 in 1 : vector<32x241xf32>, vector<32x15xf32> -> vector<32x256xf32>
    %c6_88 = arith.constant 6 : index
    %c0_89 = arith.constant 0 : index
    %156 = vector.load %arg8[%c6_88, %c0_89] : memref<9x256xf32, #tpu.memory_space<vmem>>, vector<1x256xf32>
    %157 = vector.broadcast %156 : vector<1x256xf32> to vector<32x256xf32>
    %158 = arith.mulf %155, %157 : vector<32x256xf32>
    %c6_90 = arith.constant 6 : index
    %c0_91 = arith.constant 0 : index
    %c0_92 = arith.constant 0 : index
    %159 = vector.load %arg4[%c6_90, %c0_91, %c0_92] : memref<9x32x32xf32, #tpu.memory_space<vmem>>, vector<1x32x32xf32>
    %160 = vector.shape_cast %159 : vector<1x32x32xf32> to vector<32x32xf32>
    %cst_93 = arith.constant dense<0.000000e+00> : vector<32x256xf32>
    %161 = tpu.matmul %160, %158, %cst_93 {dimension_numbers = #tpu.dot_dimension_numbers<[1], [0], [0], [1], [0, 0, 1, 1], [], []>} : vector<32x32xf32>, vector<32x256xf32>, vector<32x256xf32> -> vector<32x256xf32>
    %162 = arith.addf %152, %161 : vector<32x256xf32>
    %163 = vector.extract_strided_slice %94 {offsets = [0, 16], sizes = [32, 240], strides = [1, 1]} : vector<32x256xf32> to vector<32x240xf32>
    %164 = vector.extract_strided_slice %94 {offsets = [0, 0], sizes = [32, 16], strides = [1, 1]} : vector<32x256xf32> to vector<32x16xf32>
    %165 = tpu.concatenate %163, %164 in 1 : vector<32x240xf32>, vector<32x16xf32> -> vector<32x256xf32>
    %c7_94 = arith.constant 7 : index
    %c0_95 = arith.constant 0 : index
    %166 = vector.load %arg8[%c7_94, %c0_95] : memref<9x256xf32, #tpu.memory_space<vmem>>, vector<1x256xf32>
    %167 = vector.broadcast %166 : vector<1x256xf32> to vector<32x256xf32>
    %168 = arith.mulf %165, %167 : vector<32x256xf32>
    %c7_96 = arith.constant 7 : index
    %c0_97 = arith.constant 0 : index
    %c0_98 = arith.constant 0 : index
    %169 = vector.load %arg4[%c7_96, %c0_97, %c0_98] : memref<9x32x32xf32, #tpu.memory_space<vmem>>, vector<1x32x32xf32>
    %170 = vector.shape_cast %169 : vector<1x32x32xf32> to vector<32x32xf32>
    %cst_99 = arith.constant dense<0.000000e+00> : vector<32x256xf32>
    %171 = tpu.matmul %170, %168, %cst_99 {dimension_numbers = #tpu.dot_dimension_numbers<[1], [0], [0], [1], [0, 0, 1, 1], [], []>} : vector<32x32xf32>, vector<32x256xf32>, vector<32x256xf32> -> vector<32x256xf32>
    %172 = arith.addf %162, %171 : vector<32x256xf32>
    %173 = vector.extract_strided_slice %94 {offsets = [0, 17], sizes = [32, 239], strides = [1, 1]} : vector<32x256xf32> to vector<32x239xf32>
    %174 = vector.extract_strided_slice %94 {offsets = [0, 0], sizes = [32, 17], strides = [1, 1]} : vector<32x256xf32> to vector<32x17xf32>
    %175 = tpu.concatenate %173, %174 in 1 : vector<32x239xf32>, vector<32x17xf32> -> vector<32x256xf32>
    %c8_100 = arith.constant 8 : index
    %c0_101 = arith.constant 0 : index
    %176 = vector.load %arg8[%c8_100, %c0_101] : memref<9x256xf32, #tpu.memory_space<vmem>>, vector<1x256xf32>
    %177 = vector.broadcast %176 : vector<1x256xf32> to vector<32x256xf32>
    %178 = arith.mulf %175, %177 : vector<32x256xf32>
    %c8_102 = arith.constant 8 : index
    %c0_103 = arith.constant 0 : index
    %c0_104 = arith.constant 0 : index
    %179 = vector.load %arg4[%c8_102, %c0_103, %c0_104] : memref<9x32x32xf32, #tpu.memory_space<vmem>>, vector<1x32x32xf32>
    %180 = vector.shape_cast %179 : vector<1x32x32xf32> to vector<32x32xf32>
    %cst_105 = arith.constant dense<0.000000e+00> : vector<32x256xf32>
    %181 = tpu.matmul %180, %178, %cst_105 {dimension_numbers = #tpu.dot_dimension_numbers<[1], [0], [0], [1], [0, 0, 1, 1], [], []>} : vector<32x32xf32>, vector<32x256xf32>, vector<32x256xf32> -> vector<32x256xf32>
    %182 = arith.addf %172, %181 : vector<32x256xf32>
    %c0_106 = arith.constant 0 : index
    %c0_107 = arith.constant 0 : index
    %183 = vector.load %arg5[%c0_106, %c0_107] : memref<32x1xf32, #tpu.memory_space<vmem>>, vector<32x1xf32>
    %184 = vector.broadcast %183 : vector<32x1xf32> to vector<32x256xf32>
    %185 = arith.addf %182, %184 : vector<32x256xf32>
    %cst_108 = arith.constant dense<0.000000e+00> : vector<32xf32>
    %186 = vector.multi_reduction <add>, %185, %cst_108 [1] : vector<32x256xf32> to vector<32xf32>
    %187 = vector.shape_cast %186 : vector<32xf32> to vector<32x1xf32>
    %cst_109 = arith.constant 2.560000e+02 : f32
    %188 = vector.broadcast %cst_109 : f32 to vector<32x1xf32>
    %189 = arith.divf %187, %188 : vector<32x1xf32>
    %cst_110 = arith.constant dense<0xFF800000> : vector<32xf32>
    %190 = vector.multi_reduction <maximumf>, %185, %cst_110 [1] : vector<32x256xf32> to vector<32xf32>
    %191 = vector.shape_cast %190 : vector<32xf32> to vector<32x1xf32>
    %c0_111 = arith.constant 0 : index
    %c0_112 = arith.constant 0 : index
    %192 = vector.load %arg6[%c0_111, %c0_112] : memref<2x32xf32, #tpu.memory_space<vmem>>, vector<2x32xf32>
    %cst_113 = arith.constant dense<0.000000e+00> : vector<2x1xf32>
    %193 = tpu.matmul %192, %189, %cst_113 {dimension_numbers = #tpu.dot_dimension_numbers<[1], [0], [0], [1], [0, 0, 1, 1], [], []>} : vector<2x32xf32>, vector<32x1xf32>, vector<2x1xf32> -> vector<2x1xf32>
    %cst_114 = arith.constant 0.000000e+00 : f32
    %194 = vector.broadcast %cst_114 : f32 to vector<2x1xf32>
    %195 = arith.maximumf %193, %194 : vector<2x1xf32>
    %c0_115 = arith.constant 0 : index
    %c0_116 = arith.constant 0 : index
    %196 = vector.load %arg7[%c0_115, %c0_116] : memref<32x2xf32, #tpu.memory_space<vmem>>, vector<32x2xf32>
    %cst_117 = arith.constant dense<0.000000e+00> : vector<32x1xf32>
    %197 = tpu.matmul %196, %195, %cst_117 {dimension_numbers = #tpu.dot_dimension_numbers<[1], [0], [0], [1], [0, 0, 1, 1], [], []>} : vector<32x2xf32>, vector<2x1xf32>, vector<32x1xf32> -> vector<32x1xf32>
    %c0_118 = arith.constant 0 : index
    %c0_119 = arith.constant 0 : index
    %198 = vector.load %arg6[%c0_118, %c0_119] : memref<2x32xf32, #tpu.memory_space<vmem>>, vector<2x32xf32>
    %cst_120 = arith.constant dense<0.000000e+00> : vector<2x1xf32>
    %199 = tpu.matmul %198, %191, %cst_120 {dimension_numbers = #tpu.dot_dimension_numbers<[1], [0], [0], [1], [0, 0, 1, 1], [], []>} : vector<2x32xf32>, vector<32x1xf32>, vector<2x1xf32> -> vector<2x1xf32>
    %cst_121 = arith.constant 0.000000e+00 : f32
    %200 = vector.broadcast %cst_121 : f32 to vector<2x1xf32>
    %201 = arith.maximumf %199, %200 : vector<2x1xf32>
    %c0_122 = arith.constant 0 : index
    %c0_123 = arith.constant 0 : index
    %202 = vector.load %arg7[%c0_122, %c0_123] : memref<32x2xf32, #tpu.memory_space<vmem>>, vector<32x2xf32>
    %cst_124 = arith.constant dense<0.000000e+00> : vector<32x1xf32>
    %203 = tpu.matmul %202, %201, %cst_124 {dimension_numbers = #tpu.dot_dimension_numbers<[1], [0], [0], [1], [0, 0, 1, 1], [], []>} : vector<32x2xf32>, vector<2x1xf32>, vector<32x1xf32> -> vector<32x1xf32>
    %204 = arith.addf %197, %203 : vector<32x1xf32>
    %205 = arith.negf %204 : vector<32x1xf32>
    %206 = math.exp %205 : vector<32x1xf32>
    %cst_125 = arith.constant 1.000000e+00 : f32
    %207 = vector.broadcast %cst_125 : f32 to vector<32x1xf32>
    %208 = arith.addf %207, %206 : vector<32x1xf32>
    %209 = arith.divf %207, %208 : vector<32x1xf32>
    %210 = vector.broadcast %209 : vector<32x1xf32> to vector<32x256xf32>
    %211 = arith.mulf %185, %210 : vector<32x256xf32>
    %cst_126 = arith.constant dense<0.000000e+00> : vector<256xf32>
    %212 = vector.multi_reduction <add>, %211, %cst_126 [0] : vector<32x256xf32> to vector<256xf32>
    %213 = vector.shape_cast %212 : vector<256xf32> to vector<1x256xf32>
    %cst_127 = arith.constant 3.200000e+01 : f32
    %214 = vector.broadcast %cst_127 : f32 to vector<1x256xf32>
    %215 = arith.divf %213, %214 : vector<1x256xf32>
    %cst_128 = arith.constant dense<0xFF800000> : vector<256xf32>
    %216 = vector.multi_reduction <maximumf>, %211, %cst_128 [0] : vector<32x256xf32> to vector<256xf32>
    %217 = vector.shape_cast %216 : vector<256xf32> to vector<1x256xf32>
    %cst_129 = arith.constant 0.000000e+00 : f32
    %218 = vector.broadcast %cst_129 : f32 to vector<1x256xf32>
    %219 = vector.extract_strided_slice %215 {offsets = [0, 205], sizes = [1, 51], strides = [1, 1]} : vector<1x256xf32> to vector<1x51xf32>
    %220 = vector.extract_strided_slice %215 {offsets = [0, 0], sizes = [1, 205], strides = [1, 1]} : vector<1x256xf32> to vector<1x205xf32>
    %221 = tpu.concatenate %219, %220 in 1 : vector<1x51xf32>, vector<1x205xf32> -> vector<1x256xf32>
    %c0_130 = arith.constant 0 : index
    %c0_131 = arith.constant 0 : index
    %222 = vector.load %arg9[%c0_130, %c0_131] : memref<49x256xf32, #tpu.memory_space<vmem>>, vector<1x256xf32>
    %223 = arith.mulf %221, %222 : vector<1x256xf32>
    %224 = arith.addf %218, %223 : vector<1x256xf32>
    %225 = vector.extract_strided_slice %217 {offsets = [0, 205], sizes = [1, 51], strides = [1, 1]} : vector<1x256xf32> to vector<1x51xf32>
    %226 = vector.extract_strided_slice %217 {offsets = [0, 0], sizes = [1, 205], strides = [1, 1]} : vector<1x256xf32> to vector<1x205xf32>
    %227 = tpu.concatenate %225, %226 in 1 : vector<1x51xf32>, vector<1x205xf32> -> vector<1x256xf32>
    %c0_132 = arith.constant 0 : index
    %c0_133 = arith.constant 0 : index
    %228 = vector.load %arg10[%c0_132, %c0_133] : memref<49x256xf32, #tpu.memory_space<vmem>>, vector<1x256xf32>
    %229 = arith.mulf %227, %228 : vector<1x256xf32>
    %230 = arith.addf %224, %229 : vector<1x256xf32>
    %231 = vector.extract_strided_slice %215 {offsets = [0, 206], sizes = [1, 50], strides = [1, 1]} : vector<1x256xf32> to vector<1x50xf32>
    %232 = vector.extract_strided_slice %215 {offsets = [0, 0], sizes = [1, 206], strides = [1, 1]} : vector<1x256xf32> to vector<1x206xf32>
    %233 = tpu.concatenate %231, %232 in 1 : vector<1x50xf32>, vector<1x206xf32> -> vector<1x256xf32>
    %c1_134 = arith.constant 1 : index
    %c0_135 = arith.constant 0 : index
    %234 = vector.load %arg9[%c1_134, %c0_135] : memref<49x256xf32, #tpu.memory_space<vmem>>, vector<1x256xf32>
    %235 = arith.mulf %233, %234 : vector<1x256xf32>
    %236 = arith.addf %230, %235 : vector<1x256xf32>
    %237 = vector.extract_strided_slice %217 {offsets = [0, 206], sizes = [1, 50], strides = [1, 1]} : vector<1x256xf32> to vector<1x50xf32>
    %238 = vector.extract_strided_slice %217 {offsets = [0, 0], sizes = [1, 206], strides = [1, 1]} : vector<1x256xf32> to vector<1x206xf32>
    %239 = tpu.concatenate %237, %238 in 1 : vector<1x50xf32>, vector<1x206xf32> -> vector<1x256xf32>
    %c1_136 = arith.constant 1 : index
    %c0_137 = arith.constant 0 : index
    %240 = vector.load %arg10[%c1_136, %c0_137] : memref<49x256xf32, #tpu.memory_space<vmem>>, vector<1x256xf32>
    %241 = arith.mulf %239, %240 : vector<1x256xf32>
    %242 = arith.addf %236, %241 : vector<1x256xf32>
    %243 = vector.extract_strided_slice %215 {offsets = [0, 207], sizes = [1, 49], strides = [1, 1]} : vector<1x256xf32> to vector<1x49xf32>
    %244 = vector.extract_strided_slice %215 {offsets = [0, 0], sizes = [1, 207], strides = [1, 1]} : vector<1x256xf32> to vector<1x207xf32>
    %245 = tpu.concatenate %243, %244 in 1 : vector<1x49xf32>, vector<1x207xf32> -> vector<1x256xf32>
    %c2_138 = arith.constant 2 : index
    %c0_139 = arith.constant 0 : index
    %246 = vector.load %arg9[%c2_138, %c0_139] : memref<49x256xf32, #tpu.memory_space<vmem>>, vector<1x256xf32>
    %247 = arith.mulf %245, %246 : vector<1x256xf32>
    %248 = arith.addf %242, %247 : vector<1x256xf32>
    %249 = vector.extract_strided_slice %217 {offsets = [0, 207], sizes = [1, 49], strides = [1, 1]} : vector<1x256xf32> to vector<1x49xf32>
    %250 = vector.extract_strided_slice %217 {offsets = [0, 0], sizes = [1, 207], strides = [1, 1]} : vector<1x256xf32> to vector<1x207xf32>
    %251 = tpu.concatenate %249, %250 in 1 : vector<1x49xf32>, vector<1x207xf32> -> vector<1x256xf32>
    %c2_140 = arith.constant 2 : index
    %c0_141 = arith.constant 0 : index
    %252 = vector.load %arg10[%c2_140, %c0_141] : memref<49x256xf32, #tpu.memory_space<vmem>>, vector<1x256xf32>
    %253 = arith.mulf %251, %252 : vector<1x256xf32>
    %254 = arith.addf %248, %253 : vector<1x256xf32>
    %255 = vector.extract_strided_slice %215 {offsets = [0, 208], sizes = [1, 48], strides = [1, 1]} : vector<1x256xf32> to vector<1x48xf32>
    %256 = vector.extract_strided_slice %215 {offsets = [0, 0], sizes = [1, 208], strides = [1, 1]} : vector<1x256xf32> to vector<1x208xf32>
    %257 = tpu.concatenate %255, %256 in 1 : vector<1x48xf32>, vector<1x208xf32> -> vector<1x256xf32>
    %c3_142 = arith.constant 3 : index
    %c0_143 = arith.constant 0 : index
    %258 = vector.load %arg9[%c3_142, %c0_143] : memref<49x256xf32, #tpu.memory_space<vmem>>, vector<1x256xf32>
    %259 = arith.mulf %257, %258 : vector<1x256xf32>
    %260 = arith.addf %254, %259 : vector<1x256xf32>
    %261 = vector.extract_strided_slice %217 {offsets = [0, 208], sizes = [1, 48], strides = [1, 1]} : vector<1x256xf32> to vector<1x48xf32>
    %262 = vector.extract_strided_slice %217 {offsets = [0, 0], sizes = [1, 208], strides = [1, 1]} : vector<1x256xf32> to vector<1x208xf32>
    %263 = tpu.concatenate %261, %262 in 1 : vector<1x48xf32>, vector<1x208xf32> -> vector<1x256xf32>
    %c3_144 = arith.constant 3 : index
    %c0_145 = arith.constant 0 : index
    %264 = vector.load %arg10[%c3_144, %c0_145] : memref<49x256xf32, #tpu.memory_space<vmem>>, vector<1x256xf32>
    %265 = arith.mulf %263, %264 : vector<1x256xf32>
    %266 = arith.addf %260, %265 : vector<1x256xf32>
    %267 = vector.extract_strided_slice %215 {offsets = [0, 209], sizes = [1, 47], strides = [1, 1]} : vector<1x256xf32> to vector<1x47xf32>
    %268 = vector.extract_strided_slice %215 {offsets = [0, 0], sizes = [1, 209], strides = [1, 1]} : vector<1x256xf32> to vector<1x209xf32>
    %269 = tpu.concatenate %267, %268 in 1 : vector<1x47xf32>, vector<1x209xf32> -> vector<1x256xf32>
    %c4_146 = arith.constant 4 : index
    %c0_147 = arith.constant 0 : index
    %270 = vector.load %arg9[%c4_146, %c0_147] : memref<49x256xf32, #tpu.memory_space<vmem>>, vector<1x256xf32>
    %271 = arith.mulf %269, %270 : vector<1x256xf32>
    %272 = arith.addf %266, %271 : vector<1x256xf32>
    %273 = vector.extract_strided_slice %217 {offsets = [0, 209], sizes = [1, 47], strides = [1, 1]} : vector<1x256xf32> to vector<1x47xf32>
    %274 = vector.extract_strided_slice %217 {offsets = [0, 0], sizes = [1, 209], strides = [1, 1]} : vector<1x256xf32> to vector<1x209xf32>
    %275 = tpu.concatenate %273, %274 in 1 : vector<1x47xf32>, vector<1x209xf32> -> vector<1x256xf32>
    %c4_148 = arith.constant 4 : index
    %c0_149 = arith.constant 0 : index
    %276 = vector.load %arg10[%c4_148, %c0_149] : memref<49x256xf32, #tpu.memory_space<vmem>>, vector<1x256xf32>
    %277 = arith.mulf %275, %276 : vector<1x256xf32>
    %278 = arith.addf %272, %277 : vector<1x256xf32>
    %279 = vector.extract_strided_slice %215 {offsets = [0, 210], sizes = [1, 46], strides = [1, 1]} : vector<1x256xf32> to vector<1x46xf32>
    %280 = vector.extract_strided_slice %215 {offsets = [0, 0], sizes = [1, 210], strides = [1, 1]} : vector<1x256xf32> to vector<1x210xf32>
    %281 = tpu.concatenate %279, %280 in 1 : vector<1x46xf32>, vector<1x210xf32> -> vector<1x256xf32>
    %c5_150 = arith.constant 5 : index
    %c0_151 = arith.constant 0 : index
    %282 = vector.load %arg9[%c5_150, %c0_151] : memref<49x256xf32, #tpu.memory_space<vmem>>, vector<1x256xf32>
    %283 = arith.mulf %281, %282 : vector<1x256xf32>
    %284 = arith.addf %278, %283 : vector<1x256xf32>
    %285 = vector.extract_strided_slice %217 {offsets = [0, 210], sizes = [1, 46], strides = [1, 1]} : vector<1x256xf32> to vector<1x46xf32>
    %286 = vector.extract_strided_slice %217 {offsets = [0, 0], sizes = [1, 210], strides = [1, 1]} : vector<1x256xf32> to vector<1x210xf32>
    %287 = tpu.concatenate %285, %286 in 1 : vector<1x46xf32>, vector<1x210xf32> -> vector<1x256xf32>
    %c5_152 = arith.constant 5 : index
    %c0_153 = arith.constant 0 : index
    %288 = vector.load %arg10[%c5_152, %c0_153] : memref<49x256xf32, #tpu.memory_space<vmem>>, vector<1x256xf32>
    %289 = arith.mulf %287, %288 : vector<1x256xf32>
    %290 = arith.addf %284, %289 : vector<1x256xf32>
    %291 = vector.extract_strided_slice %215 {offsets = [0, 211], sizes = [1, 45], strides = [1, 1]} : vector<1x256xf32> to vector<1x45xf32>
    %292 = vector.extract_strided_slice %215 {offsets = [0, 0], sizes = [1, 211], strides = [1, 1]} : vector<1x256xf32> to vector<1x211xf32>
    %293 = tpu.concatenate %291, %292 in 1 : vector<1x45xf32>, vector<1x211xf32> -> vector<1x256xf32>
    %c6_154 = arith.constant 6 : index
    %c0_155 = arith.constant 0 : index
    %294 = vector.load %arg9[%c6_154, %c0_155] : memref<49x256xf32, #tpu.memory_space<vmem>>, vector<1x256xf32>
    %295 = arith.mulf %293, %294 : vector<1x256xf32>
    %296 = arith.addf %290, %295 : vector<1x256xf32>
    %297 = vector.extract_strided_slice %217 {offsets = [0, 211], sizes = [1, 45], strides = [1, 1]} : vector<1x256xf32> to vector<1x45xf32>
    %298 = vector.extract_strided_slice %217 {offsets = [0, 0], sizes = [1, 211], strides = [1, 1]} : vector<1x256xf32> to vector<1x211xf32>
    %299 = tpu.concatenate %297, %298 in 1 : vector<1x45xf32>, vector<1x211xf32> -> vector<1x256xf32>
    %c6_156 = arith.constant 6 : index
    %c0_157 = arith.constant 0 : index
    %300 = vector.load %arg10[%c6_156, %c0_157] : memref<49x256xf32, #tpu.memory_space<vmem>>, vector<1x256xf32>
    %301 = arith.mulf %299, %300 : vector<1x256xf32>
    %302 = arith.addf %296, %301 : vector<1x256xf32>
    %303 = vector.extract_strided_slice %215 {offsets = [0, 221], sizes = [1, 35], strides = [1, 1]} : vector<1x256xf32> to vector<1x35xf32>
    %304 = vector.extract_strided_slice %215 {offsets = [0, 0], sizes = [1, 221], strides = [1, 1]} : vector<1x256xf32> to vector<1x221xf32>
    %305 = tpu.concatenate %303, %304 in 1 : vector<1x35xf32>, vector<1x221xf32> -> vector<1x256xf32>
    %c7_158 = arith.constant 7 : index
    %c0_159 = arith.constant 0 : index
    %306 = vector.load %arg9[%c7_158, %c0_159] : memref<49x256xf32, #tpu.memory_space<vmem>>, vector<1x256xf32>
    %307 = arith.mulf %305, %306 : vector<1x256xf32>
    %308 = arith.addf %302, %307 : vector<1x256xf32>
    %309 = vector.extract_strided_slice %217 {offsets = [0, 221], sizes = [1, 35], strides = [1, 1]} : vector<1x256xf32> to vector<1x35xf32>
    %310 = vector.extract_strided_slice %217 {offsets = [0, 0], sizes = [1, 221], strides = [1, 1]} : vector<1x256xf32> to vector<1x221xf32>
    %311 = tpu.concatenate %309, %310 in 1 : vector<1x35xf32>, vector<1x221xf32> -> vector<1x256xf32>
    %c7_160 = arith.constant 7 : index
    %c0_161 = arith.constant 0 : index
    %312 = vector.load %arg10[%c7_160, %c0_161] : memref<49x256xf32, #tpu.memory_space<vmem>>, vector<1x256xf32>
    %313 = arith.mulf %311, %312 : vector<1x256xf32>
    %314 = arith.addf %308, %313 : vector<1x256xf32>
    %315 = vector.extract_strided_slice %215 {offsets = [0, 222], sizes = [1, 34], strides = [1, 1]} : vector<1x256xf32> to vector<1x34xf32>
    %316 = vector.extract_strided_slice %215 {offsets = [0, 0], sizes = [1, 222], strides = [1, 1]} : vector<1x256xf32> to vector<1x222xf32>
    %317 = tpu.concatenate %315, %316 in 1 : vector<1x34xf32>, vector<1x222xf32> -> vector<1x256xf32>
    %c8_162 = arith.constant 8 : index
    %c0_163 = arith.constant 0 : index
    %318 = vector.load %arg9[%c8_162, %c0_163] : memref<49x256xf32, #tpu.memory_space<vmem>>, vector<1x256xf32>
    %319 = arith.mulf %317, %318 : vector<1x256xf32>
    %320 = arith.addf %314, %319 : vector<1x256xf32>
    %321 = vector.extract_strided_slice %217 {offsets = [0, 222], sizes = [1, 34], strides = [1, 1]} : vector<1x256xf32> to vector<1x34xf32>
    %322 = vector.extract_strided_slice %217 {offsets = [0, 0], sizes = [1, 222], strides = [1, 1]} : vector<1x256xf32> to vector<1x222xf32>
    %323 = tpu.concatenate %321, %322 in 1 : vector<1x34xf32>, vector<1x222xf32> -> vector<1x256xf32>
    %c8_164 = arith.constant 8 : index
    %c0_165 = arith.constant 0 : index
    %324 = vector.load %arg10[%c8_164, %c0_165] : memref<49x256xf32, #tpu.memory_space<vmem>>, vector<1x256xf32>
    %325 = arith.mulf %323, %324 : vector<1x256xf32>
    %326 = arith.addf %320, %325 : vector<1x256xf32>
    %327 = vector.extract_strided_slice %215 {offsets = [0, 223], sizes = [1, 33], strides = [1, 1]} : vector<1x256xf32> to vector<1x33xf32>
    %328 = vector.extract_strided_slice %215 {offsets = [0, 0], sizes = [1, 223], strides = [1, 1]} : vector<1x256xf32> to vector<1x223xf32>
    %329 = tpu.concatenate %327, %328 in 1 : vector<1x33xf32>, vector<1x223xf32> -> vector<1x256xf32>
    %c9 = arith.constant 9 : index
    %c0_166 = arith.constant 0 : index
    %330 = vector.load %arg9[%c9, %c0_166] : memref<49x256xf32, #tpu.memory_space<vmem>>, vector<1x256xf32>
    %331 = arith.mulf %329, %330 : vector<1x256xf32>
    %332 = arith.addf %326, %331 : vector<1x256xf32>
    %333 = vector.extract_strided_slice %217 {offsets = [0, 223], sizes = [1, 33], strides = [1, 1]} : vector<1x256xf32> to vector<1x33xf32>
    %334 = vector.extract_strided_slice %217 {offsets = [0, 0], sizes = [1, 223], strides = [1, 1]} : vector<1x256xf32> to vector<1x223xf32>
    %335 = tpu.concatenate %333, %334 in 1 : vector<1x33xf32>, vector<1x223xf32> -> vector<1x256xf32>
    %c9_167 = arith.constant 9 : index
    %c0_168 = arith.constant 0 : index
    %336 = vector.load %arg10[%c9_167, %c0_168] : memref<49x256xf32, #tpu.memory_space<vmem>>, vector<1x256xf32>
    %337 = arith.mulf %335, %336 : vector<1x256xf32>
    %338 = arith.addf %332, %337 : vector<1x256xf32>
    %339 = vector.extract_strided_slice %215 {offsets = [0, 224], sizes = [1, 32], strides = [1, 1]} : vector<1x256xf32> to vector<1x32xf32>
    %340 = vector.extract_strided_slice %215 {offsets = [0, 0], sizes = [1, 224], strides = [1, 1]} : vector<1x256xf32> to vector<1x224xf32>
    %341 = tpu.concatenate %339, %340 in 1 : vector<1x32xf32>, vector<1x224xf32> -> vector<1x256xf32>
    %c10 = arith.constant 10 : index
    %c0_169 = arith.constant 0 : index
    %342 = vector.load %arg9[%c10, %c0_169] : memref<49x256xf32, #tpu.memory_space<vmem>>, vector<1x256xf32>
    %343 = arith.mulf %341, %342 : vector<1x256xf32>
    %344 = arith.addf %338, %343 : vector<1x256xf32>
    %345 = vector.extract_strided_slice %217 {offsets = [0, 224], sizes = [1, 32], strides = [1, 1]} : vector<1x256xf32> to vector<1x32xf32>
    %346 = vector.extract_strided_slice %217 {offsets = [0, 0], sizes = [1, 224], strides = [1, 1]} : vector<1x256xf32> to vector<1x224xf32>
    %347 = tpu.concatenate %345, %346 in 1 : vector<1x32xf32>, vector<1x224xf32> -> vector<1x256xf32>
    %c10_170 = arith.constant 10 : index
    %c0_171 = arith.constant 0 : index
    %348 = vector.load %arg10[%c10_170, %c0_171] : memref<49x256xf32, #tpu.memory_space<vmem>>, vector<1x256xf32>
    %349 = arith.mulf %347, %348 : vector<1x256xf32>
    %350 = arith.addf %344, %349 : vector<1x256xf32>
    %351 = vector.extract_strided_slice %215 {offsets = [0, 225], sizes = [1, 31], strides = [1, 1]} : vector<1x256xf32> to vector<1x31xf32>
    %352 = vector.extract_strided_slice %215 {offsets = [0, 0], sizes = [1, 225], strides = [1, 1]} : vector<1x256xf32> to vector<1x225xf32>
    %353 = tpu.concatenate %351, %352 in 1 : vector<1x31xf32>, vector<1x225xf32> -> vector<1x256xf32>
    %c11 = arith.constant 11 : index
    %c0_172 = arith.constant 0 : index
    %354 = vector.load %arg9[%c11, %c0_172] : memref<49x256xf32, #tpu.memory_space<vmem>>, vector<1x256xf32>
    %355 = arith.mulf %353, %354 : vector<1x256xf32>
    %356 = arith.addf %350, %355 : vector<1x256xf32>
    %357 = vector.extract_strided_slice %217 {offsets = [0, 225], sizes = [1, 31], strides = [1, 1]} : vector<1x256xf32> to vector<1x31xf32>
    %358 = vector.extract_strided_slice %217 {offsets = [0, 0], sizes = [1, 225], strides = [1, 1]} : vector<1x256xf32> to vector<1x225xf32>
    %359 = tpu.concatenate %357, %358 in 1 : vector<1x31xf32>, vector<1x225xf32> -> vector<1x256xf32>
    %c11_173 = arith.constant 11 : index
    %c0_174 = arith.constant 0 : index
    %360 = vector.load %arg10[%c11_173, %c0_174] : memref<49x256xf32, #tpu.memory_space<vmem>>, vector<1x256xf32>
    %361 = arith.mulf %359, %360 : vector<1x256xf32>
    %362 = arith.addf %356, %361 : vector<1x256xf32>
    %363 = vector.extract_strided_slice %215 {offsets = [0, 226], sizes = [1, 30], strides = [1, 1]} : vector<1x256xf32> to vector<1x30xf32>
    %364 = vector.extract_strided_slice %215 {offsets = [0, 0], sizes = [1, 226], strides = [1, 1]} : vector<1x256xf32> to vector<1x226xf32>
    %365 = tpu.concatenate %363, %364 in 1 : vector<1x30xf32>, vector<1x226xf32> -> vector<1x256xf32>
    %c12 = arith.constant 12 : index
    %c0_175 = arith.constant 0 : index
    %366 = vector.load %arg9[%c12, %c0_175] : memref<49x256xf32, #tpu.memory_space<vmem>>, vector<1x256xf32>
    %367 = arith.mulf %365, %366 : vector<1x256xf32>
    %368 = arith.addf %362, %367 : vector<1x256xf32>
    %369 = vector.extract_strided_slice %217 {offsets = [0, 226], sizes = [1, 30], strides = [1, 1]} : vector<1x256xf32> to vector<1x30xf32>
    %370 = vector.extract_strided_slice %217 {offsets = [0, 0], sizes = [1, 226], strides = [1, 1]} : vector<1x256xf32> to vector<1x226xf32>
    %371 = tpu.concatenate %369, %370 in 1 : vector<1x30xf32>, vector<1x226xf32> -> vector<1x256xf32>
    %c12_176 = arith.constant 12 : index
    %c0_177 = arith.constant 0 : index
    %372 = vector.load %arg10[%c12_176, %c0_177] : memref<49x256xf32, #tpu.memory_space<vmem>>, vector<1x256xf32>
    %373 = arith.mulf %371, %372 : vector<1x256xf32>
    %374 = arith.addf %368, %373 : vector<1x256xf32>
    %375 = vector.extract_strided_slice %215 {offsets = [0, 227], sizes = [1, 29], strides = [1, 1]} : vector<1x256xf32> to vector<1x29xf32>
    %376 = vector.extract_strided_slice %215 {offsets = [0, 0], sizes = [1, 227], strides = [1, 1]} : vector<1x256xf32> to vector<1x227xf32>
    %377 = tpu.concatenate %375, %376 in 1 : vector<1x29xf32>, vector<1x227xf32> -> vector<1x256xf32>
    %c13 = arith.constant 13 : index
    %c0_178 = arith.constant 0 : index
    %378 = vector.load %arg9[%c13, %c0_178] : memref<49x256xf32, #tpu.memory_space<vmem>>, vector<1x256xf32>
    %379 = arith.mulf %377, %378 : vector<1x256xf32>
    %380 = arith.addf %374, %379 : vector<1x256xf32>
    %381 = vector.extract_strided_slice %217 {offsets = [0, 227], sizes = [1, 29], strides = [1, 1]} : vector<1x256xf32> to vector<1x29xf32>
    %382 = vector.extract_strided_slice %217 {offsets = [0, 0], sizes = [1, 227], strides = [1, 1]} : vector<1x256xf32> to vector<1x227xf32>
    %383 = tpu.concatenate %381, %382 in 1 : vector<1x29xf32>, vector<1x227xf32> -> vector<1x256xf32>
    %c13_179 = arith.constant 13 : index
    %c0_180 = arith.constant 0 : index
    %384 = vector.load %arg10[%c13_179, %c0_180] : memref<49x256xf32, #tpu.memory_space<vmem>>, vector<1x256xf32>
    %385 = arith.mulf %383, %384 : vector<1x256xf32>
    %386 = arith.addf %380, %385 : vector<1x256xf32>
    %387 = vector.extract_strided_slice %215 {offsets = [0, 237], sizes = [1, 19], strides = [1, 1]} : vector<1x256xf32> to vector<1x19xf32>
    %388 = vector.extract_strided_slice %215 {offsets = [0, 0], sizes = [1, 237], strides = [1, 1]} : vector<1x256xf32> to vector<1x237xf32>
    %389 = tpu.concatenate %387, %388 in 1 : vector<1x19xf32>, vector<1x237xf32> -> vector<1x256xf32>
    %c14 = arith.constant 14 : index
    %c0_181 = arith.constant 0 : index
    %390 = vector.load %arg9[%c14, %c0_181] : memref<49x256xf32, #tpu.memory_space<vmem>>, vector<1x256xf32>
    %391 = arith.mulf %389, %390 : vector<1x256xf32>
    %392 = arith.addf %386, %391 : vector<1x256xf32>
    %393 = vector.extract_strided_slice %217 {offsets = [0, 237], sizes = [1, 19], strides = [1, 1]} : vector<1x256xf32> to vector<1x19xf32>
    %394 = vector.extract_strided_slice %217 {offsets = [0, 0], sizes = [1, 237], strides = [1, 1]} : vector<1x256xf32> to vector<1x237xf32>
    %395 = tpu.concatenate %393, %394 in 1 : vector<1x19xf32>, vector<1x237xf32> -> vector<1x256xf32>
    %c14_182 = arith.constant 14 : index
    %c0_183 = arith.constant 0 : index
    %396 = vector.load %arg10[%c14_182, %c0_183] : memref<49x256xf32, #tpu.memory_space<vmem>>, vector<1x256xf32>
    %397 = arith.mulf %395, %396 : vector<1x256xf32>
    %398 = arith.addf %392, %397 : vector<1x256xf32>
    %399 = vector.extract_strided_slice %215 {offsets = [0, 238], sizes = [1, 18], strides = [1, 1]} : vector<1x256xf32> to vector<1x18xf32>
    %400 = vector.extract_strided_slice %215 {offsets = [0, 0], sizes = [1, 238], strides = [1, 1]} : vector<1x256xf32> to vector<1x238xf32>
    %401 = tpu.concatenate %399, %400 in 1 : vector<1x18xf32>, vector<1x238xf32> -> vector<1x256xf32>
    %c15 = arith.constant 15 : index
    %c0_184 = arith.constant 0 : index
    %402 = vector.load %arg9[%c15, %c0_184] : memref<49x256xf32, #tpu.memory_space<vmem>>, vector<1x256xf32>
    %403 = arith.mulf %401, %402 : vector<1x256xf32>
    %404 = arith.addf %398, %403 : vector<1x256xf32>
    %405 = vector.extract_strided_slice %217 {offsets = [0, 238], sizes = [1, 18], strides = [1, 1]} : vector<1x256xf32> to vector<1x18xf32>
    %406 = vector.extract_strided_slice %217 {offsets = [0, 0], sizes = [1, 238], strides = [1, 1]} : vector<1x256xf32> to vector<1x238xf32>
    %407 = tpu.concatenate %405, %406 in 1 : vector<1x18xf32>, vector<1x238xf32> -> vector<1x256xf32>
    %c15_185 = arith.constant 15 : index
    %c0_186 = arith.constant 0 : index
    %408 = vector.load %arg10[%c15_185, %c0_186] : memref<49x256xf32, #tpu.memory_space<vmem>>, vector<1x256xf32>
    %409 = arith.mulf %407, %408 : vector<1x256xf32>
    %410 = arith.addf %404, %409 : vector<1x256xf32>
    %411 = vector.extract_strided_slice %215 {offsets = [0, 239], sizes = [1, 17], strides = [1, 1]} : vector<1x256xf32> to vector<1x17xf32>
    %412 = vector.extract_strided_slice %215 {offsets = [0, 0], sizes = [1, 239], strides = [1, 1]} : vector<1x256xf32> to vector<1x239xf32>
    %413 = tpu.concatenate %411, %412 in 1 : vector<1x17xf32>, vector<1x239xf32> -> vector<1x256xf32>
    %c16 = arith.constant 16 : index
    %c0_187 = arith.constant 0 : index
    %414 = vector.load %arg9[%c16, %c0_187] : memref<49x256xf32, #tpu.memory_space<vmem>>, vector<1x256xf32>
    %415 = arith.mulf %413, %414 : vector<1x256xf32>
    %416 = arith.addf %410, %415 : vector<1x256xf32>
    %417 = vector.extract_strided_slice %217 {offsets = [0, 239], sizes = [1, 17], strides = [1, 1]} : vector<1x256xf32> to vector<1x17xf32>
    %418 = vector.extract_strided_slice %217 {offsets = [0, 0], sizes = [1, 239], strides = [1, 1]} : vector<1x256xf32> to vector<1x239xf32>
    %419 = tpu.concatenate %417, %418 in 1 : vector<1x17xf32>, vector<1x239xf32> -> vector<1x256xf32>
    %c16_188 = arith.constant 16 : index
    %c0_189 = arith.constant 0 : index
    %420 = vector.load %arg10[%c16_188, %c0_189] : memref<49x256xf32, #tpu.memory_space<vmem>>, vector<1x256xf32>
    %421 = arith.mulf %419, %420 : vector<1x256xf32>
    %422 = arith.addf %416, %421 : vector<1x256xf32>
    %423 = vector.extract_strided_slice %215 {offsets = [0, 240], sizes = [1, 16], strides = [1, 1]} : vector<1x256xf32> to vector<1x16xf32>
    %424 = vector.extract_strided_slice %215 {offsets = [0, 0], sizes = [1, 240], strides = [1, 1]} : vector<1x256xf32> to vector<1x240xf32>
    %425 = tpu.concatenate %423, %424 in 1 : vector<1x16xf32>, vector<1x240xf32> -> vector<1x256xf32>
    %c17 = arith.constant 17 : index
    %c0_190 = arith.constant 0 : index
    %426 = vector.load %arg9[%c17, %c0_190] : memref<49x256xf32, #tpu.memory_space<vmem>>, vector<1x256xf32>
    %427 = arith.mulf %425, %426 : vector<1x256xf32>
    %428 = arith.addf %422, %427 : vector<1x256xf32>
    %429 = vector.extract_strided_slice %217 {offsets = [0, 240], sizes = [1, 16], strides = [1, 1]} : vector<1x256xf32> to vector<1x16xf32>
    %430 = vector.extract_strided_slice %217 {offsets = [0, 0], sizes = [1, 240], strides = [1, 1]} : vector<1x256xf32> to vector<1x240xf32>
    %431 = tpu.concatenate %429, %430 in 1 : vector<1x16xf32>, vector<1x240xf32> -> vector<1x256xf32>
    %c17_191 = arith.constant 17 : index
    %c0_192 = arith.constant 0 : index
    %432 = vector.load %arg10[%c17_191, %c0_192] : memref<49x256xf32, #tpu.memory_space<vmem>>, vector<1x256xf32>
    %433 = arith.mulf %431, %432 : vector<1x256xf32>
    %434 = arith.addf %428, %433 : vector<1x256xf32>
    %435 = vector.extract_strided_slice %215 {offsets = [0, 241], sizes = [1, 15], strides = [1, 1]} : vector<1x256xf32> to vector<1x15xf32>
    %436 = vector.extract_strided_slice %215 {offsets = [0, 0], sizes = [1, 241], strides = [1, 1]} : vector<1x256xf32> to vector<1x241xf32>
    %437 = tpu.concatenate %435, %436 in 1 : vector<1x15xf32>, vector<1x241xf32> -> vector<1x256xf32>
    %c18 = arith.constant 18 : index
    %c0_193 = arith.constant 0 : index
    %438 = vector.load %arg9[%c18, %c0_193] : memref<49x256xf32, #tpu.memory_space<vmem>>, vector<1x256xf32>
    %439 = arith.mulf %437, %438 : vector<1x256xf32>
    %440 = arith.addf %434, %439 : vector<1x256xf32>
    %441 = vector.extract_strided_slice %217 {offsets = [0, 241], sizes = [1, 15], strides = [1, 1]} : vector<1x256xf32> to vector<1x15xf32>
    %442 = vector.extract_strided_slice %217 {offsets = [0, 0], sizes = [1, 241], strides = [1, 1]} : vector<1x256xf32> to vector<1x241xf32>
    %443 = tpu.concatenate %441, %442 in 1 : vector<1x15xf32>, vector<1x241xf32> -> vector<1x256xf32>
    %c18_194 = arith.constant 18 : index
    %c0_195 = arith.constant 0 : index
    %444 = vector.load %arg10[%c18_194, %c0_195] : memref<49x256xf32, #tpu.memory_space<vmem>>, vector<1x256xf32>
    %445 = arith.mulf %443, %444 : vector<1x256xf32>
    %446 = arith.addf %440, %445 : vector<1x256xf32>
    %447 = vector.extract_strided_slice %215 {offsets = [0, 242], sizes = [1, 14], strides = [1, 1]} : vector<1x256xf32> to vector<1x14xf32>
    %448 = vector.extract_strided_slice %215 {offsets = [0, 0], sizes = [1, 242], strides = [1, 1]} : vector<1x256xf32> to vector<1x242xf32>
    %449 = tpu.concatenate %447, %448 in 1 : vector<1x14xf32>, vector<1x242xf32> -> vector<1x256xf32>
    %c19 = arith.constant 19 : index
    %c0_196 = arith.constant 0 : index
    %450 = vector.load %arg9[%c19, %c0_196] : memref<49x256xf32, #tpu.memory_space<vmem>>, vector<1x256xf32>
    %451 = arith.mulf %449, %450 : vector<1x256xf32>
    %452 = arith.addf %446, %451 : vector<1x256xf32>
    %453 = vector.extract_strided_slice %217 {offsets = [0, 242], sizes = [1, 14], strides = [1, 1]} : vector<1x256xf32> to vector<1x14xf32>
    %454 = vector.extract_strided_slice %217 {offsets = [0, 0], sizes = [1, 242], strides = [1, 1]} : vector<1x256xf32> to vector<1x242xf32>
    %455 = tpu.concatenate %453, %454 in 1 : vector<1x14xf32>, vector<1x242xf32> -> vector<1x256xf32>
    %c19_197 = arith.constant 19 : index
    %c0_198 = arith.constant 0 : index
    %456 = vector.load %arg10[%c19_197, %c0_198] : memref<49x256xf32, #tpu.memory_space<vmem>>, vector<1x256xf32>
    %457 = arith.mulf %455, %456 : vector<1x256xf32>
    %458 = arith.addf %452, %457 : vector<1x256xf32>
    %459 = vector.extract_strided_slice %215 {offsets = [0, 243], sizes = [1, 13], strides = [1, 1]} : vector<1x256xf32> to vector<1x13xf32>
    %460 = vector.extract_strided_slice %215 {offsets = [0, 0], sizes = [1, 243], strides = [1, 1]} : vector<1x256xf32> to vector<1x243xf32>
    %461 = tpu.concatenate %459, %460 in 1 : vector<1x13xf32>, vector<1x243xf32> -> vector<1x256xf32>
    %c20 = arith.constant 20 : index
    %c0_199 = arith.constant 0 : index
    %462 = vector.load %arg9[%c20, %c0_199] : memref<49x256xf32, #tpu.memory_space<vmem>>, vector<1x256xf32>
    %463 = arith.mulf %461, %462 : vector<1x256xf32>
    %464 = arith.addf %458, %463 : vector<1x256xf32>
    %465 = vector.extract_strided_slice %217 {offsets = [0, 243], sizes = [1, 13], strides = [1, 1]} : vector<1x256xf32> to vector<1x13xf32>
    %466 = vector.extract_strided_slice %217 {offsets = [0, 0], sizes = [1, 243], strides = [1, 1]} : vector<1x256xf32> to vector<1x243xf32>
    %467 = tpu.concatenate %465, %466 in 1 : vector<1x13xf32>, vector<1x243xf32> -> vector<1x256xf32>
    %c20_200 = arith.constant 20 : index
    %c0_201 = arith.constant 0 : index
    %468 = vector.load %arg10[%c20_200, %c0_201] : memref<49x256xf32, #tpu.memory_space<vmem>>, vector<1x256xf32>
    %469 = arith.mulf %467, %468 : vector<1x256xf32>
    %470 = arith.addf %464, %469 : vector<1x256xf32>
    %471 = vector.extract_strided_slice %215 {offsets = [0, 253], sizes = [1, 3], strides = [1, 1]} : vector<1x256xf32> to vector<1x3xf32>
    %472 = vector.extract_strided_slice %215 {offsets = [0, 0], sizes = [1, 253], strides = [1, 1]} : vector<1x256xf32> to vector<1x253xf32>
    %473 = tpu.concatenate %471, %472 in 1 : vector<1x3xf32>, vector<1x253xf32> -> vector<1x256xf32>
    %c21 = arith.constant 21 : index
    %c0_202 = arith.constant 0 : index
    %474 = vector.load %arg9[%c21, %c0_202] : memref<49x256xf32, #tpu.memory_space<vmem>>, vector<1x256xf32>
    %475 = arith.mulf %473, %474 : vector<1x256xf32>
    %476 = arith.addf %470, %475 : vector<1x256xf32>
    %477 = vector.extract_strided_slice %217 {offsets = [0, 253], sizes = [1, 3], strides = [1, 1]} : vector<1x256xf32> to vector<1x3xf32>
    %478 = vector.extract_strided_slice %217 {offsets = [0, 0], sizes = [1, 253], strides = [1, 1]} : vector<1x256xf32> to vector<1x253xf32>
    %479 = tpu.concatenate %477, %478 in 1 : vector<1x3xf32>, vector<1x253xf32> -> vector<1x256xf32>
    %c21_203 = arith.constant 21 : index
    %c0_204 = arith.constant 0 : index
    %480 = vector.load %arg10[%c21_203, %c0_204] : memref<49x256xf32, #tpu.memory_space<vmem>>, vector<1x256xf32>
    %481 = arith.mulf %479, %480 : vector<1x256xf32>
    %482 = arith.addf %476, %481 : vector<1x256xf32>
    %483 = vector.extract_strided_slice %215 {offsets = [0, 254], sizes = [1, 2], strides = [1, 1]} : vector<1x256xf32> to vector<1x2xf32>
    %484 = vector.extract_strided_slice %215 {offsets = [0, 0], sizes = [1, 254], strides = [1, 1]} : vector<1x256xf32> to vector<1x254xf32>
    %485 = tpu.concatenate %483, %484 in 1 : vector<1x2xf32>, vector<1x254xf32> -> vector<1x256xf32>
    %c22 = arith.constant 22 : index
    %c0_205 = arith.constant 0 : index
    %486 = vector.load %arg9[%c22, %c0_205] : memref<49x256xf32, #tpu.memory_space<vmem>>, vector<1x256xf32>
    %487 = arith.mulf %485, %486 : vector<1x256xf32>
    %488 = arith.addf %482, %487 : vector<1x256xf32>
    %489 = vector.extract_strided_slice %217 {offsets = [0, 254], sizes = [1, 2], strides = [1, 1]} : vector<1x256xf32> to vector<1x2xf32>
    %490 = vector.extract_strided_slice %217 {offsets = [0, 0], sizes = [1, 254], strides = [1, 1]} : vector<1x256xf32> to vector<1x254xf32>
    %491 = tpu.concatenate %489, %490 in 1 : vector<1x2xf32>, vector<1x254xf32> -> vector<1x256xf32>
    %c22_206 = arith.constant 22 : index
    %c0_207 = arith.constant 0 : index
    %492 = vector.load %arg10[%c22_206, %c0_207] : memref<49x256xf32, #tpu.memory_space<vmem>>, vector<1x256xf32>
    %493 = arith.mulf %491, %492 : vector<1x256xf32>
    %494 = arith.addf %488, %493 : vector<1x256xf32>
    %495 = vector.extract_strided_slice %215 {offsets = [0, 255], sizes = [1, 1], strides = [1, 1]} : vector<1x256xf32> to vector<1x1xf32>
    %496 = vector.extract_strided_slice %215 {offsets = [0, 0], sizes = [1, 255], strides = [1, 1]} : vector<1x256xf32> to vector<1x255xf32>
    %497 = tpu.concatenate %495, %496 in 1 : vector<1x1xf32>, vector<1x255xf32> -> vector<1x256xf32>
    %c23 = arith.constant 23 : index
    %c0_208 = arith.constant 0 : index
    %498 = vector.load %arg9[%c23, %c0_208] : memref<49x256xf32, #tpu.memory_space<vmem>>, vector<1x256xf32>
    %499 = arith.mulf %497, %498 : vector<1x256xf32>
    %500 = arith.addf %494, %499 : vector<1x256xf32>
    %501 = vector.extract_strided_slice %217 {offsets = [0, 255], sizes = [1, 1], strides = [1, 1]} : vector<1x256xf32> to vector<1x1xf32>
    %502 = vector.extract_strided_slice %217 {offsets = [0, 0], sizes = [1, 255], strides = [1, 1]} : vector<1x256xf32> to vector<1x255xf32>
    %503 = tpu.concatenate %501, %502 in 1 : vector<1x1xf32>, vector<1x255xf32> -> vector<1x256xf32>
    %c23_209 = arith.constant 23 : index
    %c0_210 = arith.constant 0 : index
    %504 = vector.load %arg10[%c23_209, %c0_210] : memref<49x256xf32, #tpu.memory_space<vmem>>, vector<1x256xf32>
    %505 = arith.mulf %503, %504 : vector<1x256xf32>
    %506 = arith.addf %500, %505 : vector<1x256xf32>
    %c24 = arith.constant 24 : index
    %c0_211 = arith.constant 0 : index
    %507 = vector.load %arg9[%c24, %c0_211] : memref<49x256xf32, #tpu.memory_space<vmem>>, vector<1x256xf32>
    %508 = arith.mulf %215, %507 : vector<1x256xf32>
    %509 = arith.addf %506, %508 : vector<1x256xf32>
    %c24_212 = arith.constant 24 : index
    %c0_213 = arith.constant 0 : index
    %510 = vector.load %arg10[%c24_212, %c0_213] : memref<49x256xf32, #tpu.memory_space<vmem>>, vector<1x256xf32>
    %511 = arith.mulf %217, %510 : vector<1x256xf32>
    %512 = arith.addf %509, %511 : vector<1x256xf32>
    %513 = vector.extract_strided_slice %215 {offsets = [0, 1], sizes = [1, 255], strides = [1, 1]} : vector<1x256xf32> to vector<1x255xf32>
    %514 = vector.extract_strided_slice %215 {offsets = [0, 0], sizes = [1, 1], strides = [1, 1]} : vector<1x256xf32> to vector<1x1xf32>
    %515 = tpu.concatenate %513, %514 in 1 : vector<1x255xf32>, vector<1x1xf32> -> vector<1x256xf32>
    %c25 = arith.constant 25 : index
    %c0_214 = arith.constant 0 : index
    %516 = vector.load %arg9[%c25, %c0_214] : memref<49x256xf32, #tpu.memory_space<vmem>>, vector<1x256xf32>
    %517 = arith.mulf %515, %516 : vector<1x256xf32>
    %518 = arith.addf %512, %517 : vector<1x256xf32>
    %519 = vector.extract_strided_slice %217 {offsets = [0, 1], sizes = [1, 255], strides = [1, 1]} : vector<1x256xf32> to vector<1x255xf32>
    %520 = vector.extract_strided_slice %217 {offsets = [0, 0], sizes = [1, 1], strides = [1, 1]} : vector<1x256xf32> to vector<1x1xf32>
    %521 = tpu.concatenate %519, %520 in 1 : vector<1x255xf32>, vector<1x1xf32> -> vector<1x256xf32>
    %c25_215 = arith.constant 25 : index
    %c0_216 = arith.constant 0 : index
    %522 = vector.load %arg10[%c25_215, %c0_216] : memref<49x256xf32, #tpu.memory_space<vmem>>, vector<1x256xf32>
    %523 = arith.mulf %521, %522 : vector<1x256xf32>
    %524 = arith.addf %518, %523 : vector<1x256xf32>
    %525 = vector.extract_strided_slice %215 {offsets = [0, 2], sizes = [1, 254], strides = [1, 1]} : vector<1x256xf32> to vector<1x254xf32>
    %526 = vector.extract_strided_slice %215 {offsets = [0, 0], sizes = [1, 2], strides = [1, 1]} : vector<1x256xf32> to vector<1x2xf32>
    %527 = tpu.concatenate %525, %526 in 1 : vector<1x254xf32>, vector<1x2xf32> -> vector<1x256xf32>
    %c26 = arith.constant 26 : index
    %c0_217 = arith.constant 0 : index
    %528 = vector.load %arg9[%c26, %c0_217] : memref<49x256xf32, #tpu.memory_space<vmem>>, vector<1x256xf32>
    %529 = arith.mulf %527, %528 : vector<1x256xf32>
    %530 = arith.addf %524, %529 : vector<1x256xf32>
    %531 = vector.extract_strided_slice %217 {offsets = [0, 2], sizes = [1, 254], strides = [1, 1]} : vector<1x256xf32> to vector<1x254xf32>
    %532 = vector.extract_strided_slice %217 {offsets = [0, 0], sizes = [1, 2], strides = [1, 1]} : vector<1x256xf32> to vector<1x2xf32>
    %533 = tpu.concatenate %531, %532 in 1 : vector<1x254xf32>, vector<1x2xf32> -> vector<1x256xf32>
    %c26_218 = arith.constant 26 : index
    %c0_219 = arith.constant 0 : index
    %534 = vector.load %arg10[%c26_218, %c0_219] : memref<49x256xf32, #tpu.memory_space<vmem>>, vector<1x256xf32>
    %535 = arith.mulf %533, %534 : vector<1x256xf32>
    %536 = arith.addf %530, %535 : vector<1x256xf32>
    %537 = vector.extract_strided_slice %215 {offsets = [0, 3], sizes = [1, 253], strides = [1, 1]} : vector<1x256xf32> to vector<1x253xf32>
    %538 = vector.extract_strided_slice %215 {offsets = [0, 0], sizes = [1, 3], strides = [1, 1]} : vector<1x256xf32> to vector<1x3xf32>
    %539 = tpu.concatenate %537, %538 in 1 : vector<1x253xf32>, vector<1x3xf32> -> vector<1x256xf32>
    %c27 = arith.constant 27 : index
    %c0_220 = arith.constant 0 : index
    %540 = vector.load %arg9[%c27, %c0_220] : memref<49x256xf32, #tpu.memory_space<vmem>>, vector<1x256xf32>
    %541 = arith.mulf %539, %540 : vector<1x256xf32>
    %542 = arith.addf %536, %541 : vector<1x256xf32>
    %543 = vector.extract_strided_slice %217 {offsets = [0, 3], sizes = [1, 253], strides = [1, 1]} : vector<1x256xf32> to vector<1x253xf32>
    %544 = vector.extract_strided_slice %217 {offsets = [0, 0], sizes = [1, 3], strides = [1, 1]} : vector<1x256xf32> to vector<1x3xf32>
    %545 = tpu.concatenate %543, %544 in 1 : vector<1x253xf32>, vector<1x3xf32> -> vector<1x256xf32>
    %c27_221 = arith.constant 27 : index
    %c0_222 = arith.constant 0 : index
    %546 = vector.load %arg10[%c27_221, %c0_222] : memref<49x256xf32, #tpu.memory_space<vmem>>, vector<1x256xf32>
    %547 = arith.mulf %545, %546 : vector<1x256xf32>
    %548 = arith.addf %542, %547 : vector<1x256xf32>
    %549 = vector.extract_strided_slice %215 {offsets = [0, 13], sizes = [1, 243], strides = [1, 1]} : vector<1x256xf32> to vector<1x243xf32>
    %550 = vector.extract_strided_slice %215 {offsets = [0, 0], sizes = [1, 13], strides = [1, 1]} : vector<1x256xf32> to vector<1x13xf32>
    %551 = tpu.concatenate %549, %550 in 1 : vector<1x243xf32>, vector<1x13xf32> -> vector<1x256xf32>
    %c28 = arith.constant 28 : index
    %c0_223 = arith.constant 0 : index
    %552 = vector.load %arg9[%c28, %c0_223] : memref<49x256xf32, #tpu.memory_space<vmem>>, vector<1x256xf32>
    %553 = arith.mulf %551, %552 : vector<1x256xf32>
    %554 = arith.addf %548, %553 : vector<1x256xf32>
    %555 = vector.extract_strided_slice %217 {offsets = [0, 13], sizes = [1, 243], strides = [1, 1]} : vector<1x256xf32> to vector<1x243xf32>
    %556 = vector.extract_strided_slice %217 {offsets = [0, 0], sizes = [1, 13], strides = [1, 1]} : vector<1x256xf32> to vector<1x13xf32>
    %557 = tpu.concatenate %555, %556 in 1 : vector<1x243xf32>, vector<1x13xf32> -> vector<1x256xf32>
    %c28_224 = arith.constant 28 : index
    %c0_225 = arith.constant 0 : index
    %558 = vector.load %arg10[%c28_224, %c0_225] : memref<49x256xf32, #tpu.memory_space<vmem>>, vector<1x256xf32>
    %559 = arith.mulf %557, %558 : vector<1x256xf32>
    %560 = arith.addf %554, %559 : vector<1x256xf32>
    %561 = vector.extract_strided_slice %215 {offsets = [0, 14], sizes = [1, 242], strides = [1, 1]} : vector<1x256xf32> to vector<1x242xf32>
    %562 = vector.extract_strided_slice %215 {offsets = [0, 0], sizes = [1, 14], strides = [1, 1]} : vector<1x256xf32> to vector<1x14xf32>
    %563 = tpu.concatenate %561, %562 in 1 : vector<1x242xf32>, vector<1x14xf32> -> vector<1x256xf32>
    %c29 = arith.constant 29 : index
    %c0_226 = arith.constant 0 : index
    %564 = vector.load %arg9[%c29, %c0_226] : memref<49x256xf32, #tpu.memory_space<vmem>>, vector<1x256xf32>
    %565 = arith.mulf %563, %564 : vector<1x256xf32>
    %566 = arith.addf %560, %565 : vector<1x256xf32>
    %567 = vector.extract_strided_slice %217 {offsets = [0, 14], sizes = [1, 242], strides = [1, 1]} : vector<1x256xf32> to vector<1x242xf32>
    %568 = vector.extract_strided_slice %217 {offsets = [0, 0], sizes = [1, 14], strides = [1, 1]} : vector<1x256xf32> to vector<1x14xf32>
    %569 = tpu.concatenate %567, %568 in 1 : vector<1x242xf32>, vector<1x14xf32> -> vector<1x256xf32>
    %c29_227 = arith.constant 29 : index
    %c0_228 = arith.constant 0 : index
    %570 = vector.load %arg10[%c29_227, %c0_228] : memref<49x256xf32, #tpu.memory_space<vmem>>, vector<1x256xf32>
    %571 = arith.mulf %569, %570 : vector<1x256xf32>
    %572 = arith.addf %566, %571 : vector<1x256xf32>
    %573 = vector.extract_strided_slice %215 {offsets = [0, 15], sizes = [1, 241], strides = [1, 1]} : vector<1x256xf32> to vector<1x241xf32>
    %574 = vector.extract_strided_slice %215 {offsets = [0, 0], sizes = [1, 15], strides = [1, 1]} : vector<1x256xf32> to vector<1x15xf32>
    %575 = tpu.concatenate %573, %574 in 1 : vector<1x241xf32>, vector<1x15xf32> -> vector<1x256xf32>
    %c30 = arith.constant 30 : index
    %c0_229 = arith.constant 0 : index
    %576 = vector.load %arg9[%c30, %c0_229] : memref<49x256xf32, #tpu.memory_space<vmem>>, vector<1x256xf32>
    %577 = arith.mulf %575, %576 : vector<1x256xf32>
    %578 = arith.addf %572, %577 : vector<1x256xf32>
    %579 = vector.extract_strided_slice %217 {offsets = [0, 15], sizes = [1, 241], strides = [1, 1]} : vector<1x256xf32> to vector<1x241xf32>
    %580 = vector.extract_strided_slice %217 {offsets = [0, 0], sizes = [1, 15], strides = [1, 1]} : vector<1x256xf32> to vector<1x15xf32>
    %581 = tpu.concatenate %579, %580 in 1 : vector<1x241xf32>, vector<1x15xf32> -> vector<1x256xf32>
    %c30_230 = arith.constant 30 : index
    %c0_231 = arith.constant 0 : index
    %582 = vector.load %arg10[%c30_230, %c0_231] : memref<49x256xf32, #tpu.memory_space<vmem>>, vector<1x256xf32>
    %583 = arith.mulf %581, %582 : vector<1x256xf32>
    %584 = arith.addf %578, %583 : vector<1x256xf32>
    %585 = vector.extract_strided_slice %215 {offsets = [0, 16], sizes = [1, 240], strides = [1, 1]} : vector<1x256xf32> to vector<1x240xf32>
    %586 = vector.extract_strided_slice %215 {offsets = [0, 0], sizes = [1, 16], strides = [1, 1]} : vector<1x256xf32> to vector<1x16xf32>
    %587 = tpu.concatenate %585, %586 in 1 : vector<1x240xf32>, vector<1x16xf32> -> vector<1x256xf32>
    %c31 = arith.constant 31 : index
    %c0_232 = arith.constant 0 : index
    %588 = vector.load %arg9[%c31, %c0_232] : memref<49x256xf32, #tpu.memory_space<vmem>>, vector<1x256xf32>
    %589 = arith.mulf %587, %588 : vector<1x256xf32>
    %590 = arith.addf %584, %589 : vector<1x256xf32>
    %591 = vector.extract_strided_slice %217 {offsets = [0, 16], sizes = [1, 240], strides = [1, 1]} : vector<1x256xf32> to vector<1x240xf32>
    %592 = vector.extract_strided_slice %217 {offsets = [0, 0], sizes = [1, 16], strides = [1, 1]} : vector<1x256xf32> to vector<1x16xf32>
    %593 = tpu.concatenate %591, %592 in 1 : vector<1x240xf32>, vector<1x16xf32> -> vector<1x256xf32>
    %c31_233 = arith.constant 31 : index
    %c0_234 = arith.constant 0 : index
    %594 = vector.load %arg10[%c31_233, %c0_234] : memref<49x256xf32, #tpu.memory_space<vmem>>, vector<1x256xf32>
    %595 = arith.mulf %593, %594 : vector<1x256xf32>
    %596 = arith.addf %590, %595 : vector<1x256xf32>
    %597 = vector.extract_strided_slice %215 {offsets = [0, 17], sizes = [1, 239], strides = [1, 1]} : vector<1x256xf32> to vector<1x239xf32>
    %598 = vector.extract_strided_slice %215 {offsets = [0, 0], sizes = [1, 17], strides = [1, 1]} : vector<1x256xf32> to vector<1x17xf32>
    %599 = tpu.concatenate %597, %598 in 1 : vector<1x239xf32>, vector<1x17xf32> -> vector<1x256xf32>
    %c32 = arith.constant 32 : index
    %c0_235 = arith.constant 0 : index
    %600 = vector.load %arg9[%c32, %c0_235] : memref<49x256xf32, #tpu.memory_space<vmem>>, vector<1x256xf32>
    %601 = arith.mulf %599, %600 : vector<1x256xf32>
    %602 = arith.addf %596, %601 : vector<1x256xf32>
    %603 = vector.extract_strided_slice %217 {offsets = [0, 17], sizes = [1, 239], strides = [1, 1]} : vector<1x256xf32> to vector<1x239xf32>
    %604 = vector.extract_strided_slice %217 {offsets = [0, 0], sizes = [1, 17], strides = [1, 1]} : vector<1x256xf32> to vector<1x17xf32>
    %605 = tpu.concatenate %603, %604 in 1 : vector<1x239xf32>, vector<1x17xf32> -> vector<1x256xf32>
    %c32_236 = arith.constant 32 : index
    %c0_237 = arith.constant 0 : index
    %606 = vector.load %arg10[%c32_236, %c0_237] : memref<49x256xf32, #tpu.memory_space<vmem>>, vector<1x256xf32>
    %607 = arith.mulf %605, %606 : vector<1x256xf32>
    %608 = arith.addf %602, %607 : vector<1x256xf32>
    %609 = vector.extract_strided_slice %215 {offsets = [0, 18], sizes = [1, 238], strides = [1, 1]} : vector<1x256xf32> to vector<1x238xf32>
    %610 = vector.extract_strided_slice %215 {offsets = [0, 0], sizes = [1, 18], strides = [1, 1]} : vector<1x256xf32> to vector<1x18xf32>
    %611 = tpu.concatenate %609, %610 in 1 : vector<1x238xf32>, vector<1x18xf32> -> vector<1x256xf32>
    %c33 = arith.constant 33 : index
    %c0_238 = arith.constant 0 : index
    %612 = vector.load %arg9[%c33, %c0_238] : memref<49x256xf32, #tpu.memory_space<vmem>>, vector<1x256xf32>
    %613 = arith.mulf %611, %612 : vector<1x256xf32>
    %614 = arith.addf %608, %613 : vector<1x256xf32>
    %615 = vector.extract_strided_slice %217 {offsets = [0, 18], sizes = [1, 238], strides = [1, 1]} : vector<1x256xf32> to vector<1x238xf32>
    %616 = vector.extract_strided_slice %217 {offsets = [0, 0], sizes = [1, 18], strides = [1, 1]} : vector<1x256xf32> to vector<1x18xf32>
    %617 = tpu.concatenate %615, %616 in 1 : vector<1x238xf32>, vector<1x18xf32> -> vector<1x256xf32>
    %c33_239 = arith.constant 33 : index
    %c0_240 = arith.constant 0 : index
    %618 = vector.load %arg10[%c33_239, %c0_240] : memref<49x256xf32, #tpu.memory_space<vmem>>, vector<1x256xf32>
    %619 = arith.mulf %617, %618 : vector<1x256xf32>
    %620 = arith.addf %614, %619 : vector<1x256xf32>
    %621 = vector.extract_strided_slice %215 {offsets = [0, 19], sizes = [1, 237], strides = [1, 1]} : vector<1x256xf32> to vector<1x237xf32>
    %622 = vector.extract_strided_slice %215 {offsets = [0, 0], sizes = [1, 19], strides = [1, 1]} : vector<1x256xf32> to vector<1x19xf32>
    %623 = tpu.concatenate %621, %622 in 1 : vector<1x237xf32>, vector<1x19xf32> -> vector<1x256xf32>
    %c34 = arith.constant 34 : index
    %c0_241 = arith.constant 0 : index
    %624 = vector.load %arg9[%c34, %c0_241] : memref<49x256xf32, #tpu.memory_space<vmem>>, vector<1x256xf32>
    %625 = arith.mulf %623, %624 : vector<1x256xf32>
    %626 = arith.addf %620, %625 : vector<1x256xf32>
    %627 = vector.extract_strided_slice %217 {offsets = [0, 19], sizes = [1, 237], strides = [1, 1]} : vector<1x256xf32> to vector<1x237xf32>
    %628 = vector.extract_strided_slice %217 {offsets = [0, 0], sizes = [1, 19], strides = [1, 1]} : vector<1x256xf32> to vector<1x19xf32>
    %629 = tpu.concatenate %627, %628 in 1 : vector<1x237xf32>, vector<1x19xf32> -> vector<1x256xf32>
    %c34_242 = arith.constant 34 : index
    %c0_243 = arith.constant 0 : index
    %630 = vector.load %arg10[%c34_242, %c0_243] : memref<49x256xf32, #tpu.memory_space<vmem>>, vector<1x256xf32>
    %631 = arith.mulf %629, %630 : vector<1x256xf32>
    %632 = arith.addf %626, %631 : vector<1x256xf32>
    %633 = vector.extract_strided_slice %215 {offsets = [0, 29], sizes = [1, 227], strides = [1, 1]} : vector<1x256xf32> to vector<1x227xf32>
    %634 = vector.extract_strided_slice %215 {offsets = [0, 0], sizes = [1, 29], strides = [1, 1]} : vector<1x256xf32> to vector<1x29xf32>
    %635 = tpu.concatenate %633, %634 in 1 : vector<1x227xf32>, vector<1x29xf32> -> vector<1x256xf32>
    %c35 = arith.constant 35 : index
    %c0_244 = arith.constant 0 : index
    %636 = vector.load %arg9[%c35, %c0_244] : memref<49x256xf32, #tpu.memory_space<vmem>>, vector<1x256xf32>
    %637 = arith.mulf %635, %636 : vector<1x256xf32>
    %638 = arith.addf %632, %637 : vector<1x256xf32>
    %639 = vector.extract_strided_slice %217 {offsets = [0, 29], sizes = [1, 227], strides = [1, 1]} : vector<1x256xf32> to vector<1x227xf32>
    %640 = vector.extract_strided_slice %217 {offsets = [0, 0], sizes = [1, 29], strides = [1, 1]} : vector<1x256xf32> to vector<1x29xf32>
    %641 = tpu.concatenate %639, %640 in 1 : vector<1x227xf32>, vector<1x29xf32> -> vector<1x256xf32>
    %c35_245 = arith.constant 35 : index
    %c0_246 = arith.constant 0 : index
    %642 = vector.load %arg10[%c35_245, %c0_246] : memref<49x256xf32, #tpu.memory_space<vmem>>, vector<1x256xf32>
    %643 = arith.mulf %641, %642 : vector<1x256xf32>
    %644 = arith.addf %638, %643 : vector<1x256xf32>
    %645 = vector.extract_strided_slice %215 {offsets = [0, 30], sizes = [1, 226], strides = [1, 1]} : vector<1x256xf32> to vector<1x226xf32>
    %646 = vector.extract_strided_slice %215 {offsets = [0, 0], sizes = [1, 30], strides = [1, 1]} : vector<1x256xf32> to vector<1x30xf32>
    %647 = tpu.concatenate %645, %646 in 1 : vector<1x226xf32>, vector<1x30xf32> -> vector<1x256xf32>
    %c36 = arith.constant 36 : index
    %c0_247 = arith.constant 0 : index
    %648 = vector.load %arg9[%c36, %c0_247] : memref<49x256xf32, #tpu.memory_space<vmem>>, vector<1x256xf32>
    %649 = arith.mulf %647, %648 : vector<1x256xf32>
    %650 = arith.addf %644, %649 : vector<1x256xf32>
    %651 = vector.extract_strided_slice %217 {offsets = [0, 30], sizes = [1, 226], strides = [1, 1]} : vector<1x256xf32> to vector<1x226xf32>
    %652 = vector.extract_strided_slice %217 {offsets = [0, 0], sizes = [1, 30], strides = [1, 1]} : vector<1x256xf32> to vector<1x30xf32>
    %653 = tpu.concatenate %651, %652 in 1 : vector<1x226xf32>, vector<1x30xf32> -> vector<1x256xf32>
    %c36_248 = arith.constant 36 : index
    %c0_249 = arith.constant 0 : index
    %654 = vector.load %arg10[%c36_248, %c0_249] : memref<49x256xf32, #tpu.memory_space<vmem>>, vector<1x256xf32>
    %655 = arith.mulf %653, %654 : vector<1x256xf32>
    %656 = arith.addf %650, %655 : vector<1x256xf32>
    %657 = vector.extract_strided_slice %215 {offsets = [0, 31], sizes = [1, 225], strides = [1, 1]} : vector<1x256xf32> to vector<1x225xf32>
    %658 = vector.extract_strided_slice %215 {offsets = [0, 0], sizes = [1, 31], strides = [1, 1]} : vector<1x256xf32> to vector<1x31xf32>
    %659 = tpu.concatenate %657, %658 in 1 : vector<1x225xf32>, vector<1x31xf32> -> vector<1x256xf32>
    %c37 = arith.constant 37 : index
    %c0_250 = arith.constant 0 : index
    %660 = vector.load %arg9[%c37, %c0_250] : memref<49x256xf32, #tpu.memory_space<vmem>>, vector<1x256xf32>
    %661 = arith.mulf %659, %660 : vector<1x256xf32>
    %662 = arith.addf %656, %661 : vector<1x256xf32>
    %663 = vector.extract_strided_slice %217 {offsets = [0, 31], sizes = [1, 225], strides = [1, 1]} : vector<1x256xf32> to vector<1x225xf32>
    %664 = vector.extract_strided_slice %217 {offsets = [0, 0], sizes = [1, 31], strides = [1, 1]} : vector<1x256xf32> to vector<1x31xf32>
    %665 = tpu.concatenate %663, %664 in 1 : vector<1x225xf32>, vector<1x31xf32> -> vector<1x256xf32>
    %c37_251 = arith.constant 37 : index
    %c0_252 = arith.constant 0 : index
    %666 = vector.load %arg10[%c37_251, %c0_252] : memref<49x256xf32, #tpu.memory_space<vmem>>, vector<1x256xf32>
    %667 = arith.mulf %665, %666 : vector<1x256xf32>
    %668 = arith.addf %662, %667 : vector<1x256xf32>
    %669 = vector.extract_strided_slice %215 {offsets = [0, 32], sizes = [1, 224], strides = [1, 1]} : vector<1x256xf32> to vector<1x224xf32>
    %670 = vector.extract_strided_slice %215 {offsets = [0, 0], sizes = [1, 32], strides = [1, 1]} : vector<1x256xf32> to vector<1x32xf32>
    %671 = tpu.concatenate %669, %670 in 1 : vector<1x224xf32>, vector<1x32xf32> -> vector<1x256xf32>
    %c38 = arith.constant 38 : index
    %c0_253 = arith.constant 0 : index
    %672 = vector.load %arg9[%c38, %c0_253] : memref<49x256xf32, #tpu.memory_space<vmem>>, vector<1x256xf32>
    %673 = arith.mulf %671, %672 : vector<1x256xf32>
    %674 = arith.addf %668, %673 : vector<1x256xf32>
    %675 = vector.extract_strided_slice %217 {offsets = [0, 32], sizes = [1, 224], strides = [1, 1]} : vector<1x256xf32> to vector<1x224xf32>
    %676 = vector.extract_strided_slice %217 {offsets = [0, 0], sizes = [1, 32], strides = [1, 1]} : vector<1x256xf32> to vector<1x32xf32>
    %677 = tpu.concatenate %675, %676 in 1 : vector<1x224xf32>, vector<1x32xf32> -> vector<1x256xf32>
    %c38_254 = arith.constant 38 : index
    %c0_255 = arith.constant 0 : index
    %678 = vector.load %arg10[%c38_254, %c0_255] : memref<49x256xf32, #tpu.memory_space<vmem>>, vector<1x256xf32>
    %679 = arith.mulf %677, %678 : vector<1x256xf32>
    %680 = arith.addf %674, %679 : vector<1x256xf32>
    %681 = vector.extract_strided_slice %215 {offsets = [0, 33], sizes = [1, 223], strides = [1, 1]} : vector<1x256xf32> to vector<1x223xf32>
    %682 = vector.extract_strided_slice %215 {offsets = [0, 0], sizes = [1, 33], strides = [1, 1]} : vector<1x256xf32> to vector<1x33xf32>
    %683 = tpu.concatenate %681, %682 in 1 : vector<1x223xf32>, vector<1x33xf32> -> vector<1x256xf32>
    %c39 = arith.constant 39 : index
    %c0_256 = arith.constant 0 : index
    %684 = vector.load %arg9[%c39, %c0_256] : memref<49x256xf32, #tpu.memory_space<vmem>>, vector<1x256xf32>
    %685 = arith.mulf %683, %684 : vector<1x256xf32>
    %686 = arith.addf %680, %685 : vector<1x256xf32>
    %687 = vector.extract_strided_slice %217 {offsets = [0, 33], sizes = [1, 223], strides = [1, 1]} : vector<1x256xf32> to vector<1x223xf32>
    %688 = vector.extract_strided_slice %217 {offsets = [0, 0], sizes = [1, 33], strides = [1, 1]} : vector<1x256xf32> to vector<1x33xf32>
    %689 = tpu.concatenate %687, %688 in 1 : vector<1x223xf32>, vector<1x33xf32> -> vector<1x256xf32>
    %c39_257 = arith.constant 39 : index
    %c0_258 = arith.constant 0 : index
    %690 = vector.load %arg10[%c39_257, %c0_258] : memref<49x256xf32, #tpu.memory_space<vmem>>, vector<1x256xf32>
    %691 = arith.mulf %689, %690 : vector<1x256xf32>
    %692 = arith.addf %686, %691 : vector<1x256xf32>
    %693 = vector.extract_strided_slice %215 {offsets = [0, 34], sizes = [1, 222], strides = [1, 1]} : vector<1x256xf32> to vector<1x222xf32>
    %694 = vector.extract_strided_slice %215 {offsets = [0, 0], sizes = [1, 34], strides = [1, 1]} : vector<1x256xf32> to vector<1x34xf32>
    %695 = tpu.concatenate %693, %694 in 1 : vector<1x222xf32>, vector<1x34xf32> -> vector<1x256xf32>
    %c40 = arith.constant 40 : index
    %c0_259 = arith.constant 0 : index
    %696 = vector.load %arg9[%c40, %c0_259] : memref<49x256xf32, #tpu.memory_space<vmem>>, vector<1x256xf32>
    %697 = arith.mulf %695, %696 : vector<1x256xf32>
    %698 = arith.addf %692, %697 : vector<1x256xf32>
    %699 = vector.extract_strided_slice %217 {offsets = [0, 34], sizes = [1, 222], strides = [1, 1]} : vector<1x256xf32> to vector<1x222xf32>
    %700 = vector.extract_strided_slice %217 {offsets = [0, 0], sizes = [1, 34], strides = [1, 1]} : vector<1x256xf32> to vector<1x34xf32>
    %701 = tpu.concatenate %699, %700 in 1 : vector<1x222xf32>, vector<1x34xf32> -> vector<1x256xf32>
    %c40_260 = arith.constant 40 : index
    %c0_261 = arith.constant 0 : index
    %702 = vector.load %arg10[%c40_260, %c0_261] : memref<49x256xf32, #tpu.memory_space<vmem>>, vector<1x256xf32>
    %703 = arith.mulf %701, %702 : vector<1x256xf32>
    %704 = arith.addf %698, %703 : vector<1x256xf32>
    %705 = vector.extract_strided_slice %215 {offsets = [0, 35], sizes = [1, 221], strides = [1, 1]} : vector<1x256xf32> to vector<1x221xf32>
    %706 = vector.extract_strided_slice %215 {offsets = [0, 0], sizes = [1, 35], strides = [1, 1]} : vector<1x256xf32> to vector<1x35xf32>
    %707 = tpu.concatenate %705, %706 in 1 : vector<1x221xf32>, vector<1x35xf32> -> vector<1x256xf32>
    %c41 = arith.constant 41 : index
    %c0_262 = arith.constant 0 : index
    %708 = vector.load %arg9[%c41, %c0_262] : memref<49x256xf32, #tpu.memory_space<vmem>>, vector<1x256xf32>
    %709 = arith.mulf %707, %708 : vector<1x256xf32>
    %710 = arith.addf %704, %709 : vector<1x256xf32>
    %711 = vector.extract_strided_slice %217 {offsets = [0, 35], sizes = [1, 221], strides = [1, 1]} : vector<1x256xf32> to vector<1x221xf32>
    %712 = vector.extract_strided_slice %217 {offsets = [0, 0], sizes = [1, 35], strides = [1, 1]} : vector<1x256xf32> to vector<1x35xf32>
    %713 = tpu.concatenate %711, %712 in 1 : vector<1x221xf32>, vector<1x35xf32> -> vector<1x256xf32>
    %c41_263 = arith.constant 41 : index
    %c0_264 = arith.constant 0 : index
    %714 = vector.load %arg10[%c41_263, %c0_264] : memref<49x256xf32, #tpu.memory_space<vmem>>, vector<1x256xf32>
    %715 = arith.mulf %713, %714 : vector<1x256xf32>
    %716 = arith.addf %710, %715 : vector<1x256xf32>
    %717 = vector.extract_strided_slice %215 {offsets = [0, 45], sizes = [1, 211], strides = [1, 1]} : vector<1x256xf32> to vector<1x211xf32>
    %718 = vector.extract_strided_slice %215 {offsets = [0, 0], sizes = [1, 45], strides = [1, 1]} : vector<1x256xf32> to vector<1x45xf32>
    %719 = tpu.concatenate %717, %718 in 1 : vector<1x211xf32>, vector<1x45xf32> -> vector<1x256xf32>
    %c42 = arith.constant 42 : index
    %c0_265 = arith.constant 0 : index
    %720 = vector.load %arg9[%c42, %c0_265] : memref<49x256xf32, #tpu.memory_space<vmem>>, vector<1x256xf32>
    %721 = arith.mulf %719, %720 : vector<1x256xf32>
    %722 = arith.addf %716, %721 : vector<1x256xf32>
    %723 = vector.extract_strided_slice %217 {offsets = [0, 45], sizes = [1, 211], strides = [1, 1]} : vector<1x256xf32> to vector<1x211xf32>
    %724 = vector.extract_strided_slice %217 {offsets = [0, 0], sizes = [1, 45], strides = [1, 1]} : vector<1x256xf32> to vector<1x45xf32>
    %725 = tpu.concatenate %723, %724 in 1 : vector<1x211xf32>, vector<1x45xf32> -> vector<1x256xf32>
    %c42_266 = arith.constant 42 : index
    %c0_267 = arith.constant 0 : index
    %726 = vector.load %arg10[%c42_266, %c0_267] : memref<49x256xf32, #tpu.memory_space<vmem>>, vector<1x256xf32>
    %727 = arith.mulf %725, %726 : vector<1x256xf32>
    %728 = arith.addf %722, %727 : vector<1x256xf32>
    %729 = vector.extract_strided_slice %215 {offsets = [0, 46], sizes = [1, 210], strides = [1, 1]} : vector<1x256xf32> to vector<1x210xf32>
    %730 = vector.extract_strided_slice %215 {offsets = [0, 0], sizes = [1, 46], strides = [1, 1]} : vector<1x256xf32> to vector<1x46xf32>
    %731 = tpu.concatenate %729, %730 in 1 : vector<1x210xf32>, vector<1x46xf32> -> vector<1x256xf32>
    %c43 = arith.constant 43 : index
    %c0_268 = arith.constant 0 : index
    %732 = vector.load %arg9[%c43, %c0_268] : memref<49x256xf32, #tpu.memory_space<vmem>>, vector<1x256xf32>
    %733 = arith.mulf %731, %732 : vector<1x256xf32>
    %734 = arith.addf %728, %733 : vector<1x256xf32>
    %735 = vector.extract_strided_slice %217 {offsets = [0, 46], sizes = [1, 210], strides = [1, 1]} : vector<1x256xf32> to vector<1x210xf32>
    %736 = vector.extract_strided_slice %217 {offsets = [0, 0], sizes = [1, 46], strides = [1, 1]} : vector<1x256xf32> to vector<1x46xf32>
    %737 = tpu.concatenate %735, %736 in 1 : vector<1x210xf32>, vector<1x46xf32> -> vector<1x256xf32>
    %c43_269 = arith.constant 43 : index
    %c0_270 = arith.constant 0 : index
    %738 = vector.load %arg10[%c43_269, %c0_270] : memref<49x256xf32, #tpu.memory_space<vmem>>, vector<1x256xf32>
    %739 = arith.mulf %737, %738 : vector<1x256xf32>
    %740 = arith.addf %734, %739 : vector<1x256xf32>
    %741 = vector.extract_strided_slice %215 {offsets = [0, 47], sizes = [1, 209], strides = [1, 1]} : vector<1x256xf32> to vector<1x209xf32>
    %742 = vector.extract_strided_slice %215 {offsets = [0, 0], sizes = [1, 47], strides = [1, 1]} : vector<1x256xf32> to vector<1x47xf32>
    %743 = tpu.concatenate %741, %742 in 1 : vector<1x209xf32>, vector<1x47xf32> -> vector<1x256xf32>
    %c44 = arith.constant 44 : index
    %c0_271 = arith.constant 0 : index
    %744 = vector.load %arg9[%c44, %c0_271] : memref<49x256xf32, #tpu.memory_space<vmem>>, vector<1x256xf32>
    %745 = arith.mulf %743, %744 : vector<1x256xf32>
    %746 = arith.addf %740, %745 : vector<1x256xf32>
    %747 = vector.extract_strided_slice %217 {offsets = [0, 47], sizes = [1, 209], strides = [1, 1]} : vector<1x256xf32> to vector<1x209xf32>
    %748 = vector.extract_strided_slice %217 {offsets = [0, 0], sizes = [1, 47], strides = [1, 1]} : vector<1x256xf32> to vector<1x47xf32>
    %749 = tpu.concatenate %747, %748 in 1 : vector<1x209xf32>, vector<1x47xf32> -> vector<1x256xf32>
    %c44_272 = arith.constant 44 : index
    %c0_273 = arith.constant 0 : index
    %750 = vector.load %arg10[%c44_272, %c0_273] : memref<49x256xf32, #tpu.memory_space<vmem>>, vector<1x256xf32>
    %751 = arith.mulf %749, %750 : vector<1x256xf32>
    %752 = arith.addf %746, %751 : vector<1x256xf32>
    %753 = vector.extract_strided_slice %215 {offsets = [0, 48], sizes = [1, 208], strides = [1, 1]} : vector<1x256xf32> to vector<1x208xf32>
    %754 = vector.extract_strided_slice %215 {offsets = [0, 0], sizes = [1, 48], strides = [1, 1]} : vector<1x256xf32> to vector<1x48xf32>
    %755 = tpu.concatenate %753, %754 in 1 : vector<1x208xf32>, vector<1x48xf32> -> vector<1x256xf32>
    %c45 = arith.constant 45 : index
    %c0_274 = arith.constant 0 : index
    %756 = vector.load %arg9[%c45, %c0_274] : memref<49x256xf32, #tpu.memory_space<vmem>>, vector<1x256xf32>
    %757 = arith.mulf %755, %756 : vector<1x256xf32>
    %758 = arith.addf %752, %757 : vector<1x256xf32>
    %759 = vector.extract_strided_slice %217 {offsets = [0, 48], sizes = [1, 208], strides = [1, 1]} : vector<1x256xf32> to vector<1x208xf32>
    %760 = vector.extract_strided_slice %217 {offsets = [0, 0], sizes = [1, 48], strides = [1, 1]} : vector<1x256xf32> to vector<1x48xf32>
    %761 = tpu.concatenate %759, %760 in 1 : vector<1x208xf32>, vector<1x48xf32> -> vector<1x256xf32>
    %c45_275 = arith.constant 45 : index
    %c0_276 = arith.constant 0 : index
    %762 = vector.load %arg10[%c45_275, %c0_276] : memref<49x256xf32, #tpu.memory_space<vmem>>, vector<1x256xf32>
    %763 = arith.mulf %761, %762 : vector<1x256xf32>
    %764 = arith.addf %758, %763 : vector<1x256xf32>
    %765 = vector.extract_strided_slice %215 {offsets = [0, 49], sizes = [1, 207], strides = [1, 1]} : vector<1x256xf32> to vector<1x207xf32>
    %766 = vector.extract_strided_slice %215 {offsets = [0, 0], sizes = [1, 49], strides = [1, 1]} : vector<1x256xf32> to vector<1x49xf32>
    %767 = tpu.concatenate %765, %766 in 1 : vector<1x207xf32>, vector<1x49xf32> -> vector<1x256xf32>
    %c46 = arith.constant 46 : index
    %c0_277 = arith.constant 0 : index
    %768 = vector.load %arg9[%c46, %c0_277] : memref<49x256xf32, #tpu.memory_space<vmem>>, vector<1x256xf32>
    %769 = arith.mulf %767, %768 : vector<1x256xf32>
    %770 = arith.addf %764, %769 : vector<1x256xf32>
    %771 = vector.extract_strided_slice %217 {offsets = [0, 49], sizes = [1, 207], strides = [1, 1]} : vector<1x256xf32> to vector<1x207xf32>
    %772 = vector.extract_strided_slice %217 {offsets = [0, 0], sizes = [1, 49], strides = [1, 1]} : vector<1x256xf32> to vector<1x49xf32>
    %773 = tpu.concatenate %771, %772 in 1 : vector<1x207xf32>, vector<1x49xf32> -> vector<1x256xf32>
    %c46_278 = arith.constant 46 : index
    %c0_279 = arith.constant 0 : index
    %774 = vector.load %arg10[%c46_278, %c0_279] : memref<49x256xf32, #tpu.memory_space<vmem>>, vector<1x256xf32>
    %775 = arith.mulf %773, %774 : vector<1x256xf32>
    %776 = arith.addf %770, %775 : vector<1x256xf32>
    %777 = vector.extract_strided_slice %215 {offsets = [0, 50], sizes = [1, 206], strides = [1, 1]} : vector<1x256xf32> to vector<1x206xf32>
    %778 = vector.extract_strided_slice %215 {offsets = [0, 0], sizes = [1, 50], strides = [1, 1]} : vector<1x256xf32> to vector<1x50xf32>
    %779 = tpu.concatenate %777, %778 in 1 : vector<1x206xf32>, vector<1x50xf32> -> vector<1x256xf32>
    %c47 = arith.constant 47 : index
    %c0_280 = arith.constant 0 : index
    %780 = vector.load %arg9[%c47, %c0_280] : memref<49x256xf32, #tpu.memory_space<vmem>>, vector<1x256xf32>
    %781 = arith.mulf %779, %780 : vector<1x256xf32>
    %782 = arith.addf %776, %781 : vector<1x256xf32>
    %783 = vector.extract_strided_slice %217 {offsets = [0, 50], sizes = [1, 206], strides = [1, 1]} : vector<1x256xf32> to vector<1x206xf32>
    %784 = vector.extract_strided_slice %217 {offsets = [0, 0], sizes = [1, 50], strides = [1, 1]} : vector<1x256xf32> to vector<1x50xf32>
    %785 = tpu.concatenate %783, %784 in 1 : vector<1x206xf32>, vector<1x50xf32> -> vector<1x256xf32>
    %c47_281 = arith.constant 47 : index
    %c0_282 = arith.constant 0 : index
    %786 = vector.load %arg10[%c47_281, %c0_282] : memref<49x256xf32, #tpu.memory_space<vmem>>, vector<1x256xf32>
    %787 = arith.mulf %785, %786 : vector<1x256xf32>
    %788 = arith.addf %782, %787 : vector<1x256xf32>
    %789 = vector.extract_strided_slice %215 {offsets = [0, 51], sizes = [1, 205], strides = [1, 1]} : vector<1x256xf32> to vector<1x205xf32>
    %790 = vector.extract_strided_slice %215 {offsets = [0, 0], sizes = [1, 51], strides = [1, 1]} : vector<1x256xf32> to vector<1x51xf32>
    %791 = tpu.concatenate %789, %790 in 1 : vector<1x205xf32>, vector<1x51xf32> -> vector<1x256xf32>
    %c48 = arith.constant 48 : index
    %c0_283 = arith.constant 0 : index
    %792 = vector.load %arg9[%c48, %c0_283] : memref<49x256xf32, #tpu.memory_space<vmem>>, vector<1x256xf32>
    %793 = arith.mulf %791, %792 : vector<1x256xf32>
    %794 = arith.addf %788, %793 : vector<1x256xf32>
    %795 = vector.extract_strided_slice %217 {offsets = [0, 51], sizes = [1, 205], strides = [1, 1]} : vector<1x256xf32> to vector<1x205xf32>
    %796 = vector.extract_strided_slice %217 {offsets = [0, 0], sizes = [1, 51], strides = [1, 1]} : vector<1x256xf32> to vector<1x51xf32>
    %797 = tpu.concatenate %795, %796 in 1 : vector<1x205xf32>, vector<1x51xf32> -> vector<1x256xf32>
    %c48_284 = arith.constant 48 : index
    %c0_285 = arith.constant 0 : index
    %798 = vector.load %arg10[%c48_284, %c0_285] : memref<49x256xf32, #tpu.memory_space<vmem>>, vector<1x256xf32>
    %799 = arith.mulf %797, %798 : vector<1x256xf32>
    %800 = arith.addf %794, %799 : vector<1x256xf32>
    %801 = arith.negf %800 : vector<1x256xf32>
    %802 = math.exp %801 : vector<1x256xf32>
    %cst_286 = arith.constant 1.000000e+00 : f32
    %803 = vector.broadcast %cst_286 : f32 to vector<1x256xf32>
    %804 = arith.addf %803, %802 : vector<1x256xf32>
    %805 = arith.divf %803, %804 : vector<1x256xf32>
    %806 = vector.broadcast %805 : vector<1x256xf32> to vector<32x256xf32>
    %807 = arith.mulf %211, %806 : vector<32x256xf32>
    %808 = arith.addf %807, %1 : vector<32x256xf32>
    %cst_287 = arith.constant 0.000000e+00 : f32
    %809 = vector.broadcast %cst_287 : f32 to vector<32x256xf32>
    %810 = arith.maximumf %808, %809 : vector<32x256xf32>
    %c0_288 = arith.constant 0 : index
    %c0_289 = arith.constant 0 : index
    %c0_290 = arith.constant 0 : index
    %811 = vector.load %arg11[%c0_288, %c0_289, %c0_290] : memref<1x32x256xf32, #tpu.memory_space<vmem>>, vector<1x32x256xf32>
    %812 = vector.shape_cast %811 : vector<1x32x256xf32> to vector<32x256xf32>
    %813 = vector.shape_cast %810 : vector<32x256xf32> to vector<1x32x256xf32>
    tpu.vector_store %arg11[%c0_288, %c0_289, %c0_290], %813 {strides = array<i32>} : memref<1x32x256xf32, #tpu.memory_space<vmem>>, vector<1x32x256xf32>,
    return
  }
  func.func @transform_0(%arg0: i32) -> (i32, i32, i32) {
    %c0_i32 = arith.constant 0 : i32
    %c0_i32_0 = arith.constant 0 : i32
    %c0_i32_1 = arith.constant 0 : i32
    return %arg0, %c0_i32, %c0_i32_0 : i32, i32, i32
  }
  func.func @transform_1(%arg0: i32) -> (i32, i32, i32) {
    %c0_i32 = arith.constant 0 : i32
    %c0_i32_0 = arith.constant 0 : i32
    %c0_i32_1 = arith.constant 0 : i32
    %c0_i32_2 = arith.constant 0 : i32
    return %c0_i32, %c0_i32_0, %c0_i32_1 : i32, i32, i32
  }
  func.func @transform_2(%arg0: i32) -> (i32, i32) {
    %c0_i32 = arith.constant 0 : i32
    %c0_i32_0 = arith.constant 0 : i32
    %c0_i32_1 = arith.constant 0 : i32
    return %c0_i32, %c0_i32_0 : i32, i32
  }
  func.func @transform_3(%arg0: i32) -> (i32, i32, i32) {
    %c0_i32 = arith.constant 0 : i32
    %c0_i32_0 = arith.constant 0 : i32
    %c0_i32_1 = arith.constant 0 : i32
    %c0_i32_2 = arith.constant 0 : i32
    return %c0_i32, %c0_i32_0, %c0_i32_1 : i32, i32, i32
  }
  func.func @transform_4(%arg0: i32) -> (i32, i32) {
    %c0_i32 = arith.constant 0 : i32
    %c0_i32_0 = arith.constant 0 : i32
    %c0_i32_1 = arith.constant 0 : i32
    return %c0_i32, %c0_i32_0 : i32, i32
  }
  func.func @transform_5(%arg0: i32) -> (i32, i32) {
    %c0_i32 = arith.constant 0 : i32
    %c0_i32_0 = arith.constant 0 : i32
    %c0_i32_1 = arith.constant 0 : i32
    return %c0_i32, %c0_i32_0 : i32, i32
  }
  func.func @transform_6(%arg0: i32) -> (i32, i32) {
    %c0_i32 = arith.constant 0 : i32
    %c0_i32_0 = arith.constant 0 : i32
    %c0_i32_1 = arith.constant 0 : i32
    return %c0_i32, %c0_i32_0 : i32, i32
  }
  func.func @transform_7(%arg0: i32) -> (i32, i32) {
    %c0_i32 = arith.constant 0 : i32
    %c0_i32_0 = arith.constant 0 : i32
    %c0_i32_1 = arith.constant 0 : i32
    return %c0_i32, %c0_i32_0 : i32, i32
  }
  func.func @transform_8(%arg0: i32) -> (i32, i32) {
    %c0_i32 = arith.constant 0 : i32
    %c0_i32_0 = arith.constant 0 : i32
    %c0_i32_1 = arith.constant 0 : i32
    return %c0_i32, %c0_i32_0 : i32, i32
  }
  func.func @transform_9(%arg0: i32) -> (i32, i32) {
    %c0_i32 = arith.constant 0 : i32
    %c0_i32_0 = arith.constant 0 : i32
    %c0_i32_1 = arith.constant 0 : i32
    return %c0_i32, %c0_i32_0 : i32, i32
  }
  func.func @transform_10(%arg0: i32) -> (i32, i32, i32) {
    %c0_i32 = arith.constant 0 : i32
    %c0_i32_0 = arith.constant 0 : i32
    %c0_i32_1 = arith.constant 0 : i32
    return %arg0, %c0_i32, %c0_i32_0 : i32, i32, i32
  }
}

</mosaic_0001>

<bundles_post_ra>
// kernel: tpu_custom_call.1
= control target key start
LH: loop header
LB: loop body
LE: loop exit
PB: predicated region body
PF: predicated region fallthrough
CT: control target
= control target key end

     0   :  { %s8134_s0 = inlined_call_operand.hbm [shape: f32[2,32,256], index: 0, kind: input, shape index: {}]   ;;  %s8135_s1 = inlined_call_operand.hbm [shape: f32[9,32,32], index: 1, kind: input, shape index: {}]   ;;  %s8136_s2 = inlined_call_operand.vmem [shape: f32[32,1], index: 2, kind: input, shape index: {}]   ;;  %s8137_s3 = inlined_call_operand.hbm [shape: f32[9,32,32], index: 3, kind: input, shape index: {}]   ;;  %s8138_s4 = inlined_call_operand.vmem [shape: f32[32,1], index: 4, kind: input, shape index: {}]   ;;  %s8139_s5 = inlined_call_operand.vmem [shape: f32[2,32], index: 5, kind: input, shape index: {}]   ;;  %s8140_s6 = inlined_call_operand.vmem [shape: f32[32,2], index: 6, kind: input, shape index: {}]   ;;  %s8141_s7 = inlined_call_operand.vmem [shape: f32[9,256], index: 7, kind: input, shape index: {}]   ;;  %s8142_s8 = inlined_call_operand.hbm [shape: f32[49,256], index: 8, kind: input, shape index: {}]   ;;  %s8143_s9 = inlined_call_operand.hbm [shape: f32[49,256], index: 9, kind: input, shape index: {}]   ;;  %s8144_s10 = inlined_call_operand.hbm [shape: f32[2,32,256], index: 10, kind: output, shape index: {}]  }
   0x1   :  { %8190 = sst [smem:[#allocation40_spill]] %s8135_s1 }
   0x2   :  { %8191 = sst [smem:[#allocation41_spill]] %s8137_s3 }
   0x3   :  { %8192 = sst [smem:[#allocation42_spill]] %s8142_s8 }
   0x4   :  { %15 = vsyncpa [#allocation3], 0 }
   0x5   :  { %17 = vsyncpa [#allocation3 + $0x1], 0 }
   0x6   :  { %18 = vsyncpa [#allocation6], 0 }
   0x7   :  { %19 = vsyncpa [#allocation9], 0 }
   0x8   :  { %20 = vsyncpa [#allocation4], 0 }
   0x9   :  { %22 = vsyncpa [#allocation4 + $0x1], 0  ;;  %s6011_s13 = smov 0   ;;  %s6013_s14 = smov 0  }
   0xa   :  { %s6015_s15 = smov 0   ;;  %s6017_s16 = smov 0  }
   0xb LB: > { %s6032_s17 = sadd.s32 4294967295, %s5894_s16   ;;  %s5286_s18 = sadd.s32 4294967294, %s5894_s16   ;;  %s5894_s16 = sphi %s6017_s16, %s8266_s16   ;;  %s5890_s15 = sphi %s6015_s15, %s8265_s15   ;;  %s5886_s14 = sphi %s6013_s14, %s8264_s14   ;;  %s5882_s13 = sphi %s6011_s13, %s8263_s13  }
   0xc   : > { %p48_p0 = scmp.ne.s32.totalorder %s5886_s14, %s5882_s13  ;;  %p49_p1 = scmp.eq.s32.totalorder %s6032_s17, 0 }
   0xd   : > { %p261_p2 = scmp.eq.s32.totalorder %s6032_s17, 1  ;;  %p267_p3 = scmp.eq.s32.totalorder %s5286_s18, 1 }
   0xe   : > { %p6041_p4 = por %p49_p1, %p48_p0  ;;  %p5287_p5 = scmp.ge.s32.totalorder %s5894_s16, 1 }
   0xf   : > { %p6046_p6 = por %p267_p3, %p48_p0  ;;  %p274_p7 = scmp.lt.s32.totalorder %s5894_s16, 3 }
  0x10   : > { %s8196_s1 = sld [smem:[#allocation40_spill]]  ;;  %s5896_s25 = smov [#allocation5]  }
  0x11   : > { %s8194_s20 = scalar_select %p6046_p6, 1, 0 }
  0x12   : > { %p6054_p8 = pnand %p5287_p5, %p274_p7  ;;  %s287_s26 = sshll.u32 %s5896_s25, 4  ;;  %s288_s26 = int_to_ptr.vmem [resolvable:$true] %s287_s26 }
  0x13   : > { %8195 = sst [smem:[#allocation16_spill]] %s8194_s20  ;;  %s5897_s11 = smov 128  }
  0x14   : > { %p5508_p9 = pneg %p6054_p8  ;;  %s8199_s8 = sld [smem:[#allocation42_spill]] }
  0x15   : > { %s5898_s12 = smov 8   ;;  %s5899_s18 = smov [#allocation8]  }
  0x16   : > { %s285_s23 = sshll.u32 %s8196_s1, 4  ;;  %p6062_p10 = pnand %p5508_p9, %p49_p1  ;;  %s286_s23 = int_to_ptr.hbm [resolvable:$true] %s285_s23 }
  0x17   : > { %s330_s21 = sshll.u32 %s5899_s18, 4  ;;  %s8146_s22 = smov 256   ;;  %s331_s21 = int_to_ptr.vmem [resolvable:$true] %s330_s21 }
  0x18   : > { %5511 = dma.hbm_to_vmem [thread:$0]  (!%p6062_p10), %s286_s23, 4608, %s288_s26, [#allocation6], %s5897_s11, %s5897_s11, %s5898_s12  }
  0x19   : > { %s8147_s25 = smov 16   ;;  %s8200_s3 = sld [smem:[#allocation41_spill]] }
  0x1a   : > { %s328_s30 = sshll.u32 %s8199_s8, 4  ;;  %s5902_s26 = smov [#allocation7]   ;;  %s329_s30 = int_to_ptr.hbm [resolvable:$true] %s328_s30 }
  0x1b   : > { %5517 = dma.hbm_to_vmem [thread:$0]  (!%p6062_p10), %s329_s30, 1792, %s331_s21, [#allocation9], %s8146_s22, %s8146_s22, %s8147_s25  }
  0x1c   : > { %s304_s18 = sshll.u32 %s5902_s26, 4  ;;  %s342_s20 = sshll.u32 %s8143_s9, 4  ;;  %s305_s18 = int_to_ptr.vmem [resolvable:$true] %s304_s18  ;;  %s343_s20 = int_to_ptr.hbm [resolvable:$true] %s342_s20 }
  0x1d   : > { %s5903_s30 = smov [#allocation10]   ;;  %s6091_s28 = sadd.s32 1, %s5894_s16  }
  0x1e   : > { %s344_s21 = sshll.u32 %s5903_s30, 4  ;;  %s35_s29 = sadd.s32 1, %s5890_s15  ;;  %s345_s21 = int_to_ptr.vmem [resolvable:$true] %s344_s21 }
  0x1f   : > { %s302_s23 = sshll.u32 %s8200_s3, 4  ;;  %s32_s1 = ssub.s32 %s5894_s16, %s6091_s28  ;;  %s303_s23 = int_to_ptr.hbm [resolvable:$true] %s302_s23 }
  0x20   : > { %5514 = dma.hbm_to_vmem [thread:$0]  (!%p6062_p10), %s303_s23, 4608, %s305_s18, [#allocation6], %s5897_s11, %s5897_s11, %s5898_s12  }
  0x21   : > { %5520 = dma.hbm_to_vmem [thread:$0]  (!%p6062_p10), %s343_s20, 1792, %s345_s21, [#allocation9], %s8146_s22, %s8146_s22, %s8147_s25  }
  0x22   : > { %p42_p12 = scmp.ne.s32.totalorder %s5890_s15, %s5886_s14  ;;  %p33_p13 = scmp.eq.s32.totalorder %s32_s1, 0 }
  0x23   : > { %p43_p0 = scmp.eq.s32.totalorder %s5894_s16, 0  ;;  %p5533_p5 = scmp.lt.s32.totalorder %s5894_s16, 2 }
  0x24   : > { %p6101_p3 = por %p261_p2, %p42_p12  ;;  %s358_s27 = sand.u32 1, %s5890_s15  }
  0x25   : > { %s6107_s11 = scalar_select %p33_p13, %s5890_s15, %s35_s29  }
  0x26   : > { %p44_p7 = por %p43_p0, %p42_p12  ;;  %s5293_s12 = sshll.u32 %s358_s27, 6 }
  0x27   : > { %s5478_s20 = sshll.u32 %s5894_s16, 6  ;;  %s362_s30 = scalar_lea.vmem [#allocation2], %s5293_s12 }
  0x28   : > { %s367_s18 = scalar_lea.hbm %s8134_s0, %s5478_s20  ;;  %s370_s21 = sshll.u32 %s362_s30, 4  ;;  %s371_s21 = int_to_ptr.vmem [resolvable:$true] %s370_s21 }
  0x29   : > { %s368_s1 = sshll.u32 %s367_s18, 4  ;;  %p6114_p2 = pnand %p5533_p5, %p44_p7  ;;  %s369_s1 = int_to_ptr.hbm [resolvable:$true] %s368_s1 }
  0x2a   : > { %s359_s29 = scalar_lea.sflag [#allocation3], %s358_s27  ;;  %s5790_s25 = sshra.s32 %s369_s1, 4  ;;  %s5791_s25 = int_to_ptr.hbm [resolvable:$true] %s5790_s25 }
  0x2b   : > { %s5792_s3 = scalar_lea.hbm %s5791_s25, 64  ;;  %p5794_p10 = pneg %p6114_p2 }
  0x2c   : > { %p5793_p9 = scmp.ne.s32.totalorder %s5791_s25, %s5792_s3  ;;  %s5797_s23 = scalar_lea.hbm %s8134_s0, 128 }
  0x2d   : > { %p5798_p0 = scmp.lt.s32.totalorder %s5791_s25, %s8134_s0  ;;  %p5799_p5 = scmp.lt.s32.totalorder %s5797_s23, %s5792_s3 }
  0x2e   : > { %p5795_p12 = pnand %p5794_p10, %p5793_p9 }
  0x2f   : > { %p5800_p7 = por %p5799_p5, %p5798_p0 }
  0x30   : > { %p5796_p13 = pneg %p5795_p12 }
  0x32   : > { %p5801_p11 = pnand %p5800_p7, %p5796_p13 }
  0x34   : > { %5804 = shalt.err (!%p5801_p11)
}
  0x35   : > { %s8203_s27 = smov 16   ;;  %s8204_s30 = smov 256  }
  0x36   : > { %5524 = dma.hbm_to_vmem [thread:$0]  (!%p6114_p2), %s369_s1, 1024, %s371_s21, %s359_s29, %s8204_s30, %s8204_s30, %s8203_s27  }
  0x37   : > { %382 = sbr.rel (%p6054_p8) target bundleno = 2185 (0x889), region = 60 }
  0x3c   : > { %s6134_s20 = sand.u32 1, %s5886_s14  }
  0x3d   : > { %s8185_s3 = sshll.u32 %s6134_s20, 6  ;;  %s385_s25 = scalar_lea.sflag [#allocation3], %s6134_s20 }
  0x3e   : > { %s6140_s12 = scalar_lea.vmem [#allocation2], %s8185_s3 }
  0x3f   : > { %5865 = dma.done.wait (%p6041_p4), %s385_s25, 1024  }
  0x40   : > { %5867 = vsyncadd (%p6041_p4), %s385_s25, 4294966272 }
  0x41   : > { %5869 = dma.done.wait (%p49_p1), [#allocation6], 9216  }
  0x42   : > { %5871 = vsyncadd (%p49_p1), [#allocation6], 4294958080 }
  0x43   : > { %5873 = dma.done.wait (%p49_p1), [#allocation9], 3584  }
  0x44   : > { %5875 = vsyncadd (%p49_p1), [#allocation9], 4294963712  ;;  %v6155_v0 = vld [vmem:[%s6140_s12 + $0x38] sm:$0xff]  ;;  %v6158_v1 = vld [vmem:[%s6140_s12 + $0x28] sm:$0xff]  ;;  %s5904_s19 = smov 16   ;;  %s5905_s24 = smov 17  }
  0x45   : > { %523 = vrot.lane.b32.xlu0 %v6155_v0, %s5904_s19  ;;  %521 = vrot.lane.b32.xlu1 %v6158_v1, %s5904_s19  ;;  %v6165_v2 = vld [vmem:[%s6140_s12 + $0x18] sm:$0xff]  ;;  %v6170_v3 = vld [vmem:[%s6140_s12 + $0x30] sm:$0xff]  ;;  %s5906_s22 = smov 15   ;;  %s5907_s21 = smov 1   ;;  %vm537_vm0 = vcmask 130048   ;;  %v570_v38 = vld [vmem:[#allocation5 + $0x20] sm:$0xff] }
  0x46   : > { %519 = vrot.lane.b32.xlu2 %v6165_v2, %s5904_s19  ;;  %v6173_v4 = vld [vmem:[%s6140_s12 + $0x20] sm:$0xff]  ;;  %v6176_v5 = vld [vmem:[%s6140_s12 + $0x10] sm:$0xff]  ;;  %v6185_v6 = vld [vmem:[%s6140_s12 + $0x8] sm:$0xff]  ;;  %s5908_s1 = smov 127   ;;  %s5909_s29 = smov 113   ;;  %vm574_vm1 = vcmask 261120  }
  0x47   : > { %v6188_v7 = vld [vmem:[%s6140_s12] sm:$0xff]  ;;  %s5910_s18 = smov 112   ;;  %vm482_vm2 = vcmask 138240   ;;  %v571_v52 = vld [vmem:[#allocation5 + $0x28] sm:$0xff]  ;;  %s8186_s25 = smov 111   ;;  %v572_v62 = vld [vmem:[#allocation5 + $0x30] sm:$0xff] }
  0x48   : > { %v5303_v14 = vld [vmem:[%s8141_s7 + $0x1] ss:$8 sm:$0x3]  ;;  %v499_v40 = vld [vmem:[%s8141_s7] ss:$8 sm:$0x3] }
  0x49   : > { %v6275_v15 = vperm.slane %v5303_v14, 0  ;;  %v6277_v16 = vperm.slane %v5303_v14, 1  ;;  %v6312_v41 = vperm.slane %v499_v40, 0  ;;  %v6314_v42 = vperm.slane %v499_v40, 1  ;;  %s5915_s3 = smov 51   ;;  %s5917_s27 = smov 49  }
  0x4a   : > { %v5320_v63 = vld [vmem:[%s8141_s7 + $0x2] ss:$8 sm:$0x3]  ;;  %vm735_vm3 = vcmask 121856   ;;  %vm870_vm4 = vcmask 7168   ;;  %vm1099_vm5 = vcmask 1039360  }
  0x4b   : > { %8205 = vst [vmem:[#allocation17_spill] sm:$0xff] %v6275_v15  ;;  %vm1234_vm6 = vcmask 924672   ;;  %vm8189_vm7 = vcmask 916480   ;;  %vm8188_vm8 = vcmask 908288   ;;  %vm2891_vm10 = vcmask 1041408   ;;  %s5918_s30 = smov 48  }
  0x4c   : > { %8206 = vst [vmem:[#allocation18_spill] sm:$0xff] %v6277_v16  ;;  %vm2878_vm11 = vcmask 15360   ;;  %s5919_s23 = smov 47   ;;  %s5920_s26 = smov 46  }
  0x4d   : > { %535 = vrot.lane.b32.xlu0 %v6170_v3, %s5904_s19  ;;  %533 = vrot.lane.b32.xlu1 %v6173_v4, %s5904_s19  ;;  %8207 = vst [vmem:[#allocation19_spill] sm:$0xff] %v6312_v41 }
  0x4e   : > { %531 = vrot.lane.b32.xlu2 %v6176_v5, %s5904_s19  ;;  %8208 = vst [vmem:[#allocation20_spill] sm:$0xff] %v6314_v42 }
  0x55   : > { %517 = vrot.lane.b32.xlu0 %v6185_v6, %s5904_s19  ;;  %529 = vrot.lane.b32.xlu1 %v6188_v7, %s5904_s19 }
  0x56   : > { %464 = vrot.lane.b32.xlu2 %v6155_v0, %s5905_s24 }
  0x5d   : > { %480 = vrot.lane.b32.xlu0 %v6170_v3, %s5905_s24  ;;  %462 = vrot.lane.b32.xlu1 %v6158_v1, %s5905_s24 }
  0x5e   : > { %478 = vrot.lane.b32.xlu2 %v6173_v4, %s5905_s24 }
  0x65   : > { %460 = vrot.lane.b32.xlu0 %v6165_v2, %s5905_s24  ;;  %476 = vrot.lane.b32.xlu1 %v6176_v5, %s5905_s24 }
  0x66   : > { %458 = vrot.lane.b32.xlu2 %v6185_v6, %s5905_s24 }
  0x6d   : > { %474 = vrot.lane.b32.xlu0 %v6188_v7, %s5905_s24  ;;  %721 = vrot.lane.b32.xlu1 %v6155_v0, %s5906_s22 }
  0x6e   : > { %733 = vrot.lane.b32.xlu2 %v6170_v3, %s5906_s22 }
  0x75   : > { %719 = vrot.lane.b32.xlu0 %v6158_v1, %s5906_s22  ;;  %731 = vrot.lane.b32.xlu1 %v6173_v4, %s5906_s22 }
  0x76   : > { %717 = vrot.lane.b32.xlu2 %v6165_v2, %s5906_s22 }
  0x7d   : > { %729 = vrot.lane.b32.xlu0 %v6176_v5, %s5906_s22  ;;  %715 = vrot.lane.b32.xlu1 %v6185_v6, %s5906_s22 }
  0x7e   : > { %727 = vrot.lane.b32.xlu2 %v6188_v7, %s5906_s22 }
  0x85   : > { %856 = vrot.lane.b32.xlu0 %v6155_v0, %s5907_s21  ;;  %868 = vrot.lane.b32.xlu1 %v6170_v3, %s5907_s21 }
  0x86   : > { %854 = vrot.lane.b32.xlu2 %v6158_v1, %s5907_s21 }
  0x8d   : > { %866 = vrot.lane.b32.xlu0 %v6173_v4, %s5907_s21  ;;  %852 = vrot.lane.b32.xlu1 %v6165_v2, %s5907_s21 }
  0x8e   : > { %864 = vrot.lane.b32.xlu2 %v6176_v5, %s5907_s21 }
  0x95   : > { %850 = vrot.lane.b32.xlu0 %v6185_v6, %s5907_s21  ;;  %862 = vrot.lane.b32.xlu1 %v6188_v7, %s5907_s21 }
  0x96   : > { %1095 = vrot.lane.b32.xlu2 %v6170_v3, %s5908_s1 }
  0x9d   : > { %1097 = vrot.lane.b32.xlu0 %v6155_v0, %s5908_s1  ;;  %1091 = vrot.lane.b32.xlu1 %v6173_v4, %s5908_s1 }
  0x9e   : > { %1093 = vrot.lane.b32.xlu2 %v6158_v1, %s5908_s1 }
  0xa0   : > { %v520_v8 = vpop.permute.xlu2 %519 }
  0xa5   : > { %1087 = vrot.lane.b32.xlu0 %v6176_v5, %s5908_s1  ;;  %1089 = vrot.lane.b32.xlu1 %v6165_v2, %s5908_s1 }
  0xa6   : > { %1083 = vrot.lane.b32.xlu2 %v6188_v7, %s5908_s1 }
  0xa8   : > { %v532_v9 = vpop.permute.xlu2 %531 }
  0xa9   : > { %v551_v26 = vsel %vm537_vm0, %v520_v8, %v532_v9  ;;  %v539_v27 = vsel %vm537_vm0, %v532_v9, %v520_v8 }
  0xaa   : > { %v563_v30 = vmul.f32 %v6275_v15, %v551_v26  ;;  %v564_v31 = vmul.f32 %v6277_v16, %v539_v27 }
  0xad   : > { %1085 = vrot.lane.b32.xlu0 %v6185_v6, %s5908_s1  ;;  %1230 = vrot.lane.b32.xlu1 %v6170_v3, %s5909_s29 }
  0xae   : > { %1232 = vrot.lane.b32.xlu2 %v6155_v0, %s5909_s29 }
  0xb0   : > { %v465_v10 = vpop.permute.xlu2 %464 }
  0xb5   : > { %1226 = vrot.lane.b32.xlu0 %v6173_v4, %s5909_s29  ;;  %1228 = vrot.lane.b32.xlu1 %v6158_v1, %s5909_s29 }
  0xb6   : > { %1222 = vrot.lane.b32.xlu2 %v6176_v5, %s5909_s29 }
  0xb7   : > { %v524_v11 = vpop.permute.xlu0 %523  ;;  %v522_v12 = vpop.permute.xlu1 %521 }
  0xb8   : > { %v479_v13 = vpop.permute.xlu2 %478 }
  0xbd   : > { %1224 = vrot.lane.b32.xlu0 %v6165_v2, %s5909_s29  ;;  %1218 = vrot.lane.b32.xlu1 %v6188_v7, %s5909_s29 }
  0xbe   : > { %1220 = vrot.lane.b32.xlu2 %v6185_v6, %s5909_s29 }
  0xbf   : > { %v536_v17 = vpop.permute.xlu0 %535  ;;  %v534_v18 = vpop.permute.xlu1 %533 }
  0xc0   : > { %v553_v19 = vsel %vm537_vm0, %v524_v11, %v536_v17  ;;  %v541_v20 = vsel %vm537_vm0, %v536_v17, %v524_v11  ;;  %v552_v21 = vsel %vm537_vm0, %v522_v12, %v534_v18  ;;  %v540_v22 = vsel %vm537_vm0, %v534_v18, %v522_v12  ;;  %v6287_v25 = vpop.permute.xlu2 %458 }
  0xc1   : > { %v567_v23 = vmul.f32 %v6275_v15, %v553_v19  ;;  %v568_v24 = vmul.f32 %v6277_v16, %v541_v20  ;;  %v565_v28 = vmul.f32 %v6275_v15, %v552_v21  ;;  %v566_v29 = vmul.f32 %v6277_v16, %v540_v22  ;;  %v573_v20 = vld [vmem:[#allocation5 + $0x38] sm:$0xff]  ;;  %v514_v22 = vld [vmem:[#allocation5 + $0x8] sm:$0xff] }
  0xc2   : > { %v6357_v11 = vperm.slane %v5320_v63, 1 }
  0xc3   : > { %599 = vmatpush.msra.mxu0 %v567_v23  ;;  %628 = vmatpush.msra.mxu1 %v568_v24 }
  0xc4   : > { %8210 = vst [vmem:[#allocation22_spill] sm:$0xff] %v6357_v11 }
  0xc5   : > { %600 = vmatpush.msra.mxu0 %v565_v28  ;;  %629 = vmatpush.msra.mxu1 %v566_v29 }
  0xc6   : > { %1365 = vrot.lane.b32.xlu0 %v6170_v3, %s5910_s18  ;;  %1367 = vrot.lane.b32.xlu1 %v6155_v0, %s5910_s18 }
  0xc7   : > { %601 = vmatpush.msra.mxu0 %v563_v30  ;;  %630 = vmatpush.msra.mxu1 %v564_v31  ;;  %v518_v32 = vpop.permute.xlu0 %517  ;;  %v530_v33 = vpop.permute.xlu1 %529  ;;  %v513_v31 = vld [vmem:[#allocation5] sm:$0xff] }
  0xc8   : > { %v550_v34 = vsel %vm537_vm0, %v518_v32, %v530_v33  ;;  %v538_v35 = vsel %vm537_vm0, %v530_v33, %v518_v32  ;;  %1361 = vrot.lane.b32.xlu2 %v6173_v4, %s5910_s18  ;;  %v6305_v39 = vpop.permute.xlu2 %733  ;;  %v515_v32 = vld [vmem:[#allocation5 + $0x10] sm:$0xff] }
  0xc9   : > { %v561_v36 = vmul.f32 %v6275_v15, %v550_v34  ;;  %v562_v37 = vmul.f32 %v6277_v16, %v538_v35  ;;  %v5338_v34 = vld [vmem:[%s8141_s7 + $0x4] ss:$8 sm:$0x3] }
  0xcb   : > { %602 = vmatpush.msra.mxu0 %v561_v36  ;;  %631 = vmatpush.msra.mxu1 %v562_v37  ;;  %v6400_v37 = vperm.slane %v5338_v34, 0 }
  0xcc   : > { %5304 = vmatmul.msk.f32.vlgmr.msra.gmra.mxu0 %vm574_vm1, %v570_v38  ;;  %5308 = vmatmul.msk.f32.vlgmr.msra.gmra.mxu1 %vm574_vm1, %v570_v38  ;;  %v6402_v38 = vperm.slane %v5338_v34, 1 }
  0xcd   : > { %8211 = vst [vmem:[#allocation23_spill] sm:$0xff] %v6400_v37 }
  0xce   : > { %1363 = vrot.lane.b32.xlu0 %v6158_v1, %s5910_s18  ;;  %1357 = vrot.lane.b32.xlu1 %v6176_v5, %s5910_s18  ;;  %8212 = vst [vmem:[#allocation24_spill] sm:$0xff] %v6402_v38 }
  0xcf   : > { %v481_v43 = vpop.permute.xlu0 %480  ;;  %v463_v44 = vpop.permute.xlu1 %462 }
  0xd0   : > { %v498_v45 = vsel %vm482_vm2, %v465_v10, %v481_v43  ;;  %v486_v46 = vsel %vm482_vm2, %v481_v43, %v465_v10  ;;  %v497_v47 = vsel %vm482_vm2, %v463_v44, %v479_v13  ;;  %1359 = vrot.lane.b32.xlu2 %v6165_v2, %s5910_s18  ;;  %v485_v50 = vsel %vm482_vm2, %v479_v13, %v463_v44  ;;  %v6328_v51 = vpop.permute.xlu2 %717 }
  0xd1   : > { %v511_v48 = vmul.f32 %v6312_v41, %v498_v45  ;;  %v512_v49 = vmul.f32 %v6314_v42, %v486_v46  ;;  %v509_v53 = vmul.f32 %v6312_v41, %v497_v47  ;;  %v510_v54 = vmul.f32 %v6314_v42, %v485_v50  ;;  %v516_v50 = vld [vmem:[#allocation5 + $0x18] sm:$0xff] }
  0xd2   : > { %v6355_v10 = vperm.slane %v5320_v63, 0  ;;  %v992_v63 = vmul.f32 %v6400_v37, %v6188_v7 }
  0xd3   : > { %669 = vmatpush.msrb.mxu0 %v511_v48  ;;  %5480 = vmatpush.msra.mxu2 %v511_v48 }
  0xd4   : > { %698 = vmatpush.msrb.mxu1 %v512_v49  ;;  %5484 = vmatpush.msra.mxu3 %v512_v49  ;;  %8209 = vst [vmem:[#allocation21_spill] sm:$0xff] %v6355_v10  ;;  %v5329_v49 = vld [vmem:[%s8141_s7 + $0x3] ss:$8 sm:$0x3] }
  0xd5   : > { %5305 = vmatmul.msk.f32.gmra.mxu0 %vm574_vm1, %v571_v52  ;;  %5309 = vmatmul.msk.f32.gmra.mxu1 %vm574_vm1, %v571_v52  ;;  %v998_v52 = vmul.f32 %v6400_v37, %v6170_v3 }
  0xd6   : > { %1353 = vrot.lane.b32.xlu0 %v6188_v7, %s5910_s18  ;;  %1355 = vrot.lane.b32.xlu1 %v6185_v6, %s5910_s18 }
  0xd7   : > { %v461_v55 = vpop.permute.xlu0 %460  ;;  %v477_v56 = vpop.permute.xlu1 %476  ;;  %670 = vmatpush.msrb.mxu0 %v509_v53  ;;  %5481 = vmatpush.msra.mxu2 %v509_v53  ;;  %v999_v53 = vmul.f32 %v6402_v38, %v6155_v0 }
  0xd8   : > { %699 = vmatpush.msrb.mxu1 %v510_v54  ;;  %5485 = vmatpush.msra.mxu3 %v510_v54  ;;  %v496_v57 = vsel %vm482_vm2, %v461_v55, %v477_v56  ;;  %v484_v58 = vsel %vm482_vm2, %v477_v56, %v461_v55  ;;  %v6342_v61 = vpop.permute.xlu2 %727  ;;  %v6423_v54 = vperm.slane %v5329_v49, 0  ;;  %v6425_v55 = vperm.slane %v5329_v49, 1  ;;  %v1001_v49 = vld [vmem:[#allocation5 + $0x80] sm:$0xff] }
  0xd9   : > { %v507_v59 = vmul.f32 %v6312_v41, %v496_v57  ;;  %v508_v60 = vmul.f32 %v6314_v42, %v484_v58  ;;  %1500 = vrot.lane.b32.xlu2 %v6170_v3, %s8186_s25  ;;  %v996_v57 = vmul.f32 %v6400_v37, %v6173_v4  ;;  %v997_v3 = vmul.f32 %v6402_v38, %v6158_v1 }
  0xda   : > { %8213 = vst [vmem:[#allocation25_spill] sm:$0xff] %v6423_v54 }
  0xdb   : > { %671 = vmatpush.msrb.mxu0 %v507_v59  ;;  %5482 = vmatpush.msra.mxu2 %v507_v59  ;;  %8214 = vst [vmem:[#allocation26_spill] sm:$0xff] %v6425_v55  ;;  %v994_v59 = vmul.f32 %v6400_v37, %v6176_v5 }
  0xdc   : > { %700 = vmatpush.msrb.mxu1 %v508_v60  ;;  %5486 = vmatpush.msra.mxu3 %v508_v60 }
  0xdd   : > { %5306 = vmatmul.msk.f32.gmra.mxu0 %vm574_vm1, %v572_v62  ;;  %5310 = vmatmul.msk.f32.gmra.mxu1 %vm574_vm1, %v572_v62 }
  0xde   : > { %1502 = vrot.lane.b32.xlu0 %v6155_v0, %s8186_s25  ;;  %1496 = vrot.lane.b32.xlu1 %v6173_v4, %s8186_s25  ;;  %v995_v4 = vmul.f32 %v6402_v38, %v6165_v2 }
  0xdf   : > { %v475_v8 = vpop.permute.xlu0 %474  ;;  %v722_v9 = vpop.permute.xlu1 %721 }
  0xe0   : > { %v495_v12 = vsel %vm482_vm2, %v6287_v25, %v475_v8  ;;  %v483_v13 = vsel %vm482_vm2, %v475_v8, %v6287_v25  ;;  %v739_v14 = vsel %vm735_vm3, %v6305_v39, %v722_v9  ;;  %v751_v17 = vsel %vm735_vm3, %v722_v9, %v6305_v39  ;;  %v6371_v21 = vpop.permute.xlu2 %854  ;;  %v769_v8 = vld [vmem:[#allocation5 + $0x48] sm:$0xff] }
  0xe1   : > { %v505_v18 = vmul.f32 %v6312_v41, %v495_v12  ;;  %v506_v19 = vmul.f32 %v6314_v42, %v483_v13  ;;  %1498 = vrot.lane.b32.xlu2 %v6158_v1, %s8186_s25  ;;  %v765_v23 = vmul.f32 %v6355_v10, %v751_v17  ;;  %v766_v24 = vmul.f32 %v6357_v11, %v739_v14 }
  0xe3   : > { %672 = vmatpush.msrb.mxu0 %v505_v18  ;;  %5483 = vmatpush.msra.mxu2 %v505_v18 }
  0xe4   : > { %701 = vmatpush.msrb.mxu1 %v506_v19  ;;  %5487 = vmatpush.msra.mxu3 %v506_v19 }
  0xe5   : > { %5307 = vmatmul.msk.f32.gmra.mxu0 %vm574_vm1, %v573_v20  ;;  %5311 = vmatmul.msk.f32.gmra.mxu1 %vm574_vm1, %v573_v20 }
  0xe6   : > { %5313 = vmatmul.msk.f32.vlgmr.msra.gmra.mxu2 %vm574_vm1, %v514_v22  ;;  %5317 = vmatmul.msk.f32.vlgmr.msra.gmra.mxu3 %vm574_vm1, %v514_v22  ;;  %v770_v22 = vld [vmem:[#allocation5 + $0x50] sm:$0xff] }
  0xe7   : > { %1492 = vrot.lane.b32.xlu0 %v6176_v5, %s8186_s25  ;;  %1494 = vrot.lane.b32.xlu1 %v6165_v2, %s8186_s25  ;;  %v720_v25 = vpop.permute.xlu0 %719  ;;  %v732_v26 = vpop.permute.xlu1 %731  ;;  %v993_v5 = vmul.f32 %v6402_v38, %v6185_v6 }
  0xe8   : > { %v738_v27 = vsel %vm735_vm3, %v732_v26, %v720_v25  ;;  %v750_v28 = vsel %vm735_vm3, %v720_v25, %v732_v26  ;;  %796 = vmatpush.msra.mxu0 %v765_v23  ;;  %825 = vmatpush.msra.mxu1 %v766_v24  ;;  %v6389_v33 = vpop.permute.xlu2 %864 }
  0xe9   : > { %v763_v29 = vmul.f32 %v6355_v10, %v750_v28  ;;  %v764_v30 = vmul.f32 %v6357_v11, %v738_v27  ;;  %1488 = vrot.lane.b32.xlu2 %v6188_v7, %s8186_s25  ;;  %v903_v28 = vld [vmem:[#allocation5 + $0x60] sm:$0xff] }
  0xeb   : > { %797 = vmatpush.msra.mxu0 %v763_v29  ;;  %826 = vmatpush.msra.mxu1 %v764_v30  ;;  %v5347_v29 = vld [vmem:[%s8141_s7 + $0x5] ss:$8 sm:$0x3] }
  0xed   : > { %5312 = vmatmul.msk.f32.vlgmr.msrb.gmra.mxu0 %vm574_vm1, %v513_v31  ;;  %5316 = vmatmul.msk.f32.vlgmr.msrb.gmra.mxu1 %vm574_vm1, %v513_v31  ;;  %v771_v31 = vld [vmem:[#allocation5 + $0x58] sm:$0xff] }
  0xee   : > { %5314 = vmatmul.msk.f32.gmra.mxu2 %vm574_vm1, %v515_v32  ;;  %5318 = vmatmul.msk.f32.gmra.mxu3 %vm574_vm1, %v515_v32  ;;  %v6474_v32 = vperm.slane %v5347_v29, 0 }
  0xef   : > { %1490 = vrot.lane.b32.xlu0 %v6185_v6, %s8186_s25  ;;  %v730_v35 = vpop.permute.xlu0 %729  ;;  %v716_v36 = vpop.permute.xlu1 %715 }
  0xf0   : > { %v737_v39 = vsel %vm735_vm3, %v730_v35, %v6328_v51  ;;  %v749_v40 = vsel %vm735_vm3, %v6328_v51, %v730_v35  ;;  %v736_v43 = vsel %vm735_vm3, %v6342_v61, %v716_v36  ;;  %v748_v44 = vsel %vm735_vm3, %v716_v36, %v6342_v61  ;;  %v768_v51 = vld [vmem:[#allocation5 + $0x40] sm:$0xff]  ;;  %v6429_v56 = vpop.permute.xlu2 %1095  ;;  %8215 = vst [vmem:[#allocation27_spill] sm:$0xff] %v6474_v32 }
  0xf1   : > { %v761_v45 = vmul.f32 %v6355_v10, %v749_v40  ;;  %v762_v46 = vmul.f32 %v6357_v11, %v737_v39  ;;  %v759_v47 = vmul.f32 %v6355_v10, %v748_v44  ;;  %v760_v48 = vmul.f32 %v6357_v11, %v736_v43 }
  0xf3   : > { %798 = vmatpush.msra.mxu0 %v761_v45  ;;  %827 = vmatpush.msra.mxu1 %v762_v46  ;;  %v904_v46 = vld [vmem:[#allocation5 + $0x68] sm:$0xff] }
  0xf5   : > { %799 = vmatpush.msra.mxu0 %v759_v47  ;;  %828 = vmatpush.msra.mxu1 %v760_v48 }
  0xf6   : > { %5315 = vmatmul.msk.f32.gmra.mxu2 %vm574_vm1, %v516_v50  ;;  %5319 = vmatmul.msk.f32.gmra.mxu3 %vm574_vm1, %v516_v50 }
  0xf7   : > { %5321 = vmatmul.msk.f32.vlgmr.msra.gmra.mxu0 %vm574_vm1, %v768_v51  ;;  %5325 = vmatmul.msk.f32.vlgmr.msra.gmra.mxu1 %vm574_vm1, %v768_v51  ;;  %v857_v0 = vpop.permute.xlu0 %856  ;;  %v869_v58 = vpop.permute.xlu1 %868 }
  0xf8   : > { %v886_v60 = vsel %vm870_vm4, %v857_v0, %v869_v58  ;;  %v874_v61 = vsel %vm870_vm4, %v869_v58, %v857_v0  ;;  %1029 = vmatpush.msrb.mxu0 %v998_v52  ;;  %1058 = vmatpush.msrb.mxu1 %v999_v53  ;;  %v1094_v14 = vpop.permute.xlu2 %1093  ;;  %v905_v0 = vld [vmem:[#allocation5 + $0x70] sm:$0xff]  ;;  %v5356_v58 = vld [vmem:[%s8141_s7 + $0x6] ss:$8 sm:$0x3] }
  0xf9   : > { %v900_v1 = vmul.f32 %v6423_v54, %v886_v60  ;;  %v901_v62 = vmul.f32 %v6425_v55, %v874_v61  ;;  %v6503_v60 = vperm.slane %v5356_v58, 0  ;;  %v6505_v61 = vperm.slane %v5356_v58, 1 }
  0xfa   : > { %1030 = vmatpush.msrb.mxu0 %v996_v57  ;;  %1059 = vmatpush.msrb.mxu1 %v997_v3 }
  0xfb   : > { %931 = vmatpush.msrb.mxu2 %v900_v1  ;;  %960 = vmatpush.msrb.mxu3 %v901_v62  ;;  %8217 = vst [vmem:[#allocation29_spill] sm:$0xff] %v6503_v60 }
  0xfc   : > { %1031 = vmatpush.msrb.mxu0 %v994_v59  ;;  %1060 = vmatpush.msrb.mxu1 %v995_v4  ;;  %v1002_v59 = vld [vmem:[#allocation5 + $0x88] sm:$0xff]  ;;  %8218 = vst [vmem:[#allocation30_spill] sm:$0xff] %v6505_v61 }
  0xfe   : > { %1032 = vmatpush.msrb.mxu0 %v992_v63  ;;  %1061 = vmatpush.msrb.mxu1 %v993_v5 }
  0xff   : > { %5322 = vmatmul.msk.f32.gmra.mxu0 %vm574_vm1, %v769_v8  ;;  %5326 = vmatmul.msk.f32.gmra.mxu1 %vm574_vm1, %v769_v8  ;;  %v867_v2 = vpop.permute.xlu0 %866  ;;  %v853_v9 = vpop.permute.xlu1 %852 }
 0x100   : > { %v885_v12 = vsel %vm870_vm4, %v6371_v21, %v867_v2  ;;  %v873_v7 = vsel %vm870_vm4, %v867_v2, %v6371_v21  ;;  %v884_v6 = vsel %vm870_vm4, %v853_v9, %v6389_v33  ;;  %v872_v13 = vsel %vm870_vm4, %v6389_v33, %v853_v9  ;;  %v1084_v30 = vpop.permute.xlu2 %1083 }
 0x101   : > { %v898_v17 = vmul.f32 %v6423_v54, %v885_v12  ;;  %v899_v18 = vmul.f32 %v6425_v55, %v873_v7  ;;  %v896_v19 = vmul.f32 %v6423_v54, %v884_v6  ;;  %v897_v20 = vmul.f32 %v6425_v55, %v872_v13  ;;  %v906_v13 = vld [vmem:[#allocation5 + $0x78] sm:$0xff] }
 0x102   : > { %v6476_v33 = vperm.slane %v5347_v29, 1 }
 0x103   : > { %932 = vmatpush.msrb.mxu2 %v898_v17  ;;  %961 = vmatpush.msrb.mxu3 %v899_v18 }
 0x104   : > { %8216 = vst [vmem:[#allocation28_spill] sm:$0xff] %v6476_v33 }
 0x105   : > { %933 = vmatpush.msrb.mxu2 %v896_v19  ;;  %962 = vmatpush.msrb.mxu3 %v897_v20 }
 0x107   : > { %5323 = vmatmul.msk.f32.gmra.mxu0 %vm574_vm1, %v770_v22  ;;  %5327 = vmatmul.msk.f32.gmra.mxu1 %vm574_vm1, %v770_v22  ;;  %v851_v21 = vpop.permute.xlu0 %850  ;;  %v863_v23 = vpop.permute.xlu1 %862 }
 0x108   : > { %v883_v24 = vsel %vm870_vm4, %v851_v21, %v863_v23  ;;  %v871_v25 = vsel %vm870_vm4, %v863_v23, %v851_v21  ;;  %v1233_v50 = vpop.permute.xlu2 %1232 }
 0x109   : > { %v894_v26 = vmul.f32 %v6423_v54, %v883_v24  ;;  %v895_v27 = vmul.f32 %v6425_v55, %v871_v25  ;;  %v1136_v24 = vld [vmem:[#allocation5 + $0xa0] sm:$0xff]  ;;  %v1004_v25 = vld [vmem:[#allocation5 + $0x98] sm:$0xff] }
 0x10b   : > { %934 = vmatpush.msrb.mxu2 %v894_v26  ;;  %963 = vmatpush.msrb.mxu3 %v895_v27 }
 0x10c   : > { %5330 = vmatmul.msk.f32.vlgmr.msrb.gmra.mxu2 %vm574_vm1, %v903_v28  ;;  %5334 = vmatmul.msk.f32.vlgmr.msrb.gmra.mxu3 %vm574_vm1, %v903_v28 }
 0x10f   : > { %5324 = vmatmul.msk.f32.gmra.mxu0 %vm574_vm1, %v771_v31  ;;  %5328 = vmatmul.msk.f32.gmra.mxu1 %vm574_vm1, %v771_v31  ;;  %v1098_v34 = vpop.permute.xlu0 %1097  ;;  %v1092_v35 = vpop.permute.xlu1 %1091 }
 0x110   : > { %v1103_v36 = vsel %vm1099_vm5, %v6429_v56, %v1098_v34  ;;  %v1119_v39 = vsel %vm1099_vm5, %v1098_v34, %v6429_v56  ;;  %v1102_v40 = vsel %vm1099_vm5, %v1092_v35, %v1094_v14  ;;  %v1118_v43 = vsel %vm1099_vm5, %v1094_v14, %v1092_v35  ;;  %v1223_v4 = vpop.permute.xlu2 %1222  ;;  %v1003_v14 = vld [vmem:[#allocation5 + $0x90] sm:$0xff] }
 0x111   : > { %v1133_v44 = vmul.f32 %v6474_v32, %v1103_v36  ;;  %v1134_v45 = vmul.f32 %v6476_v33, %v1119_v39  ;;  %v1131_v47 = vmul.f32 %v6474_v32, %v1102_v40  ;;  %v1132_v48 = vmul.f32 %v6476_v33, %v1118_v43  ;;  %v1137_v39 = vld [vmem:[#allocation5 + $0xa8] sm:$0xff] }
 0x113   : > { %1164 = vmatpush.msra.mxu2 %v1133_v44  ;;  %1193 = vmatpush.msra.mxu3 %v1134_v45  ;;  %v5365_v44 = vld [vmem:[%s8141_s7 + $0x7] ss:$8 sm:$0x3] }
 0x114   : > { %5331 = vmatmul.msk.f32.gmra.mxu2 %vm574_vm1, %v904_v46  ;;  %5335 = vmatmul.msk.f32.gmra.mxu3 %vm574_vm1, %v904_v46  ;;  %v1271_v45 = vld [vmem:[#allocation5 + $0xc0] sm:$0xff]  ;;  %v6542_v46 = vperm.slane %v5365_v44, 0 }
 0x115   : > { %1165 = vmatpush.msra.mxu2 %v1131_v47  ;;  %1194 = vmatpush.msra.mxu3 %v1132_v48  ;;  %v6544_v47 = vperm.slane %v5365_v44, 1 }
 0x116   : > { %8219 = vst [vmem:[#allocation31_spill] sm:$0xff] %v6542_v46 }
 0x117   : > { %5339 = vmatmul.msk.f32.vlgmr.msrb.gmra.mxu0 %vm574_vm1, %v1001_v49  ;;  %5343 = vmatmul.msk.f32.vlgmr.msrb.gmra.mxu1 %vm574_vm1, %v1001_v49  ;;  %v1088_v51 = vpop.permute.xlu0 %1087  ;;  %v1090_v52 = vpop.permute.xlu1 %1089  ;;  %8220 = vst [vmem:[#allocation32_spill] sm:$0xff] %v6544_v47 }
 0x118   : > { %v1101_v53 = vsel %vm1099_vm5, %v1088_v51, %v1090_v52  ;;  %v1117_v56 = vsel %vm1099_vm5, %v1090_v52, %v1088_v51  ;;  %v1221_v22 = vpop.permute.xlu2 %1220 }
 0x119   : > { %v1129_v57 = vmul.f32 %v6474_v32, %v1101_v53  ;;  %v1130_v3 = vmul.f32 %v6476_v33, %v1117_v56  ;;  %v1138_v56 = vld [vmem:[#allocation5 + $0xb0] sm:$0xff] }
 0x11b   : > { %1166 = vmatpush.msra.mxu2 %v1129_v57  ;;  %1195 = vmatpush.msra.mxu3 %v1130_v3  ;;  %v1272_v3 = vld [vmem:[#allocation5 + $0xc8] sm:$0xff] }
 0x11c   : > { %5332 = vmatmul.msk.f32.gmra.mxu2 %vm574_vm1, %v905_v0  ;;  %5336 = vmatmul.msk.f32.gmra.mxu3 %vm574_vm1, %v905_v0 }
 0x11f   : > { %5340 = vmatmul.msk.f32.gmra.mxu0 %vm574_vm1, %v1002_v59  ;;  %5344 = vmatmul.msk.f32.gmra.mxu1 %vm574_vm1, %v1002_v59  ;;  %v1086_v1 = vpop.permute.xlu0 %1085  ;;  %v1231_v62 = vpop.permute.xlu1 %1230 }
 0x120   : > { %v1100_v63 = vsel %vm1099_vm5, %v1084_v30, %v1086_v1  ;;  %v1116_v5 = vsel %vm1099_vm5, %v1086_v1, %v1084_v30  ;;  %v1238_v8 = vsel %vm1234_vm6, %v1231_v62, %v1233_v50  ;;  %v1254_v2 = vsel %vm1234_vm6, %v1233_v50, %v1231_v62 }
 0x121   : > { %v1268_v9 = vmul.f32 %v6503_v60, %v1238_v8  ;;  %v1269_v12 = vmul.f32 %v6505_v61, %v1254_v2  ;;  %v1127_v7 = vmul.f32 %v6474_v32, %v1100_v63  ;;  %v1128_v6 = vmul.f32 %v6476_v33, %v1116_v5  ;;  %v1139_v8 = vld [vmem:[#allocation5 + $0xb8] sm:$0xff] }
 0x122   : > { %v1362_v34 = vpop.permute.xlu2 %1361 }
 0x123   : > { %1167 = vmatpush.msra.mxu2 %v1127_v7  ;;  %1196 = vmatpush.msra.mxu3 %v1128_v6  ;;  %v1626_v6 = vld [vmem:[%s8136_s2 + $0x18] sm:$0xff] }
 0x124   : > { %5333 = vmatmul.msk.f32.gmra.mxu2 %vm574_vm1, %v906_v13  ;;  %5337 = vmatmul.msk.f32.gmra.mxu3 %vm574_vm1, %v906_v13 }
 0x125   : > { %1299 = vmatpush.msra.mxu0 %v1268_v9  ;;  %1328 = vmatpush.msra.mxu1 %v1269_v12  ;;  %v1273_v12 = vld [vmem:[#allocation5 + $0xd0] sm:$0xff] }
 0x127   : > { %5341 = vmatmul.msk.f32.gmra.mxu0 %vm574_vm1, %v1003_v14  ;;  %5345 = vmatmul.msk.f32.gmra.mxu1 %vm574_vm1, %v1003_v14  ;;  %v1227_v17 = vpop.permute.xlu0 %1226  ;;  %v1229_v18 = vpop.permute.xlu1 %1228 }
 0x128   : > { %v1237_v19 = vsel %vm1234_vm6, %v1227_v17, %v1229_v18  ;;  %v1253_v20 = vsel %vm1234_vm6, %v1229_v18, %v1227_v17  ;;  %v5912_v17 = vmov 0  }
 0x129   : > { %v1266_v21 = vmul.f32 %v6503_v60, %v1237_v19  ;;  %v1267_v23 = vmul.f32 %v6505_v61, %v1253_v20  ;;  %5631 = vset.pattern.permute.xlu1 %v5912_v17  ;;  %5633 = vset.pattern.permute.xlu0 %v5912_v17 }
 0x12a   : > { %v1360_v57 = vpop.permute.xlu2 %1359  ;;  %1644 = vperm.xlu1 %5631, %v1626_v6   ;;  %5632 = vset.pattern.permute.xlu2 %v5912_v17  ;;  %v1409_v6 = vld [vmem:[#allocation5 + $0xf8] sm:$0xff] }
 0x12b   : > { %1300 = vmatpush.msra.mxu0 %v1266_v21  ;;  %1329 = vmatpush.msra.mxu1 %v1267_v23 }
 0x12c   : > { %5348 = vmatmul.msk.f32.vlgmr.msra.gmra.mxu2 %vm574_vm1, %v1136_v24  ;;  %5352 = vmatmul.msk.f32.vlgmr.msra.gmra.mxu3 %vm574_vm1, %v1136_v24  ;;  %v1406_v24 = vld [vmem:[#allocation5 + $0xe0] sm:$0xff] }
 0x12f   : > { %5342 = vmatmul.msk.f32.gmra.mxu0 %vm574_vm1, %v1004_v25  ;;  %5346 = vmatmul.msk.f32.gmra.mxu1 %vm574_vm1, %v1004_v25  ;;  %v1225_v26 = vpop.permute.xlu0 %1224  ;;  %v1219_v27 = vpop.permute.xlu1 %1218  ;;  %v5374_v25 = vld [vmem:[%s8141_s7 + $0x10] ss:$8 sm:$0x3] }
 0x130   : > { %v1236_v28 = vsel %vm1234_vm6, %v1223_v4, %v1225_v26  ;;  %v1252_v29 = vsel %vm1234_vm6, %v1225_v26, %v1223_v4  ;;  %v1235_v30 = vsel %vm1234_vm6, %v1219_v27, %v1221_v22  ;;  %v1251_v31 = vsel %vm1234_vm6, %v1221_v22, %v1219_v27  ;;  %v1274_v26 = vld [vmem:[#allocation5 + $0xd8] sm:$0xff] }
 0x131   : > { %v1264_v35 = vmul.f32 %v6503_v60, %v1236_v28  ;;  %v1265_v36 = vmul.f32 %v6505_v61, %v1252_v29  ;;  %v1262_v40 = vmul.f32 %v6503_v60, %v1235_v30  ;;  %v1263_v43 = vmul.f32 %v6505_v61, %v1251_v31  ;;  %v1623_v30 = vld [vmem:[%s8136_s2] sm:$0xff] }
 0x132   : > { %v6584_v27 = vperm.slane %v5374_v25, 0  ;;  %v6586_v28 = vperm.slane %v5374_v25, 1  ;;  %1629 = vperm.xlu1 %5631, %v1623_v30   ;;  %v1543_v25 = vld [vmem:[#allocation5 + $0x110] sm:$0xff] }
 0x133   : > { %1301 = vmatpush.msra.mxu0 %v1264_v35  ;;  %1330 = vmatpush.msra.mxu1 %v1265_v36  ;;  %v1501_v7 = vpop.permute.xlu2 %1500 }
 0x134   : > { %5349 = vmatmul.msk.f32.gmra.mxu2 %vm574_vm1, %v1137_v39  ;;  %5353 = vmatmul.msk.f32.gmra.mxu3 %vm574_vm1, %v1137_v39  ;;  %8221 = vst [vmem:[#allocation33_spill] sm:$0xff] %v6584_v27 }
 0x135   : > { %1302 = vmatpush.msra.mxu0 %v1262_v40  ;;  %1331 = vmatpush.msra.mxu1 %v1263_v43  ;;  %8222 = vst [vmem:[#allocation34_spill] sm:$0xff] %v6586_v28 }
 0x137   : > { %5357 = vmatmul.msk.f32.vlgmr.msra.gmra.mxu0 %vm574_vm1, %v1271_v45  ;;  %5361 = vmatmul.msk.f32.vlgmr.msra.gmra.mxu1 %vm574_vm1, %v1271_v45 }
 0x138   : > { %v1366_v48 = vpop.permute.xlu0 %1365  ;;  %v1368_v49 = vpop.permute.xlu1 %1367 }
 0x139   : > { %v1373_v50 = vsel %vm8189_vm7, %v1366_v48, %v1368_v49  ;;  %v1389_v51 = vsel %vm8189_vm7, %v1368_v49, %v1366_v48  ;;  %v1407_v49 = vld [vmem:[#allocation5 + $0xe8] sm:$0xff] }
 0x13a   : > { %v1403_v52 = vmul.f32 %v6542_v46, %v1373_v50  ;;  %v1404_v53 = vmul.f32 %v6544_v47, %v1389_v51 }
 0x13b   : > { %v1499_v29 = vpop.permute.xlu2 %1498 }
 0x13c   : > { %1434 = vmatpush.msrb.mxu2 %v1403_v52  ;;  %1463 = vmatpush.msrb.mxu3 %v1404_v53 }
 0x13d   : > { %5350 = vmatmul.msk.f32.gmra.mxu2 %vm574_vm1, %v1138_v56  ;;  %5354 = vmatmul.msk.f32.gmra.mxu3 %vm574_vm1, %v1138_v56 }
 0x13f   : > { %5358 = vmatmul.msk.f32.gmra.mxu0 %vm574_vm1, %v1272_v3  ;;  %5362 = vmatmul.msk.f32.gmra.mxu1 %vm574_vm1, %v1272_v3 }
 0x140   : > { %v1364_v0 = vpop.permute.xlu0 %1363  ;;  %v1358_v58 = vpop.permute.xlu1 %1357 }
 0x141   : > { %v1372_v59 = vsel %vm8189_vm7, %v1362_v34, %v1364_v0  ;;  %v1388_v4 = vsel %vm8189_vm7, %v1364_v0, %v1362_v34  ;;  %v1371_v1 = vsel %vm8189_vm7, %v1358_v58, %v1360_v57  ;;  %v1387_v62 = vsel %vm8189_vm7, %v1360_v57, %v1358_v58  ;;  %v1624_v58 = vld [vmem:[%s8136_s2 + $0x8] sm:$0xff] }
 0x142   : > { %v1401_v63 = vmul.f32 %v6542_v46, %v1372_v59  ;;  %v1402_v5 = vmul.f32 %v6544_v47, %v1388_v4  ;;  %v1399_v2 = vmul.f32 %v6542_v46, %v1371_v1  ;;  %v1400_v9 = vmul.f32 %v6544_v47, %v1387_v62  ;;  %v1408_v1 = vld [vmem:[#allocation5 + $0xf0] sm:$0xff]  ;;  %1634 = vperm.xlu0 %5633, %v1624_v58  }
 0x143   : > { %v1489_v62 = vpop.permute.xlu2 %1488 }
 0x144   : > { %1435 = vmatpush.msrb.mxu2 %v1401_v63  ;;  %1464 = vmatpush.msrb.mxu3 %v1402_v5 }
 0x145   : > { %5351 = vmatmul.msk.f32.gmra.mxu2 %vm574_vm1, %v1139_v8  ;;  %5355 = vmatmul.msk.f32.gmra.mxu3 %vm574_vm1, %v1139_v8 }
 0x146   : > { %1436 = vmatpush.msrb.mxu2 %v1399_v2  ;;  %1465 = vmatpush.msrb.mxu3 %v1400_v9 }
 0x147   : > { %5359 = vmatmul.msk.f32.gmra.mxu0 %vm574_vm1, %v1273_v12  ;;  %5363 = vmatmul.msk.f32.gmra.mxu1 %vm574_vm1, %v1273_v12 }
 0x148   : > { %v1354_v13 = vpop.permute.xlu0 %1353  ;;  %v1356_v14 = vpop.permute.xlu1 %1355 }
 0x149   : > { %v1370_v18 = vsel %vm8189_vm7, %v1354_v13, %v1356_v14  ;;  %v1386_v19 = vsel %vm8189_vm7, %v1356_v14, %v1354_v13  ;;  %v6573_v20 = vpop.f32.mrf.mxu0  ;;  %v6575_v22 = vpop.f32.mrf.mxu1  ;;  %v1541_v13 = vld [vmem:[#allocation5 + $0x100] sm:$0xff] }
 0x14a   : > { %v1397_v21 = vmul.f32 %v6542_v46, %v1370_v18  ;;  %v1398_v23 = vmul.f32 %v6544_v47, %v1386_v19  ;;  %v1542_v18 = vld [vmem:[#allocation5 + $0x108] sm:$0xff] }
 0x14c   : > { %1437 = vmatpush.msrb.mxu2 %v1397_v21  ;;  %1466 = vmatpush.msrb.mxu3 %v1398_v23 }
 0x14d   : > { %5366 = vmatmul.msk.f32.vlgmr.msrb.gmra.mxu2 %vm574_vm1, %v1406_v24  ;;  %5370 = vmatmul.msk.f32.vlgmr.msrb.gmra.mxu3 %vm574_vm1, %v1406_v24 }
 0x14f   : > { %5360 = vmatmul.msk.f32.gmra.mxu0 %vm574_vm1, %v1274_v26  ;;  %5364 = vmatmul.msk.f32.gmra.mxu1 %vm574_vm1, %v1274_v26  ;;  %v1625_v26 = vld [vmem:[%s8136_s2 + $0x10] sm:$0xff] }
 0x150   : > { %v1503_v31 = vpop.permute.xlu0 %1502  ;;  %v1497_v34 = vpop.permute.xlu1 %1496  ;;  %1639 = vperm.xlu2 %5632, %v1625_v26  }
 0x151   : > { %v1508_v35 = vsel %vm8188_vm8, %v1501_v7, %v1503_v31  ;;  %v1524_v36 = vsel %vm8188_vm8, %v1503_v31, %v1501_v7  ;;  %v1507_v39 = vsel %vm8188_vm8, %v1497_v34, %v1499_v29  ;;  %v1523_v40 = vsel %vm8188_vm8, %v1499_v29, %v1497_v34  ;;  %v1544_v31 = vld [vmem:[#allocation5 + $0x118] sm:$0xff] }
 0x152   : > { %v1538_v43 = vmul.f32 %v6584_v27, %v1508_v35  ;;  %v1539_v44 = vmul.f32 %v6586_v28, %v1524_v36  ;;  %v6599_v45 = vpop.f32.mrf.mxu0  ;;  %v6601_v48 = vpop.f32.mrf.mxu1  ;;  %v1536_v50 = vmul.f32 %v6584_v27, %v1507_v39  ;;  %v1537_v51 = vmul.f32 %v6586_v28, %v1523_v40 }
 0x154   : > { %1569 = vmatpush.msrb.mxu0 %v1538_v43  ;;  %1598 = vmatpush.msrb.mxu1 %v1539_v44 }
 0x155   : > { %5367 = vmatmul.msk.f32.gmra.mxu2 %vm574_vm1, %v1407_v49  ;;  %5371 = vmatmul.msk.f32.gmra.mxu3 %vm574_vm1, %v1407_v49 }
 0x156   : > { %1570 = vmatpush.msrb.mxu0 %v1536_v50  ;;  %1599 = vmatpush.msrb.mxu1 %v1537_v51 }
 0x159   : > { %v1493_v52 = vpop.permute.xlu0 %1492  ;;  %v1495_v53 = vpop.permute.xlu1 %1494 }
 0x15a   : > { %v1506_v56 = vsel %vm8188_vm8, %v1493_v52, %v1495_v53  ;;  %v1522_v57 = vsel %vm8188_vm8, %v1495_v53, %v1493_v52  ;;  %v6609_v3 = vpop.f32.mrf.mxu0  ;;  %v6611_v0 = vpop.f32.mrf.mxu1 }
 0x15b   : > { %v1534_v59 = vmul.f32 %v6584_v27, %v1506_v56  ;;  %v1535_v4 = vmul.f32 %v6586_v28, %v1522_v57 }
 0x15d   : > { %1571 = vmatpush.msrb.mxu0 %v1534_v59  ;;  %1600 = vmatpush.msrb.mxu1 %v1535_v4 }
 0x15e   : > { %5368 = vmatmul.msk.f32.gmra.mxu2 %vm574_vm1, %v1408_v1  ;;  %5372 = vmatmul.msk.f32.gmra.mxu3 %vm574_vm1, %v1408_v1 }
 0x161   : > { %v1491_v63 = vpop.permute.xlu0 %1490 }
 0x162   : > { %v1505_v5 = vsel %vm8188_vm8, %v1489_v62, %v1491_v63  ;;  %v1521_v8 = vsel %vm8188_vm8, %v1491_v63, %v1489_v62  ;;  %v6622_v2 = vpop.f32.mrf.mxu0  ;;  %v6624_v9 = vpop.f32.mrf.mxu1 }
 0x163   : > { %v1532_v12 = vmul.f32 %v6584_v27, %v1505_v5  ;;  %v1533_v7 = vmul.f32 %v6586_v28, %v1521_v8 }
 0x165   : > { %1572 = vmatpush.msrb.mxu0 %v1532_v12  ;;  %1601 = vmatpush.msrb.mxu1 %v1533_v7 }
 0x166   : > { %5369 = vmatmul.msk.f32.gmra.mxu2 %vm574_vm1, %v1409_v6  ;;  %5373 = vmatmul.msk.f32.gmra.mxu3 %vm574_vm1, %v1409_v6 }
 0x167   : > { %5375 = vmatmul.msk.f32.vlgmr.msrb.gmra.mxu0 %vm574_vm1, %v1541_v13  ;;  %5379 = vmatmul.msk.f32.vlgmr.msrb.gmra.mxu1 %vm574_vm1, %v1541_v13 }
 0x169   : > { %v6634_v19 = vpop.f32.mrf.mxu2  ;;  %v6636_v21 = vpop.f32.mrf.mxu3 }
 0x16a   : > { %v674_v14 = vpop.f32.mrf.mxu0  ;;  %v703_v17 = vpop.f32.mrf.mxu1 }
 0x16b   : > { %v675_v55 = vadd.f32 %v674_v14, %v6573_v20  ;;  %v704_v54 = vadd.f32 %v703_v17, %v6575_v22  ;;  %v707_v20 = vadd.f32 %v6636_v21, %v6601_v48 }
 0x16f   : > { %5376 = vmatmul.msk.f32.gmra.mxu0 %vm574_vm1, %v1542_v18  ;;  %5380 = vmatmul.msk.f32.gmra.mxu1 %vm574_vm1, %v1542_v18 }
 0x171   : > { %v6643_v34 = vpop.f32.mrf.mxu2  ;;  %v6645_v35 = vpop.f32.mrf.mxu3 }
 0x172   : > { %v681_v48 = vadd.f32 %v6643_v34, %v6609_v3 }
 0x174   : > { %v801_v23 = vpop.f32.mrf.mxu0  ;;  %v830_v24 = vpop.f32.mrf.mxu1 }
 0x175   : > { %v842_v38 = vadd.f32 %v801_v23, %v675_v55  ;;  %v843_v42 = vadd.f32 %v830_v24, %v704_v54 }
 0x177   : > { %5377 = vmatmul.msk.f32.gmra.mxu0 %vm574_vm1, %v1543_v25  ;;  %5381 = vmatmul.msk.f32.gmra.mxu1 %vm574_vm1, %v1543_v25 }
 0x179   : > { %v6653_v40 = vpop.f32.mrf.mxu2  ;;  %v6655_v43 = vpop.f32.mrf.mxu3 }
 0x17c   : > { %v804_v29 = vpop.f32.mrf.mxu0  ;;  %v833_v30 = vpop.f32.mrf.mxu1 }
 0x17f   : > { %5378 = vmatmul.msk.f32.gmra.mxu0 %vm574_vm1, %v1544_v31  ;;  %5382 = vmatmul.msk.f32.gmra.mxu1 %vm574_vm1, %v1544_v31 }
 0x184   : > { %v6649_v36 = vpop.f32.mrf.mxu0  ;;  %v6651_v39 = vpop.f32.mrf.mxu1 }
 0x18c   : > { %v6657_v44 = vpop.f32.mrf.mxu0  ;;  %v6659_v49 = vpop.f32.mrf.mxu1 }
 0x18f   : > { %v936_v50 = vpop.f32.mrf.mxu2  ;;  %v965_v51 = vpop.f32.mrf.mxu3 }
 0x190   : > { %v977_v37 = vadd.f32 %v936_v50, %v842_v38  ;;  %v978_v11 = vadd.f32 %v965_v51, %v843_v42  ;;  %v845_v38 = vadd.f32 %v833_v30, %v707_v20 }
 0x194   : > { %v1034_v52 = vpop.f32.mrf.mxu0  ;;  %v1063_v53 = vpop.f32.mrf.mxu1 }
 0x197   : > { %v939_v56 = vpop.f32.mrf.mxu2  ;;  %v968_v57 = vpop.f32.mrf.mxu3 }
 0x198   : > { %v980_v23 = vadd.f32 %v968_v57, %v845_v38 }
 0x19c   : > { %v1037_v58 = vpop.f32.mrf.mxu0  ;;  %v1066_v4 = vpop.f32.mrf.mxu1 }
 0x19d   : > { %v6693_v16 = vpop.permute.xlu1 %1644 }
 0x19e   : > { %8227 = vst [vmem:[#allocation39_spill] sm:$0xff] %v6693_v16 }
 0x19f   : > { %v6661_v59 = vpop.f32.mrf.mxu2  ;;  %v6663_v1 = vpop.f32.mrf.mxu3 }
 0x1a4   : > { %v6667_v63 = vpop.f32.mrf.mxu0  ;;  %v6669_v5 = vpop.f32.mrf.mxu1 }
 0x1a7   : > { %v6665_v62 = vpop.f32.mrf.mxu2  ;;  %v6671_v8 = vpop.f32.mrf.mxu3 }
 0x1a8   : > { %8223 = vst [vmem:[#allocation35_spill] sm:$0xff] %v6671_v8  ;;  %v1076_v8 = vadd.f32 %v1063_v53, %v978_v11 }
 0x1ac   : > { %v6673_v7 = vpop.f32.mrf.mxu0  ;;  %v6675_v6 = vpop.f32.mrf.mxu1 }
 0x1ad   : > { %8224 = vst [vmem:[#allocation36_spill] sm:$0xff] %v6675_v6 }
 0x1af   : > { %v1169_v12 = vpop.f32.mrf.mxu2  ;;  %v1198_v13 = vpop.f32.mrf.mxu3 }
 0x1b0   : > { %v1211_v54 = vadd.f32 %v1198_v13, %v1076_v8 }
 0x1b4   : > { %v1304_v25 = vpop.f32.mrf.mxu0  ;;  %v1333_v26 = vpop.f32.mrf.mxu1 }
 0x1b5   : > { %v1346_v14 = vadd.f32 %v1333_v26, %v1211_v54 }
 0x1b7   : > { %v1172_v18 = vpop.f32.mrf.mxu2  ;;  %v1201_v31 = vpop.f32.mrf.mxu3 }
 0x1bc   : > { %v1307_v27 = vpop.f32.mrf.mxu0  ;;  %v1336_v47 = vpop.f32.mrf.mxu1 }
 0x1c0   : > { %v6677_v28 = vpop.f32.mrf.mxu2  ;;  %v6679_v46 = vpop.f32.mrf.mxu3 }
 0x1c4   : > { %v6683_v32 = vpop.f32.mrf.mxu0  ;;  %v6685_v61 = vpop.f32.mrf.mxu1 }
 0x1c8   : > { %v6681_v33 = vpop.f32.mrf.mxu2  ;;  %v6687_v60 = vpop.f32.mrf.mxu3 }
 0x1c9   : > { %8225 = vst [vmem:[#allocation37_spill] sm:$0xff] %v6681_v33  ;;  %v1075_v33 = vadd.f32 %v1034_v52, %v977_v37  ;;  %v1078_v52 = vadd.f32 %v1066_v4, %v980_v23 }
 0x1ca   : > { %8226 = vst [vmem:[#allocation38_spill] sm:$0xff] %v6687_v60  ;;  %v678_v60 = vadd.f32 %v6634_v19, %v6599_v45  ;;  %v1630_v19 = vpop.permute.xlu1 %1629 }
 0x1cb   : > { %v1210_v55 = vadd.f32 %v1169_v12, %v1075_v33  ;;  %v710_v33 = vadd.f32 %v6645_v35, %v6611_v0 }
 0x1cc   : > { %v6691_v10 = vpop.f32.mrf.mxu0  ;;  %v6695_v15 = vpop.f32.mrf.mxu1  ;;  %v844_v22 = vadd.f32 %v804_v29, %v678_v60  ;;  %v1213_v29 = vadd.f32 %v1201_v31, %v1078_v52 }
 0x1cd   : > { %v1345_v42 = vadd.f32 %v1304_v25, %v1210_v55  ;;  %v847_v57 = vadd.f32 %v6651_v39, %v710_v33 }
 0x1ce   : > { %v979_v17 = vadd.f32 %v939_v56, %v844_v22  ;;  %v846_v56 = vadd.f32 %v6649_v36, %v681_v48  ;;  %v1348_v4 = vadd.f32 %v1336_v47, %v1213_v29  ;;  %v1635_v36 = vpop.permute.xlu0 %1634 }
 0x1cf   : > { %v982_v0 = vadd.f32 %v6663_v1, %v847_v57 }
 0x1d0   : > { %v1439_v41 = vpop.f32.mrf.mxu2  ;;  %v1468_v6 = vpop.f32.mrf.mxu3  ;;  %v1077_v11 = vadd.f32 %v1037_v58, %v979_v17  ;;  %v981_v3 = vadd.f32 %v6661_v59, %v846_v56  ;;  %v684_v59 = vadd.f32 %v6653_v40, %v6622_v2  ;;  %v713_v2 = vadd.f32 %v6655_v43, %v6624_v9  ;;  %v8228_v9 = vld [vmem:[#allocation35_spill] sm:$0xff] }
 0x1d1   : > { %v1480_v24 = vadd.f32 %v1439_v41, %v1345_v42  ;;  %v1481_v50 = vadd.f32 %v1468_v6, %v1346_v14  ;;  %v1080_v12 = vadd.f32 %v6669_v5, %v982_v0 }
 0x1d2   : > { %v1212_v21 = vadd.f32 %v1172_v18, %v1077_v11  ;;  %v1079_v47 = vadd.f32 %v6667_v63, %v981_v3  ;;  %v848_v20 = vadd.f32 %v6657_v44, %v684_v59  ;;  %v849_v38 = vadd.f32 %v6659_v49, %v713_v2  ;;  %v8231_v49 = vld [vmem:[#allocation38_spill] sm:$0xff] }
 0x1d3   : > { %v1215_v25 = vadd.f32 %v6679_v46, %v1080_v12 }
 0x1d4   : > { %v1347_v58 = vadd.f32 %v1307_v27, %v1212_v21  ;;  %v1214_v18 = vadd.f32 %v6677_v28, %v1079_v47  ;;  %v983_v28 = vadd.f32 %v6665_v62, %v848_v20  ;;  %v984_v43 = vadd.f32 %v8228_v9, %v849_v38  ;;  %v8229_v62 = vld [vmem:[#allocation37_spill] sm:$0xff]  ;;  %v8234_v20 = vld [vmem:[#allocation18_spill] sm:$0xff] }
 0x1d5   : > { %v1350_v63 = vadd.f32 %v6685_v61, %v1215_v25  ;;  %v1764_v9 = vld [vmem:[#allocation7 + $0x20] sm:$0xff] }
 0x1d6   : > { %v1349_v54 = vadd.f32 %v6683_v32, %v1214_v18  ;;  %v1640_v32 = vpop.permute.xlu2 %1639  ;;  %v1081_v42 = vadd.f32 %v6673_v7, %v983_v28 }
 0x1d8   : > { %v1442_v51 = vpop.f32.mrf.mxu2  ;;  %v1471_v60 = vpop.f32.mrf.mxu3  ;;  %v1216_v23 = vadd.f32 %v8229_v62, %v1081_v42 }
 0x1d9   : > { %v1482_v34 = vadd.f32 %v1442_v51, %v1347_v58  ;;  %v1483_v35 = vadd.f32 %v1471_v60, %v1348_v4 }
 0x1da   : > { %v1351_v52 = vadd.f32 %v6691_v10, %v1216_v23 }
 0x1e1   : > { %v1445_v1 = vpop.f32.mrf.mxu2  ;;  %v1474_v55 = vpop.f32.mrf.mxu3 }
 0x1e2   : > { %v1484_v40 = vadd.f32 %v1445_v1, %v1349_v54  ;;  %v1485_v46 = vadd.f32 %v1474_v55, %v1350_v63 }
 0x1e4   : > { %v1603_v16 = vpop.f32.mrf.mxu1  ;;  %v1574_v37 = vpop.f32.mrf.mxu0 }
 0x1e5   : > { %v1616_v53 = vadd.f32 %v1603_v16, %v1481_v50  ;;  %v1615_v45 = vadd.f32 %v1574_v37, %v1480_v24  ;;  %v8230_v37 = vld [vmem:[#allocation36_spill] sm:$0xff] }
 0x1e6   : > { %v1082_v11 = vadd.f32 %v8230_v37, %v984_v43 }
 0x1e7   : > { %v1648_v30 = vadd.f32 %v1630_v19, %v1616_v53  ;;  %v1647_v41 = vadd.f32 %v1630_v19, %v1615_v45 }
 0x1e8   : > { %v1217_v48 = vadd.f32 %v8231_v49, %v1082_v11  ;;  %v2764_v49 = vld [vmem:[%s8138_s4 + $0x18] sm:$0xff] }
 0x1e9   : > { %v6707_v16 = vmax.f32 %v1648_v30, 0.0  ;;  %v6709_v8 = vmax.f32 %v1647_v41, 0.0  ;;  %v1448_v51 = vpop.f32.mrf.mxu2  ;;  %v1477_v33 = vpop.f32.mrf.mxu3  ;;  %v8232_v30 = vld [vmem:[#allocation39_spill] sm:$0xff] }
 0x1ea   : > { %v1486_v7 = vadd.f32 %v1448_v51, %v1351_v52  ;;  %v1352_v10 = vadd.f32 %v6695_v15, %v1217_v48  ;;  %v1766_v52 = vld [vmem:[#allocation7 + $0x30] sm:$0xff] }
 0x1eb   : > { %1719 = vrot.lane.b32.xlu0 %v6707_v16, %s5904_s19  ;;  %1731 = vrot.lane.b32.xlu1 %v6709_v8, %s5904_s19 }
 0x1ec   : > { %v1577_v39 = vpop.f32.mrf.mxu0  ;;  %v1606_v27 = vpop.f32.mrf.mxu1  ;;  %v1487_v29 = vadd.f32 %v1477_v33, %v1352_v10 }
 0x1ed   : > { %v1617_v6 = vadd.f32 %v1577_v39, %v1482_v34  ;;  %v1618_v13 = vadd.f32 %v1606_v27, %v1483_v35 }
 0x1ef   : > { %v1649_v26 = vadd.f32 %v1635_v36, %v1617_v6  ;;  %v1650_v31 = vadd.f32 %v1635_v36, %v1618_v13 }
 0x1f1   : > { %v6726_v5 = vmax.f32 %v1649_v26, 0.0  ;;  %v6728_v22 = vmax.f32 %v1650_v31, 0.0  ;;  %v8233_v26 = vld [vmem:[#allocation17_spill] sm:$0xff] }
 0x1f3   : > { %1721 = vrot.lane.b32.xlu1 %v6728_v22, %s5904_s19  ;;  %1733 = vrot.lane.b32.xlu2 %v6726_v5, %s5904_s19 }
 0x1f4   : > { %v1580_v44 = vpop.f32.mrf.mxu0  ;;  %v1609_v61 = vpop.f32.mrf.mxu1 }
 0x1f5   : > { %v1619_v14 = vadd.f32 %v1580_v44, %v1484_v40  ;;  %v1620_v17 = vadd.f32 %v1609_v61, %v1485_v46 }
 0x1f7   : > { %v1651_v24 = vadd.f32 %v1640_v32, %v1619_v14  ;;  %v1652_v50 = vadd.f32 %v1640_v32, %v1620_v17 }
 0x1f9   : > { %v6743_v53 = vmax.f32 %v1651_v24, 0.0  ;;  %v6745_v45 = vmax.f32 %v1652_v50, 0.0  ;;  %v1765_v50 = vld [vmem:[#allocation7 + $0x28] sm:$0xff] }
 0x1fb   : > { %1912 = vrot.lane.b32.xlu1 %v6745_v45, %s5906_s22  ;;  %1723 = vrot.lane.b32.xlu2 %v6745_v45, %s5904_s19 }
 0x1fc   : > { %1735 = vrot.lane.b32.xlu0 %v6743_v53, %s5904_s19  ;;  %v1583_v60 = vpop.f32.mrf.mxu0  ;;  %v1612_v21 = vpop.f32.mrf.mxu1 }
 0x1fd   : > { %v1621_v19 = vadd.f32 %v1583_v60, %v1486_v7  ;;  %v1622_v57 = vadd.f32 %v1612_v21, %v1487_v29  ;;  %v1767_v60 = vld [vmem:[#allocation7 + $0x38] sm:$0xff] }
 0x1ff   : > { %v1653_v41 = vadd.f32 %v8232_v30, %v1621_v19  ;;  %v1654_v58 = vadd.f32 %v8232_v30, %v1622_v57  ;;  %v8235_v30 = vld [vmem:[#allocation21_spill] sm:$0xff]  ;;  %v8236_v57 = vld [vmem:[#allocation22_spill] sm:$0xff] }
 0x201   : > { %v6756_v56 = vmax.f32 %v1653_v41, 0.0  ;;  %v6765_v15 = vmax.f32 %v1654_v58, 0.0 }
 0x203   : > { %1924 = vrot.lane.b32.xlu2 %v6743_v53, %s5906_s22  ;;  %1737 = vrot.lane.b32.xlu1 %v6756_v56, %s5904_s19 }
 0x204   : > { %1922 = vrot.lane.b32.xlu0 %v6726_v5, %s5906_s22 }
 0x20b   : > { %1725 = vrot.lane.b32.xlu2 %v6765_v15, %s5904_s19  ;;  %1671 = vrot.lane.b32.xlu1 %v6745_v45, %s5905_s24 }
 0x20c   : > { %1908 = vrot.lane.b32.xlu0 %v6707_v16, %s5906_s22 }
 0x213   : > { %1910 = vrot.lane.b32.xlu2 %v6728_v22, %s5906_s22  ;;  %1920 = vrot.lane.b32.xlu1 %v6709_v8, %s5906_s22 }
 0x214   : > { %1685 = vrot.lane.b32.xlu0 %v6726_v5, %s5905_s24 }
 0x21b   : > { %1687 = vrot.lane.b32.xlu2 %v6743_v53, %s5905_s24  ;;  %1667 = vrot.lane.b32.xlu1 %v6707_v16, %s5905_s24 }
 0x21c   : > { %2051 = vrot.lane.b32.xlu0 %v6743_v53, %s5907_s21 }
 0x223   : > { %1669 = vrot.lane.b32.xlu2 %v6728_v22, %s5905_s24  ;;  %1689 = vrot.lane.b32.xlu1 %v6756_v56, %s5905_s24 }
 0x224   : > { %1926 = vrot.lane.b32.xlu0 %v6756_v56, %s5906_s22 }
 0x22b   : > { %1914 = vrot.lane.b32.xlu2 %v6765_v15, %s5906_s22  ;;  %2037 = vrot.lane.b32.xlu1 %v6728_v22, %s5907_s21 }
 0x22c   : > { %1673 = vrot.lane.b32.xlu0 %v6765_v15, %s5905_s24 }
 0x233   : > { %1683 = vrot.lane.b32.xlu2 %v6709_v8, %s5905_s24  ;;  %2047 = vrot.lane.b32.xlu1 %v6709_v8, %s5907_s21 }
 0x234   : > { %2035 = vrot.lane.b32.xlu0 %v6707_v16, %s5907_s21 }
 0x23b   : > { %2039 = vrot.lane.b32.xlu2 %v6745_v45, %s5907_s21  ;;  %2388 = vrot.lane.b32.xlu1 %v6743_v53, %s5909_s29 }
 0x23c   : > { %2386 = vrot.lane.b32.xlu0 %v6728_v22, %s5909_s29 }
 0x243   : > { %2049 = vrot.lane.b32.xlu2 %v6726_v5, %s5907_s21  ;;  %2053 = vrot.lane.b32.xlu1 %v6756_v56, %s5907_s21 }
 0x244   : > { %2041 = vrot.lane.b32.xlu0 %v6765_v15, %s5907_s21 }
 0x24b   : > { %2390 = vrot.lane.b32.xlu2 %v6745_v45, %s5909_s29  ;;  %2261 = vrot.lane.b32.xlu1 %v6743_v53, %s5908_s1 }
 0x24c   : > { %2380 = vrot.lane.b32.xlu0 %v6709_v8, %s5909_s29 }
 0x24d   : > { %v1734_v4 = vpop.permute.xlu2 %1733 }
 0x253   : > { %2384 = vrot.lane.b32.xlu2 %v6726_v5, %s5909_s29  ;;  %2382 = vrot.lane.b32.xlu1 %v6707_v16, %s5909_s29 }
 0x254   : > { %2259 = vrot.lane.b32.xlu0 %v6728_v22, %s5908_s1 }
 0x255   : > { %v1724_v3 = vpop.permute.xlu2 %1723 }
 0x25b   : > { %2263 = vrot.lane.b32.xlu2 %v6745_v45, %s5908_s1  ;;  %2253 = vrot.lane.b32.xlu1 %v6709_v8, %s5908_s1 }
 0x25c   : > { %2644 = vrot.lane.b32.xlu0 %v6745_v45, %s8186_s25 }
 0x25d   : > { %v1732_v0 = vpop.permute.xlu1 %1731  ;;  %v6833_v34 = vpop.permute.xlu2 %1924 }
 0x25e   : > { %v1720_v36 = vpop.permute.xlu0 %1719 }
 0x25f   : > { %v1751_v40 = vsel %vm537_vm0, %v1720_v36, %v1732_v0  ;;  %v1739_v32 = vsel %vm537_vm0, %v1732_v0, %v1720_v36  ;;  %v2762_v0 = vld [vmem:[%s8138_s4 + $0x8] sm:$0xff] }
 0x260   : > { %v1755_v17 = vmul.f32 %v1751_v40, %v8233_v26  ;;  %v1756_v43 = vmul.f32 %v1739_v32, %v8234_v20  ;;  %v8239_v40 = vld [vmem:[#allocation20_spill] sm:$0xff] }
 0x263   : > { %2257 = vrot.lane.b32.xlu2 %v6726_v5, %s5908_s1  ;;  %2267 = vrot.lane.b32.xlu1 %v6765_v15, %s5908_s1 }
 0x264   : > { %2394 = vrot.lane.b32.xlu0 %v6765_v15, %s5909_s29 }
 0x265   : > { %v1722_v35 = vpop.permute.xlu1 %1721  ;;  %v1726_v39 = vpop.permute.xlu2 %1725 }
 0x266   : > { %v1752_v63 = vsel %vm537_vm0, %v1722_v35, %v1734_v4  ;;  %v1740_v2 = vsel %vm537_vm0, %v1734_v4, %v1722_v35  ;;  %v2761_v4 = vld [vmem:[%s8138_s4] sm:$0xff] }
 0x267   : > { %v1757_v44 = vmul.f32 %v1752_v63, %v8233_v26  ;;  %v1758_v61 = vmul.f32 %v1740_v2, %v8234_v20  ;;  %v8238_v2 = vld [vmem:[#allocation19_spill] sm:$0xff] }
 0x26b   : > { %2392 = vrot.lane.b32.xlu2 %v6756_v56, %s5909_s29  ;;  %2640 = vrot.lane.b32.xlu1 %v6728_v22, %s8186_s25 }
 0x26c   : > { %2265 = vrot.lane.b32.xlu0 %v6756_v56, %s5908_s1 }
 0x26d   : > { %v6847_v27 = vpop.permute.xlu1 %1912  ;;  %v6849_v47 = vpop.permute.xlu2 %1910 }
 0x26e   : > { %v1736_v12 = vpop.permute.xlu0 %1735  ;;  %v1942_v10 = vsel %vm735_vm3, %v6847_v27, %v6833_v34  ;;  %v1930_v29 = vsel %vm735_vm3, %v6833_v34, %v6847_v27 }
 0x26f   : > { %v1753_v25 = vsel %vm537_vm0, %v1724_v3, %v1736_v12  ;;  %v1741_v54 = vsel %vm537_vm0, %v1736_v12, %v1724_v3  ;;  %v1948_v35 = vmul.f32 %v1942_v10, %v8235_v30  ;;  %v1955_v10 = vld [vmem:[#allocation7 + $0x50] sm:$0xff] }
 0x270   : > { %v1759_v28 = vmul.f32 %v1753_v25, %v8233_v26  ;;  %v1760_v46 = vmul.f32 %v1741_v54, %v8234_v20  ;;  %v8237_v25 = vld [vmem:[#allocation23_spill] sm:$0xff] }
 0x273   : > { %2255 = vrot.lane.b32.xlu2 %v6707_v16, %s5908_s1  ;;  %2634 = vrot.lane.b32.xlu1 %v6709_v8, %s8186_s25 }
 0x274   : > { %2638 = vrot.lane.b32.xlu0 %v6726_v5, %s8186_s25 }
 0x275   : > { %v1738_v6 = vpop.permute.xlu1 %1737  ;;  %v6857_v13 = vpop.permute.xlu2 %1687 }
 0x276   : > { %v6859_v59 = vpop.permute.xlu0 %1922  ;;  %v1742_v1 = vsel %vm537_vm0, %v1738_v6, %v1726_v39  ;;  %v1754_v18 = vsel %vm537_vm0, %v1726_v39, %v1738_v6  ;;  %v1949_v39 = vmul.f32 %v1930_v29, %v8236_v57 }
 0x277   : > { %v1761_v31 = vmul.f32 %v1754_v18, %v8233_v26  ;;  %v1762_v55 = vmul.f32 %v1742_v1, %v8234_v20  ;;  %v1941_v3 = vsel %vm735_vm3, %v6849_v47, %v6859_v59  ;;  %v1929_v34 = vsel %vm735_vm3, %v6859_v59, %v6849_v47 }
 0x278   : > { %v1946_v12 = vmul.f32 %v1941_v3, %v8235_v30  ;;  %v1947_v47 = vmul.f32 %v1929_v34, %v8236_v57  ;;  %v2168_v26 = vmul.f32 %v6756_v56, %v8237_v25 }
 0x279   : > { %1792 = vmatpush.msra.mxu2 %v1761_v31  ;;  %1821 = vmatpush.msra.mxu3 %v1762_v55 }
 0x27b   : > { %2642 = vrot.lane.b32.xlu2 %v6743_v53, %s8186_s25  ;;  %2648 = vrot.lane.b32.xlu1 %v6765_v15, %s8186_s25 }
 0x27c   : > { %2517 = vrot.lane.b32.xlu0 %v6745_v45, %s5910_s18  ;;  %1793 = vmatpush.msra.mxu2 %v1759_v28 }
 0x27d   : > { %1822 = vmatpush.msra.mxu3 %v1760_v46  ;;  %v6881_v38 = vpop.permute.xlu1 %1671  ;;  %v6883_v42 = vpop.permute.xlu2 %1669 }
 0x27e   : > { %v1909_v14 = vpop.permute.xlu0 %1908  ;;  %1794 = vmatpush.msra.mxu2 %v1757_v44  ;;  %v1705_v31 = vsel %vm482_vm2, %v6881_v38, %v6857_v13  ;;  %v1693_v63 = vsel %vm482_vm2, %v6857_v13, %v6881_v38  ;;  %v2166_v44 = vmul.f32 %v6743_v53, %v8237_v25 }
 0x27f   : > { %1823 = vmatpush.msra.mxu3 %v1758_v61  ;;  %v2763_v61 = vld [vmem:[%s8138_s4 + $0x10] sm:$0xff]  ;;  %v1711_v38 = vmul.f32 %v1705_v31, %v8238_v2 }
 0x280   : > { %1795 = vmatpush.msra.mxu2 %v1755_v17  ;;  %v1953_v17 = vld [vmem:[#allocation7 + $0x40] sm:$0xff] }
 0x281   : > { %1824 = vmatpush.msra.mxu3 %v1756_v43  ;;  %5383 = vmatmul.msk.f32.vlgmr.msra.gmra.mxu2 %vm574_vm1, %v1764_v9 }
 0x282   : > { %5387 = vmatmul.msk.f32.vlgmr.msra.gmra.mxu3 %vm574_vm1, %v1764_v9 }
 0x283   : > { %2515 = vrot.lane.b32.xlu2 %v6743_v53, %s5910_s18  ;;  %2519 = vrot.lane.b32.xlu1 %v6756_v56, %s5910_s18  ;;  %v1712_v53 = vmul.f32 %v1693_v63, %v8239_v40 }
 0x284   : > { %2646 = vrot.lane.b32.xlu0 %v6756_v56, %s8186_s25  ;;  %v8240_v56 = vld [vmem:[#allocation24_spill] sm:$0xff] }
 0x285   : > { %v1921_v62 = vpop.permute.xlu1 %1920  ;;  %v1915_v23 = vpop.permute.xlu2 %1914  ;;  %v2169_v32 = vmul.f32 %v6765_v15, %v8240_v56  ;;  %v2167_v13 = vmul.f32 %v6745_v45, %v8240_v56  ;;  %v2164_v45 = vmul.f32 %v6726_v5, %v8237_v25 }
 0x286   : > { %v6895_v24 = vpop.permute.xlu0 %1685  ;;  %v1940_v36 = vsel %vm735_vm3, %v1909_v14, %v1921_v62  ;;  %v1928_v27 = vsel %vm735_vm3, %v1921_v62, %v1909_v14 }
 0x287   : > { %v1944_v18 = vmul.f32 %v1940_v36, %v8235_v30  ;;  %v1945_v54 = vmul.f32 %v1928_v27, %v8236_v57  ;;  %v1704_v14 = vsel %vm482_vm2, %v6883_v42, %v6895_v24 }
 0x289   : > { %5384 = vmatmul.msk.f32.gmra.mxu2 %vm574_vm1, %v1765_v50 }
 0x28a   : > { %5388 = vmatmul.msk.f32.gmra.mxu3 %vm574_vm1, %v1765_v50 }
 0x28b   : > { %2636 = vrot.lane.b32.xlu2 %v6707_v16, %s8186_s25  ;;  %2513 = vrot.lane.b32.xlu1 %v6728_v22, %s5910_s18  ;;  %s5916_s25 = smov 50  }
 0x28c   : > { %2511 = vrot.lane.b32.xlu0 %v6726_v5, %s5910_s18 }
 0x28d   : > { %v6905_v51 = vpop.permute.xlu1 %1667  ;;  %v6907_v37 = vpop.permute.xlu2 %1683 }
 0x28e   : > { %v6909_v11 = vpop.permute.xlu0 %2051  ;;  %v1691_v9 = vsel %vm482_vm2, %v6907_v37, %v6905_v51  ;;  %v1703_v43 = vsel %vm482_vm2, %v6905_v51, %v6907_v37  ;;  %v2162_v51 = vmul.f32 %v6709_v8, %v8237_v25 }
 0x28f   : > { %v1707_v37 = vmul.f32 %v1703_v43, %v8238_v2 }
 0x291   : > { %5385 = vmatmul.msk.f32.gmra.mxu2 %vm574_vm1, %v1766_v52 }
 0x292   : > { %5389 = vmatmul.msk.f32.gmra.mxu3 %vm574_vm1, %v1766_v52  ;;  %v1708_v52 = vmul.f32 %v1691_v9, %v8239_v40  ;;  %v8243_v9 = vld [vmem:[#allocation29_spill] sm:$0xff] }
 0x293   : > { %2521 = vrot.lane.b32.xlu2 %v6765_v15, %s5910_s18  ;;  %2782 = vperm.xlu1 %5631, %v2764_v49   ;;  %v1692_v15 = vsel %vm482_vm2, %v6895_v24, %v6883_v42  ;;  %v2165_v42 = vmul.f32 %v6728_v22, %v8240_v56  ;;  %v1709_v24 = vmul.f32 %v1704_v14, %v8238_v2  ;;  %v1715_v49 = vld [vmem:[#allocation7] sm:$0xff] }
 0x294   : > { %2509 = vrot.lane.b32.xlu0 %v6707_v16, %s5910_s18  ;;  %v1710_v50 = vmul.f32 %v1692_v15, %v8239_v40  ;;  %v2163_v22 = vmul.f32 %v6707_v16, %v8240_v56 }
 0x295   : > { %v1690_v48 = vpop.permute.xlu1 %1689  ;;  %v6920_v7 = vpop.permute.xlu2 %2039 }
 0x296   : > { %v1927_v33 = vpop.permute.xlu0 %1926 }
 0x297   : > { %v1931_v19 = vsel %vm735_vm3, %v1927_v33, %v1915_v23  ;;  %v1943_v21 = vsel %vm735_vm3, %v1915_v23, %v1927_v33 }
 0x298   : > { %v1950_v41 = vmul.f32 %v1943_v21, %v8235_v30  ;;  %v1951_v58 = vmul.f32 %v1931_v19, %v8236_v57  ;;  %v2069_v21 = vsel %vm870_vm4, %v6920_v7, %v6909_v11 }
 0x299   : > { %5386 = vmatmul.msk.f32.gmra.mxu2 %vm574_vm1, %v1767_v60 }
 0x29a   : > { %1981 = vmatpush.msrb.mxu2 %v1950_v41  ;;  %2010 = vmatpush.msrb.mxu3 %v1951_v58  ;;  %v2057_v41 = vsel %vm870_vm4, %v6909_v11, %v6920_v7  ;;  %v1956_v7 = vld [vmem:[#allocation7 + $0x58] sm:$0xff] }
 0x29b   : > { %2507 = vrot.lane.b32.xlu2 %v6709_v8, %s5910_s18  ;;  %2767 = vperm.xlu1 %5631, %v2761_v4   ;;  %v8241_v4 = vld [vmem:[#allocation25_spill] sm:$0xff] }
 0x29c   : > { %2772 = vperm.xlu0 %5633, %v2762_v0   ;;  %1982 = vmatpush.msrb.mxu2 %v1948_v35  ;;  %v8242_v0 = vld [vmem:[#allocation26_spill] sm:$0xff]  ;;  %v1717_v35 = vld [vmem:[#allocation7 + $0x10] sm:$0xff]  ;;  %v2075_v36 = vmul.f32 %v2069_v21, %v8241_v4 }
 0x29d   : > { %2011 = vmatpush.msrb.mxu3 %v1949_v39  ;;  %v6953_v6 = vpop.permute.xlu1 %2037  ;;  %v6956_v59 = vpop.permute.xlu2 %2049  ;;  %v2076_v11 = vmul.f32 %v2057_v41, %v8242_v0  ;;  %v8245_v41 = vld [vmem:[#allocation27_spill] sm:$0xff] }
 0x29e   : > { %5390 = vmatmul.msk.f32.gmra.mxu3 %vm574_vm1, %v1767_v60  ;;  %v1674_v1 = vpop.permute.xlu0 %1673  ;;  %1983 = vmatpush.msrb.mxu2 %v1946_v12  ;;  %v1716_v60 = vld [vmem:[#allocation7 + $0x8] sm:$0xff]  ;;  %v2056_v39 = vsel %vm870_vm4, %v6956_v59, %v6953_v6  ;;  %v2068_v27 = vsel %vm870_vm4, %v6953_v6, %v6956_v59 }
 0x29f   : > { %v1694_v20 = vsel %vm482_vm2, %v1690_v48, %v1674_v1  ;;  %v1706_v55 = vsel %vm482_vm2, %v1674_v1, %v1690_v48  ;;  %2012 = vmatpush.msrb.mxu3 %v1947_v47  ;;  %v1954_v48 = vld [vmem:[#allocation7 + $0x48] sm:$0xff]  ;;  %v2073_v1 = vmul.f32 %v2068_v27, %v8241_v4 }
 0x2a0   : > { %v1713_v28 = vmul.f32 %v1706_v55, %v8238_v2  ;;  %v1714_v46 = vmul.f32 %v1694_v20, %v8239_v40  ;;  %1984 = vmatpush.msrb.mxu2 %v1944_v18  ;;  %v2074_v18 = vmul.f32 %v2056_v39, %v8242_v0  ;;  %v1718_v20 = vld [vmem:[#allocation7 + $0x18] sm:$0xff]  ;;  %v2171_v55 = vld [vmem:[#allocation7 + $0x80] sm:$0xff]  ;;  %v2172_v40 = vld [vmem:[#allocation7 + $0x88] sm:$0xff] }
 0x2a1   : > { %2013 = vmatpush.msrb.mxu3 %v1945_v54  ;;  %5399 = vmatmul.msk.f32.vlgmr.msrb.gmra.mxu2 %vm574_vm1, %v1953_v17  ;;  %v2425_v39 = vld [vmem:[#allocation7 + $0xc0] sm:$0xff] }
 0x2a2   : > { %2199 = vmatpush.msra.mxu2 %v2168_v26  ;;  %1862 = vmatpush.msra.mxu0 %v1713_v28  ;;  %v2080_v28 = vld [vmem:[#allocation7 + $0x60] sm:$0xff] }
 0x2a3   : > { %2228 = vmatpush.msra.mxu3 %v2169_v32  ;;  %1891 = vmatpush.msra.mxu1 %v1714_v46 }
 0x2a4   : > { %2200 = vmatpush.msra.mxu2 %v2166_v44  ;;  %2777 = vperm.xlu2 %5632, %v2763_v61   ;;  %v2081_v44 = vld [vmem:[#allocation7 + $0x68] sm:$0xff]  ;;  %v2173_v61 = vld [vmem:[#allocation7 + $0x90] sm:$0xff] }
 0x2a5   : > { %2229 = vmatpush.msra.mxu3 %v2167_v13  ;;  %1863 = vmatpush.msra.mxu0 %v1711_v38  ;;  %v2048_v62 = vpop.permute.xlu1 %2047  ;;  %v7001_v23 = vpop.permute.xlu2 %2390 }
 0x2a6   : > { %1892 = vmatpush.msra.mxu1 %v1712_v53  ;;  %5403 = vmatmul.msk.f32.vlgmr.msrb.gmra.mxu3 %vm574_vm1, %v1953_v17  ;;  %v2036_v5 = vpop.permute.xlu0 %2035 }
 0x2a7   : > { %2201 = vmatpush.msra.mxu2 %v2164_v45  ;;  %2230 = vmatpush.msra.mxu3 %v2165_v42  ;;  %v2055_v12 = vsel %vm870_vm4, %v2048_v62, %v2036_v5  ;;  %v2067_v47 = vsel %vm870_vm4, %v2036_v5, %v2048_v62  ;;  %v8244_v42 = vld [vmem:[#allocation30_spill] sm:$0xff]  ;;  %v2082_v5 = vld [vmem:[#allocation7 + $0x70] sm:$0xff] }
 0x2a8   : > { %1864 = vmatpush.msra.mxu0 %v1709_v24  ;;  %1893 = vmatpush.msra.mxu1 %v1710_v50  ;;  %v2071_v26 = vmul.f32 %v2067_v47, %v8241_v4  ;;  %v2072_v31 = vmul.f32 %v2055_v12, %v8242_v0 }
 0x2a9   : > { %2202 = vmatpush.msra.mxu2 %v2162_v51  ;;  %2231 = vmatpush.msra.mxu3 %v2163_v22 }
 0x2aa   : > { %1865 = vmatpush.msra.mxu0 %v1707_v37  ;;  %1894 = vmatpush.msra.mxu1 %v1708_v52  ;;  %v2174_v37 = vld [vmem:[#allocation7 + $0x98] sm:$0xff] }
 0x2ab   : > { %5391 = vmatmul.msk.f32.vlgmr.msra.gmra.mxu0 %vm574_vm1, %v1715_v49  ;;  %5395 = vmatmul.msk.f32.vlgmr.msra.gmra.mxu1 %vm574_vm1, %v1715_v49 }
 0x2ac   : > { %5400 = vmatmul.msk.f32.gmra.mxu2 %vm574_vm1, %v1954_v48 }
 0x2ad   : > { %v7013_v8 = vpop.permute.xlu1 %2388  ;;  %v7017_v16 = vpop.permute.xlu2 %2384 }
 0x2ae   : > { %5404 = vmatmul.msk.f32.gmra.mxu3 %vm574_vm1, %v1954_v48  ;;  %v7019_v33 = vpop.permute.xlu0 %2386  ;;  %v2398_v15 = vsel %vm1234_vm6, %v7013_v8, %v7001_v23  ;;  %v2414_v14 = vsel %vm1234_vm6, %v7001_v23, %v7013_v8 }
 0x2af   : > { %v2397_v24 = vsel %vm1234_vm6, %v7017_v16, %v7019_v33  ;;  %v2413_v50 = vsel %vm1234_vm6, %v7019_v33, %v7017_v16  ;;  %v2420_v23 = vmul.f32 %v2398_v15, %v8243_v9  ;;  %v2421_v51 = vmul.f32 %v2414_v14, %v8244_v42  ;;  %v8248_v14 = vld [vmem:[#allocation32_spill] sm:$0xff] }
 0x2b0   : > { %v2419_v49 = vmul.f32 %v2413_v50, %v8244_v42  ;;  %v2418_v8 = vmul.f32 %v2397_v24, %v8243_v9  ;;  %v2300_v24 = vld [vmem:[#allocation7 + $0xb0] sm:$0xff] }
 0x2b3   : > { %5392 = vmatmul.msk.f32.gmra.mxu0 %vm574_vm1, %v1716_v60  ;;  %5396 = vmatmul.msk.f32.gmra.mxu1 %vm574_vm1, %v1716_v60 }
 0x2b4   : > { %5401 = vmatmul.msk.f32.gmra.mxu2 %vm574_vm1, %v1955_v10 }
 0x2b5   : > { %v2054_v19 = vpop.permute.xlu1 %2053  ;;  %v7028_v29 = vpop.permute.xlu2 %2263 }
 0x2b6   : > { %5405 = vmatmul.msk.f32.gmra.mxu3 %vm574_vm1, %v1955_v10  ;;  %v2042_v30 = vpop.permute.xlu0 %2041 }
 0x2b7   : > { %v2058_v57 = vsel %vm870_vm4, %v2054_v19, %v2042_v30  ;;  %v2070_v58 = vsel %vm870_vm4, %v2042_v30, %v2054_v19 }
 0x2b8   : > { %v2077_v3 = vmul.f32 %v2070_v58, %v8241_v4  ;;  %v2078_v34 = vmul.f32 %v2058_v57, %v8242_v0  ;;  %v8246_v58 = vld [vmem:[#allocation28_spill] sm:$0xff] }
 0x2ba   : > { %2108 = vmatpush.msrb.mxu0 %v2077_v3  ;;  %2137 = vmatpush.msrb.mxu1 %v2078_v34 }
 0x2bb   : > { %5393 = vmatmul.msk.f32.gmra.mxu0 %vm574_vm1, %v1717_v35  ;;  %5397 = vmatmul.msk.f32.gmra.mxu1 %vm574_vm1, %v1717_v35 }
 0x2bc   : > { %2109 = vmatpush.msrb.mxu0 %v2075_v36  ;;  %2138 = vmatpush.msrb.mxu1 %v2076_v11 }
 0x2bd   : > { %v7051_v6 = vpop.permute.xlu1 %2261  ;;  %5402 = vmatmul.msk.f32.gmra.mxu2 %vm574_vm1, %v1956_v7  ;;  %v7055_v59 = vpop.permute.xlu2 %2257 }
 0x2be   : > { %5406 = vmatmul.msk.f32.gmra.mxu3 %vm574_vm1, %v1956_v7  ;;  %v2381_v25 = vpop.permute.xlu0 %2380  ;;  %2110 = vmatpush.msrb.mxu0 %v2073_v1  ;;  %v2271_v16 = vsel %vm1099_vm5, %v7051_v6, %v7028_v29  ;;  %v2287_v33 = vsel %vm1099_vm5, %v7028_v29, %v7051_v6  ;;  %v2083_v29 = vld [vmem:[#allocation7 + $0x78] sm:$0xff] }
 0x2bf   : > { %2139 = vmatpush.msrb.mxu1 %v2074_v18  ;;  %v2293_v0 = vmul.f32 %v2271_v16, %v8245_v41  ;;  %v2294_v36 = vmul.f32 %v2287_v33, %v8246_v58 }
 0x2c0   : > { %2111 = vmatpush.msrb.mxu0 %v2071_v26  ;;  %v2426_v26 = vld [vmem:[#allocation7 + $0xc8] sm:$0xff] }
 0x2c1   : > { %2140 = vmatpush.msrb.mxu1 %v2072_v31 }
 0x2c3   : > { %5394 = vmatmul.msk.f32.gmra.mxu0 %vm574_vm1, %v1718_v20  ;;  %5398 = vmatmul.msk.f32.gmra.mxu1 %vm574_vm1, %v1718_v20 }
 0x2c5   : > { %v2383_v54 = vpop.permute.xlu1 %2382  ;;  %5415 = vmatmul.msk.f32.vlgmr.msra.gmra.mxu2 %vm574_vm1, %v2171_v55  ;;  %v2393_v63 = vpop.permute.xlu2 %2392 }
 0x2c6   : > { %5419 = vmatmul.msk.f32.vlgmr.msra.gmra.mxu3 %vm574_vm1, %v2171_v55  ;;  %v2260_v2 = vpop.permute.xlu0 %2259  ;;  %v2396_v22 = vsel %vm1234_vm6, %v2381_v25, %v2383_v54  ;;  %v2412_v52 = vsel %vm1234_vm6, %v2383_v54, %v2381_v25  ;;  %v2299_v55 = vld [vmem:[#allocation7 + $0xa8] sm:$0xff]  ;;  %v2427_v54 = vld [vmem:[#allocation7 + $0xd0] sm:$0xff] }
 0x2c7   : > { %v2416_v10 = vmul.f32 %v2396_v22, %v8243_v9  ;;  %v2417_v30 = vmul.f32 %v2412_v52, %v8244_v42  ;;  %v2270_v34 = vsel %vm1099_vm5, %v7055_v59, %v2260_v2  ;;  %v2286_v35 = vsel %vm1099_vm5, %v2260_v2, %v7055_v59  ;;  %v2298_v59 = vld [vmem:[#allocation7 + $0xa0] sm:$0xff]  ;;  %v2428_v52 = vld [vmem:[#allocation7 + $0xd8] sm:$0xff] }
 0x2c8   : > { %v2291_v7 = vmul.f32 %v2270_v34, %v8245_v41  ;;  %v2292_v12 = vmul.f32 %v2286_v35, %v8246_v58 }
 0x2cb   : > { %5407 = vmatmul.msk.f32.vlgmr.msrb.gmra.mxu0 %vm574_vm1, %v2080_v28  ;;  %5411 = vmatmul.msk.f32.vlgmr.msrb.gmra.mxu1 %vm574_vm1, %v2080_v28 }
 0x2cd   : > { %v7065_v46 = vpop.permute.xlu1 %2253  ;;  %5416 = vmatmul.msk.f32.gmra.mxu2 %vm574_vm1, %v2172_v40  ;;  %v2256_v56 = vpop.permute.xlu2 %2255 }
 0x2ce   : > { %5420 = vmatmul.msk.f32.gmra.mxu3 %vm574_vm1, %v2172_v40  ;;  %v7069_v32 = vpop.permute.xlu0 %2644  ;;  %v2269_v27 = vsel %vm1099_vm5, %v7065_v46, %v2256_v56  ;;  %v2285_v11 = vsel %vm1099_vm5, %v2256_v56, %v7065_v46 }
 0x2cf   : > { %v2289_v18 = vmul.f32 %v2269_v27, %v8245_v41  ;;  %v2290_v6 = vmul.f32 %v2285_v11, %v8246_v58  ;;  %v2552_v27 = vld [vmem:[#allocation7 + $0xe0] sm:$0xff]  ;;  %v2680_v11 = vld [vmem:[#allocation7 + $0x108] sm:$0xff] }
 0x2d3   : > { %5408 = vmatmul.msk.f32.gmra.mxu0 %vm574_vm1, %v2081_v44  ;;  %5412 = vmatmul.msk.f32.gmra.mxu1 %vm574_vm1, %v2081_v44 }
 0x2d5   : > { %v2268_v13 = vpop.permute.xlu1 %2267  ;;  %5417 = vmatmul.msk.f32.gmra.mxu2 %vm574_vm1, %v2173_v61  ;;  %v7081_v53 = vpop.permute.xlu2 %2642 }
 0x2d6   : > { %5421 = vmatmul.msk.f32.gmra.mxu3 %vm574_vm1, %v2173_v61  ;;  %v2395_v38 = vpop.permute.xlu0 %2394 }
 0x2d7   : > { %v2399_v17 = vsel %vm1234_vm6, %v2393_v63, %v2395_v38  ;;  %v2415_v45 = vsel %vm1234_vm6, %v2395_v38, %v2393_v63  ;;  %v8247_v38 = vld [vmem:[#allocation31_spill] sm:$0xff] }
 0x2d8   : > { %v2422_v43 = vmul.f32 %v2399_v17, %v8243_v9  ;;  %v2423_v62 = vmul.f32 %v2415_v45, %v8244_v42  ;;  %v2652_v45 = vsel %vm8188_vm8, %v7081_v53, %v7069_v32  ;;  %v2668_v9 = vsel %vm8188_vm8, %v7069_v32, %v7081_v53 }
 0x2da   : > { %2453 = vmatpush.msrb.mxu2 %v2422_v43  ;;  %2482 = vmatpush.msrb.mxu3 %v2423_v62  ;;  %v8249_v43 = vld [vmem:[#allocation33_spill] sm:$0xff]  ;;  %v8250_v62 = vld [vmem:[#allocation34_spill] sm:$0xff] }
 0x2db   : > { %5409 = vmatmul.msk.f32.gmra.mxu0 %vm574_vm1, %v2082_v5  ;;  %5413 = vmatmul.msk.f32.gmra.mxu1 %vm574_vm1, %v2082_v5  ;;  %v2674_v53 = vmul.f32 %v2652_v45, %v8249_v43 }
 0x2dc   : > { %2454 = vmatpush.msrb.mxu2 %v2420_v23  ;;  %2483 = vmatpush.msrb.mxu3 %v2421_v51 }
 0x2dd   : > { %v7100_v48 = vpop.permute.xlu1 %2640  ;;  %5418 = vmatmul.msk.f32.gmra.mxu2 %vm574_vm1, %v2174_v37  ;;  %v2516_v3 = vpop.permute.xlu2 %2515 }
 0x2de   : > { %5422 = vmatmul.msk.f32.gmra.mxu3 %vm574_vm1, %v2174_v37  ;;  %v2266_v60 = vpop.permute.xlu0 %2265  ;;  %2455 = vmatpush.msrb.mxu2 %v2418_v8  ;;  %v2675_v37 = vmul.f32 %v2668_v9, %v8250_v62 }
 0x2df   : > { %v2272_v19 = vsel %vm1099_vm5, %v2266_v60, %v2268_v13  ;;  %v2288_v21 = vsel %vm1099_vm5, %v2268_v13, %v2266_v60  ;;  %2484 = vmatpush.msrb.mxu3 %v2419_v49 }
 0x2e0   : > { %v2295_v57 = vmul.f32 %v2272_v19, %v8245_v41  ;;  %v2296_v4 = vmul.f32 %v2288_v21, %v8246_v58  ;;  %2456 = vmatpush.msrb.mxu2 %v2416_v10  ;;  %v2679_v58 = vld [vmem:[#allocation7 + $0x100] sm:$0xff] }
 0x2e1   : > { %2485 = vmatpush.msrb.mxu3 %v2417_v30  ;;  %v2301_v30 = vld [vmem:[#allocation7 + $0xb8] sm:$0xff] }
 0x2e2   : > { %2326 = vmatpush.msra.mxu0 %v2295_v57  ;;  %2355 = vmatpush.msra.mxu1 %v2296_v4 }
 0x2e3   : > { %5410 = vmatmul.msk.f32.gmra.mxu0 %vm574_vm1, %v2083_v29  ;;  %5414 = vmatmul.msk.f32.gmra.mxu1 %vm574_vm1, %v2083_v29 }
 0x2e4   : > { %2327 = vmatpush.msra.mxu0 %v2293_v0  ;;  %2356 = vmatpush.msra.mxu1 %v2294_v36 }
 0x2e5   : > { %v2635_v47 = vpop.permute.xlu1 %2634  ;;  %5431 = vmatmul.msk.f32.vlgmr.msrb.gmra.mxu2 %vm574_vm1, %v2425_v39  ;;  %v2637_v25 = vpop.permute.xlu2 %2636 }
 0x2e6   : > { %5435 = vmatmul.msk.f32.vlgmr.msrb.gmra.mxu3 %vm574_vm1, %v2425_v39  ;;  %v2639_v1 = vpop.permute.xlu0 %2638  ;;  %2328 = vmatpush.msra.mxu0 %v2291_v7  ;;  %v2650_v32 = vsel %vm8188_vm8, %v2635_v47, %v2637_v25  ;;  %v2666_v49 = vsel %vm8188_vm8, %v2637_v25, %v2635_v47  ;;  %v2553_v47 = vld [vmem:[#allocation7 + $0xe8] sm:$0xff]  ;;  %v2682_v25 = vld [vmem:[#allocation7 + $0x118] sm:$0xff] }
 0x2e7   : > { %2357 = vmatpush.msra.mxu1 %v2292_v12  ;;  %v2651_v50 = vsel %vm8188_vm8, %v2639_v1, %v7100_v48  ;;  %v2667_v23 = vsel %vm8188_vm8, %v7100_v48, %v2639_v1  ;;  %v2670_v60 = vmul.f32 %v2650_v32, %v8249_v43  ;;  %v2671_v21 = vmul.f32 %v2666_v49, %v8250_v62  ;;  %v2681_v1 = vld [vmem:[#allocation7 + $0x110] sm:$0xff] }
 0x2e8   : > { %2329 = vmatpush.msra.mxu0 %v2289_v18  ;;  %v2673_v48 = vmul.f32 %v2667_v23, %v8250_v62  ;;  %v2672_v16 = vmul.f32 %v2651_v50, %v8249_v43 }
 0x2e9   : > { %2358 = vmatpush.msra.mxu1 %v2290_v6 }
 0x2eb   : > { %5423 = vmatmul.msk.f32.vlgmr.msra.gmra.mxu0 %vm574_vm1, %v2298_v59  ;;  %5427 = vmatmul.msk.f32.vlgmr.msra.gmra.mxu1 %vm574_vm1, %v2298_v59  ;;  %v2554_v59 = vld [vmem:[#allocation7 + $0xf0] sm:$0xff] }
 0x2ed   : > { %v2649_v31 = vpop.permute.xlu1 %2648  ;;  %5432 = vmatmul.msk.f32.gmra.mxu2 %vm574_vm1, %v2426_v26  ;;  %v2522_v63 = vpop.permute.xlu2 %2521 }
 0x2ee   : > { %5436 = vmatmul.msk.f32.gmra.mxu3 %vm574_vm1, %v2426_v26  ;;  %v2518_v20 = vpop.permute.xlu0 %2517 }
 0x2ef   : > { %v2525_v2 = vsel %vm8189_vm7, %v2516_v3, %v2518_v20  ;;  %v2541_v40 = vsel %vm8189_vm7, %v2518_v20, %v2516_v3 }
 0x2f0   : > { %v2547_v51 = vmul.f32 %v2525_v2, %v8247_v38  ;;  %v2548_v22 = vmul.f32 %v2541_v40, %v8248_v14 }
 0x2f3   : > { %5424 = vmatmul.msk.f32.gmra.mxu0 %vm574_vm1, %v2299_v55  ;;  %5428 = vmatmul.msk.f32.gmra.mxu1 %vm574_vm1, %v2299_v55 }
 0x2f5   : > { %v2520_v28 = vpop.permute.xlu1 %2519  ;;  %5433 = vmatmul.msk.f32.gmra.mxu2 %vm574_vm1, %v2427_v54  ;;  %v2508_v3 = vpop.permute.xlu2 %2507 }
 0x2f6   : > { %5437 = vmatmul.msk.f32.gmra.mxu3 %vm574_vm1, %v2427_v54  ;;  %v2647_v46 = vpop.permute.xlu0 %2646  ;;  %v2526_v56 = vsel %vm8189_vm7, %v2520_v28, %v2522_v63  ;;  %v2542_v44 = vsel %vm8189_vm7, %v2522_v63, %v2520_v28 }
 0x2f7   : > { %v2653_v61 = vsel %vm8188_vm8, %v2647_v46, %v2649_v31  ;;  %v2669_v13 = vsel %vm8188_vm8, %v2649_v31, %v2647_v46  ;;  %v2549_v15 = vmul.f32 %v2526_v56, %v8247_v38  ;;  %v2550_v17 = vmul.f32 %v2542_v44, %v8248_v14  ;;  %v2555_v31 = vld [vmem:[#allocation7 + $0xf8] sm:$0xff] }
 0x2f8   : > { %v2676_v42 = vmul.f32 %v2653_v61, %v8249_v43  ;;  %v2677_v5 = vmul.f32 %v2669_v13, %v8250_v62 }
 0x2f9   : > { %2580 = vmatpush.msrb.mxu0 %v2549_v15  ;;  %2609 = vmatpush.msrb.mxu1 %v2550_v17 }
 0x2fa   : > { %2707 = vmatpush.msra.mxu2 %v2676_v42  ;;  %2736 = vmatpush.msra.mxu3 %v2677_v5 }
 0x2fb   : > { %5425 = vmatmul.msk.f32.gmra.mxu0 %vm574_vm1, %v2300_v24  ;;  %5429 = vmatmul.msk.f32.gmra.mxu1 %vm574_vm1, %v2300_v24 }
 0x2fc   : > { %2581 = vmatpush.msrb.mxu0 %v2547_v51  ;;  %2610 = vmatpush.msrb.mxu1 %v2548_v22 }
 0x2fd   : > { %2708 = vmatpush.msra.mxu2 %v2674_v53  ;;  %2737 = vmatpush.msra.mxu3 %v2675_v37  ;;  %v2514_v8 = vpop.permute.xlu1 %2513 }
 0x2fe   : > { %5434 = vmatmul.msk.f32.gmra.mxu2 %vm574_vm1, %v2428_v52  ;;  %5438 = vmatmul.msk.f32.gmra.mxu3 %vm574_vm1, %v2428_v52  ;;  %v2512_v33 = vpop.permute.xlu0 %2511 }
 0x2ff   : > { %2738 = vmatpush.msra.mxu3 %v2673_v48  ;;  %v2524_v10 = vsel %vm8189_vm7, %v2512_v33, %v2514_v8  ;;  %v2540_v19 = vsel %vm8189_vm7, %v2514_v8, %v2512_v33  ;;  %2709 = vmatpush.msra.mxu2 %v2672_v16 }
 0x300   : > { %v2545_v41 = vmul.f32 %v2524_v10, %v8247_v38  ;;  %v2546_v57 = vmul.f32 %v2540_v19, %v8248_v14 }
 0x301   : > { %2710 = vmatpush.msra.mxu2 %v2670_v60  ;;  %2739 = vmatpush.msra.mxu3 %v2671_v21 }
 0x302   : > { %2582 = vmatpush.msrb.mxu0 %v2545_v41  ;;  %2611 = vmatpush.msrb.mxu1 %v2546_v57 }
 0x303   : > { %5426 = vmatmul.msk.f32.gmra.mxu0 %vm574_vm1, %v2301_v30  ;;  %5430 = vmatmul.msk.f32.gmra.mxu1 %vm574_vm1, %v2301_v30 }
 0x304   : > { %v1797_v4 = vpop.f32.mrf.mxu2 }
 0x305   : > { %v1826_v29 = vpop.f32.mrf.mxu3 }
 0x306   : > { %v2510_v0 = vpop.permute.xlu0 %2509  ;;  %5447 = vmatmul.msk.f32.vlgmr.msra.gmra.mxu2 %vm574_vm1, %v2679_v58  ;;  %5451 = vmatmul.msk.f32.vlgmr.msra.gmra.mxu3 %vm574_vm1, %v2679_v58 }
 0x307   : > { %v2523_v34 = vsel %vm8189_vm7, %v2508_v3, %v2510_v0  ;;  %v2539_v35 = vsel %vm8189_vm7, %v2510_v0, %v2508_v3 }
 0x308   : > { %v2543_v36 = vmul.f32 %v2523_v34, %v8247_v38  ;;  %v2544_v39 = vmul.f32 %v2539_v35, %v8248_v14 }
 0x30a   : > { %2583 = vmatpush.msrb.mxu0 %v2543_v36  ;;  %2612 = vmatpush.msrb.mxu1 %v2544_v39 }
 0x30b   : > { %5439 = vmatmul.msk.f32.vlgmr.msrb.gmra.mxu0 %vm574_vm1, %v2552_v27  ;;  %5443 = vmatmul.msk.f32.vlgmr.msrb.gmra.mxu1 %vm574_vm1, %v2552_v27 }
 0x30c   : > { %v1800_v7 = vpop.f32.mrf.mxu2 }
 0x30d   : > { %v1829_v12 = vpop.f32.mrf.mxu3 }
 0x30e   : > { %5448 = vmatmul.msk.f32.gmra.mxu2 %vm574_vm1, %v2680_v11  ;;  %5452 = vmatmul.msk.f32.gmra.mxu3 %vm574_vm1, %v2680_v11 }
 0x313   : > { %5440 = vmatmul.msk.f32.gmra.mxu0 %vm574_vm1, %v2553_v47  ;;  %5444 = vmatmul.msk.f32.gmra.mxu1 %vm574_vm1, %v2553_v47 }
 0x314   : > { %v1803_v18 = vpop.f32.mrf.mxu2 }
 0x315   : > { %v1832_v6 = vpop.f32.mrf.mxu3 }
 0x316   : > { %5449 = vmatmul.msk.f32.gmra.mxu2 %vm574_vm1, %v2681_v1  ;;  %5453 = vmatmul.msk.f32.gmra.mxu3 %vm574_vm1, %v2681_v1 }
 0x31b   : > { %5441 = vmatmul.msk.f32.gmra.mxu0 %vm574_vm1, %v2554_v59  ;;  %5445 = vmatmul.msk.f32.gmra.mxu1 %vm574_vm1, %v2554_v59 }
 0x31c   : > { %v1806_v26 = vpop.f32.mrf.mxu2 }
 0x31e   : > { %5450 = vmatmul.msk.f32.gmra.mxu2 %vm574_vm1, %v2682_v25  ;;  %5454 = vmatmul.msk.f32.gmra.mxu3 %vm574_vm1, %v2682_v25 }
 0x321   : > { %v1835_v20 = vpop.f32.mrf.mxu3 }
 0x323   : > { %5442 = vmatmul.msk.f32.gmra.mxu0 %vm574_vm1, %v2555_v31  ;;  %5446 = vmatmul.msk.f32.gmra.mxu1 %vm574_vm1, %v2555_v31 }
 0x324   : > { %v1986_v28 = vpop.f32.mrf.mxu2 }
 0x328   : > { %v1867_v55 = vpop.f32.mrf.mxu0  ;;  %v1896_v54 = vpop.f32.mrf.mxu1 }
 0x329   : > { %v1868_v63 = vadd.f32 %v1867_v55, %v1797_v4  ;;  %v1897_v2 = vadd.f32 %v1896_v54, %v1826_v29  ;;  %v2015_v40 = vpop.f32.mrf.mxu3 }
 0x32b   : > { %v2027_v46 = vadd.f32 %v1986_v28, %v1868_v63  ;;  %v2028_v56 = vadd.f32 %v2015_v40, %v1897_v2 }
 0x32f   : > { %v1989_v15 = vpop.f32.mrf.mxu2 }
 0x330   : > { %v1870_v44 = vpop.f32.mrf.mxu0  ;;  %v1899_v61 = vpop.f32.mrf.mxu1 }
 0x331   : > { %v1871_v13 = vadd.f32 %v1870_v44, %v1800_v7  ;;  %v1900_v38 = vadd.f32 %v1899_v61, %v1829_v12  ;;  %v2018_v14 = vpop.f32.mrf.mxu3 }
 0x333   : > { %v2029_v17 = vadd.f32 %v1989_v15, %v1871_v13  ;;  %v2030_v45 = vadd.f32 %v2018_v14, %v1900_v38 }
 0x337   : > { %v1992_v5 = vpop.f32.mrf.mxu2 }
 0x338   : > { %v1873_v9 = vpop.f32.mrf.mxu0  ;;  %v1902_v43 = vpop.f32.mrf.mxu1 }
 0x339   : > { %v1874_v42 = vadd.f32 %v1873_v9, %v1803_v18  ;;  %v1903_v62 = vadd.f32 %v1902_v43, %v1832_v6  ;;  %v2021_v24 = vpop.f32.mrf.mxu3 }
 0x33b   : > { %v2031_v50 = vadd.f32 %v1992_v5, %v1874_v42  ;;  %v2032_v23 = vadd.f32 %v2021_v24, %v1903_v62 }
 0x340   : > { %v1876_v51 = vpop.f32.mrf.mxu0  ;;  %v1905_v22 = vpop.f32.mrf.mxu1 }
 0x341   : > { %v1877_v32 = vadd.f32 %v1876_v51, %v1806_v26  ;;  %v1906_v53 = vadd.f32 %v1905_v22, %v1835_v20  ;;  %v1995_v37 = vpop.f32.mrf.mxu2  ;;  %v2024_v52 = vpop.f32.mrf.mxu3 }
 0x343   : > { %v7203_v49 = vadd.f32 %v1995_v37, %v1877_v32  ;;  %v7205_v48 = vadd.f32 %v2024_v52, %v1906_v53 }
 0x348   : > { %v2113_v8 = vpop.f32.mrf.mxu0  ;;  %v2142_v16 = vpop.f32.mrf.mxu1 }
 0x349   : > { %v2154_v33 = vadd.f32 %v2113_v8, %v2027_v46  ;;  %v2155_v60 = vadd.f32 %v2142_v16, %v2028_v56  ;;  %v2204_v10 = vpop.f32.mrf.mxu2  ;;  %v2233_v19 = vpop.f32.mrf.mxu3 }
 0x34b   : > { %v2245_v21 = vadd.f32 %v2204_v10, %v2154_v33  ;;  %v2246_v30 = vadd.f32 %v2233_v19, %v2155_v60  ;;  %v2773_v33 = vpop.permute.xlu0 %2772 }
 0x350   : > { %v2116_v41 = vpop.f32.mrf.mxu0  ;;  %v2145_v57 = vpop.f32.mrf.mxu1 }
 0x351   : > { %v2207_v58 = vpop.f32.mrf.mxu2  ;;  %v2236_v4 = vpop.f32.mrf.mxu3  ;;  %v2156_v28 = vadd.f32 %v2116_v41, %v2029_v17  ;;  %v2157_v40 = vadd.f32 %v2145_v57, %v2030_v45 }
 0x352   : > { %v2783_v57 = vpop.permute.xlu1 %2782 }
 0x353   : > { %v2247_v44 = vadd.f32 %v2207_v58, %v2156_v28  ;;  %v2248_v61 = vadd.f32 %v2236_v4, %v2157_v40 }
 0x358   : > { %v2119_v29 = vpop.f32.mrf.mxu0  ;;  %v2148_v3 = vpop.f32.mrf.mxu1 }
 0x359   : > { %v2210_v0 = vpop.f32.mrf.mxu2  ;;  %v2239_v34 = vpop.f32.mrf.mxu3  ;;  %v2158_v9 = vadd.f32 %v2119_v29, %v2031_v50  ;;  %v2159_v43 = vadd.f32 %v2148_v3, %v2032_v23 }
 0x35b   : > { %v2249_v51 = vadd.f32 %v2210_v0, %v2158_v9  ;;  %v2250_v22 = vadd.f32 %v2239_v34, %v2159_v43 }
 0x360   : > { %v2122_v35 = vpop.f32.mrf.mxu0  ;;  %v2151_v36 = vpop.f32.mrf.mxu1 }
 0x361   : > { %v2213_v39 = vpop.f32.mrf.mxu2  ;;  %v2242_v27 = vpop.f32.mrf.mxu3  ;;  %v2160_v60 = vadd.f32 %v2122_v35, %v7203_v49  ;;  %v2161_v50 = vadd.f32 %v2151_v36, %v7205_v48 }
 0x363   : > { %v2251_v3 = vadd.f32 %v2213_v39, %v2160_v60  ;;  %v2252_v0 = vadd.f32 %v2242_v27, %v2161_v50 }
 0x368   : > { %v2331_v11 = vpop.f32.mrf.mxu0  ;;  %v2360_v7 = vpop.f32.mrf.mxu1 }
 0x369   : > { %v2458_v12 = vpop.f32.mrf.mxu2  ;;  %v2487_v47 = vpop.f32.mrf.mxu3  ;;  %v2372_v23 = vadd.f32 %v2331_v11, %v2245_v21  ;;  %v2373_v10 = vadd.f32 %v2360_v7, %v2246_v30 }
 0x36b   : > { %v2500_v49 = vadd.f32 %v2487_v47, %v2373_v10 }
 0x370   : > { %v2334_v1 = vpop.f32.mrf.mxu0  ;;  %v2363_v18 = vpop.f32.mrf.mxu1 }
 0x371   : > { %v2461_v6 = vpop.f32.mrf.mxu2  ;;  %v2490_v59 = vpop.f32.mrf.mxu3  ;;  %v2374_v15 = vadd.f32 %v2334_v1, %v2247_v44  ;;  %v2375_v14 = vadd.f32 %v2363_v18, %v2248_v61  ;;  %v2499_v18 = vadd.f32 %v2458_v12, %v2372_v23 }
 0x373   : > { %v2501_v42 = vadd.f32 %v2461_v6, %v2374_v15  ;;  %v2502_v62 = vadd.f32 %v2490_v59, %v2375_v14  ;;  %v2768_v15 = vpop.permute.xlu1 %2767 }
 0x378   : > { %v2337_v25 = vpop.f32.mrf.mxu0  ;;  %v2366_v26 = vpop.f32.mrf.mxu1 }
 0x379   : > { %v2464_v31 = vpop.f32.mrf.mxu2  ;;  %v2493_v20 = vpop.f32.mrf.mxu3  ;;  %v2376_v37 = vadd.f32 %v2337_v25, %v2249_v51  ;;  %v2377_v52 = vadd.f32 %v2366_v26, %v2250_v22  ;;  %v5913_v51 = vmov 256.0  }
 0x37a   : > { %v2778_v26 = vpop.permute.xlu2 %2777  ;;  %5634 = vrcp.f32 %v5913_v51 }
 0x37b   : > { %v2503_v58 = vadd.f32 %v2464_v31, %v2376_v37  ;;  %v2504_v4 = vadd.f32 %v2493_v20, %v2377_v52 }
 0x380   : > { %v2340_v55 = vpop.f32.mrf.mxu0  ;;  %v2369_v54 = vpop.f32.mrf.mxu1 }
 0x381   : > { %v2467_v63 = vpop.f32.mrf.mxu2  ;;  %v2496_v2 = vpop.f32.mrf.mxu3  ;;  %v2378_v36 = vadd.f32 %v2340_v55, %v2251_v3  ;;  %v2379_v11 = vadd.f32 %v2369_v54, %v2252_v0 }
 0x382   : > { %v5635_v22 = vpop.eup %5634 }
 0x383   : > { %v2505_v27 = vadd.f32 %v2467_v63, %v2378_v36  ;;  %v2506_v20 = vadd.f32 %v2496_v2, %v2379_v11  ;;  %vm2810_vm9 = vweird.f32 %v5635_v22 }
 0x388   : > { %v2585_v46 = vpop.f32.mrf.mxu0  ;;  %v2614_v56 = vpop.f32.mrf.mxu1 }
 0x389   : > { %v2712_v13 = vpop.f32.mrf.mxu2  ;;  %v2741_v38 = vpop.f32.mrf.mxu3  ;;  %v2626_v7 = vadd.f32 %v2585_v46, %v2499_v18  ;;  %v2627_v6 = vadd.f32 %v2614_v56, %v2500_v49  ;;  %v2853_v18 = vld [vmem:[%s8140_s6] sm:$0xff] }
 0x38b   : > { %v2753_v12 = vadd.f32 %v2712_v13, %v2626_v7  ;;  %v2754_v47 = vadd.f32 %v2741_v38, %v2627_v6 }
 0x38d   : > { %v7223_v14 = vadd.f32 %v2768_v15, %v2753_v12  ;;  %v7225_v63 = vadd.f32 %v2768_v15, %v2754_v47 }
 0x38f   : > { %v2793_v43 = vadd.f32 %v7225_v63, %v7223_v14 }
 0x390   : > { %v2588_v5 = vpop.f32.mrf.mxu0  ;;  %v2617_v24 = vpop.f32.mrf.mxu1 }
 0x391   : > { %v2628_v32 = vadd.f32 %v2588_v5, %v2501_v42  ;;  %v2629_v53 = vadd.f32 %v2617_v24, %v2502_v62  ;;  %v2715_v17 = vpop.f32.mrf.mxu2  ;;  %v2744_v45 = vpop.f32.mrf.mxu3  ;;  %v2816_v24 = vmax.f32 %v7223_v14, %v7225_v63 }
 0x393   : > { %v2755_v8 = vadd.f32 %v2715_v17, %v2628_v32  ;;  %v2756_v16 = vadd.f32 %v2744_v45, %v2629_v53  ;;  %v2806_v53 = vmul.f32 256.0, %v5635_v22 }
 0x395   : > { %v7209_v19 = vadd.f32 %v2773_v33, %v2755_v8  ;;  %v7211_v41 = vadd.f32 %v2773_v33, %v2756_v16  ;;  %v2807_v17 = vsub.f32 1.0, %v2806_v53 }
 0x397   : > { %v2796_v29 = vadd.f32 %v7211_v41, %v7209_v19  ;;  %v2819_v5 = vmax.f32 %v7209_v19, %v7211_v41  ;;  %v2808_v37 = vmul.f32 %v5635_v22, %v2807_v17 }
 0x398   : > { %v2591_v34 = vpop.f32.mrf.mxu0  ;;  %v2620_v1 = vpop.f32.mrf.mxu1 }
 0x399   : > { %v2630_v35 = vadd.f32 %v2591_v34, %v2503_v58  ;;  %v2631_v48 = vadd.f32 %v2620_v1, %v2504_v4  ;;  %2797 = vadd.xlane.f32.xlu2 %v2796_v29  ;;  %v2718_v21 = vpop.f32.mrf.mxu2  ;;  %v2747_v30 = vpop.f32.mrf.mxu3  ;;  %v2809_v8 = vadd.f32 %v5635_v22, %v2808_v37  ;;  %v2828_v29 = vld [vmem:[%s8139_s5] sm:$0x3] }
 0x39b   : > { %v2757_v59 = vadd.f32 %v2718_v21, %v2630_v35  ;;  %v2758_v25 = vadd.f32 %v2747_v30, %v2631_v48  ;;  %v2811_v33 = vsel %vm2810_vm9, %v5635_v22, %v2809_v8  ;;  %v2854_v35 = vld [vmem:[%s8140_s6 + $0x8] sm:$0xff]  ;;  %v2855_v48 = vld [vmem:[%s8140_s6 + $0x10] sm:$0xff]  ;;  %v2856_v21 = vld [vmem:[%s8140_s6 + $0x18] sm:$0xff] }
 0x39d   : > { %v7215_v31 = vadd.f32 %v2778_v26, %v2757_v59  ;;  %v7217_v39 = vadd.f32 %v2778_v26, %v2758_v25 }
 0x39f   : > { %v2822_v28 = vmax.f32 %v7215_v31, %v7217_v39  ;;  %v2799_v55 = vadd.f32 %v7217_v39, %v7215_v31 }
 0x3a0   : > { %v2594_v54 = vpop.f32.mrf.mxu0  ;;  %v2623_v40 = vpop.f32.mrf.mxu1 }
 0x3a1   : > { %v2632_v46 = vadd.f32 %v2594_v54, %v2505_v27  ;;  %v2633_v56 = vadd.f32 %v2623_v40, %v2506_v20  ;;  %2823 = vmax.xlane.f32.xlu2 %v2822_v28  ;;  %2800 = vadd.xlane.f32.xlu0 %v2799_v55  ;;  %v2721_v44 = vpop.f32.mrf.mxu2  ;;  %v2750_v61 = vpop.f32.mrf.mxu3 }
 0x3a3   : > { %v2759_v2 = vadd.f32 %v2721_v44, %v2632_v46  ;;  %v2760_v13 = vadd.f32 %v2750_v61, %v2633_v56 }
 0x3a5   : > { %v7227_v38 = vadd.f32 %v2783_v57, %v2759_v2  ;;  %v7229_v9 = vadd.f32 %v2783_v57, %v2760_v13 }
 0x3a7   : > { %v2825_v42 = vmax.f32 %v7227_v38, %v7229_v9  ;;  %v2802_v62 = vadd.f32 %v7229_v9, %v7227_v38 }
 0x3a9   : > { %2794 = vadd.xlane.f32.xlu0 %v2793_v43  ;;  %2826 = vmax.xlane.f32.xlu1 %v2825_v42 }
 0x3aa   : > { %2803 = vadd.xlane.f32.xlu2 %v2802_v62 }
 0x3b1   : > { %2820 = vmax.xlane.f32.xlu1 %v2819_v5 }
 0x3b2   : > { %2817 = vmax.xlane.f32.xlu2 %v2816_v24 }
 0x40c   : > { %v2798_v32 = vpop.xlane.xlu2 %2797 }
 0x40d   : > { %v2813_v57 = vmul.f32 %v2811_v33, %v2798_v32 }
 0x414   : > { %v2824_v45 = vpop.xlane.xlu2 %2823  ;;  %v2801_v52 = vpop.xlane.xlu0 %2800 }
 0x415   : > { %v2814_v23 = vmul.f32 %v2811_v33, %v2801_v52 }
 0x41c   : > { %v2827_v16 = vpop.xlane.xlu1 %2826  ;;  %v2795_v10 = vpop.xlane.xlu0 %2794 }
 0x41d   : > { %v2804_v60 = vpop.xlane.xlu2 %2803  ;;  %2869 = vmatpush.msra.mxu1 %v2827_v16  ;;  %v2812_v58 = vmul.f32 %v2811_v33, %v2795_v10 }
 0x41e   : > { %v2815_v50 = vmul.f32 %v2811_v33, %v2804_v60 }
 0x41f   : > { %2870 = vmatpush.msra.mxu1 %v2824_v45 }
 0x420   : > { %2844 = vmatpush.msra.mxu0 %v2815_v50 }
 0x422   : > { %2845 = vmatpush.msra.mxu0 %v2814_v23 }
 0x424   : > { %2846 = vmatpush.msra.mxu0 %v2813_v57  ;;  %v2821_v4 = vpop.xlane.xlu1 %2820 }
 0x425   : > { %2871 = vmatpush.msra.mxu1 %v2821_v4  ;;  %v2818_v3 = vpop.xlane.xlu2 %2817 }
 0x426   : > { %2847 = vmatpush.msra.mxu0 %v2812_v58 }
 0x427   : > { %2872 = vmatpush.msra.mxu1 %v2818_v3  ;;  %5455 = vmatmul.msk.f32.vlgmr.msra.gmra.mxu0 %vm574_vm1, %v2828_v29 }
 0x428   : > { %5456 = vmatmul.msk.f32.vlgmr.msra.gmra.mxu1 %vm574_vm1, %v2828_v29 }
 0x4a4   : > { %v2849_v0 = vpop.f32.mrf.mxu0 }
 0x4a5   : > { %v2852_v34 = vmax.f32 %v2849_v0, 0.0  ;;  %v2874_v1 = vpop.f32.mrf.mxu1 }
 0x4a6   : > { %v2877_v49 = vmax.f32 %v2874_v1, 0.0 }
 0x4a7   : > { %5462 = vmatpush.msk.msrb.mxu3 %vm2891_vm10, %v2852_v34 }
 0x4a8   : > { %5457 = vmatpush.msk.msrb.mxu2 %vm2891_vm10, %v2877_v49  ;;  %5463 = vmatmul.msk.f32.vlgmr.msrb.gmra.mxu3 %vm2878_vm11, %v2853_v18 }
 0x4a9   : > { %5458 = vmatmul.msk.f32.vlgmr.msrb.gmra.mxu2 %vm2878_vm11, %v2853_v18 }
 0x4b0   : > { %5464 = vmatmul.msk.f32.gmra.mxu3 %vm2878_vm11, %v2854_v35 }
 0x4b1   : > { %5459 = vmatmul.msk.f32.gmra.mxu2 %vm2878_vm11, %v2854_v35 }
 0x4b8   : > { %5465 = vmatmul.msk.f32.gmra.mxu3 %vm2878_vm11, %v2855_v48 }
 0x4b9   : > { %5460 = vmatmul.msk.f32.gmra.mxu2 %vm2878_vm11, %v2855_v48 }
 0x4c0   : > { %5466 = vmatmul.msk.f32.gmra.mxu3 %vm2878_vm11, %v2856_v21 }
 0x4c1   : > { %5461 = vmatmul.msk.f32.gmra.mxu2 %vm2878_vm11, %v2856_v21 }
 0x52b   : > { %v2944_v30 = vpop.f32.mrf.mxu3 }
 0x52c   : > { %v2912_v36 = vpop.f32.mrf.mxu2 }
 0x52d   : > { %v2945_v11 = vadd.f32 %v2944_v30, %v2912_v36 }
 0x52f   : > { %v5467_v7 = vmul.f32 -1.442695, %v2945_v11 }
 0x531   : > { %5636 = vpow2.f32 %v5467_v7 }
 0x533   : > { %v2947_v6 = vpop.f32.mrf.mxu3 }
 0x534   : > { %v2915_v59 = vpop.f32.mrf.mxu2 }
 0x535   : > { %v2948_v25 = vadd.f32 %v2947_v6, %v2915_v59 }
 0x537   : > { %v5637_v26 = vpop.eup %5636  ;;  %v5468_v27 = vmul.f32 -1.442695, %v2948_v25 }
 0x538   : > { %v2968_v20 = vadd.f32 1.0, %v5637_v26 }
 0x539   : > { %5638 = vpow2.f32 %v5468_v27  ;;  %v5914_v27 = vmov 32.0  }
 0x53a   : > { %5640 = vrcp.f32 %v2968_v20  ;;  %v2983_v2 = vand.u32 2147483648, %v2968_v20  ;;  %v2981_v42 = vand.u32 2147483647, %v2968_v20  ;;  %vm2977_vm13 = vweird.f32 %v2968_v20 }
 0x53b   : > { %v2950_v12 = vpop.f32.mrf.mxu3 }
 0x53c   : > { %v2918_v47 = vpop.f32.mrf.mxu2  ;;  %v2984_v32 = vor.u32 1.1754944e-38, %v2983_v2  ;;  %vm2982_vm15 = vcmp.eq.f32.partialorder %v2981_v42, 8.507059e+37 }
 0x53d   : > { %v2951_v28 = vadd.f32 %v2950_v12, %v2918_v47 }
 0x53f   : > { %v5639_v55 = vpop.eup %5638  ;;  %v5469_v54 = vmul.f32 -1.442695, %v2951_v28 }
 0x540   : > { %v5641_v40 = vpop.eup %5640  ;;  %v2969_v46 = vadd.f32 1.0, %v5639_v55 }
 0x541   : > { %5642 = vpow2.f32 %v5469_v54  ;;  %v2973_v56 = vmul.f32 %v5641_v40, %v2968_v20  ;;  %vm2978_vm12 = vweird.f32 %v5641_v40 }
 0x542   : > { %5644 = vrcp.f32 %v2969_v46  ;;  %vm2979_vm14 = vmor %vm2977_vm13, %vm2978_vm12  ;;  %v2998_v52 = vand.u32 2147483648, %v2969_v46  ;;  %v2996_v16 = vand.u32 2147483647, %v2969_v46  ;;  %vm2992_vm10 = vweird.f32 %v2969_v46 }
 0x543   : > { %v2953_v44 = vpop.f32.mrf.mxu3  ;;  %v2974_v61 = vsub.f32 1.0, %v2973_v56 }
 0x544   : > { %v2921_v15 = vpop.f32.mrf.mxu2  ;;  %v2999_v10 = vor.u32 1.1754944e-38, %v2998_v52  ;;  %vm2997_vm12 = vcmp.eq.f32.partialorder %v2996_v16, 8.507059e+37 }
 0x545   : > { %v2954_v13 = vadd.f32 %v2953_v44, %v2921_v15  ;;  %v2975_v43 = vmul.f32 %v5641_v40, %v2974_v61 }
 0x547   : > { %v5643_v62 = vpop.eup %5642  ;;  %v5470_v5 = vmul.f32 -1.442695, %v2954_v13  ;;  %v2976_v24 = vadd.f32 %v5641_v40, %v2975_v43 }
 0x548   : > { %v5645_v51 = vpop.eup %5644  ;;  %v2970_v22 = vadd.f32 1.0, %v5643_v62 }
 0x549   : > { %5646 = vpow2.f32 %v5470_v5  ;;  %v2980_v53 = vsel %vm2979_vm14, %v5641_v40, %v2976_v24  ;;  %v2988_v17 = vmul.f32 %v5645_v51, %v2969_v46  ;;  %vm2993_vm9 = vweird.f32 %v5645_v51 }
 0x54a   : > { %5648 = vrcp.f32 %v2970_v22  ;;  %v2985_v45 = vsel %vm2982_vm15, %v2984_v32, %v2980_v53  ;;  %vm2994_vm8 = vmor %vm2992_vm10, %vm2993_vm9  ;;  %v3013_v3 = vand.u32 2147483648, %v2970_v22  ;;  %v3011_v34 = vand.u32 2147483647, %v2970_v22 }
 0x54b   : > { %3034 = vperm.xlu0 %5633, %v2985_v45   ;;  %v2989_v37 = vsub.f32 1.0, %v2988_v17  ;;  %vm3007_vm14 = vweird.f32 %v2970_v22 }
 0x54c   : > { %v3014_v49 = vor.u32 1.1754944e-38, %v3013_v3  ;;  %vm3012_vm7 = vcmp.eq.f32.partialorder %v3011_v34, 8.507059e+37 }
 0x54d   : > { %v2990_v8 = vmul.f32 %v5645_v51, %v2989_v37 }
 0x54f   : > { %v5647_v33 = vpop.eup %5646  ;;  %v2991_v60 = vadd.f32 %v5645_v51, %v2990_v8 }
 0x550   : > { %v5649_v50 = vpop.eup %5648  ;;  %v2971_v23 = vadd.f32 1.0, %v5647_v33 }
 0x551   : > { %v2995_v57 = vsel %vm2994_vm8, %v5645_v51, %v2991_v60  ;;  %v3003_v58 = vmul.f32 %v5649_v50, %v2970_v22  ;;  %vm3008_vm13 = vweird.f32 %v5649_v50 }
 0x552   : > { %5650 = vrcp.f32 %v2971_v23  ;;  %v3000_v4 = vsel %vm2997_vm12, %v2999_v10, %v2995_v57  ;;  %vm3009_vm15 = vmor %vm3007_vm14, %vm3008_vm13  ;;  %v3028_v36 = vand.u32 2147483648, %v2971_v23  ;;  %v3026_v7 = vand.u32 2147483647, %v2971_v23 }
 0x553   : > { %3039 = vperm.xlu1 %5631, %v3000_v4   ;;  %v3004_v29 = vsub.f32 1.0, %v3003_v58  ;;  %vm3022_vm9 = vweird.f32 %v2971_v23  ;;  %5652 = vrcp.f32 %v5914_v27  ;;  %vm3112_vm13 = vcmask 416768  }
 0x554   : > { %v3029_v59 = vor.u32 1.1754944e-38, %v3028_v36  ;;  %vm3027_vm12 = vcmp.eq.f32.partialorder %v3026_v7, 8.507059e+37  ;;  %vm3153_vm14 = vcmask 408576  }
 0x555   : > { %v3005_v0 = vmul.f32 %v5649_v50, %v3004_v29 }
 0x557   : > { %v3006_v1 = vadd.f32 %v5649_v50, %v3005_v0 }
 0x558   : > { %v5651_v18 = vpop.eup %5650 }
 0x559   : > { %v3010_v35 = vsel %vm3009_vm15, %v5649_v50, %v3006_v1  ;;  %v3018_v48 = vmul.f32 %v5651_v18, %v2971_v23  ;;  %vm3023_vm8 = vweird.f32 %v5651_v18  ;;  %v5653_v55 = vpop.eup %5652  ;;  %vm3194_vm15 = vcmask 400384  }
 0x55a   : > { %v3015_v21 = vsel %vm3012_vm7, %v3014_v49, %v3010_v35  ;;  %vm3024_vm10 = vmor %vm3022_vm9, %vm3023_vm8  ;;  %v3079_v61 = vmul.f32 32.0, %v5653_v55  ;;  %vm3083_vm7 = vweird.f32 %v5653_v55  ;;  %vm3235_vm8 = vcmask 392192  }
 0x55b   : > { %3044 = vperm.xlu2 %5632, %v3015_v21   ;;  %v3019_v30 = vsub.f32 1.0, %v3018_v48  ;;  %vm3276_vm9 = vcmask 384000  }
 0x55c   : > { %v3080_v42 = vsub.f32 1.0, %v3079_v61 }
 0x55d   : > { %v3020_v11 = vmul.f32 %v5651_v18, %v3019_v30 }
 0x55e   : > { %v3081_v32 = vmul.f32 %v5653_v55, %v3080_v42 }
 0x55f   : > { %v3021_v6 = vadd.f32 %v5651_v18, %v3020_v11 }
 0x560   : > { %v3082_v60 = vadd.f32 %v5653_v55, %v3081_v32 }
 0x561   : > { %v3025_v25 = vsel %vm3024_vm10, %v5651_v18, %v3021_v6  ;;  %vm3317_vm10 = vcmask 375808  }
 0x562   : > { %v3030_v26 = vsel %vm3027_vm12, %v3029_v59, %v3025_v25  ;;  %v3084_v3 = vsel %vm3083_vm7, %v5653_v55, %v3082_v60  ;;  %vm3358_vm12 = vcmask 367616   ;;  %vm3399_vm7 = vcmask 285696  }
 0x563   : > { %3049 = vperm.xlu0 %5633, %v3030_v26  }
 0x5b5   : > { %v3045_v46 = vpop.permute.xlu2 %3044 }
 0x5bd   : > { %v3035_v12 = vpop.permute.xlu0 %3034 }
 0x5be   : > { %v7273_v54 = vmul.f32 %v3035_v12, %v7223_v14  ;;  %v7276_v40 = vmul.f32 %v3035_v12, %v7225_v63 }
 0x5c5   : > { %v3040_v20 = vpop.permute.xlu1 %3039 }
 0x5c6   : > { %v7267_v47 = vmul.f32 %v3040_v20, %v7209_v19  ;;  %v7270_v28 = vmul.f32 %v3040_v20, %v7211_v41  ;;  %v7283_v19 = vmul.f32 %v3045_v46, %v7215_v31  ;;  %v7286_v41 = vmul.f32 %v3045_v46, %v7217_v39 }
 0x5c8   : > { %v3060_v56 = vadd.f32 %v7267_v47, %v7273_v54  ;;  %v3069_v44 = vadd.f32 %v7270_v28, %v7276_v40  ;;  %v3087_v43 = vmax.f32 %v7273_v54, %v7283_v19  ;;  %v3096_v31 = vmax.f32 %v7276_v40, %v7286_v41 }
 0x5ca   : > { %v3061_v14 = vadd.f32 %v3060_v56, %v7283_v19  ;;  %v3070_v63 = vadd.f32 %v3069_v44, %v7286_v41 }
 0x5d5   : > { %v3050_v15 = vpop.permute.xlu0 %3049 }
 0x5d6   : > { %v7291_v2 = vmul.f32 %v3050_v15, %v7227_v38  ;;  %v7294_v13 = vmul.f32 %v3050_v15, %v7229_v9 }
 0x5d8   : > { %v3062_v39 = vadd.f32 %v3061_v14, %v7291_v2  ;;  %v3071_v62 = vadd.f32 %v3070_v63, %v7294_v13  ;;  %v3088_v5 = vmax.f32 %v7267_v47, %v7291_v2  ;;  %v3097_v38 = vmax.f32 %v7270_v28, %v7294_v13 }
 0x5da   : > { %v3063_v24 = vrot.slane %v3062_v39, 4  ;;  %v3072_v9 = vrot.slane %v3071_v62, 4  ;;  %v3089_v51 = vmax.f32 %v3087_v43, %v3088_v5  ;;  %v3098_v22 = vmax.f32 %v3096_v31, %v3097_v38  ;;  %v3138_v38 = vld [vmem:[#allocation10] ss:$8 sm:$0x3] }
 0x5db   : > { %v3140_v32 = vperm.slane %v3138_v38, 0 }
 0x5dc   : > { %v3064_v53 = vadd.f32 %v3063_v24, %v3062_v39  ;;  %v3073_v17 = vadd.f32 %v3072_v9, %v3071_v62  ;;  %v3090_v45 = vrot.slane %v3089_v51, 4  ;;  %v3099_v37 = vrot.slane %v3098_v22, 4 }
 0x5de   : > { %v3065_v52 = vrot.slane %v3064_v53, 2  ;;  %v3074_v8 = vrot.slane %v3073_v17, 2  ;;  %v3091_v16 = vmax.f32 %v3089_v51, %v3090_v45  ;;  %v3100_v33 = vmax.f32 %v3098_v22, %v3099_v37  ;;  %v3117_v51 = vld [vmem:[#allocation8] ss:$8 sm:$0x3] }
 0x5df   : > { %v3120_v45 = vperm.slane %v3117_v51, 1 }
 0x5e0   : > { %v3066_v50 = vadd.f32 %v3065_v52, %v3064_v53  ;;  %v3075_v23 = vadd.f32 %v3074_v8, %v3073_v17  ;;  %v3101_v10 = vrot.slane %v3100_v33, 2  ;;  %v3092_v4 = vrot.slane %v3091_v16, 2  ;;  %v3159_v8 = vld [vmem:[#allocation8 + $0x1] ss:$8 sm:$0x3] }
 0x5e1   : > { %v3141_v53 = vperm.slane %v3138_v38, 1  ;;  %v3119_v17 = vperm.slane %v3117_v51, 0 }
 0x5e2   : > { %v3067_v57 = vrot.slane %v3066_v50, 1  ;;  %v3076_v58 = vrot.slane %v3075_v23, 1  ;;  %v3102_v29 = vmax.f32 %v3100_v33, %v3101_v10  ;;  %v3093_v35 = vmax.f32 %v3091_v16, %v3092_v4  ;;  %v3179_v16 = vld [vmem:[#allocation10 + $0x1] ss:$8 sm:$0x3] }
 0x5e3   : > { %v3161_v10 = vperm.slane %v3159_v8, 0  ;;  %v3200_v4 = vld [vmem:[#allocation8 + $0x2] ss:$8 sm:$0x3] }
 0x5e4   : > { %v3068_v0 = vadd.f32 %v3067_v57, %v3066_v50  ;;  %v3077_v34 = vadd.f32 %v3076_v58, %v3075_v23  ;;  %v3103_v1 = vrot.slane %v3102_v29, 1  ;;  %v3094_v21 = vrot.slane %v3093_v35, 1 }
 0x5e5   : > { %v3162_v57 = vperm.slane %v3159_v8, 1  ;;  %v3181_v58 = vperm.slane %v3179_v16, 0  ;;  %v3202_v51 = vperm.slane %v3200_v4, 0  ;;  %v3241_v8 = vld [vmem:[#allocation8 + $0x3] ss:$8 sm:$0x3] }
 0x5e6   : > { %v7306_v18 = vmul.f32 %v3084_v3, %v3068_v0  ;;  %v7308_v49 = vmul.f32 %v3084_v3, %v3077_v34  ;;  %v7310_v48 = vmax.f32 %v3102_v29, %v3103_v1  ;;  %v7315_v30 = vmax.f32 %v3093_v35, %v3094_v21 }
 0x5e7   : > { %v3182_v1 = vperm.slane %v3179_v16, 1 }
 0x5e8   : > { %3128 = vrot.lane.b32.xlu2 %v7310_v48, %s5915_s3  ;;  %3106 = vrot.lane.b32.xlu1 %v7308_v49, %s5915_s3 }
 0x5e9   : > { %3110 = vrot.lane.b32.xlu0 %v7306_v18, %s5915_s3 }
 0x5f0   : > { %3132 = vrot.lane.b32.xlu1 %v7315_v30, %s5915_s3  ;;  %3151 = vrot.lane.b32.xlu2 %v7306_v18, %s5916_s25  ;;  %s5921_s3 = smov 45  }
 0x5f1   : > { %3148 = vrot.lane.b32.xlu0 %v7308_v49, %s5916_s25 }
 0x5f8   : > { %3169 = vrot.lane.b32.xlu1 %v7310_v48, %s5916_s25  ;;  %3189 = vrot.lane.b32.xlu2 %v7308_v49, %s5917_s27 }
 0x5f9   : > { %3172 = vrot.lane.b32.xlu0 %v7315_v30, %s5916_s25  ;;  %s5922_s25 = smov 35  }
 0x600   : > { %3192 = vrot.lane.b32.xlu1 %v7306_v18, %s5917_s27  ;;  %3213 = vrot.lane.b32.xlu2 %v7315_v30, %s5917_s27 }
 0x601   : > { %3210 = vrot.lane.b32.xlu0 %v7310_v48, %s5917_s27  ;;  %s5923_s27 = smov 34  }
 0x608   : > { %3230 = vrot.lane.b32.xlu1 %v7308_v49, %s5918_s30  ;;  %3251 = vrot.lane.b32.xlu2 %v7310_v48, %s5918_s30 }
 0x609   : > { %3233 = vrot.lane.b32.xlu0 %v7306_v18, %s5918_s30 }
 0x610   : > { %3254 = vrot.lane.b32.xlu1 %v7315_v30, %s5918_s30  ;;  %3274 = vrot.lane.b32.xlu2 %v7306_v18, %s5919_s23  ;;  %s5924_s30 = smov 33  }
 0x611   : > { %3271 = vrot.lane.b32.xlu0 %v7308_v49, %s5919_s23 }
 0x618   : > { %3292 = vrot.lane.b32.xlu1 %v7310_v48, %s5919_s23  ;;  %3312 = vrot.lane.b32.xlu2 %v7308_v49, %s5920_s26 }
 0x619   : > { %3295 = vrot.lane.b32.xlu0 %v7315_v30, %s5919_s23  ;;  %s5925_s23 = smov 32  }
 0x620   : > { %3315 = vrot.lane.b32.xlu1 %v7306_v18, %s5920_s26  ;;  %3336 = vrot.lane.b32.xlu2 %v7315_v30, %s5920_s26 }
 0x621   : > { %3333 = vrot.lane.b32.xlu0 %v7310_v48, %s5920_s26  ;;  %s5926_s26 = smov 31  }
 0x628   : > { %3353 = vrot.lane.b32.xlu1 %v7308_v49, %s5921_s3  ;;  %3374 = vrot.lane.b32.xlu2 %v7310_v48, %s5921_s3 }
 0x629   : > { %3356 = vrot.lane.b32.xlu0 %v7306_v18, %s5921_s3 }
 0x630   : > { %3377 = vrot.lane.b32.xlu1 %v7315_v30, %s5921_s3  ;;  %3397 = vrot.lane.b32.xlu2 %v7306_v18, %s5922_s25  ;;  %s5927_s3 = smov 30  }
 0x631   : > { %3394 = vrot.lane.b32.xlu0 %v7308_v49, %s5922_s25 }
 0x638   : > { %3415 = vrot.lane.b32.xlu1 %v7310_v48, %s5922_s25  ;;  %3435 = vrot.lane.b32.xlu2 %v7308_v49, %s5923_s27 }
 0x639   : > { %3418 = vrot.lane.b32.xlu0 %v7315_v30, %s5922_s25  ;;  %s5928_s25 = smov 29  }
 0x640   : > { %3438 = vrot.lane.b32.xlu1 %v7306_v18, %s5923_s27  ;;  %3459 = vrot.lane.b32.xlu2 %v7315_v30, %s5923_s27 }
 0x641   : > { %3456 = vrot.lane.b32.xlu0 %v7310_v48, %s5923_s27  ;;  %s5929_s27 = smov 19  }
 0x642   : > { %v7350_v36 = vpop.permute.xlu2 %3128 }
 0x648   : > { %3476 = vrot.lane.b32.xlu1 %v7308_v49, %s5924_s30  ;;  %3497 = vrot.lane.b32.xlu2 %v7310_v48, %s5924_s30 }
 0x649   : > { %3479 = vrot.lane.b32.xlu0 %v7306_v18, %s5924_s30 }
 0x64a   : > { %v7355_v11 = vpop.permute.xlu2 %3151 }
 0x650   : > { %3500 = vrot.lane.b32.xlu1 %v7315_v30, %s5924_s30  ;;  %3520 = vrot.lane.b32.xlu2 %v7306_v18, %s5925_s23  ;;  %s5930_s30 = smov 18  }
 0x651   : > { %3517 = vrot.lane.b32.xlu0 %v7308_v49, %s5925_s23 }
 0x652   : > { %v7360_v7 = vpop.permute.xlu2 %3189 }
 0x658   : > { %3537 = vrot.lane.b32.xlu1 %v7310_v48, %s5925_s23  ;;  %3557 = vrot.lane.b32.xlu2 %v7308_v49, %s5926_s26 }
 0x659   : > { %3540 = vrot.lane.b32.xlu0 %v7315_v30, %s5925_s23  ;;  %s5933_s23 = smov 3  }
 0x65a   : > { %v3107_v6 = vpop.permute.xlu1 %3106  ;;  %v7365_v59 = vpop.permute.xlu2 %3213 }
 0x65b   : > { %v3111_v25 = vpop.permute.xlu0 %3110 }
 0x65c   : > { %v3113_v33 = vsel %vm3112_vm13, %v3111_v25, %v3107_v6  ;;  %v3116_v60 = vsel %vm3112_vm13, %v3107_v6, %v3111_v25 }
 0x65d   : > { %v3123_v0 = vmul.f32 %v3119_v17, %v3116_v60  ;;  %v3124_v34 = vmul.f32 %v3120_v45, %v3113_v33  ;;  %v3261_v60 = vld [vmem:[#allocation10 + $0x3] ss:$8 sm:$0x3] }
 0x660   : > { %3560 = vrot.lane.b32.xlu1 %v7306_v18, %s5926_s26  ;;  %3581 = vrot.lane.b32.xlu2 %v7315_v30, %s5926_s26 }
 0x661   : > { %3578 = vrot.lane.b32.xlu0 %v7310_v48, %s5926_s26  ;;  %s5934_s26 = smov 2  }
 0x662   : > { %v3133_v26 = vpop.permute.xlu1 %3132  ;;  %v7370_v27 = vpop.permute.xlu2 %3251 }
 0x663   : > { %v7372_v20 = vpop.permute.xlu0 %3148  ;;  %v3134_v37 = vsel %vm3112_vm13, %v3133_v26, %v7350_v36  ;;  %v3137_v52 = vsel %vm3112_vm13, %v7350_v36, %v3133_v26  ;;  %vm3440_vm13 = vcmask 277504  }
 0x664   : > { %v3144_v50 = vmul.f32 %v3140_v32, %v3137_v52  ;;  %v3145_v23 = vmul.f32 %v3141_v53, %v3134_v37  ;;  %v3154_v21 = vsel %vm3153_vm14, %v7355_v11, %v7372_v20  ;;  %v3157_v36 = vsel %vm3153_vm14, %v7372_v20, %v7355_v11  ;;  %v3220_v52 = vld [vmem:[#allocation10 + $0x2] ss:$8 sm:$0x3] }
 0x665   : > { %v3203_v32 = vperm.slane %v3200_v4, 1  ;;  %v3165_v20 = vmul.f32 %v3161_v10, %v3157_v36  ;;  %v3166_v17 = vmul.f32 %v3162_v57, %v3154_v21  ;;  %v3244_v4 = vperm.slane %v3241_v8, 1 }
 0x666   : > { %v3146_v26 = vadd.f32 %v3144_v50, %v3123_v0  ;;  %v3147_v38 = vadd.f32 %v3145_v23, %v3124_v34 }
 0x668   : > { %3598 = vrot.lane.b32.xlu1 %v7308_v49, %s5927_s3  ;;  %3619 = vrot.lane.b32.xlu2 %v7310_v48, %s5927_s3 }
 0x669   : > { %3601 = vrot.lane.b32.xlu0 %v7306_v18, %s5927_s3 }
 0x66a   : > { %v7377_v12 = vpop.permute.xlu1 %3169  ;;  %v7379_v55 = vpop.permute.xlu2 %3274 }
 0x66b   : > { %v7381_v46 = vpop.permute.xlu0 %3172 }
 0x66c   : > { %v3174_v6 = vsel %vm3153_vm14, %v7381_v46, %v7377_v12  ;;  %v3177_v25 = vsel %vm3153_vm14, %v7377_v12, %v7381_v46  ;;  %v3167_v12 = vadd.f32 %v3165_v20, %v3146_v26  ;;  %v3168_v46 = vadd.f32 %v3166_v17, %v3147_v38  ;;  %v3282_v20 = vld [vmem:[#allocation8 + $0x4] ss:$8 sm:$0x3]  ;;  %v3302_v17 = vld [vmem:[#allocation10 + $0x4] ss:$8 sm:$0x3] }
 0x66d   : > { %v3185_v45 = vmul.f32 %v3181_v58, %v3177_v25  ;;  %v3186_v37 = vmul.f32 %v3182_v1, %v3174_v6  ;;  %v3243_v58 = vperm.slane %v3241_v8, 0  ;;  %v3263_v26 = vperm.slane %v3261_v60, 0  ;;  %v3323_v8 = vld [vmem:[#allocation8 + $0x5] ss:$8 sm:$0x3] }
 0x66e   : > { %v3264_v38 = vperm.slane %v3261_v60, 1  ;;  %vm3481_vm14 = vcmask 269312  }
 0x66f   : > { %v3187_v10 = vadd.f32 %v3185_v45, %v3167_v12  ;;  %v3188_v57 = vadd.f32 %v3186_v37, %v3168_v46 }
 0x670   : > { %3622 = vrot.lane.b32.xlu1 %v7315_v30, %s5927_s3  ;;  %3642 = vrot.lane.b32.xlu2 %v7306_v18, %s5928_s25  ;;  %s5937_s3 = smov 115  }
 0x671   : > { %3639 = vrot.lane.b32.xlu0 %v7308_v49, %s5928_s25 }
 0x672   : > { %v7386_v56 = vpop.permute.xlu1 %3192  ;;  %v7388_v44 = vpop.permute.xlu2 %3312 }
 0x673   : > { %v7390_v61 = vpop.permute.xlu0 %3210  ;;  %v3195_v53 = vsel %vm3194_vm15, %v7386_v56, %v7360_v7  ;;  %v3198_v11 = vsel %vm3194_vm15, %v7360_v7, %v7386_v56  ;;  %v3222_v7 = vperm.slane %v3220_v52, 0  ;;  %v3223_v56 = vperm.slane %v3220_v52, 1 }
 0x674   : > { %v3206_v16 = vmul.f32 %v3202_v51, %v3198_v11  ;;  %v3207_v33 = vmul.f32 %v3203_v32, %v3195_v53  ;;  %v3215_v34 = vsel %vm3194_vm15, %v7365_v59, %v7390_v61  ;;  %v3218_v1 = vsel %vm3194_vm15, %v7390_v61, %v7365_v59 }
 0x675   : > { %v3226_v61 = vmul.f32 %v3222_v7, %v3218_v1  ;;  %v3227_v32 = vmul.f32 %v3223_v56, %v3215_v34  ;;  %v3304_v52 = vperm.slane %v3302_v17, 0  ;;  %v3305_v7 = vperm.slane %v3302_v17, 1 }
 0x676   : > { %v3208_v6 = vadd.f32 %v3206_v16, %v3187_v10  ;;  %v3209_v25 = vadd.f32 %v3207_v33, %v3188_v57  ;;  %v3325_v1 = vperm.slane %v3323_v8, 0  ;;  %vm3562_vm15 = vcmask 252928  }
 0x678   : > { %3660 = vrot.lane.b32.xlu1 %v7310_v48, %s5928_s25  ;;  %3680 = vrot.lane.b32.xlu2 %v7308_v49, %s5929_s27 }
 0x679   : > { %3663 = vrot.lane.b32.xlu0 %v7315_v30, %s5928_s25  ;;  %s5938_s25 = smov 114  }
 0x67a   : > { %v7395_v15 = vpop.permute.xlu1 %3230  ;;  %v7397_v14 = vpop.permute.xlu2 %3336 }
 0x67b   : > { %v7399_v63 = vpop.permute.xlu0 %3233 }
 0x67c   : > { %v3236_v21 = vsel %vm3235_vm8, %v7399_v63, %v7395_v15  ;;  %v3239_v36 = vsel %vm3235_vm8, %v7395_v15, %v7399_v63  ;;  %v3228_v15 = vadd.f32 %v3226_v61, %v3208_v6  ;;  %v3229_v63 = vadd.f32 %v3227_v32, %v3209_v25  ;;  %v3384_v32 = vld [vmem:[#allocation10 + $0x6] ss:$8 sm:$0x3] }
 0x67d   : > { %v3247_v53 = vmul.f32 %v3243_v58, %v3239_v36  ;;  %v3248_v11 = vmul.f32 %v3244_v4, %v3236_v21  ;;  %v3326_v21 = vperm.slane %v3323_v8, 1 }
 0x67f   : > { %v3249_v16 = vadd.f32 %v3247_v53, %v3228_v15  ;;  %v3250_v33 = vadd.f32 %v3248_v11, %v3229_v63 }
 0x680   : > { %3683 = vrot.lane.b32.xlu1 %v7306_v18, %s5929_s27  ;;  %3704 = vrot.lane.b32.xlu2 %v7315_v30, %s5929_s27 }
 0x681   : > { %3701 = vrot.lane.b32.xlu0 %v7310_v48, %s5929_s27  ;;  %s5940_s27 = smov 109  }
 0x682   : > { %v7404_v43 = vpop.permute.xlu1 %3254  ;;  %v7406_v31 = vpop.permute.xlu2 %3374 }
 0x683   : > { %v7408_v42 = vpop.permute.xlu0 %3271  ;;  %v3256_v51 = vsel %vm3235_vm8, %v7404_v43, %v7370_v27  ;;  %v3259_v59 = vsel %vm3235_vm8, %v7370_v27, %v7404_v43  ;;  %v3284_v27 = vperm.slane %v3282_v20, 0  ;;  %v3285_v43 = vperm.slane %v3282_v20, 1 }
 0x684   : > { %v3267_v45 = vmul.f32 %v3263_v26, %v3259_v59  ;;  %v3268_v37 = vmul.f32 %v3264_v38, %v3256_v51  ;;  %v3277_v60 = vsel %vm3276_vm9, %v7379_v55, %v7408_v42  ;;  %v3280_v10 = vsel %vm3276_vm9, %v7408_v42, %v7379_v55  ;;  %v3343_v38 = vld [vmem:[#allocation10 + $0x5] ss:$8 sm:$0x3]  ;;  %v3364_v51 = vld [vmem:[#allocation8 + $0x6] ss:$8 sm:$0x3] }
 0x685   : > { %v3288_v42 = vmul.f32 %v3284_v27, %v3280_v10  ;;  %v3289_v6 = vmul.f32 %v3285_v43, %v3277_v60  ;;  %v3366_v15 = vperm.slane %v3364_v51, 0  ;;  %v3367_v63 = vperm.slane %v3364_v51, 1 }
 0x686   : > { %v3269_v4 = vadd.f32 %v3267_v45, %v3249_v16  ;;  %v3270_v34 = vadd.f32 %v3268_v37, %v3250_v33  ;;  %v3386_v33 = vperm.slane %v3384_v32, 0  ;;  %vm3644_vm8 = vcmask 236544  }
 0x688   : > { %3721 = vrot.lane.b32.xlu1 %v7308_v49, %s5930_s30  ;;  %3742 = vrot.lane.b32.xlu2 %v7310_v48, %s5930_s30 }
 0x689   : > { %3724 = vrot.lane.b32.xlu0 %v7306_v18, %s5930_s30 }
 0x68a   : > { %v7413_v39 = vpop.permute.xlu1 %3292  ;;  %v7415_v62 = vpop.permute.xlu2 %3397 }
 0x68b   : > { %v7417_v5 = vpop.permute.xlu0 %3295 }
 0x68c   : > { %v3297_v57 = vsel %vm3276_vm9, %v7417_v5, %v7413_v39  ;;  %v3300_v58 = vsel %vm3276_vm9, %v7413_v39, %v7417_v5  ;;  %v3290_v39 = vadd.f32 %v3288_v42, %v3269_v4  ;;  %v3291_v5 = vadd.f32 %v3289_v6, %v3270_v34  ;;  %v3405_v4 = vld [vmem:[#allocation8 + $0x7] ss:$8 sm:$0x3]  ;;  %v3425_v34 = vld [vmem:[#allocation10 + $0x7] ss:$8 sm:$0x3] }
 0x68d   : > { %v3308_v25 = vmul.f32 %v3304_v52, %v3300_v58  ;;  %v3309_v26 = vmul.f32 %v3305_v7, %v3297_v57  ;;  %v3387_v7 = vperm.slane %v3384_v32, 1  ;;  %vm3685_vm9 = vcmask 154624  }
 0x68f   : > { %v3310_v20 = vadd.f32 %v3308_v25, %v3290_v39  ;;  %v3311_v17 = vadd.f32 %v3309_v26, %v3291_v5 }
 0x690   : > { %3745 = vrot.lane.b32.xlu1 %v7315_v30, %s5930_s30  ;;  %3765 = vrot.lane.b32.xlu2 %v7306_v18, %s5905_s24  ;;  %s5941_s30 = smov 99  }
 0x691   : > { %3762 = vrot.lane.b32.xlu0 %v7308_v49, %s5905_s24 }
 0x692   : > { %v7424_v24 = vpop.permute.xlu1 %3315  ;;  %v7426_v9 = vpop.permute.xlu2 %3435 }
 0x693   : > { %v7428_v22 = vpop.permute.xlu0 %3333  ;;  %v3318_v36 = vsel %vm3317_vm10, %v7424_v24, %v7388_v44  ;;  %v3321_v55 = vsel %vm3317_vm10, %v7388_v44, %v7424_v24  ;;  %v3345_v44 = vperm.slane %v3343_v38, 0  ;;  %v3346_v24 = vperm.slane %v3343_v38, 1 }
 0x694   : > { %v3329_v59 = vmul.f32 %v3325_v1, %v3321_v55  ;;  %v3330_v61 = vmul.f32 %v3326_v21, %v3318_v36  ;;  %v3338_v37 = vsel %vm3317_vm10, %v7397_v14, %v7428_v22  ;;  %v3341_v27 = vsel %vm3317_vm10, %v7428_v22, %v7397_v14  ;;  %v3446_v55 = vld [vmem:[#allocation8 + $0x10] ss:$8 sm:$0x3] }
 0x695   : > { %v3349_v22 = vmul.f32 %v3345_v44, %v3341_v27  ;;  %v3350_v10 = vmul.f32 %v3346_v24, %v3338_v37  ;;  %v3427_v36 = vperm.slane %v3425_v34, 0  ;;  %v3428_v38 = vperm.slane %v3425_v34, 1  ;;  %v3466_v27 = vld [vmem:[#allocation10 + $0x10] ss:$8 sm:$0x3] }
 0x696   : > { %v3331_v8 = vadd.f32 %v3329_v59, %v3310_v20  ;;  %v3332_v16 = vadd.f32 %v3330_v61, %v3311_v17  ;;  %v3448_v32 = vperm.slane %v3446_v55, 0  ;;  %v3449_v20 = vperm.slane %v3446_v55, 1 }
 0x697   : > { %vm3726_vm10 = vcmask 146432  }
 0x698   : > { %3782 = vrot.lane.b32.xlu1 %v7310_v48, %s5905_s24  ;;  %3802 = vrot.lane.b32.xlu2 %v7308_v49, %s5904_s19 }
 0x699   : > { %3785 = vrot.lane.b32.xlu0 %v7315_v30, %s5905_s24  ;;  %s5931_s24 = smov 14  }
 0x69a   : > { %v7438_v29 = vpop.permute.xlu1 %3353  ;;  %v7440_v3 = vpop.permute.xlu2 %3459 }
 0x69b   : > { %v7442_v35 = vpop.permute.xlu0 %3356 }
 0x69c   : > { %v3359_v43 = vsel %vm3358_vm12, %v7442_v35, %v7438_v29  ;;  %v3362_v52 = vsel %vm3358_vm12, %v7438_v29, %v7442_v35  ;;  %v3351_v29 = vadd.f32 %v3349_v22, %v3331_v8  ;;  %v3352_v35 = vadd.f32 %v3350_v10, %v3332_v16  ;;  %v3507_v16 = vld [vmem:[#allocation10 + $0x11] ss:$8 sm:$0x3] }
 0x69d   : > { %v3370_v57 = vmul.f32 %v3366_v15, %v3362_v52  ;;  %v3371_v58 = vmul.f32 %v3367_v63, %v3359_v43  ;;  %v3487_v43 = vld [vmem:[#allocation8 + $0x11] ss:$8 sm:$0x3] }
 0x69e   : > { %v3489_v22 = vperm.slane %v3487_v43, 0  ;;  %v3490_v10 = vperm.slane %v3487_v43, 1 }
 0x69f   : > { %v3372_v25 = vadd.f32 %v3370_v57, %v3351_v29  ;;  %v3373_v26 = vadd.f32 %v3371_v58, %v3352_v35 }
 0x6a0   : > { %3805 = vrot.lane.b32.xlu1 %v7306_v18, %s5904_s19  ;;  %3825 = vrot.lane.b32.xlu2 %v7315_v30, %s5904_s19 }
 0x6a1   : > { %3822 = vrot.lane.b32.xlu0 %v7310_v48, %s5904_s19 }
 0x6a2   : > { %v7468_v50 = vpop.permute.xlu1 %3377  ;;  %v7470_v23 = vpop.permute.xlu2 %3497 }
 0x6a3   : > { %v7472_v0 = vpop.permute.xlu0 %3394  ;;  %v3379_v60 = vsel %vm3358_vm12, %v7468_v50, %v7406_v31  ;;  %v3382_v14 = vsel %vm3358_vm12, %v7406_v31, %v7468_v50  ;;  %v3407_v31 = vperm.slane %v3405_v4, 0  ;;  %v3408_v50 = vperm.slane %v3405_v4, 1 }
 0x6a4   : > { %v3390_v1 = vmul.f32 %v3386_v33, %v3382_v14  ;;  %v3391_v21 = vmul.f32 %v3387_v7, %v3379_v60  ;;  %v3400_v39 = vsel %vm3399_vm7, %v7415_v62, %v7472_v0  ;;  %v3403_v5 = vsel %vm3399_vm7, %v7472_v0, %v7415_v62 }
 0x6a5   : > { %v3411_v63 = vmul.f32 %v3407_v31, %v3403_v5  ;;  %v3412_v62 = vmul.f32 %v3408_v50, %v3400_v39  ;;  %v3510_v31 = vperm.slane %v3507_v16, 1  ;;  %v3527_v39 = vld [vmem:[#allocation8 + $0x12] ss:$8 sm:$0x3]  ;;  %vm4274_vm12 = vcmask 932864  }
 0x6a6   : > { %v3392_v44 = vadd.f32 %v3390_v1, %v3372_v25  ;;  %v3393_v24 = vadd.f32 %v3391_v21, %v3373_v26  ;;  %v3509_v21 = vperm.slane %v3507_v16, 0 }
 0x6a8   : > { %3842 = vrot.lane.b32.xlu1 %v7308_v49, %s5906_s22  ;;  %3862 = vrot.lane.b32.xlu2 %v7310_v48, %s5906_s22 }
 0x6a9   : > { %3845 = vrot.lane.b32.xlu0 %v7306_v18, %s5906_s22 }
 0x6aa   : > { %v7498_v12 = vpop.permute.xlu1 %3415  ;;  %v7500_v46 = vpop.permute.xlu2 %3520 }
 0x6ab   : > { %v7502_v56 = vpop.permute.xlu0 %3418 }
 0x6ac   : > { %v3420_v59 = vsel %vm3399_vm7, %v7502_v56, %v7498_v12  ;;  %v3423_v61 = vsel %vm3399_vm7, %v7498_v12, %v7502_v56  ;;  %v3413_v12 = vadd.f32 %v3411_v63, %v3392_v44  ;;  %v3414_v56 = vadd.f32 %v3412_v62, %v3393_v24 }
 0x6ad   : > { %v3431_v0 = vmul.f32 %v3427_v36, %v3423_v61  ;;  %v3432_v37 = vmul.f32 %v3428_v38, %v3420_v59  ;;  %v3529_v59 = vperm.slane %v3527_v39, 0  ;;  %v3530_v61 = vperm.slane %v3527_v39, 1 }
 0x6af   : > { %v3433_v60 = vadd.f32 %v3431_v0, %v3413_v12  ;;  %v3434_v14 = vadd.f32 %v3432_v37, %v3414_v56  ;;  %v3568_v12 = vld [vmem:[#allocation8 + $0x13] ss:$8 sm:$0x3] }
 0x6b0   : > { %3865 = vrot.lane.b32.xlu1 %v7315_v30, %s5906_s22  ;;  %3885 = vrot.lane.b32.xlu2 %v7306_v18, %s5931_s24  ;;  %s5932_s22 = smov 13   ;;  %v3571_v16 = vperm.slane %v3568_v12, 1 }
 0x6b1   : > { %3882 = vrot.lane.b32.xlu0 %v7308_v49, %s5931_s24 }
 0x6b2   : > { %v3439_v53 = vpop.permute.xlu1 %3438  ;;  %v7528_v11 = vpop.permute.xlu2 %3557 }
 0x6b3   : > { %v7530_v45 = vpop.permute.xlu0 %3456  ;;  %v3441_v17 = vsel %vm3440_vm13, %v3439_v53, %v7426_v9  ;;  %v3444_v15 = vsel %vm3440_vm13, %v7426_v9, %v3439_v53  ;;  %v3468_v9 = vperm.slane %v3466_v27, 0  ;;  %v3469_v53 = vperm.slane %v3466_v27, 1 }
 0x6b4   : > { %v3452_v52 = vmul.f32 %v3448_v32, %v3444_v15  ;;  %v3453_v8 = vmul.f32 %v3449_v20, %v3441_v17  ;;  %v3461_v58 = vsel %vm3440_vm13, %v7440_v3, %v7530_v45  ;;  %v3464_v4 = vsel %vm3440_vm13, %v7530_v45, %v7440_v3  ;;  %v3547_v3 = vld [vmem:[#allocation10 + $0x12] ss:$8 sm:$0x3] }
 0x6b5   : > { %v3472_v55 = vmul.f32 %v3468_v9, %v3464_v4  ;;  %v3473_v25 = vmul.f32 %v3469_v53, %v3461_v58  ;;  %v3549_v20 = vperm.slane %v3547_v3, 0  ;;  %v3550_v17 = vperm.slane %v3547_v3, 1  ;;  %v3588_v53 = vld [vmem:[#allocation10 + $0x13] ss:$8 sm:$0x3] }
 0x6b6   : > { %v3454_v35 = vadd.f32 %v3452_v52, %v3433_v60  ;;  %v3455_v1 = vadd.f32 %v3453_v8, %v3434_v14 }
 0x6b8   : > { %3903 = vrot.lane.b32.xlu1 %v7310_v48, %s5931_s24  ;;  %3923 = vrot.lane.b32.xlu2 %v7308_v49, %s5932_s22  ;;  %v3474_v45 = vadd.f32 %v3472_v55, %v3454_v35 }
 0x6b9   : > { %3906 = vrot.lane.b32.xlu0 %v7315_v30, %s5931_s24  ;;  %s5942_s24 = smov 98  }
 0x6ba   : > { %v3477_v42 = vpop.permute.xlu1 %3476  ;;  %v7556_v6 = vpop.permute.xlu2 %3581 }
 0x6bb   : > { %v3480_v51 = vpop.permute.xlu0 %3479 }
 0x6bc   : > { %v3482_v34 = vsel %vm3481_vm14, %v3480_v51, %v3477_v42  ;;  %v3485_v29 = vsel %vm3481_vm14, %v3477_v42, %v3480_v51  ;;  %v3475_v42 = vadd.f32 %v3473_v25, %v3455_v1 }
 0x6bd   : > { %v3493_v26 = vmul.f32 %v3489_v22, %v3485_v29  ;;  %v3494_v38 = vmul.f32 %v3490_v10, %v3482_v34  ;;  %v3590_v10 = vperm.slane %v3588_v53, 0 }
 0x6bf   : > { %v3495_v24 = vadd.f32 %v3493_v26, %v3474_v45  ;;  %v3496_v32 = vadd.f32 %v3494_v38, %v3475_v42  ;;  %v3609_v38 = vld [vmem:[#allocation8 + $0x14] ss:$8 sm:$0x3] }
 0x6c0   : > { %3926 = vrot.lane.b32.xlu1 %v7306_v18, %s5932_s22  ;;  %3947 = vrot.lane.b32.xlu2 %v7315_v30, %s5932_s22  ;;  %v3612_v45 = vperm.slane %v3609_v38, 1 }
 0x6c1   : > { %3944 = vrot.lane.b32.xlu0 %v7310_v48, %s5932_s22  ;;  %s5943_s22 = smov 97  }
 0x6c2   : > { %v3501_v33 = vpop.permute.xlu1 %3500  ;;  %v7580_v7 = vpop.permute.xlu2 %3619 }
 0x6c3   : > { %v3518_v57 = vpop.permute.xlu0 %3517  ;;  %v3502_v50 = vsel %vm3481_vm14, %v3501_v33, %v7470_v23  ;;  %v3505_v36 = vsel %vm3481_vm14, %v7470_v23, %v3501_v33 }
 0x6c4   : > { %v3513_v51 = vmul.f32 %v3509_v21, %v3505_v36  ;;  %v3514_v5 = vmul.f32 %v3510_v31, %v3502_v50  ;;  %v3522_v63 = vsel %vm574_vm1, %v7500_v46, %v3518_v57  ;;  %v3525_v62 = vsel %vm574_vm1, %v3518_v57, %v7500_v46 }
 0x6c5   : > { %v3533_v56 = vmul.f32 %v3529_v59, %v3525_v62  ;;  %v3534_v52 = vmul.f32 %v3530_v61, %v3522_v63  ;;  %v3570_v46 = vperm.slane %v3568_v12, 0  ;;  %v3591_v57 = vperm.slane %v3588_v53, 1 }
 0x6c6   : > { %v3515_v27 = vadd.f32 %v3513_v51, %v3495_v24  ;;  %v3516_v43 = vadd.f32 %v3514_v5, %v3496_v32  ;;  %v3629_v24 = vld [vmem:[#allocation10 + $0x14] ss:$8 sm:$0x3] }
 0x6c7   : > { %v3632_v63 = vperm.slane %v3629_v24, 1 }
 0x6c8   : > { %3964 = vrot.lane.b32.xlu1 %v7308_v49, %s5933_s23  ;;  %3985 = vrot.lane.b32.xlu2 %v7310_v48, %s5933_s23  ;;  %v3535_v33 = vadd.f32 %v3533_v56, %v3515_v27  ;;  %v3536_v60 = vadd.f32 %v3534_v52, %v3516_v43 }
 0x6c9   : > { %3967 = vrot.lane.b32.xlu0 %v7306_v18, %s5933_s23 }
 0x6ca   : > { %v3538_v23 = vpop.permute.xlu1 %3537  ;;  %v7597_v44 = vpop.permute.xlu2 %3642 }
 0x6cb   : > { %v3541_v15 = vpop.permute.xlu0 %3540 }
 0x6cc   : > { %v3542_v0 = vsel %vm574_vm1, %v3541_v15, %v3538_v23  ;;  %v3545_v37 = vsel %vm574_vm1, %v3538_v23, %v3541_v15  ;;  %vm3603_vm1 = vcmask 244736   ;;  %v3631_v15 = vperm.slane %v3629_v24, 0 }
 0x6cd   : > { %v3553_v8 = vmul.f32 %v3549_v20, %v3545_v37  ;;  %v3554_v9 = vmul.f32 %v3550_v17, %v3542_v0  ;;  %v3650_v17 = vld [vmem:[#allocation8 + $0x15] ss:$8 sm:$0x3] }
 0x6ce   : > { %v3652_v37 = vperm.slane %v3650_v17, 0  ;;  %v3653_v27 = vperm.slane %v3650_v17, 1 }
 0x6cf   : > { %v3555_v58 = vadd.f32 %v3553_v8, %v3535_v33  ;;  %v3556_v4 = vadd.f32 %v3554_v9, %v3536_v60 }
 0x6d0   : > { %3988 = vrot.lane.b32.xlu1 %v7315_v30, %s5933_s23  ;;  %4008 = vrot.lane.b32.xlu2 %v7306_v18, %s5934_s26  ;;  %s5944_s23 = smov 96  }
 0x6d1   : > { %4005 = vrot.lane.b32.xlu0 %v7308_v49, %s5934_s26 }
 0x6d2   : > { %v3561_v14 = vpop.permute.xlu1 %3560  ;;  %v7610_v22 = vpop.permute.xlu2 %3680 }
 0x6d3   : > { %v3563_v34 = vsel %vm3562_vm15, %v3561_v14, %v7528_v11  ;;  %v3566_v29 = vsel %vm3562_vm15, %v7528_v11, %v3561_v14  ;;  %v3579_v35 = vpop.permute.xlu0 %3578  ;;  %v3611_v11 = vperm.slane %v3609_v38, 0  ;;  %v3670_v14 = vld [vmem:[#allocation10 + $0x15] ss:$8 sm:$0x3] }
 0x6d4   : > { %v3574_v1 = vmul.f32 %v3570_v46, %v3566_v29  ;;  %v3575_v21 = vmul.f32 %v3571_v16, %v3563_v34  ;;  %v3583_v31 = vsel %vm3562_vm15, %v7556_v6, %v3579_v35  ;;  %v3586_v50 = vsel %vm3562_vm15, %v3579_v35, %v7556_v6 }
 0x6d5   : > { %v3594_v25 = vmul.f32 %v3590_v10, %v3586_v50  ;;  %v3595_v26 = vmul.f32 %v3591_v57, %v3583_v31  ;;  %v3691_v31 = vld [vmem:[#allocation8 + $0x16] ss:$8 sm:$0x3]  ;;  %vm8256_vm15 = vcmask 908288  }
 0x6d6   : > { %v3576_v36 = vadd.f32 %v3574_v1, %v3555_v58  ;;  %v3577_v55 = vadd.f32 %v3575_v21, %v3556_v4  ;;  %v3673_v58 = vperm.slane %v3670_v14, 1 }
 0x6d8   : > { %v3596_v39 = vadd.f32 %v3594_v25, %v3576_v36  ;;  %v3597_v3 = vadd.f32 %v3595_v26, %v3577_v55  ;;  %4025 = vrot.lane.b32.xlu1 %v7310_v48, %s5934_s26  ;;  %4045 = vrot.lane.b32.xlu2 %v7308_v49, %s5907_s21  ;;  %v3711_v55 = vld [vmem:[#allocation10 + $0x16] ss:$8 sm:$0x3]  ;;  %v3693_v25 = vperm.slane %v3691_v31, 0  ;;  %v3694_v26 = vperm.slane %v3691_v31, 1 }
 0x6d9   : > { %4028 = vrot.lane.b32.xlu0 %v7315_v30, %s5934_s26  ;;  %s5945_s26 = smov 95  }
 0x6da   : > { %v3599_v6 = vpop.permute.xlu1 %3598  ;;  %v7626_v42 = vpop.permute.xlu2 %3704 }
 0x6db   : > { %v3602_v51 = vpop.permute.xlu0 %3601 }
 0x6dc   : > { %v3604_v5 = vsel %vm3603_vm1, %v3602_v51, %v3599_v6  ;;  %v3607_v59 = vsel %vm3603_vm1, %v3599_v6, %v3602_v51 }
 0x6dd   : > { %v3615_v61 = vmul.f32 %v3611_v11, %v3607_v59  ;;  %v3616_v23 = vmul.f32 %v3612_v45, %v3604_v5  ;;  %v3714_v11 = vperm.slane %v3711_v55, 1 }
 0x6df   : > { %v3617_v32 = vadd.f32 %v3615_v61, %v3596_v39  ;;  %v3618_v20 = vadd.f32 %v3616_v23, %v3597_v3  ;;  %v3713_v3 = vperm.slane %v3711_v55, 0 }
 0x6e0   : > { %4048 = vrot.lane.b32.xlu1 %v7306_v18, %s5907_s21  ;;  %4068 = vrot.lane.b32.xlu2 %v7315_v30, %s5907_s21 }
 0x6e1   : > { %4065 = vrot.lane.b32.xlu0 %v7310_v48, %s5907_s21  ;;  %s5935_s21 = smov 126  }
 0x6e2   : > { %v3623_v62 = vpop.permute.xlu1 %3622  ;;  %v7636_v0 = vpop.permute.xlu2 %3742 }
 0x6e3   : > { %v3624_v43 = vsel %vm3603_vm1, %v3623_v62, %v7580_v7  ;;  %v3627_v12 = vsel %vm3603_vm1, %v7580_v7, %v3623_v62  ;;  %v3640_v56 = vpop.permute.xlu0 %3639  ;;  %v3672_v7 = vperm.slane %v3670_v14, 0  ;;  %vm8257_vm1 = vmmov %vm8256_vm15 }
 0x6e4   : > { %v3635_v52 = vmul.f32 %v3631_v15, %v3627_v12  ;;  %v3636_v8 = vmul.f32 %v3632_v63, %v3624_v43  ;;  %v3645_v9 = vsel %vm3644_vm8, %v7597_v44, %v3640_v56  ;;  %v3648_v53 = vsel %vm3644_vm8, %v3640_v56, %v7597_v44  ;;  %v3732_v15 = vld [vmem:[#allocation8 + $0x17] ss:$8 sm:$0x3] }
 0x6e5   : > { %v3656_v33 = vmul.f32 %v3652_v37, %v3648_v53  ;;  %v3657_v60 = vmul.f32 %v3653_v27, %v3645_v9  ;;  %v3735_v37 = vperm.slane %v3732_v15, 1  ;;  %v3752_v9 = vld [vmem:[#allocation10 + $0x17] ss:$8 sm:$0x3] }
 0x6e6   : > { %v3637_v46 = vadd.f32 %v3635_v52, %v3617_v32  ;;  %v3638_v16 = vadd.f32 %v3636_v8, %v3618_v20 }
 0x6e8   : > { %v3658_v10 = vadd.f32 %v3656_v33, %v3637_v46  ;;  %v3659_v57 = vadd.f32 %v3657_v60, %v3638_v16  ;;  %4107 = vrot.lane.b32.xlu1 %v7306_v18, %s5908_s1  ;;  %4127 = vrot.lane.b32.xlu2 %v7315_v30, %s5908_s1  ;;  %v3772_v16 = vld [vmem:[#allocation8 + $0x20] ss:$8 sm:$0x3]  ;;  %v3754_v33 = vperm.slane %v3752_v9, 0  ;;  %v3755_v60 = vperm.slane %v3752_v9, 1 }
 0x6e9   : > { %4109 = vrot.lane.b32.xlu0 %v7308_v49, %s5908_s1 }
 0x6ea   : > { %v3661_v4 = vpop.permute.xlu1 %3660  ;;  %v7652_v44 = vpop.permute.xlu2 %3765 }
 0x6eb   : > { %v3664_v34 = vpop.permute.xlu0 %3663 }
 0x6ec   : > { %v3665_v29 = vsel %vm3644_vm8, %v3664_v34, %v3661_v4  ;;  %v3668_v35 = vsel %vm3644_vm8, %v3661_v4, %v3664_v34  ;;  %vm8258_vm8 = vmmov %vm8257_vm1 }
 0x6ed   : > { %v3676_v1 = vmul.f32 %v3672_v7, %v3668_v35  ;;  %v3677_v21 = vmul.f32 %v3673_v58, %v3665_v29  ;;  %v3775_v7 = vperm.slane %v3772_v16, 1 }
 0x6ef   : > { %v3678_v50 = vadd.f32 %v3676_v1, %v3658_v10  ;;  %v3679_v36 = vadd.f32 %v3677_v21, %v3659_v57  ;;  %v3774_v57 = vperm.slane %v3772_v16, 0 }
 0x6f0   : > { %4129 = vrot.lane.b32.xlu1 %v7310_v48, %s5908_s1  ;;  %4149 = vrot.lane.b32.xlu2 %v7308_v49, %s5935_s21  ;;  %s5936_s1 = smov 125  }
 0x6f1   : > { %4147 = vrot.lane.b32.xlu0 %v7306_v18, %s5935_s21 }
 0x6f2   : > { %v3684_v38 = vpop.permute.xlu1 %3683  ;;  %v7660_v39 = vpop.permute.xlu2 %3802 }
 0x6f3   : > { %v3686_v45 = vsel %vm3685_vm9, %v3684_v38, %v7610_v22  ;;  %v3689_v6 = vsel %vm3685_vm9, %v7610_v22, %v3684_v38  ;;  %v3702_v51 = vpop.permute.xlu0 %3701  ;;  %v3734_v22 = vperm.slane %v3732_v15, 0 }
 0x6f4   : > { %v3697_v5 = vmul.f32 %v3693_v25, %v3689_v6  ;;  %v3698_v59 = vmul.f32 %v3694_v26, %v3686_v45  ;;  %v3706_v61 = vsel %vm3685_vm9, %v7626_v42, %v3702_v51  ;;  %v3709_v23 = vsel %vm3685_vm9, %v3702_v51, %v7626_v42  ;;  %v3792_v25 = vld [vmem:[#allocation10 + $0x20] ss:$8 sm:$0x3]  ;;  %vm8259_vm9 = vmmov %vm8257_vm1 }
 0x6f5   : > { %v3717_v20 = vmul.f32 %v3713_v3, %v3709_v23  ;;  %v3718_v17 = vmul.f32 %v3714_v11, %v3706_v61  ;;  %v3795_v3 = vperm.slane %v3792_v25, 1  ;;  %v3812_v61 = vld [vmem:[#allocation8 + $0x21] ss:$8 sm:$0x3] }
 0x6f6   : > { %v3699_v24 = vadd.f32 %v3697_v5, %v3678_v50  ;;  %v3700_v32 = vadd.f32 %v3698_v59, %v3679_v36 }
 0x6f8   : > { %v3719_v63 = vadd.f32 %v3717_v20, %v3699_v24  ;;  %v3720_v62 = vadd.f32 %v3718_v17, %v3700_v32  ;;  %4168 = vrot.lane.b32.xlu1 %v7315_v30, %s5935_s21  ;;  %4188 = vrot.lane.b32.xlu2 %v7306_v18, %s5936_s1  ;;  %v3832_v32 = vld [vmem:[#allocation10 + $0x21] ss:$8 sm:$0x3]  ;;  %v3814_v20 = vperm.slane %v3812_v61, 0  ;;  %v3815_v17 = vperm.slane %v3812_v61, 1 }
 0x6f9   : > { %4170 = vrot.lane.b32.xlu0 %v7310_v48, %s5935_s21  ;;  %s5946_s21 = smov 94  }
 0x6fa   : > { %v3722_v27 = vpop.permute.xlu1 %3721  ;;  %v7669_v43 = vpop.permute.xlu2 %3825 }
 0x6fb   : > { %v3725_v42 = vpop.permute.xlu0 %3724 }
 0x6fc   : > { %v3727_v12 = vsel %vm3726_vm10, %v3725_v42, %v3722_v27  ;;  %v3730_v56 = vsel %vm3726_vm10, %v3722_v27, %v3725_v42 }
 0x6fd   : > { %v3738_v52 = vmul.f32 %v3734_v22, %v3730_v56  ;;  %v3739_v8 = vmul.f32 %v3735_v37, %v3727_v12  ;;  %v3835_v22 = vperm.slane %v3832_v32, 1 }
 0x6ff   : > { %v3740_v53 = vadd.f32 %v3738_v52, %v3719_v63  ;;  %v3741_v46 = vadd.f32 %v3739_v8, %v3720_v62  ;;  %v3834_v62 = vperm.slane %v3832_v32, 0 }
 0x700   : > { %4190 = vrot.lane.b32.xlu1 %v7308_v49, %s5936_s1  ;;  %4211 = vrot.lane.b32.xlu2 %v7310_v48, %s5936_s1 }
 0x701   : > { %4209 = vrot.lane.b32.xlu0 %v7315_v30, %s5936_s1  ;;  %s5947_s1 = smov 93  }
 0x702   : > { %v3746_v14 = vpop.permute.xlu1 %3745  ;;  %v7676_v10 = vpop.permute.xlu2 %3862 }
 0x703   : > { %v3747_v58 = vsel %vm3726_vm10, %v3746_v14, %v7636_v0  ;;  %v3750_v4 = vsel %vm3726_vm10, %v7636_v0, %v3746_v14  ;;  %v3763_v34 = vpop.permute.xlu0 %3762  ;;  %v3794_v0 = vperm.slane %v3792_v25, 0  ;;  %vm4435_vm10 = vcmask 900096  }
 0x704   : > { %v3758_v29 = vmul.f32 %v3754_v33, %v3750_v4  ;;  %v3759_v35 = vmul.f32 %v3755_v60, %v3747_v58  ;;  %v3767_v1 = vsel %vm482_vm2, %v7652_v44, %v3763_v34  ;;  %v3770_v21 = vsel %vm482_vm2, %v3763_v34, %v7652_v44  ;;  %v3852_v33 = vld [vmem:[#allocation8 + $0x22] ss:$8 sm:$0x3] }
 0x705   : > { %v3778_v36 = vmul.f32 %v3774_v57, %v3770_v21  ;;  %v3779_v55 = vmul.f32 %v3775_v7, %v3767_v1  ;;  %v3855_v57 = vperm.slane %v3852_v33, 1  ;;  %v3872_v1 = vld [vmem:[#allocation10 + $0x22] ss:$8 sm:$0x3] }
 0x706   : > { %v3760_v31 = vadd.f32 %v3758_v29, %v3740_v53  ;;  %v3761_v50 = vadd.f32 %v3759_v35, %v3741_v46 }
 0x708   : > { %v3780_v26 = vadd.f32 %v3778_v36, %v3760_v31  ;;  %v3781_v38 = vadd.f32 %v3779_v55, %v3761_v50  ;;  %4229 = vrot.lane.b32.xlu1 %v7306_v18, %s5937_s3  ;;  %4250 = vrot.lane.b32.xlu2 %v7315_v30, %s5937_s3  ;;  %v3893_v50 = vld [vmem:[#allocation8 + $0x23] ss:$8 sm:$0x3]  ;;  %v3874_v36 = vperm.slane %v3872_v1, 0  ;;  %v3875_v55 = vperm.slane %v3872_v1, 1 }
 0x709   : > { %4231 = vrot.lane.b32.xlu0 %v7308_v49, %s5937_s3 }
 0x70a   : > { %v3783_v11 = vpop.permute.xlu1 %3782  ;;  %v7689_v45 = vpop.permute.xlu2 %3885 }
 0x70b   : > { %v3786_v44 = vpop.permute.xlu0 %3785 }
 0x70c   : > { %v3787_v6 = vsel %vm482_vm2, %v3786_v44, %v3783_v11  ;;  %v3790_v51 = vsel %vm482_vm2, %v3783_v11, %v3786_v44  ;;  %vm3928_vm2 = vcmask 105472  }
 0x70d   : > { %v3798_v5 = vmul.f32 %v3794_v0, %v3790_v51  ;;  %v3799_v59 = vmul.f32 %v3795_v3, %v3787_v6  ;;  %v3896_v0 = vperm.slane %v3893_v50, 1 }
 0x70f   : > { %v3800_v23 = vadd.f32 %v3798_v5, %v3780_v26  ;;  %v3801_v24 = vadd.f32 %v3799_v59, %v3781_v38  ;;  %v3895_v38 = vperm.slane %v3893_v50, 0 }
 0x710   : > { %4252 = vrot.lane.b32.xlu1 %v7310_v48, %s5937_s3  ;;  %4272 = vrot.lane.b32.xlu2 %v7308_v49, %s5938_s25  ;;  %s5948_s3 = smov 83  }
 0x711   : > { %4270 = vrot.lane.b32.xlu0 %v7306_v18, %s5938_s25 }
 0x712   : > { %v3806_v15 = vpop.permute.xlu1 %3805  ;;  %v7696_v63 = vpop.permute.xlu2 %3923 }
 0x713   : > { %v3807_v37 = vsel %vm537_vm0, %v3806_v15, %v7660_v39  ;;  %v3810_v27 = vsel %vm537_vm0, %v7660_v39, %v3806_v15  ;;  %v3823_v42 = vpop.permute.xlu0 %3822  ;;  %v3854_v39 = vperm.slane %v3852_v33, 0 }
 0x714   : > { %v3818_v12 = vmul.f32 %v3814_v20, %v3810_v27  ;;  %v3819_v56 = vmul.f32 %v3815_v17, %v3807_v37  ;;  %v3827_v52 = vsel %vm537_vm0, %v7669_v43, %v3823_v42  ;;  %v3830_v8 = vsel %vm537_vm0, %v3823_v42, %v7669_v43  ;;  %v3913_v20 = vld [vmem:[#allocation10 + $0x23] ss:$8 sm:$0x3] }
 0x715   : > { %v3838_v46 = vmul.f32 %v3834_v62, %v3830_v8  ;;  %v3839_v16 = vmul.f32 %v3835_v22, %v3827_v52  ;;  %vm3887_vm0 = vcmask 113664   ;;  %v3916_v62 = vperm.slane %v3913_v20, 1  ;;  %v3934_v52 = vld [vmem:[#allocation8 + $0x24] ss:$8 sm:$0x3] }
 0x716   : > { %v3820_v9 = vadd.f32 %v3818_v12, %v3800_v23  ;;  %v3821_v53 = vadd.f32 %v3819_v56, %v3801_v24 }
 0x718   : > { %v3840_v60 = vadd.f32 %v3838_v46, %v3820_v9  ;;  %v3841_v14 = vadd.f32 %v3839_v16, %v3821_v53  ;;  %4291 = vrot.lane.b32.xlu1 %v7315_v30, %s5938_s25  ;;  %4311 = vrot.lane.b32.xlu2 %v7306_v18, %s5909_s29  ;;  %v3954_v53 = vld [vmem:[#allocation10 + $0x24] ss:$8 sm:$0x3]  ;;  %v3936_v46 = vperm.slane %v3934_v52, 0  ;;  %v3937_v16 = vperm.slane %v3934_v52, 1 }
 0x719   : > { %4293 = vrot.lane.b32.xlu0 %v7310_v48, %s5938_s25  ;;  %s5949_s25 = smov 82  }
 0x71a   : > { %v3843_v7 = vpop.permute.xlu1 %3842  ;;  %v7710_v58 = vpop.permute.xlu2 %3947 }
 0x71b   : > { %v3846_v43 = vpop.permute.xlu0 %3845 }
 0x71c   : > { %v3847_v4 = vsel %vm735_vm3, %v3846_v43, %v3843_v7  ;;  %v3850_v34 = vsel %vm735_vm3, %v3843_v7, %v3846_v43 }
 0x71d   : > { %v3858_v29 = vmul.f32 %v3854_v39, %v3850_v34  ;;  %v3859_v35 = vmul.f32 %v3855_v57, %v3847_v4  ;;  %v3957_v39 = vperm.slane %v3954_v53, 1 }
 0x71f   : > { %v3860_v21 = vadd.f32 %v3858_v29, %v3840_v60  ;;  %v3861_v31 = vadd.f32 %v3859_v35, %v3841_v14  ;;  %v3956_v14 = vperm.slane %v3954_v53, 0 }
 0x720   : > { %4313 = vrot.lane.b32.xlu1 %v7308_v49, %s5909_s29  ;;  %4333 = vrot.lane.b32.xlu2 %v7310_v48, %s5909_s29 }
 0x721   : > { %4331 = vrot.lane.b32.xlu0 %v7315_v30, %s5909_s29  ;;  %s8251_s29 = smov 111  }
 0x722   : > { %v3866_v25 = vpop.permute.xlu1 %3865  ;;  %v7720_v26 = vpop.permute.xlu2 %3985 }
 0x723   : > { %v3867_v3 = vsel %vm735_vm3, %v3866_v25, %v7676_v10  ;;  %v3870_v11 = vsel %vm735_vm3, %v7676_v10, %v3866_v25  ;;  %v3883_v44 = vpop.permute.xlu0 %3882  ;;  %v3915_v10 = vperm.slane %v3913_v20, 0  ;;  %vm3969_vm3 = vcmask 23552  }
 0x724   : > { %v3878_v6 = vmul.f32 %v3874_v36, %v3870_v11  ;;  %v3879_v51 = vmul.f32 %v3875_v55, %v3867_v3  ;;  %v3888_v5 = vsel %vm3887_vm0, %v7689_v45, %v3883_v44  ;;  %v3891_v59 = vsel %vm3887_vm0, %v3883_v44, %v7689_v45  ;;  %v3975_v36 = vld [vmem:[#allocation8 + $0x25] ss:$8 sm:$0x3] }
 0x725   : > { %v3899_v24 = vmul.f32 %v3895_v38, %v3891_v59  ;;  %v3900_v32 = vmul.f32 %v3896_v0, %v3888_v5  ;;  %v3978_v38 = vperm.slane %v3975_v36, 1  ;;  %v3995_v5 = vld [vmem:[#allocation10 + $0x25] ss:$8 sm:$0x3] }
 0x726   : > { %v3880_v61 = vadd.f32 %v3878_v6, %v3860_v21  ;;  %v3881_v23 = vadd.f32 %v3879_v51, %v3861_v31 }
 0x728   : > { %v3901_v17 = vadd.f32 %v3899_v24, %v3880_v61  ;;  %v3902_v15 = vadd.f32 %v3900_v32, %v3881_v23  ;;  %4351 = vrot.lane.b32.xlu1 %v7306_v18, %s5910_s18  ;;  %4371 = vrot.lane.b32.xlu2 %v7315_v30, %s5910_s18  ;;  %v4015_v23 = vld [vmem:[#allocation8 + $0x26] ss:$8 sm:$0x3]  ;;  %v3997_v24 = vperm.slane %v3995_v5, 0  ;;  %v3998_v32 = vperm.slane %v3995_v5, 1 }
 0x729   : > { %4353 = vrot.lane.b32.xlu0 %v7308_v49, %s5910_s18 }
 0x72a   : > { %v3904_v22 = vpop.permute.xlu1 %3903  ;;  %v7736_v45 = vpop.permute.xlu2 %4008 }
 0x72b   : > { %v3907_v37 = vpop.permute.xlu0 %3906 }
 0x72c   : > { %v3908_v27 = vsel %vm3887_vm0, %v3907_v37, %v3904_v22  ;;  %v3911_v42 = vsel %vm3887_vm0, %v3904_v22, %v3907_v37  ;;  %vm4476_vm0 = vcmask 891904  }
 0x72d   : > { %v3919_v12 = vmul.f32 %v3915_v10, %v3911_v42  ;;  %v3920_v56 = vmul.f32 %v3916_v62, %v3908_v27  ;;  %v4018_v10 = vperm.slane %v4015_v23, 1 }
 0x72f   : > { %v3921_v8 = vadd.f32 %v3919_v12, %v3901_v17  ;;  %v3922_v9 = vadd.f32 %v3920_v56, %v3902_v15  ;;  %v4017_v15 = vperm.slane %v4015_v23, 0 }
 0x730   : > { %4373 = vrot.lane.b32.xlu1 %v7310_v48, %s5910_s18  ;;  %4393 = vrot.lane.b32.xlu2 %v7308_v49, %s8251_s29  ;;  %s5939_s18 = smov 110  }
 0x731   : > { %4391 = vrot.lane.b32.xlu0 %v7306_v18, %s8251_s29 }
 0x732   : > { %v3927_v33 = vpop.permute.xlu1 %3926  ;;  %v7746_v60 = vpop.permute.xlu2 %4045 }
 0x733   : > { %v3929_v57 = vsel %vm3928_vm2, %v3927_v33, %v7696_v63  ;;  %v3932_v7 = vsel %vm3928_vm2, %v7696_v63, %v3927_v33  ;;  %v3945_v43 = vpop.permute.xlu0 %3944  ;;  %v3977_v63 = vperm.slane %v3975_v36, 0  ;;  %v4086_v36 = vld [vmem:[#allocation8 + $0x30] ss:$8 sm:$0x3] }
 0x734   : > { %v3940_v4 = vmul.f32 %v3936_v46, %v3932_v7  ;;  %v3941_v34 = vmul.f32 %v3937_v16, %v3929_v57  ;;  %v3949_v29 = vsel %vm3928_vm2, %v7710_v58, %v3945_v43  ;;  %v3952_v35 = vsel %vm3928_vm2, %v3945_v43, %v7710_v58  ;;  %v4035_v46 = vld [vmem:[#allocation10 + $0x26] ss:$8 sm:$0x3] }
 0x735   : > { %v3960_v31 = vmul.f32 %v3956_v14, %v3952_v35  ;;  %v3961_v50 = vmul.f32 %v3957_v39, %v3949_v29  ;;  %v4038_v14 = vperm.slane %v4035_v46, 1  ;;  %v4055_v29 = vld [vmem:[#allocation8 + $0x27] ss:$8 sm:$0x3]  ;;  %vm4517_vm2 = vcmask 809984  }
 0x736   : > { %v3942_v1 = vadd.f32 %v3940_v4, %v3921_v8  ;;  %v3943_v21 = vadd.f32 %v3941_v34, %v3922_v9 }
 0x738   : > { %v3962_v55 = vadd.f32 %v3960_v31, %v3942_v1  ;;  %v3963_v25 = vadd.f32 %v3961_v50, %v3943_v21  ;;  %4411 = vrot.lane.b32.xlu1 %v7315_v30, %s8251_s29  ;;  %4431 = vrot.lane.b32.xlu2 %v7306_v18, %s5939_s18  ;;  %v4075_v21 = vld [vmem:[#allocation10 + $0x27] ss:$8 sm:$0x3]  ;;  %v4057_v31 = vperm.slane %v4055_v29, 0  ;;  %v4058_v50 = vperm.slane %v4055_v29, 1 }
 0x739   : > { %4413 = vrot.lane.b32.xlu0 %v7310_v48, %s8251_s29  ;;  %v4158_v29 = vld [vmem:[#allocation8 + $0x32] ss:$8 sm:$0x3]  ;;  %s5950_s29 = smov 81  }
 0x73a   : > { %v3965_v58 = vpop.permute.xlu1 %3964  ;;  %v7757_v0 = vpop.permute.xlu2 %4068 }
 0x73b   : > { %v3968_v3 = vpop.permute.xlu0 %3967 }
 0x73c   : > { %v3970_v11 = vsel %vm3969_vm3, %v3968_v3, %v3965_v58  ;;  %v3973_v44 = vsel %vm3969_vm3, %v3965_v58, %v3968_v3  ;;  %v4097_v58 = vld [vmem:[#allocation10 + $0x30] ss:$8 sm:$0x3] }
 0x73d   : > { %v3981_v6 = vmul.f32 %v3977_v63, %v3973_v44  ;;  %v3982_v51 = vmul.f32 %v3978_v38, %v3970_v11  ;;  %v4077_v63 = vperm.slane %v4075_v21, 0  ;;  %v4078_v38 = vperm.slane %v4075_v21, 1 }
 0x73e   : > { %v4088_v44 = vperm.slane %v4086_v36, 0 }
 0x73f   : > { %v3983_v59 = vadd.f32 %v3981_v6, %v3962_v55  ;;  %v3984_v61 = vadd.f32 %v3982_v51, %v3963_v25  ;;  %v4089_v6 = vperm.slane %v4086_v36, 1  ;;  %v4161_v36 = vperm.slane %v4158_v29, 1 }
 0x740   : > { %4433 = vrot.lane.b32.xlu1 %v7308_v49, %s5939_s18  ;;  %4454 = vrot.lane.b32.xlu2 %v7310_v48, %s5939_s18 }
 0x741   : > { %4452 = vrot.lane.b32.xlu0 %v7315_v30, %s5939_s18  ;;  %s5951_s18 = smov 80  }
 0x742   : > { %v3989_v20 = vpop.permute.xlu1 %3988  ;;  %v7764_v17 = vpop.permute.xlu2 %4127 }
 0x743   : > { %v3990_v62 = vsel %vm3969_vm3, %v3989_v20, %v7720_v26  ;;  %v3993_v22 = vsel %vm3969_vm3, %v7720_v26, %v3989_v20  ;;  %v4006_v37 = vpop.permute.xlu0 %4005  ;;  %v4037_v26 = vperm.slane %v4035_v46, 0  ;;  %vm4558_vm3 = vcmask 801792  }
 0x744   : > { %v4001_v27 = vmul.f32 %v3997_v24, %v3993_v22  ;;  %v4002_v42 = vmul.f32 %v3998_v32, %v3990_v62  ;;  %v4010_v12 = vsel %vm2878_vm11, %v7736_v45, %v4006_v37  ;;  %v4013_v56 = vsel %vm2878_vm11, %v4006_v37, %v7736_v45  ;;  %v4117_v22 = vld [vmem:[#allocation8 + $0x31] ss:$8 sm:$0x3] }
 0x745   : > { %v4021_v9 = vmul.f32 %v4017_v15, %v4013_v56  ;;  %v4022_v53 = vmul.f32 %v4018_v10, %v4010_v12  ;;  %v4099_v24 = vperm.slane %v4097_v58, 0  ;;  %v4100_v32 = vperm.slane %v4097_v58, 1 }
 0x746   : > { %v4003_v52 = vadd.f32 %v4001_v27, %v3983_v59  ;;  %v4004_v8 = vadd.f32 %v4002_v42, %v3984_v61  ;;  %v4092_v42 = vmul.f32 %v4088_v44, %v7306_v18  ;;  %v4120_v12 = vperm.slane %v4117_v22, 1 }
 0x747   : > { %v4103_v56 = vmul.f32 %v4099_v24, %v7315_v30 }
 0x748   : > { %v4023_v16 = vadd.f32 %v4021_v9, %v4003_v52  ;;  %v4024_v33 = vadd.f32 %v4022_v53, %v4004_v8  ;;  %4472 = vrot.lane.b32.xlu1 %v7306_v18, %s5940_s27  ;;  %4493 = vrot.lane.b32.xlu2 %v7315_v30, %s5940_s27  ;;  %v4104_v52 = vmul.f32 %v4100_v32, %v7310_v48 }
 0x749   : > { %4474 = vrot.lane.b32.xlu0 %v7308_v49, %s5940_s27 }
 0x74a   : > { %v4026_v39 = vpop.permute.xlu1 %4025  ;;  %v7777_v57 = vpop.permute.xlu2 %4149 }
 0x74b   : > { %v4029_v45 = vpop.permute.xlu0 %4028 }
 0x74c   : > { %v4030_v7 = vsel %vm2878_vm11, %v4029_v45, %v4026_v39  ;;  %v4033_v43 = vsel %vm2878_vm11, %v4026_v39, %v4029_v45  ;;  %vm4233_vm11 = vcmask 941056  }
 0x74d   : > { %v4041_v4 = vmul.f32 %v4037_v26, %v4033_v43  ;;  %v4042_v34 = vmul.f32 %v4038_v14, %v4030_v7  ;;  %v4137_v43 = vld [vmem:[#allocation10 + $0x31] ss:$8 sm:$0x3] }
 0x74f   : > { %v4043_v35 = vadd.f32 %v4041_v4, %v4023_v16  ;;  %v4044_v1 = vadd.f32 %v4042_v34, %v4024_v33 }
 0x750   : > { %4495 = vrot.lane.b32.xlu1 %v7310_v48, %s5940_s27  ;;  %4515 = vrot.lane.b32.xlu2 %v7308_v49, %s5941_s30  ;;  %s5952_s27 = smov 79  }
 0x751   : > { %4513 = vrot.lane.b32.xlu0 %v7306_v18, %s5941_s30 }
 0x752   : > { %v4049_v55 = vpop.permute.xlu1 %4048  ;;  %v7786_v25 = vpop.permute.xlu2 %4188 }
 0x753   : > { %v4050_v3 = vsel %vm870_vm4, %v4049_v55, %v7746_v60  ;;  %v4053_v11 = vsel %vm870_vm4, %v7746_v60, %v4049_v55  ;;  %v4066_v51 = vpop.permute.xlu0 %4065  ;;  %v4093_v60 = vmul.f32 %v4089_v6, %v7308_v49 }
 0x754   : > { %v4061_v5 = vmul.f32 %v4057_v31, %v4053_v11  ;;  %v4062_v59 = vmul.f32 %v4058_v50, %v4050_v3  ;;  %v4070_v61 = vsel %vm870_vm4, %v7757_v0, %v4066_v51  ;;  %v4073_v23 = vsel %vm870_vm4, %v4066_v51, %v7757_v0 }
 0x755   : > { %v4081_v10 = vmul.f32 %v4077_v63, %v4073_v23  ;;  %v4082_v62 = vmul.f32 %v4078_v38, %v4070_v61  ;;  %v4119_v0 = vperm.slane %v4117_v22, 0  ;;  %vm4151_vm4 = vcmask 1031168   ;;  %v4178_v61 = vld [vmem:[#allocation10 + $0x32] ss:$8 sm:$0x3] }
 0x756   : > { %v4063_v20 = vadd.f32 %v4061_v5, %v4043_v35  ;;  %v4064_v15 = vadd.f32 %v4062_v59, %v4044_v1  ;;  %v4139_v35 = vperm.slane %v4137_v43, 0  ;;  %v4140_v1 = vperm.slane %v4137_v43, 1 }
 0x757   : > { %v4160_v50 = vperm.slane %v4158_v29, 0  ;;  %v4181_v32 = vperm.slane %v4178_v61, 1 }
 0x758   : > { %v4083_v37 = vadd.f32 %v4081_v10, %v4063_v20  ;;  %v4084_v27 = vadd.f32 %v4082_v62, %v4064_v15  ;;  %4534 = vrot.lane.b32.xlu1 %v7315_v30, %s5941_s30  ;;  %4554 = vrot.lane.b32.xlu2 %v7306_v18, %s5942_s24 }
 0x759   : > { %4536 = vrot.lane.b32.xlu0 %v7310_v48, %s5941_s30  ;;  %s5953_s30 = smov 78  }
 0x75a   : > { %v4094_v8 = vadd.f32 %v4092_v42, %v4083_v37  ;;  %v4095_v9 = vadd.f32 %v4093_v60, %v4084_v27  ;;  %v4108_v53 = vpop.permute.xlu1 %4107  ;;  %v7805_v46 = vpop.permute.xlu2 %4211  ;;  %v4199_v37 = vld [vmem:[#allocation8 + $0x33] ss:$8 sm:$0x3] }
 0x75b   : > { %v4110_v16 = vpop.permute.xlu0 %4109 }
 0x75c   : > { %v4105_v33 = vadd.f32 %v4103_v56, %v4094_v8  ;;  %v4106_v26 = vadd.f32 %v4104_v52, %v4095_v9  ;;  %v4111_v14 = vsel %vm1099_vm5, %v4108_v53, %v4110_v16  ;;  %v4115_v39 = vsel %vm1099_vm5, %v4110_v16, %v4108_v53 }
 0x75d   : > { %v4123_v45 = vmul.f32 %v4119_v0, %v4111_v14  ;;  %v4124_v7 = vmul.f32 %v4120_v12, %v4115_v39  ;;  %v4219_v0 = vld [vmem:[#allocation10 + $0x33] ss:$8 sm:$0x3]  ;;  %v4201_v12 = vperm.slane %v4199_v37, 0  ;;  %v4202_v56 = vperm.slane %v4199_v37, 1 }
 0x75e   : > { %v4221_v9 = vperm.slane %v4219_v0, 0  ;;  %v4222_v53 = vperm.slane %v4219_v0, 1 }
 0x75f   : > { %v4125_v4 = vadd.f32 %v4123_v45, %v4105_v33  ;;  %v4126_v34 = vadd.f32 %v4124_v7, %v4106_v26 }
 0x760   : > { %4556 = vrot.lane.b32.xlu1 %v7308_v49, %s5942_s24  ;;  %4577 = vrot.lane.b32.xlu2 %v7310_v48, %s5942_s24 }
 0x761   : > { %4575 = vrot.lane.b32.xlu0 %v7315_v30, %s5942_s24  ;;  %s5954_s24 = smov 77  }
 0x762   : > { %v4130_v21 = vpop.permute.xlu1 %4129  ;;  %v7812_v31 = vpop.permute.xlu2 %4250 }
 0x763   : > { %v4131_v55 = vsel %vm1099_vm5, %v7764_v17, %v4130_v21  ;;  %v4135_v63 = vsel %vm1099_vm5, %v4130_v21, %v7764_v17  ;;  %v4148_v38 = vpop.permute.xlu0 %4147  ;;  %v4180_v17 = vperm.slane %v4178_v61, 0  ;;  %vm4192_vm5 = vcmask 1022976  }
 0x764   : > { %v4143_v58 = vmul.f32 %v4139_v35, %v4131_v55  ;;  %v4144_v3 = vmul.f32 %v4140_v1, %v4135_v63  ;;  %v4152_v11 = vsel %vm4151_vm4, %v4148_v38, %v7777_v57  ;;  %v4156_v44 = vsel %vm4151_vm4, %v7777_v57, %v4148_v38  ;;  %v4240_v35 = vld [vmem:[#allocation8 + $0x34] ss:$8 sm:$0x3] }
 0x765   : > { %v4164_v5 = vmul.f32 %v4160_v50, %v4152_v11  ;;  %v4165_v59 = vmul.f32 %v4161_v36, %v4156_v44  ;;  %v4243_v50 = vperm.slane %v4240_v35, 1  ;;  %v4260_v11 = vld [vmem:[#allocation10 + $0x34] ss:$8 sm:$0x3] }
 0x766   : > { %v4145_v6 = vadd.f32 %v4143_v58, %v4125_v4  ;;  %v4146_v51 = vadd.f32 %v4144_v3, %v4126_v34 }
 0x768   : > { %v4166_v23 = vadd.f32 %v4164_v5, %v4145_v6  ;;  %v4167_v24 = vadd.f32 %v4165_v59, %v4146_v51  ;;  %4595 = vrot.lane.b32.xlu1 %v7306_v18, %s5943_s22  ;;  %4616 = vrot.lane.b32.xlu2 %v7315_v30, %s5943_s22  ;;  %v4281_v51 = vld [vmem:[#allocation8 + $0x35] ss:$8 sm:$0x3]  ;;  %v4262_v5 = vperm.slane %v4260_v11, 0  ;;  %v4263_v59 = vperm.slane %v4260_v11, 1 }
 0x769   : > { %4597 = vrot.lane.b32.xlu0 %v7308_v49, %s5943_s22 }
 0x76a   : > { %v4169_v20 = vpop.permute.xlu1 %4168  ;;  %v7825_v15 = vpop.permute.xlu2 %4272 }
 0x76b   : > { %v4171_v57 = vpop.permute.xlu0 %4170 }
 0x76c   : > { %v4172_v10 = vsel %vm4151_vm4, %v4169_v20, %v4171_v57  ;;  %v4176_v62 = vsel %vm4151_vm4, %v4171_v57, %v4169_v20  ;;  %vm4599_vm4 = vcmask 793600  }
 0x76d   : > { %v4184_v22 = vmul.f32 %v4180_v17, %v4172_v10  ;;  %v4185_v60 = vmul.f32 %v4181_v32, %v4176_v62  ;;  %v4284_v17 = vperm.slane %v4281_v51, 1 }
 0x76f   : > { %v4186_v27 = vadd.f32 %v4184_v22, %v4166_v23  ;;  %v4187_v42 = vadd.f32 %v4185_v60, %v4167_v24  ;;  %v4283_v24 = vperm.slane %v4281_v51, 0 }
 0x770   : > { %4618 = vrot.lane.b32.xlu1 %v7310_v48, %s5943_s22  ;;  %4638 = vrot.lane.b32.xlu2 %v7308_v49, %s5944_s23  ;;  %s5479_s22 = sshll.u32 %s6032_s17, 6  ;;  %s8260_s17 = sshll.u32 %s6134_s20, 6 }
 0x771   : > { %4636 = vrot.lane.b32.xlu0 %v7306_v18, %s5944_s23 }
 0x772   : > { %v4191_v52 = vpop.permute.xlu1 %4190  ;;  %v7832_v8 = vpop.permute.xlu2 %4311 }
 0x773   : > { %v4193_v16 = vsel %vm4192_vm5, %v7786_v25, %v4191_v52  ;;  %v4197_v33 = vsel %vm4192_vm5, %v4191_v52, %v7786_v25  ;;  %v4210_v26 = vpop.permute.xlu0 %4209  ;;  %v4242_v25 = vperm.slane %v4240_v35, 0 }
 0x774   : > { %v4205_v14 = vmul.f32 %v4201_v12, %v4193_v16  ;;  %v4206_v39 = vmul.f32 %v4202_v56, %v4197_v33  ;;  %v4213_v45 = vsel %vm4192_vm5, %v4210_v26, %v7805_v46  ;;  %v4217_v7 = vsel %vm4192_vm5, %v7805_v46, %v4210_v26  ;;  %v4301_v12 = vld [vmem:[#allocation10 + $0x35] ss:$8 sm:$0x3] }
 0x775   : > { %v4225_v34 = vmul.f32 %v4221_v9, %v4213_v45  ;;  %v4226_v29 = vmul.f32 %v4222_v53, %v4217_v7  ;;  %v4304_v9 = vperm.slane %v4301_v12, 1  ;;  %v4321_v45 = vld [vmem:[#allocation8 + $0x36] ss:$8 sm:$0x3]  ;;  %vm4640_vm5 = vcmask 785408  }
 0x776   : > { %v4207_v43 = vadd.f32 %v4205_v14, %v4186_v27  ;;  %v4208_v4 = vadd.f32 %v4206_v39, %v4187_v42 }
 0x778   : > { %v4227_v1 = vadd.f32 %v4225_v34, %v4207_v43  ;;  %v4228_v21 = vadd.f32 %v4226_v29, %v4208_v4  ;;  %4657 = vrot.lane.b32.xlu1 %v7315_v30, %s5944_s23  ;;  %4677 = vrot.lane.b32.xlu2 %v7306_v18, %s5945_s26  ;;  %v4341_v4 = vld [vmem:[#allocation10 + $0x36] ss:$8 sm:$0x3]  ;;  %v4323_v34 = vperm.slane %v4321_v45, 0  ;;  %v4324_v29 = vperm.slane %v4321_v45, 1 }
 0x779   : > { %4659 = vrot.lane.b32.xlu0 %v7310_v48, %s5944_s23 }
 0x77a   : > { %v4230_v36 = vpop.permute.xlu1 %4229  ;;  %v7841_v55 = vpop.permute.xlu2 %4333 }
 0x77b   : > { %v4232_v46 = vpop.permute.xlu0 %4231 }
 0x77c   : > { %v4234_v63 = vsel %vm4233_vm11, %v4230_v36, %v4232_v46  ;;  %v4238_v38 = vsel %vm4233_vm11, %v4232_v46, %v4230_v36 }
 0x77d   : > { %v4246_v58 = vmul.f32 %v4242_v25, %v4234_v63  ;;  %v4247_v3 = vmul.f32 %v4243_v50, %v4238_v38  ;;  %v4344_v25 = vperm.slane %v4341_v4, 1 }
 0x77f   : > { %v4248_v44 = vadd.f32 %v4246_v58, %v4227_v1  ;;  %v4249_v6 = vadd.f32 %v4247_v3, %v4228_v21  ;;  %v4343_v21 = vperm.slane %v4341_v4, 0 }
 0x780   : > { %4679 = vrot.lane.b32.xlu1 %v7308_v49, %s5945_s26  ;;  %4700 = vrot.lane.b32.xlu2 %v7310_v48, %s5945_s26 }
 0x781   : > { %4698 = vrot.lane.b32.xlu0 %v7315_v30, %s5945_s26 }
 0x782   : > { %v4253_v61 = vpop.permute.xlu1 %4252  ;;  %v7848_v23 = vpop.permute.xlu2 %4371 }
 0x783   : > { %v4254_v32 = vsel %vm4233_vm11, %v7812_v31, %v4253_v61  ;;  %v4258_v20 = vsel %vm4233_vm11, %v4253_v61, %v7812_v31  ;;  %v4271_v57 = vpop.permute.xlu0 %4270  ;;  %v4303_v31 = vperm.slane %v4301_v12, 0  ;;  %vm4681_vm11 = vcmask 777216  }
 0x784   : > { %v4266_v10 = vmul.f32 %v4262_v5, %v4254_v32  ;;  %v4267_v62 = vmul.f32 %v4263_v59, %v4258_v20  ;;  %v4275_v22 = vsel %vm4274_vm12, %v4271_v57, %v7825_v15  ;;  %v4279_v60 = vsel %vm4274_vm12, %v7825_v15, %v4271_v57  ;;  %v4361_v5 = vld [vmem:[#allocation8 + $0x37] ss:$8 sm:$0x3] }
 0x785   : > { %v4287_v42 = vmul.f32 %v4283_v24, %v4275_v22  ;;  %v4288_v0 = vmul.f32 %v4284_v17, %v4279_v60  ;;  %v4364_v24 = vperm.slane %v4361_v5, 1  ;;  %v4381_v22 = vld [vmem:[#allocation10 + $0x37] ss:$8 sm:$0x3] }
 0x786   : > { %v4268_v37 = vadd.f32 %v4266_v10, %v4248_v44  ;;  %v4269_v27 = vadd.f32 %v4267_v62, %v4249_v6 }
 0x788   : > { %v4289_v56 = vadd.f32 %v4287_v42, %v4268_v37  ;;  %v4290_v52 = vadd.f32 %v4288_v0, %v4269_v27  ;;  %4718 = vrot.lane.b32.xlu1 %v7306_v18, %s5946_s21  ;;  %4739 = vrot.lane.b32.xlu2 %v7315_v30, %s5946_s21  ;;  %v4401_v27 = vld [vmem:[#allocation8 + $0x40] ss:$8 sm:$0x3]  ;;  %v4383_v42 = vperm.slane %v4381_v22, 0  ;;  %v4384_v0 = vperm.slane %v4381_v22, 1 }
 0x789   : > { %4720 = vrot.lane.b32.xlu0 %v7308_v49, %s5946_s21 }
 0x78a   : > { %v4292_v53 = vpop.permute.xlu1 %4291  ;;  %v7861_v16 = vpop.permute.xlu2 %4393 }
 0x78b   : > { %v4294_v15 = vpop.permute.xlu0 %4293 }
 0x78c   : > { %v4295_v33 = vsel %vm4274_vm12, %v4292_v53, %v4294_v15  ;;  %v4299_v26 = vsel %vm4274_vm12, %v4294_v15, %v4292_v53  ;;  %vm4722_vm12 = vcmask 769024  }
 0x78d   : > { %v4307_v14 = vmul.f32 %v4303_v31, %v4295_v33  ;;  %v4308_v39 = vmul.f32 %v4304_v9, %v4299_v26  ;;  %v4404_v31 = vperm.slane %v4401_v27, 1 }
 0x78f   : > { %v4309_v7 = vadd.f32 %v4307_v14, %v4289_v56  ;;  %v4310_v43 = vadd.f32 %v4308_v39, %v4290_v52  ;;  %v4403_v52 = vperm.slane %v4401_v27, 0 }
 0x790   : > { %4741 = vrot.lane.b32.xlu1 %v7310_v48, %s5946_s21  ;;  %4761 = vrot.lane.b32.xlu2 %v7308_v49, %s5947_s1  ;;  %s5171_s21 = scalar_lea.hbm %s8144_s10, %s5479_s22 }
 0x791   : > { %4759 = vrot.lane.b32.xlu0 %v7306_v18, %s5947_s1 }
 0x792   : > { %v4314_v35 = vpop.permute.xlu1 %4313  ;;  %v7868_v1 = vpop.permute.xlu2 %4431 }
 0x793   : > { %v4315_v50 = vsel %vm1234_vm6, %v7832_v8, %v4314_v35  ;;  %v4319_v36 = vsel %vm1234_vm6, %v4314_v35, %v7832_v8  ;;  %v4332_v46 = vpop.permute.xlu0 %4331  ;;  %v4363_v8 = vperm.slane %v4361_v5, 0 }
 0x794   : > { %v4327_v63 = vmul.f32 %v4323_v34, %v4315_v50  ;;  %v4328_v38 = vmul.f32 %v4324_v29, %v4319_v36  ;;  %v4335_v58 = vsel %vm1234_vm6, %v4332_v46, %v7841_v55  ;;  %v4339_v3 = vsel %vm1234_vm6, %v7841_v55, %v4332_v46  ;;  %v4421_v34 = vld [vmem:[#allocation10 + $0x40] ss:$8 sm:$0x3] }
 0x795   : > { %v4347_v6 = vmul.f32 %v4343_v21, %v4335_v58  ;;  %v4348_v51 = vmul.f32 %v4344_v25, %v4339_v3  ;;  %vm8252_vm6 = vcmask 916480   ;;  %v4424_v21 = vperm.slane %v4421_v34, 1  ;;  %v4442_v58 = vld [vmem:[#allocation8 + $0x41] ss:$8 sm:$0x3] }
 0x796   : > { %v4329_v11 = vadd.f32 %v4327_v63, %v4309_v7  ;;  %v4330_v44 = vadd.f32 %v4328_v38, %v4310_v43  ;;  %vm8253_vm7 = vmmov %vm8252_vm6 }
 0x797   : > { %vm8254_vm13 = vmmov %vm8252_vm6 }
 0x798   : > { %v4349_v59 = vadd.f32 %v4347_v6, %v4329_v11  ;;  %v4350_v61 = vadd.f32 %v4348_v51, %v4330_v44  ;;  %4780 = vrot.lane.b32.xlu1 %v7315_v30, %s5947_s1  ;;  %4800 = vrot.lane.b32.xlu2 %v7306_v18, %s5948_s3  ;;  %vm8255_vm14 = vmmov %vm8252_vm6  ;;  %v4462_v44 = vld [vmem:[#allocation10 + $0x41] ss:$8 sm:$0x3]  ;;  %v4444_v6 = vperm.slane %v4442_v58, 0  ;;  %v4445_v51 = vperm.slane %v4442_v58, 1 }
 0x799   : > { %4782 = vrot.lane.b32.xlu0 %v7310_v48, %s5947_s1  ;;  %s445_s1 = scalar_lea.vmem [#allocation11], %s8260_s17 }
 0x79a   : > { %v4352_v17 = vpop.permute.xlu1 %4351  ;;  %v7881_v32 = vpop.permute.xlu2 %4454 }
 0x79b   : > { %v4354_v55 = vpop.permute.xlu0 %4353 }
 0x79c   : > { %v4355_v20 = vsel %vm8252_vm6, %v4352_v17, %v4354_v55  ;;  %v4359_v57 = vsel %vm8253_vm7, %v4354_v55, %v4352_v17  ;;  %vm4763_vm6 = vcmask 760832   ;;  %vm4804_vm7 = vcmask 678912  }
 0x79d   : > { %v4367_v10 = vmul.f32 %v4363_v8, %v4355_v20  ;;  %v4368_v62 = vmul.f32 %v4364_v24, %v4359_v57  ;;  %v4465_v8 = vperm.slane %v4462_v44, 1 }
 0x79f   : > { %v4369_v60 = vadd.f32 %v4367_v10, %v4349_v59  ;;  %v4370_v37 = vadd.f32 %v4368_v62, %v4350_v61  ;;  %v4464_v61 = vperm.slane %v4462_v44, 0 }
 0x7a0   : > { %4802 = vrot.lane.b32.xlu1 %v7308_v49, %s5948_s3  ;;  %4823 = vrot.lane.b32.xlu2 %v7310_v48, %s5948_s3 }
 0x7a1   : > { %4821 = vrot.lane.b32.xlu0 %v7315_v30, %s5948_s3  ;;  %s5172_s3 = sshll.u32 %s445_s1, 4  ;;  %s5173_s3 = int_to_ptr.vmem [resolvable:$true] %s5172_s3 }
 0x7a2   : > { %v4374_v12 = vpop.permute.xlu1 %4373  ;;  %v7888_v56 = vpop.permute.xlu2 %4493 }
 0x7a3   : > { %v4375_v9 = vsel %vm8254_vm13, %v7848_v23, %v4374_v12  ;;  %v4379_v53 = vsel %vm8255_vm14, %v4374_v12, %v7848_v23  ;;  %v4392_v15 = vpop.permute.xlu0 %4391  ;;  %v4423_v23 = vperm.slane %v4421_v34, 0  ;;  %vm4845_vm13 = vcmask 670720  }
 0x7a4   : > { %v4387_v33 = vmul.f32 %v4383_v42, %v4375_v9  ;;  %v4388_v26 = vmul.f32 %v4384_v0, %v4379_v53  ;;  %v4395_v14 = vsel %vm8256_vm15, %v4392_v15, %v7861_v16  ;;  %v4399_v39 = vsel %vm8257_vm1, %v7861_v16, %v4392_v15  ;;  %v4483_v42 = vld [vmem:[#allocation8 + $0x42] ss:$8 sm:$0x3] }
 0x7a5   : > { %v4407_v43 = vmul.f32 %v4403_v52, %v4395_v14  ;;  %v4408_v4 = vmul.f32 %v4404_v31, %v4399_v39  ;;  %v4486_v52 = vperm.slane %v4483_v42, 1  ;;  %v4503_v14 = vld [vmem:[#allocation10 + $0x42] ss:$8 sm:$0x3]  ;;  %vm4886_vm14 = vcmask 662528  }
 0x7a6   : > { %v4389_v45 = vadd.f32 %v4387_v33, %v4369_v60  ;;  %v4390_v7 = vadd.f32 %v4388_v26, %v4370_v37  ;;  %vm4927_vm15 = vcmask 654336   ;;  %vm4968_vm1 = vcmask 646144  }
 0x7a8   : > { %v4409_v29 = vadd.f32 %v4407_v43, %v4389_v45  ;;  %v4410_v35 = vadd.f32 %v4408_v4, %v4390_v7  ;;  %4841 = vrot.lane.b32.xlu1 %v7306_v18, %s5949_s25  ;;  %4862 = vrot.lane.b32.xlu2 %v7315_v30, %s5949_s25  ;;  %v4524_v7 = vld [vmem:[#allocation8 + $0x43] ss:$8 sm:$0x3]  ;;  %v4505_v43 = vperm.slane %v4503_v14, 0  ;;  %v4506_v4 = vperm.slane %v4503_v14, 1 }
 0x7a9   : > { %4843 = vrot.lane.b32.xlu0 %v7308_v49, %s5949_s25 }
 0x7aa   : > { %v4412_v25 = vpop.permute.xlu1 %4411  ;;  %v7901_v50 = vpop.permute.xlu2 %4515 }
 0x7ab   : > { %v4414_v16 = vpop.permute.xlu0 %4413 }
 0x7ac   : > { %v4415_v36 = vsel %vm8258_vm8, %v4412_v25, %v4414_v16  ;;  %v4419_v46 = vsel %vm8259_vm9, %v4414_v16, %v4412_v25  ;;  %vm5009_vm8 = vcmask 637952   ;;  %vm5050_vm9 = vcmask 629760  }
 0x7ad   : > { %v4427_v63 = vmul.f32 %v4423_v23, %v4415_v36  ;;  %v4428_v38 = vmul.f32 %v4424_v21, %v4419_v46  ;;  %v4527_v23 = vperm.slane %v4524_v7, 1 }
 0x7af   : > { %v4429_v3 = vadd.f32 %v4427_v63, %v4409_v29  ;;  %v4430_v11 = vadd.f32 %v4428_v38, %v4410_v35  ;;  %v4526_v35 = vperm.slane %v4524_v7, 0 }
 0x7b0   : > { %4864 = vrot.lane.b32.xlu1 %v7310_v48, %s5949_s25  ;;  %4884 = vrot.lane.b32.xlu2 %v7308_v49, %s5950_s29  ;;  %s5174_s25 = sshll.u32 %s5171_s21, 4  ;;  %s5175_s25 = int_to_ptr.hbm [resolvable:$true] %s5174_s25 }
 0x7b1   : > { %4882 = vrot.lane.b32.xlu0 %v7306_v18, %s5950_s29 }
 0x7b2   : > { %v4434_v5 = vpop.permute.xlu1 %4433  ;;  %v7908_v59 = vpop.permute.xlu2 %4554 }
 0x7b3   : > { %v4436_v24 = vsel %vm4435_vm10, %v7868_v1, %v4434_v5  ;;  %v4440_v17 = vsel %vm4435_vm10, %v4434_v5, %v7868_v1  ;;  %v4453_v55 = vpop.permute.xlu0 %4452  ;;  %v4485_v1 = vperm.slane %v4483_v42, 0 }
 0x7b4   : > { %v4448_v20 = vmul.f32 %v4444_v6, %v4436_v24  ;;  %v4449_v57 = vmul.f32 %v4445_v51, %v4440_v17  ;;  %v4456_v10 = vsel %vm4435_vm10, %v4453_v55, %v7881_v32  ;;  %v4460_v62 = vsel %vm4435_vm10, %v7881_v32, %v4453_v55  ;;  %v4544_v6 = vld [vmem:[#allocation10 + $0x43] ss:$8 sm:$0x3] }
 0x7b5   : > { %v4468_v37 = vmul.f32 %v4464_v61, %v4456_v10  ;;  %v4469_v27 = vmul.f32 %v4465_v8, %v4460_v62  ;;  %v4547_v61 = vperm.slane %v4544_v6, 1  ;;  %v4565_v10 = vld [vmem:[#allocation8 + $0x44] ss:$8 sm:$0x3] }
 0x7b6   : > { %v4450_v22 = vadd.f32 %v4448_v20, %v4429_v3  ;;  %v4451_v60 = vadd.f32 %v4449_v57, %v4430_v11 }
 0x7b8   : > { %v4470_v0 = vadd.f32 %v4468_v37, %v4450_v22  ;;  %v4471_v12 = vadd.f32 %v4469_v27, %v4451_v60  ;;  %4903 = vrot.lane.b32.xlu1 %v7315_v30, %s5950_s29  ;;  %4923 = vrot.lane.b32.xlu2 %v7306_v18, %s5951_s18  ;;  %v4585_v60 = vld [vmem:[#allocation10 + $0x44] ss:$8 sm:$0x3]  ;;  %v4567_v37 = vperm.slane %v4565_v10, 0  ;;  %v4568_v27 = vperm.slane %v4565_v10, 1 }
 0x7b9   : > { %4905 = vrot.lane.b32.xlu0 %v7310_v48, %s5950_s29  ;;  %v4667_v10 = vld [vmem:[#allocation10 + $0x46] ss:$8 sm:$0x3]  ;;  %s5834_s29 = sshra.s32 %s5175_s25, 4  ;;  %s5835_s29 = int_to_ptr.hbm [resolvable:$true] %s5834_s29 }
 0x7ba   : > { %v4473_v31 = vpop.permute.xlu1 %4472  ;;  %v7917_v9 = vpop.permute.xlu2 %4577  ;;  %p5841_p11 = scmp.lt.s32.totalorder %s5835_s29, %s8144_s10 }
 0x7bb   : > { %v4475_v32 = vpop.permute.xlu0 %4474 }
 0x7bc   : > { %v4477_v53 = vsel %vm4476_vm0, %v4473_v31, %v4475_v32  ;;  %v4481_v15 = vsel %vm4476_vm0, %v4475_v32, %v4473_v31 }
 0x7bd   : > { %v4489_v33 = vmul.f32 %v4485_v1, %v4477_v53  ;;  %v4490_v26 = vmul.f32 %v4486_v52, %v4481_v15  ;;  %v4588_v1 = vperm.slane %v4585_v60, 1 }
 0x7bf   : > { %v4491_v39 = vadd.f32 %v4489_v33, %v4470_v0  ;;  %v4492_v45 = vadd.f32 %v4490_v26, %v4471_v12  ;;  %v4587_v12 = vperm.slane %v4585_v60, 0  ;;  %v4669_v60 = vperm.slane %v4667_v10, 0 }
 0x7c0   : > { %4925 = vrot.lane.b32.xlu1 %v7308_v49, %s5951_s18  ;;  %4946 = vrot.lane.b32.xlu2 %v7310_v48, %s5951_s18 }
 0x7c1   : > { %4944 = vrot.lane.b32.xlu0 %v7315_v30, %s5951_s18  ;;  %s5836_s18 = scalar_lea.hbm %s5835_s29, 64 }
 0x7c2   : > { %v4496_v34 = vpop.permute.xlu1 %4495  ;;  %v7924_v29 = vpop.permute.xlu2 %4616  ;;  %p5837_p1 = scmp.ne.s32.totalorder %s5835_s29, %s5836_s18 }
 0x7c3   : > { %v4497_v21 = vsel %vm4476_vm0, %v7888_v56, %v4496_v34  ;;  %v4501_v25 = vsel %vm4476_vm0, %v4496_v34, %v7888_v56  ;;  %v4514_v16 = vpop.permute.xlu0 %4513  ;;  %v4546_v56 = vperm.slane %v4544_v6, 0 }
 0x7c4   : > { %v4509_v36 = vmul.f32 %v4505_v43, %v4497_v21  ;;  %v4510_v46 = vmul.f32 %v4506_v4, %v4501_v25  ;;  %v4518_v63 = vsel %vm4517_vm2, %v4514_v16, %v7901_v50  ;;  %v4522_v38 = vsel %vm4517_vm2, %v7901_v50, %v4514_v16  ;;  %v4606_v43 = vld [vmem:[#allocation8 + $0x45] ss:$8 sm:$0x3]  ;;  %p5838_p4 = pnand %p5837_p1, %p6101_p3 }
 0x7c5   : > { %v4530_v11 = vmul.f32 %v4526_v35, %v4518_v63  ;;  %v4531_v44 = vmul.f32 %v4527_v23, %v4522_v38  ;;  %v4609_v35 = vperm.slane %v4606_v43, 1  ;;  %v4626_v63 = vld [vmem:[#allocation10 + $0x45] ss:$8 sm:$0x3] }
 0x7c6   : > { %v4511_v58 = vadd.f32 %v4509_v36, %v4491_v39  ;;  %v4512_v3 = vadd.f32 %v4510_v46, %v4492_v45  ;;  %p5839_p8 = pneg %p5838_p4 }
 0x7c8   : > { %v4532_v51 = vadd.f32 %v4530_v11, %v4511_v58  ;;  %v4533_v5 = vadd.f32 %v4531_v44, %v4512_v3  ;;  %4964 = vrot.lane.b32.xlu1 %v7306_v18, %s5952_s27  ;;  %4985 = vrot.lane.b32.xlu2 %v7315_v30, %s5952_s27  ;;  %v4647_v3 = vld [vmem:[#allocation8 + $0x46] ss:$8 sm:$0x3]  ;;  %v4629_v11 = vperm.slane %v4626_v63, 1 }
 0x7c9   : > { %4966 = vrot.lane.b32.xlu0 %v7308_v49, %s5952_s27  ;;  %v4649_v6 = vperm.slane %v4647_v3, 0 }
 0x7ca   : > { %v4535_v8 = vpop.permute.xlu1 %4534  ;;  %v7937_v24 = vpop.permute.xlu2 %4638 }
 0x7cb   : > { %v4537_v50 = vpop.permute.xlu0 %4536 }
 0x7cc   : > { %v4538_v17 = vsel %vm4517_vm2, %v4535_v8, %v4537_v50  ;;  %v4542_v55 = vsel %vm4517_vm2, %v4537_v50, %v4535_v8 }
 0x7cd   : > { %v4550_v20 = vmul.f32 %v4546_v56, %v4538_v17  ;;  %v4551_v57 = vmul.f32 %v4547_v61, %v4542_v55 }
 0x7cf   : > { %v4552_v62 = vadd.f32 %v4550_v20, %v4532_v51  ;;  %v4553_v22 = vadd.f32 %v4551_v57, %v4533_v5  ;;  %v4650_v51 = vperm.slane %v4647_v3, 1 }
 0x7d0   : > { %4987 = vrot.lane.b32.xlu1 %v7310_v48, %s5952_s27  ;;  %5007 = vrot.lane.b32.xlu2 %v7308_v49, %s5953_s30 }
 0x7d1   : > { %5005 = vrot.lane.b32.xlu0 %v7306_v18, %s5953_s30 }
 0x7d2   : > { %v4557_v42 = vpop.permute.xlu1 %4556  ;;  %v7944_v0 = vpop.permute.xlu2 %4677 }
 0x7d3   : > { %v4559_v52 = vsel %vm4558_vm3, %v7908_v59, %v4557_v42  ;;  %v4563_v31 = vsel %vm4558_vm3, %v4557_v42, %v7908_v59  ;;  %v4576_v32 = vpop.permute.xlu0 %4575  ;;  %v4608_v59 = vperm.slane %v4606_v43, 0 }
 0x7d4   : > { %v4571_v53 = vmul.f32 %v4567_v37, %v4559_v52  ;;  %v4572_v15 = vmul.f32 %v4568_v27, %v4563_v31  ;;  %v4579_v33 = vsel %vm4558_vm3, %v4576_v32, %v7917_v9  ;;  %v4583_v26 = vsel %vm4558_vm3, %v7917_v9, %v4576_v32 }
 0x7d5   : > { %v4591_v45 = vmul.f32 %v4587_v12, %v4579_v33  ;;  %v4592_v7 = vmul.f32 %v4588_v1, %v4583_v26 }
 0x7d6   : > { %v4573_v14 = vadd.f32 %v4571_v53, %v4552_v62  ;;  %v4574_v39 = vadd.f32 %v4572_v15, %v4553_v22 }
 0x7d8   : > { %v4593_v4 = vadd.f32 %v4591_v45, %v4573_v14  ;;  %v4594_v34 = vadd.f32 %v4592_v7, %v4574_v39  ;;  %5026 = vrot.lane.b32.xlu1 %v7315_v30, %s5953_s30  ;;  %5046 = vrot.lane.b32.xlu2 %v7306_v18, %s5954_s24  ;;  %v4628_v18 = vperm.slane %v4626_v63, 0 }
 0x7d9   : > { %5028 = vrot.lane.b32.xlu0 %v7310_v48, %s5953_s30 }
 0x7da   : > { %v4596_v23 = vpop.permute.xlu1 %4595  ;;  %v7953_v21 = vpop.permute.xlu2 %4700 }
 0x7db   : > { %v4598_v9 = vpop.permute.xlu0 %4597 }
 0x7dc   : > { %v4600_v25 = vsel %vm4599_vm4, %v4596_v23, %v4598_v9  ;;  %v4604_v16 = vsel %vm4599_vm4, %v4598_v9, %v4596_v23 }
 0x7dd   : > { %v4612_v36 = vmul.f32 %v4608_v59, %v4600_v25  ;;  %v4613_v46 = vmul.f32 %v4609_v35, %v4604_v16 }
 0x7df   : > { %v4614_v38 = vadd.f32 %v4612_v36, %v4593_v4  ;;  %v4615_v58 = vadd.f32 %v4613_v46, %v4594_v34 }
 0x7e0   : > { %5048 = vrot.lane.b32.xlu1 %v7308_v49, %s5954_s24  ;;  %5069 = vrot.lane.b32.xlu2 %v7310_v48, %s5954_s24 }
 0x7e1   : > { %5067 = vrot.lane.b32.xlu0 %v7315_v30, %s5954_s24  ;;  %s5840_s24 = scalar_lea.hbm %s8144_s10, 128 }
 0x7e2   : > { %v4619_v44 = vpop.permute.xlu1 %4618  ;;  %v7968_v30 = vpop.permute.xlu2 %4739  ;;  %p5842_p2 = scmp.lt.s32.totalorder %s5840_s24, %s5836_s18 }
 0x7e3   : > { %v4620_v5 = vsel %vm4599_vm4, %v7924_v29, %v4619_v44  ;;  %v4624_v56 = vsel %vm4599_vm4, %v4619_v44, %v7924_v29  ;;  %v4637_v61 = vpop.permute.xlu0 %4636  ;;  %v4670_v29 = vperm.slane %v4667_v10, 1  ;;  %v4729_v44 = vld [vmem:[#allocation8 + $0x50] ss:$8 sm:$0x3] }
 0x7e4   : > { %v4632_v8 = vmul.f32 %v4628_v18, %v4620_v5  ;;  %v4633_v50 = vmul.f32 %v4629_v11, %v4624_v56  ;;  %v4641_v49 = vsel %vm4640_vm5, %v4637_v61, %v7937_v24  ;;  %v4645_v48 = vsel %vm4640_vm5, %v7937_v24, %v4637_v61  ;;  %v4688_v24 = vld [vmem:[#allocation8 + $0x47] ss:$8 sm:$0x3]  ;;  %v4708_v11 = vld [vmem:[#allocation10 + $0x47] ss:$8 sm:$0x3]  ;;  %p5843_p9 = por %p5842_p2, %p5841_p11 }
 0x7e5   : > { %v4653_v20 = vmul.f32 %v4649_v6, %v4641_v49  ;;  %v4654_v57 = vmul.f32 %v4650_v51, %v4645_v48  ;;  %v4690_v15 = vperm.slane %v4688_v24, 0  ;;  %v4691_v33 = vperm.slane %v4688_v24, 1  ;;  %v4749_v51 = vld [vmem:[#allocation10 + $0x50] ss:$8 sm:$0x3] }
 0x7e6   : > { %v4634_v17 = vadd.f32 %v4632_v8, %v4614_v38  ;;  %v4635_v55 = vadd.f32 %v4633_v50, %v4615_v58  ;;  %v4710_v56 = vperm.slane %v4708_v11, 0  ;;  %v4711_v61 = vperm.slane %v4708_v11, 1  ;;  %p5844_p10 = pnand %p5843_p9, %p5839_p8 }
 0x7e7   : > { %v4731_v8 = vperm.slane %v4729_v44, 0  ;;  %v4732_v50 = vperm.slane %v4729_v44, 1  ;;  %v4752_v10 = vperm.slane %v4749_v51, 1 }
 0x7e8   : > { %v4655_v62 = vadd.f32 %v4653_v20, %v4634_v17  ;;  %v4656_v22 = vadd.f32 %v4654_v57, %v4635_v55  ;;  %v4751_v57 = vperm.slane %v4749_v51, 0 }
 0x7ea   : > { %v4658_v37 = vpop.permute.xlu1 %4657  ;;  %v7972_v31 = vpop.permute.xlu2 %4761 }
 0x7eb   : > { %v4660_v27 = vpop.permute.xlu0 %4659 }
 0x7ec   : > { %v4661_v42 = vsel %vm4640_vm5, %v4658_v37, %v4660_v27  ;;  %v4665_v12 = vsel %vm4640_vm5, %v4660_v27, %v4658_v37 }
 0x7ed   : > { %v4673_v1 = vmul.f32 %v4669_v60, %v4661_v42  ;;  %v4674_v52 = vmul.f32 %v4670_v29, %v4665_v12  ;;  %v4770_v42 = vld [vmem:[#allocation8 + $0x51] ss:$8 sm:$0x3]  ;;  %v4790_v12 = vld [vmem:[#allocation10 + $0x51] ss:$8 sm:$0x3] }
 0x7ef   : > { %v4675_v32 = vadd.f32 %v4673_v1, %v4655_v62  ;;  %v4676_v53 = vadd.f32 %v4674_v52, %v4656_v22 }
 0x7f2   : > { %v4680_v26 = vpop.permute.xlu1 %4679  ;;  %v7978_v59 = vpop.permute.xlu2 %4800 }
 0x7f3   : > { %v4682_v14 = vsel %vm4681_vm11, %v7944_v0, %v4680_v26  ;;  %v4686_v39 = vsel %vm4681_vm11, %v4680_v26, %v7944_v0  ;;  %v4699_v45 = vpop.permute.xlu0 %4698 }
 0x7f4   : > { %v4694_v7 = vmul.f32 %v4690_v15, %v4682_v14  ;;  %v4695_v43 = vmul.f32 %v4691_v33, %v4686_v39  ;;  %v4702_v48 = vsel %vm4681_vm11, %v4699_v45, %v7953_v21  ;;  %v4706_v17 = vsel %vm4681_vm11, %v7953_v21, %v4699_v45  ;;  %v4811_v33 = vld [vmem:[#allocation8 + $0x52] ss:$8 sm:$0x3] }
 0x7f5   : > { %v4714_v60 = vmul.f32 %v4710_v56, %v4702_v48  ;;  %v4715_v29 = vmul.f32 %v4711_v61, %v4706_v17  ;;  %v4792_v15 = vperm.slane %v4790_v12, 0  ;;  %v4813_v11 = vperm.slane %v4811_v33, 0  ;;  %v4831_v17 = vld [vmem:[#allocation10 + $0x52] ss:$8 sm:$0x3] }
 0x7f6   : > { %v4696_v4 = vadd.f32 %v4694_v7, %v4675_v32  ;;  %v4697_v34 = vadd.f32 %v4695_v43, %v4676_v53  ;;  %v4772_v32 = vperm.slane %v4770_v42, 0  ;;  %v4773_v53 = vperm.slane %v4770_v42, 1 }
 0x7f7   : > { %v4814_v44 = vperm.slane %v4811_v33, 1 }
 0x7f8   : > { %v4716_v21 = vadd.f32 %v4714_v60, %v4696_v4  ;;  %v4717_v1 = vadd.f32 %v4715_v29, %v4697_v34 }
 0x7fa   : > { %v4719_v35 = vpop.permute.xlu1 %4718  ;;  %v7980_v25 = vpop.permute.xlu2 %4823 }
 0x7fb   : > { %v4721_v23 = vpop.permute.xlu0 %4720 }
 0x7fc   : > { %v4723_v55 = vsel %vm4722_vm12, %v4719_v35, %v4721_v23  ;;  %v4727_v20 = vsel %vm4722_vm12, %v4721_v23, %v4719_v35 }
 0x7fd   : > { %v4735_v37 = vmul.f32 %v4731_v8, %v4723_v55  ;;  %v4736_v27 = vmul.f32 %v4732_v50, %v4727_v20  ;;  %v4833_v20 = vperm.slane %v4831_v17, 0 }
 0x7ff   : > { %v4737_v14 = vadd.f32 %v4735_v37, %v4716_v21  ;;  %v4738_v39 = vadd.f32 %v4736_v27, %v4717_v1 }
 0x802   : > { %v4742_v9 = vpop.permute.xlu1 %4741  ;;  %v7982_v63 = vpop.permute.xlu2 %4862 }
 0x803   : > { %v4760_v16 = vpop.permute.xlu0 %4759  ;;  %v4743_v62 = vsel %vm4722_vm12, %v7968_v30, %v4742_v9  ;;  %v4747_v22 = vsel %vm4722_vm12, %v4742_v9, %v7968_v30  ;;  %v4793_v30 = vperm.slane %v4790_v12, 1 }
 0x804   : > { %v4755_v52 = vmul.f32 %v4751_v57, %v4743_v62  ;;  %v4756_v24 = vmul.f32 %v4752_v10, %v4747_v22  ;;  %v4764_v43 = vsel %vm4763_vm6, %v4760_v16, %v7972_v31  ;;  %v4768_v4 = vsel %vm4763_vm6, %v7972_v31, %v4760_v16  ;;  %v4852_v31 = vld [vmem:[#allocation8 + $0x53] ss:$8 sm:$0x3]  ;;  %v4872_v10 = vld [vmem:[#allocation10 + $0x53] ss:$8 sm:$0x3] }
 0x805   : > { %v4776_v61 = vmul.f32 %v4772_v32, %v4764_v43  ;;  %v4777_v8 = vmul.f32 %v4773_v53, %v4768_v4  ;;  %v4834_v57 = vperm.slane %v4831_v17, 1  ;;  %v4854_v29 = vperm.slane %v4852_v31, 0 }
 0x806   : > { %v4757_v23 = vadd.f32 %v4755_v52, %v4737_v14  ;;  %v4758_v9 = vadd.f32 %v4756_v24, %v4738_v39  ;;  %v4855_v37 = vperm.slane %v4852_v31, 1  ;;  %v4874_v52 = vperm.slane %v4872_v10, 0  ;;  %v4893_v39 = vld [vmem:[#allocation8 + $0x54] ss:$8 sm:$0x3] }
 0x807   : > { %v4875_v24 = vperm.slane %v4872_v10, 1  ;;  %v4954_v10 = vld [vmem:[#allocation10 + $0x55] ss:$8 sm:$0x3] }
 0x808   : > { %v4778_v16 = vadd.f32 %v4776_v61, %v4757_v23  ;;  %v4779_v55 = vadd.f32 %v4777_v8, %v4758_v9  ;;  %v4934_v9 = vld [vmem:[#allocation8 + $0x55] ss:$8 sm:$0x3] }
 0x809   : > { %v4936_v31 = vperm.slane %v4934_v9, 0 }
 0x80a   : > { %v4781_v36 = vpop.permute.xlu1 %4780  ;;  %v7986_v0 = vpop.permute.xlu2 %4884 }
 0x80b   : > { %v4783_v46 = vpop.permute.xlu0 %4782 }
 0x80c   : > { %v4784_v34 = vsel %vm4763_vm6, %v4781_v36, %v4783_v46  ;;  %v4788_v35 = vsel %vm4763_vm6, %v4783_v46, %v4781_v36 }
 0x80d   : > { %v4796_v50 = vmul.f32 %v4792_v15, %v4784_v34  ;;  %v4797_v48 = vmul.f32 %v4793_v30, %v4788_v35  ;;  %v4895_v34 = vperm.slane %v4893_v39, 0  ;;  %v4896_v35 = vperm.slane %v4893_v39, 1 }
 0x80f   : > { %v4798_v22 = vadd.f32 %v4796_v50, %v4778_v16  ;;  %v4799_v60 = vadd.f32 %v4797_v48, %v4779_v55  ;;  %v4937_v16 = vperm.slane %v4934_v9, 1 }
 0x812   : > { %v4803_v38 = vpop.permute.xlu1 %4802  ;;  %v7992_v6 = vpop.permute.xlu2 %4923 }
 0x813   : > { %v7984_v58 = vpop.permute.xlu0 %4821  ;;  %v4805_v51 = vsel %vm4804_vm7, %v7978_v59, %v4803_v38  ;;  %v4809_v56 = vsel %vm4804_vm7, %v4803_v38, %v7978_v59 }
 0x814   : > { %v4817_v36 = vmul.f32 %v4813_v11, %v4805_v51  ;;  %v4818_v46 = vmul.f32 %v4814_v44, %v4809_v56  ;;  %v4825_v38 = vsel %vm4804_vm7, %v7984_v58, %v7980_v25  ;;  %v4829_v27 = vsel %vm4804_vm7, %v7980_v25, %v7984_v58 }
 0x815   : > { %v4837_v58 = vmul.f32 %v4833_v20, %v4825_v38  ;;  %v4838_v15 = vmul.f32 %v4834_v57, %v4829_v27  ;;  %v4957_v38 = vperm.slane %v4954_v10, 1  ;;  %v4995_v27 = vld [vmem:[#allocation10 + $0x56] ss:$8 sm:$0x3] }
 0x816   : > { %v4819_v21 = vadd.f32 %v4817_v36, %v4798_v22  ;;  %v4820_v1 = vadd.f32 %v4818_v46, %v4799_v60  ;;  %v4975_v22 = vld [vmem:[#allocation8 + $0x56] ss:$8 sm:$0x3] }
 0x818   : > { %v4840_v30 = vadd.f32 %v4838_v15, %v4820_v1  ;;  %v4977_v1 = vperm.slane %v4975_v22, 0 }
 0x81a   : > { %v7988_v3 = vpop.permute.xlu1 %4841  ;;  %v8010_v45 = vpop.permute.xlu2 %4946 }
 0x81b   : > { %v7990_v18 = vpop.permute.xlu0 %4843 }
 0x81c   : > { %v4846_v42 = vsel %vm4845_vm13, %v7988_v3, %v7990_v18  ;;  %v4850_v12 = vsel %vm4845_vm13, %v7990_v18, %v7988_v3  ;;  %v4913_v3 = vld [vmem:[#allocation10 + $0x54] ss:$8 sm:$0x3]  ;;  %v4839_v18 = vadd.f32 %v4837_v58, %v4819_v21 }
 0x81d   : > { %v4858_v33 = vmul.f32 %v4854_v29, %v4846_v42  ;;  %v4859_v14 = vmul.f32 %v4855_v37, %v4850_v12  ;;  %v4915_v23 = vperm.slane %v4913_v3, 0  ;;  %v4916_v56 = vperm.slane %v4913_v3, 1 }
 0x81e   : > { %v4956_v37 = vperm.slane %v4954_v10, 0  ;;  %v5077_v10 = vld [vmem:[#allocation10 + $0x60] ss:$8 sm:$0x3] }
 0x81f   : > { %v4860_v44 = vadd.f32 %v4858_v33, %v4839_v18  ;;  %v4861_v51 = vadd.f32 %v4859_v14, %v4840_v30  ;;  %v4997_v33 = vperm.slane %v4995_v27, 0  ;;  %v4998_v14 = vperm.slane %v4995_v27, 1 }
 0x822   : > { %v7994_v5 = vpop.permute.xlu1 %4864  ;;  %v8038_v32 = vpop.permute.xlu2 %4985 }
 0x823   : > { %v7996_v49 = vpop.permute.xlu0 %4882  ;;  %v4866_v53 = vsel %vm4845_vm13, %v7982_v63, %v7994_v5  ;;  %v4870_v25 = vsel %vm4845_vm13, %v7994_v5, %v7982_v63 }
 0x824   : > { %v4878_v43 = vmul.f32 %v4874_v52, %v4866_v53  ;;  %v4879_v4 = vmul.f32 %v4875_v24, %v4870_v25  ;;  %v4887_v5 = vsel %vm4886_vm14, %v7996_v49, %v7986_v0  ;;  %v4891_v61 = vsel %vm4886_vm14, %v7986_v0, %v7996_v49 }
 0x825   : > { %v4899_v46 = vmul.f32 %v4895_v34, %v4887_v5  ;;  %v4900_v0 = vmul.f32 %v4896_v35, %v4891_v61  ;;  %v5016_v34 = vld [vmem:[#allocation8 + $0x57] ss:$8 sm:$0x3] }
 0x826   : > { %v4880_v48 = vadd.f32 %v4878_v43, %v4860_v44  ;;  %v4881_v17 = vadd.f32 %v4879_v4, %v4861_v51  ;;  %v5018_v44 = vperm.slane %v5016_v34, 0  ;;  %v5019_v51 = vperm.slane %v5016_v34, 1 }
 0x828   : > { %v4901_v60 = vadd.f32 %v4899_v46, %v4880_v48 }
 0x82a   : > { %v8008_v26 = vpop.permute.xlu1 %4903  ;;  %v5008_v49 = vpop.permute.xlu2 %5007 }
 0x82b   : > { %v8012_v7 = vpop.permute.xlu0 %4905 }
 0x82c   : > { %v4907_v8 = vsel %vm4886_vm14, %v8008_v26, %v8012_v7  ;;  %v4911_v50 = vsel %vm4886_vm14, %v8012_v7, %v8008_v26  ;;  %v4902_v26 = vadd.f32 %v4900_v0, %v4881_v17 }
 0x82d   : > { %v4919_v20 = vmul.f32 %v4915_v23, %v4907_v8  ;;  %v4920_v57 = vmul.f32 %v4916_v56, %v4911_v50 }
 0x82f   : > { %v4921_v12 = vadd.f32 %v4919_v20, %v4901_v60  ;;  %v4922_v21 = vadd.f32 %v4920_v57, %v4902_v26 }
 0x832   : > { %v4926_v62 = vpop.permute.xlu1 %4925 }
 0x833   : > { %v8024_v59 = vpop.permute.xlu0 %4944  ;;  %v4928_v55 = vsel %vm4927_vm15, %v7992_v6, %v4926_v62  ;;  %v4932_v36 = vsel %vm4927_vm15, %v4926_v62, %v7992_v6  ;;  %v4978_v6 = vperm.slane %v4975_v22, 1 }
 0x834   : > { %v4940_v7 = vmul.f32 %v4936_v31, %v4928_v55  ;;  %v4941_v29 = vmul.f32 %v4937_v16, %v4932_v36  ;;  %v4948_v52 = vsel %vm4927_vm15, %v8024_v59, %v8010_v45  ;;  %v4952_v24 = vsel %vm4927_vm15, %v8010_v45, %v8024_v59  ;;  %v5036_v45 = vld [vmem:[#allocation10 + $0x57] ss:$8 sm:$0x3]  ;;  %v5047_v59 = vpop.permute.xlu2 %5046  ;;  %v5057_v36 = vld [vmem:[#allocation8 + $0x60] ss:$8 sm:$0x3] }
 0x835   : > { %v4960_v18 = vmul.f32 %v4956_v37, %v4948_v52  ;;  %v4961_v30 = vmul.f32 %v4957_v38, %v4952_v24  ;;  %v5038_v61 = vperm.slane %v5036_v45, 0  ;;  %v5039_v8 = vperm.slane %v5036_v45, 1 }
 0x836   : > { %v4942_v58 = vadd.f32 %v4940_v7, %v4921_v12  ;;  %v4943_v15 = vadd.f32 %v4941_v29, %v4922_v21  ;;  %v5059_v22 = vperm.slane %v5057_v36, 0  ;;  %v5060_v60 = vperm.slane %v5057_v36, 1 }
 0x837   : > { %v5079_v37 = vperm.slane %v5077_v10, 0 }
 0x838   : > { %v4962_v35 = vadd.f32 %v4960_v18, %v4942_v58  ;;  %v4963_v23 = vadd.f32 %v4961_v30, %v4943_v15 }
 0x83a   : > { %v4965_v11 = vpop.permute.xlu1 %4964 }
 0x83b   : > { %v4967_v63 = vpop.permute.xlu0 %4966 }
 0x83c   : > { %v4969_v53 = vsel %vm4968_vm1, %v4965_v11, %v4967_v63  ;;  %v4973_v25 = vsel %vm4968_vm1, %v4967_v63, %v4965_v11  ;;  %v5070_v38 = vpop.permute.xlu2 %5069 }
 0x83d   : > { %v4981_v43 = vmul.f32 %v4977_v1, %v4969_v53  ;;  %v4982_v4 = vmul.f32 %v4978_v6, %v4973_v25 }
 0x83f   : > { %v4983_v63 = vadd.f32 %v4981_v43, %v4962_v35  ;;  %v4984_v5 = vadd.f32 %v4982_v4, %v4963_v23 }
 0x842   : > { %v4988_v42 = vpop.permute.xlu1 %4987 }
 0x843   : > { %v5006_v62 = vpop.permute.xlu0 %5005  ;;  %v4989_v39 = vsel %vm4968_vm1, %v8038_v32, %v4988_v42  ;;  %v4993_v3 = vsel %vm4968_vm1, %v4988_v42, %v8038_v32 }
 0x844   : > { %v5001_v9 = vmul.f32 %v4997_v33, %v4989_v39  ;;  %v5002_v11 = vmul.f32 %v4998_v14, %v4993_v3  ;;  %v5010_v50 = vsel %vm5009_vm8, %v5006_v62, %v5008_v49  ;;  %v5014_v48 = vsel %vm5009_vm8, %v5008_v49, %v5006_v62 }
 0x845   : > { %v5022_v46 = vmul.f32 %v5018_v44, %v5010_v50  ;;  %v5023_v0 = vmul.f32 %v5019_v51, %v5014_v48  ;;  %v5080_v49 = vperm.slane %v5077_v10, 1 }
 0x846   : > { %v5003_v16 = vadd.f32 %v5001_v9, %v4983_v63  ;;  %v5004_v55 = vadd.f32 %v5002_v11, %v4984_v5 }
 0x848   : > { %v5024_v26 = vadd.f32 %v5022_v46, %v5003_v16  ;;  %v5025_v7 = vadd.f32 %v5023_v0, %v5004_v55 }
 0x84a   : > { %v5027_v56 = vpop.permute.xlu1 %5026 }
 0x84b   : > { %v5029_v32 = vpop.permute.xlu0 %5028 }
 0x84c   : > { %v5030_v17 = vsel %vm5009_vm8, %v5027_v56, %v5029_v32  ;;  %v5034_v31 = vsel %vm5009_vm8, %v5029_v32, %v5027_v56 }
 0x84d   : > { %v5042_v20 = vmul.f32 %v5038_v61, %v5030_v17  ;;  %v5043_v57 = vmul.f32 %v5039_v8, %v5034_v31 }
 0x84f   : > { %v5044_v27 = vadd.f32 %v5042_v20, %v5024_v26  ;;  %v5045_v42 = vadd.f32 %v5043_v57, %v5025_v7  ;;  %v5662_v7 = vld [vmem:[%s6140_s12] sm:$0xff] }
 0x852   : > { %v5049_v29 = vpop.permute.xlu1 %5048 }
 0x853   : > { %v5051_v12 = vsel %vm5050_vm9, %v5047_v59, %v5049_v29  ;;  %v5055_v21 = vsel %vm5050_vm9, %v5049_v29, %v5047_v59  ;;  %v5068_v1 = vpop.permute.xlu0 %5067 }
 0x854   : > { %v5063_v6 = vmul.f32 %v5059_v22, %v5051_v12  ;;  %v5064_v62 = vmul.f32 %v5060_v60, %v5055_v21  ;;  %v5071_v52 = vsel %vm5050_vm9, %v5068_v1, %v5070_v38  ;;  %v5075_v24 = vsel %vm5050_vm9, %v5070_v38, %v5068_v1  ;;  %v5666_v38 = vld [vmem:[%s6140_s12 + $0x18] sm:$0xff] }
 0x855   : > { %v5083_v58 = vmul.f32 %v5079_v37, %v5071_v52  ;;  %v5084_v15 = vmul.f32 %v5080_v49, %v5075_v24  ;;  %v5664_v37 = vld [vmem:[%s6140_s12 + $0x20] sm:$0xff] }
 0x856   : > { %v5065_v53 = vadd.f32 %v5063_v6, %v5044_v27  ;;  %v5066_v25 = vadd.f32 %v5064_v62, %v5045_v42  ;;  %v5667_v27 = vld [vmem:[%s6140_s12 + $0x28] sm:$0xff]  ;;  %v5668_v42 = vld [vmem:[%s6140_s12 + $0x30] sm:$0xff] }
 0x858   : > { %v5085_v33 = vadd.f32 %v5083_v58, %v5065_v53  ;;  %v5086_v14 = vadd.f32 %v5084_v15, %v5066_v25 }
 0x85a   : > { %v5471_v39 = vmul.f32 -1.442695, %v5085_v33  ;;  %v5472_v3 = vmul.f32 -1.442695, %v5086_v14 }
 0x85c   : > { %5654 = vpow2.f32 %v5471_v39 }
 0x85d   : > { %5656 = vpow2.f32 %v5472_v3 }
 0x862   : > { %v5655_v18 = vpop.eup %5654 }
 0x863   : > { %v5657_v30 = vpop.eup %5656  ;;  %v5093_v43 = vadd.f32 1.0, %v5655_v18 }
 0x864   : > { %v5094_v4 = vadd.f32 1.0, %v5657_v30 }
 0x865   : > { %5658 = vrcp.f32 %v5093_v43  ;;  %v5106_v9 = vand.u32 2147483648, %v5093_v43  ;;  %v5104_v51 = vand.u32 2147483647, %v5093_v43  ;;  %vm5100_vm2 = vweird.f32 %v5093_v43 }
 0x866   : > { %5660 = vrcp.f32 %v5094_v4  ;;  %v5121_v56 = vand.u32 2147483648, %v5094_v4  ;;  %v5119_v5 = vand.u32 2147483647, %v5094_v4  ;;  %vm5115_vm4 = vweird.f32 %v5094_v4 }
 0x867   : > { %v5107_v8 = vor.u32 1.1754944e-38, %v5106_v9  ;;  %vm5105_vm5 = vcmp.eq.f32.partialorder %v5104_v51, 8.507059e+37 }
 0x868   : > { %v5122_v48 = vor.u32 1.1754944e-38, %v5121_v56  ;;  %vm5120_vm12 = vcmp.eq.f32.partialorder %v5119_v5, 8.507059e+37 }
 0x86b   : > { %v5659_v34 = vpop.eup %5658 }
 0x86c   : > { %v5661_v45 = vpop.eup %5660  ;;  %v5096_v59 = vmul.f32 %v5659_v34, %v5093_v43  ;;  %vm5101_vm10 = vweird.f32 %v5659_v34 }
 0x86d   : > { %v5111_v35 = vmul.f32 %v5661_v45, %v5094_v4  ;;  %vm5116_vm0 = vweird.f32 %v5661_v45  ;;  %vm5102_vm3 = vmor %vm5100_vm2, %vm5101_vm10 }
 0x86e   : > { %v5097_v23 = vsub.f32 1.0, %v5096_v59  ;;  %vm5117_vm11 = vmor %vm5115_vm4, %vm5116_vm0 }
 0x86f   : > { %v5112_v11 = vsub.f32 1.0, %v5111_v35 }
 0x870   : > { %v5098_v44 = vmul.f32 %v5659_v34, %v5097_v23 }
 0x871   : > { %v5113_v63 = vmul.f32 %v5661_v45, %v5112_v11 }
 0x872   : > { %v5099_v61 = vadd.f32 %v5659_v34, %v5098_v44 }
 0x873   : > { %v5114_v32 = vadd.f32 %v5661_v45, %v5113_v63 }
 0x874   : > { %v5103_v50 = vsel %vm5102_vm3, %v5659_v34, %v5099_v61 }
 0x875   : > { %v5108_v17 = vsel %vm5105_vm5, %v5107_v8, %v5103_v50  ;;  %v5118_v31 = vsel %vm5117_vm11, %v5661_v45, %v5114_v32 }
 0x876   : > { %v5123_v16 = vsel %vm5120_vm12, %v5122_v48, %v5118_v31  ;;  %v5125_v55 = vperm.slane %v5108_v17, 0 }
 0x877   : > { %v5126_v36 = vperm.slane %v5123_v16, 0 }
 0x878   : > { %v5127_v46 = vmul.f32 %v5125_v55, %v7273_v54  ;;  %v5129_v0 = vmul.f32 %v5125_v55, %v7267_v47  ;;  %v5131_v20 = vmul.f32 %v5125_v55, %v7283_v19  ;;  %v5133_v57 = vmul.f32 %v5125_v55, %v7291_v2  ;;  %v5663_v54 = vld [vmem:[%s6140_s12 + $0x10] sm:$0xff]  ;;  %v5665_v19 = vld [vmem:[%s6140_s12 + $0x8] sm:$0xff] }
 0x879   : > { %v5128_v10 = vmul.f32 %v5126_v36, %v7276_v40  ;;  %v5130_v22 = vmul.f32 %v5126_v36, %v7270_v28  ;;  %v5132_v60 = vmul.f32 %v5126_v36, %v7286_v41  ;;  %v5134_v26 = vmul.f32 %v5126_v36, %v7294_v13  ;;  %v5669_v13 = vld [vmem:[%s6140_s12 + $0x38] sm:$0xff]  ;;  %s5160_s12 = scalar_lea.sflag [#allocation4], %s6134_s20 }
 0x87a   : > { %v5135_v29 = vadd.f32 %v5662_v7, %v5127_v46  ;;  %v5137_v47 = vadd.f32 %v5663_v54, %v5129_v0  ;;  %v5139_v49 = vadd.f32 %v5664_v37, %v5131_v20  ;;  %v5141_v12 = vadd.f32 %v5668_v42, %v5133_v57 }
 0x87b   : > { %v5136_v2 = vadd.f32 %v5665_v19, %v5128_v10  ;;  %v5138_v40 = vadd.f32 %v5666_v38, %v5130_v22  ;;  %v5140_v28 = vadd.f32 %v5667_v27, %v5132_v60  ;;  %v5142_v1 = vadd.f32 %v5669_v13, %v5134_v26 }
 0x87c   : > { %v5143_v41 = vmax.f32 %v5135_v29, 0.0  ;;  %v5145_v21 = vmax.f32 %v5137_v47, 0.0  ;;  %v5147_v52 = vmax.f32 %v5139_v49, 0.0  ;;  %v5149_v53 = vmax.f32 %v5141_v12, 0.0 }
 0x87d   : > { %v5144_v6 = vmax.f32 %v5136_v2, 0.0  ;;  %v5146_v62 = vmax.f32 %v5138_v40, 0.0  ;;  %v5148_v24 = vmax.f32 %v5140_v28, 0.0  ;;  %v5150_v25 = vmax.f32 %v5142_v1, 0.0 }
 0x87e   : > { %5151 = vst [vmem:[%s445_s1] sm:$0xff] %v5143_v41 }
 0x87f   : > { %5152 = vst [vmem:[%s445_s1 + $0x8] sm:$0xff] %v5144_v6 }
 0x880   : > { %5153 = vst [vmem:[%s445_s1 + $0x10] sm:$0xff] %v5145_v21 }
 0x881   : > { %5154 = vst [vmem:[%s445_s1 + $0x18] sm:$0xff] %v5146_v62 }
 0x882   : > { %5155 = vst [vmem:[%s445_s1 + $0x20] sm:$0xff] %v5147_v52 }
 0x883   : > { %5156 = vst [vmem:[%s445_s1 + $0x28] sm:$0xff] %v5148_v24 }
 0x884   : > { %5157 = vst [vmem:[%s445_s1 + $0x30] sm:$0xff] %v5149_v53 }
 0x885   : > { %5158 = vst [vmem:[%s445_s1 + $0x38] sm:$0xff] %v5150_v25 }
 0x886   : > { %5847 = shalt.err (!%p5844_p10)
}
 0x887   : > { %s5955_s20 = smov 256  }
 0x888   : > { %5506 = dma.vmem_to_hbm [thread:$0]  (%p6101_p3), %s5173_s3, 1024, %s5175_s25, %s5160_s12, %s5955_s20, %s5955_s20, %s5904_s19  }
 0x889 PF: > { %s5189_s21 = sand.u32 1, %s5882_s13   ;;  %p8262_p12 = scmp.ge.s32.totalorder %s5894_s16, 2 }
 0x88a   : > { %s5190_s17 = scalar_lea.sflag [#allocation4], %s5189_s21 }
 0x88b   : > { %p5526_p13 = pnand %p8262_p12, %p6046_p6 }
 0x88d   : > { %p5527_p0 = pneg %p5526_p13 }
 0x88f   : > { %5877 = dma.done.wait (%p5527_p0), %s5190_s17, 1024  }
 0x890   : > { %5879 = vsyncadd (%p5527_p0), %s5190_s17, 4294966272  ;;  %p25_p5 = scmp.ge.s32.totalorder %s6091_s28, 4   ;;  %s8263_s13 = smov %s5886_s14 }
 0x891   : > { %s8264_s14 = smov %s5890_s15  ;;  %s8265_s15 = smov %s6107_s11 }
 0x892   : > { %s8266_s16 = smov %s6091_s28  ;;  %27 = sbr.rel (!%p25_p5) target bundleno = 11 (0xb), region = 241 }
 0x897   :  { %5196 = vsyncpa [#allocation3], 1 }
 0x898   :  { %5198 = vsyncpa [#allocation3 + $0x1], 1 }
 0x899   :  { %5199 = vsyncpa [#allocation6], 1 }
 0x89a   :  { %5200 = vsyncpa [#allocation9], 1 }
 0x89b   :  { %5201 = vsyncpa [#allocation4], 1 }
 0x89c   :  { %5203 = vsyncpa [#allocation4 + $0x1], 1 }

</bundles_post_ra>
